<compile_context>
chip_gen: v7x
topology: tpu7x:2x2x1
jax: 0.10.0
libtpu: 0.0.40
codegen_flags: <defaults>
</compile_context>

<pallas_src>
import jax
import jax.numpy as jnp
from jax.experimental import pallas as pl
from jax.experimental.pallas import tpu as pltpu

_DILATIONS = (3, 5, 7)   # branch1 / branch2 / branch3 dilated 3x3 convs
_FFT_WINDOW = 6          # the reference's w_h = w_w = int(abs(6.0))


def _make_kernel(H, W):
    S = H * W

    def kernel(x_ref, w1_ref, b1_ref, w2_ref, b2_ref,
               brw1_ref, brb1_ref, brw3_ref, brb3_ref,
               brwd_ref, brbd_ref, wdown_ref, bdown_ref,
               wshort_ref, bshort_ref, out_ref):
        x = x_ref[0].astype(jnp.float32)                       # (C, S) identity
        C = x.shape[0]

        # Flattened spatial index / column index, built in-kernel (no HBM mask).
        n = jax.lax.broadcasted_iota(jnp.int32, (1, S), 1)
        if (W & (W - 1)) == 0:                                 # W is a power of two
            col = jnp.bitwise_and(n, W - 1)
        else:
            col = jax.lax.rem(n, jnp.full_like(n, W))

        def mix(w_mat, v):
            # Channel mix: (Co, Ci) weight applied to v (Ci, S).
            ci = v.shape[0]
            if ci <= 8:   # tiny channel count: VPU broadcast, skip the MXU round-trip
                return sum(w_mat[:, j:j + 1] * v[j:j + 1, :] for j in range(ci))
            return jnp.dot(w_mat, v, preferred_element_type=jnp.float32)

        def conv3x3(v, getw, bias, d):
            # 3x3 conv, stride 1, zero padding d, dilation d, on v (Ci, S):
            # 9 taps, each = lane-roll of the flattened image + boundary mask
            # + channel mix with the (Co, Ci) tap weight.
            acc = None
            for ky in range(3):
                dy = (ky - 1) * d
                if dy < 0:
                    row_ok = n >= (-dy) * W
                elif dy > 0:
                    row_ok = n < (H - dy) * W
                else:
                    row_ok = None
                for kx in range(3):
                    dx = (kx - 1) * d
                    ok = row_ok
                    if dx < 0:
                        c_ok = col >= -dx
                        ok = c_ok if ok is None else jnp.logical_and(ok, c_ok)
                    elif dx > 0:
                        c_ok = col < (W - dx)
                        ok = c_ok if ok is None else jnp.logical_and(ok, c_ok)
                    off = dy * W + dx
                    sh = v if off == 0 else pltpu.roll(v, (-off) % S, axis=1)
                    if ok is not None:
                        sh = jnp.where(ok, sh, 0.0)
                    term = mix(getw(3 * ky + kx), sh)
                    acc = term if acc is None else acc + term
            return acc + bias

        # trunk: out = conv2(relu(conv1(x)))
        h1 = jnp.maximum(conv3x3(x, lambda t: w1_ref[t], b1_ref[...], 1), 0.0)
        out = conv3x3(h1, lambda t: w2_ref[t], b2_ref[...], 1)        # (C, S)

        # fft(): fftshift -> zero centered block -> ifftshift == zero the four
        # corner rectangles (a = H//6 rows, b = W//6 cols) of the image.
        a = H // _FFT_WINDOW
        bb = W // _FFT_WINDOW
        row_corner = jnp.logical_or(n < a * W, n >= (H - a) * W)
        col_corner = jnp.logical_or(col < bb, col >= W - bb)
        keep = jnp.where(jnp.logical_and(row_corner, col_corner), 0.0, 1.0)
        y = out * keep                                                # (C, S)

        # spatial-attention input: per-pixel channel max / mean of y.
        ma = jnp.max(y, axis=0, keepdims=True)                        # (1, S)
        avg = jnp.sum(y, axis=0, keepdims=True) * (1.0 / C)           # (1, S)

        wdown = wdown_ref[...]                                        # (1, 8)
        gate_logit = None
        for k in range(4):
            w1x1 = brw1_ref[k]                                        # (2, 2)
            t = w1x1[:, 0:1] * ma + w1x1[:, 1:2] * avg + brb1_ref[k]  # 1x1 conv
            t = jnp.maximum(t, 0.0)
            t = conv3x3(t, lambda tap, _k=k: brw3_ref[_k, tap], brb3_ref[k], 1)
            if k >= 1:
                t = jnp.maximum(t, 0.0)
                d = _DILATIONS[k - 1]
                t = conv3x3(t, lambda tap, _k=k: brwd_ref[_k - 1, tap],
                            brbd_ref[k - 1], d)
            # this branch's 2 channels of the convdown (1x1, 8 -> 1) input
            contrib = (wdown[:, 2 * k:2 * k + 1] * t[0:1, :]
                       + wdown[:, 2 * k + 1:2 * k + 2] * t[1:2, :])
            gate_logit = contrib if gate_logit is None else gate_logit + contrib
        gate_logit = gate_logit + bdown_ref[...]                      # (1, S)

        # shortcut: 1x1 conv over y's channels.
        # TODO(synk): the reference declares shortcut = Conv2d(sain, 1, 1) but applies
        # it to the num_feat-channel tensor y; that only type-checks when
        # num_feat == sain (the demo config).  Here it is generalized to C inputs.
        short = (jnp.sum(y * wshort_ref[...], axis=0, keepdims=True)
                 + bshort_ref[...])                                   # (1, S)

        gate = 1.0 / (1.0 + jnp.exp(-(gate_logit + short)))           # sigmoid

        out_ref[0] = (out * gate + x).astype(out_ref.dtype)

    return kernel


def _pack_3x3(w):
    # (Co, Ci, 3, 3) torch layout -> (9, Co, Ci), tap-major (t = 3*ky + kx).
    co, ci = w.shape[0], w.shape[1]
    return jnp.transpose(w, (2, 3, 0, 1)).reshape(9, co, ci)


def _pack_params(p, c):
    brw1 = jnp.stack([p[f"b{k}_w0"].reshape(2, 2) for k in range(4)])
    brb1 = jnp.stack([p[f"b{k}_b0"].reshape(2, 1) for k in range(4)])
    brw3 = jnp.stack([_pack_3x3(p[f"b{k}_w1"]) for k in range(4)])
    brb3 = jnp.stack([p[f"b{k}_b1"].reshape(2, 1) for k in range(4)])
    brwd = jnp.stack([_pack_3x3(p[f"b{k}_w2"]) for k in range(1, 4)])
    brbd = jnp.stack([p[f"b{k}_b2"].reshape(2, 1) for k in range(1, 4)])
    return (
        _pack_3x3(p["conv1_w"]), p["conv1_b"].reshape(c, 1),
        _pack_3x3(p["conv2_w"]), p["conv2_b"].reshape(c, 1),
        brw1, brb1, brw3, brb3, brwd, brbd,
        p["down_w"].reshape(1, 8), p["down_b"].reshape(1, 1),
        p["short_w"].reshape(c, 1), p["short_b"].reshape(1, 1),
    )


def _const_spec(arr):
    zeros = (0,) * arr.ndim
    return pl.BlockSpec(arr.shape, lambda i, _z=zeros: _z)


def my_sa_fft_forward(x, params):
    """x: (B, C, H, W) float32; params: dict of PyTorch-layout conv weights."""
    b, c, h, w = x.shape
    # The reference forward only broadcasts correctly for even H, W (fft() pads
    # odd sizes, which makes `out * w` shape-inconsistent), so that is the domain.
    assert h % 2 == 0 and w % 2 == 0, "My_SA_fft requires even H and W"
    s = h * w   # lane-dense output when H*W is a multiple of 128 (preferred)

    x_flat = x.reshape(b, c, s)          # free reshape, no transpose / no copy
    packed = _pack_params(params, c)

    out_flat = pl.pallas_call(
        _make_kernel(h, w),
        out_shape=jax.ShapeDtypeStruct((b, c, s), x.dtype),
        grid=(b,),
        in_specs=[pl.BlockSpec((1, c, s), lambda i: (i, 0, 0))]
                 + [_const_spec(a) for a in packed],
        out_specs=pl.BlockSpec((1, c, s), lambda i: (i, 0, 0)),
        compiler_params=pltpu.CompilerParams(
            dimension_semantics=("parallel",)),
    )(x_flat, *packed)
    return out_flat.reshape(b, c, h, w)


# ----------------------- pure-JAX reference (for checking) -----------------------

def _conv_ref(x, w, b, *, padding, dilation=1):
    y = jax.lax.conv_general_dilated(
        x, w, window_strides=(1, 1),
        padding=((padding, padding), (padding, padding)),
        rhs_dilation=(dilation, dilation),
        dimension_numbers=("NCHW", "OIHW", "NCHW"),
        precision=jax.lax.Precision.HIGHEST)
    return y + b[None, :, None, None]


def _fft_ref(x):
    # literal translation of the reference `fft` helper (no actual FFT).
    _, _, h, w = x.shape
    if w % 2 != 0:
        x = jnp.pad(x, ((0, 0), (0, 0), (0, 0), (1, 0)))
    if h % 2 != 0:
        x = jnp.pad(x, ((0, 0), (0, 0), (1, 0), (0, 0)))
    _, _, h, w = x.shape
    x = jnp.fft.fftshift(x, axes=(2, 3))
    hc, wc = h // 2, w // 2
    a, bb = h // _FFT_WINDOW, w // _FFT_WINDOW
    x = x.at[:, :, hc - a:hc + a, wc - bb:wc + bb].set(0.0)
    x = jnp.fft.ifftshift(x, axes=(2, 3))
    return x


def reference_forward(x, p):
    out = jnp.maximum(_conv_ref(x, p["conv1_w"], p["conv1_b"], padding=1), 0.0)
    out = _conv_ref(out, p["conv2_w"], p["conv2_b"], padding=1)
    y = _fft_ref(out)
    ma = jnp.max(y, axis=1, keepdims=True)
    avg = jnp.mean(y, axis=1, keepdims=True)
    w2 = jnp.concatenate([ma, avg], axis=1)
    outs = []
    for k in range(4):
        t = jnp.maximum(_conv_ref(w2, p[f"b{k}_w0"], p[f"b{k}_b0"], padding=0), 0.0)
        t = _conv_ref(t, p[f"b{k}_w1"], p[f"b{k}_b1"], padding=1)
        if k >= 1:
            d = _DILATIONS[k - 1]
            t = _conv_ref(jnp.maximum(t, 0.0), p[f"b{k}_w2"], p[f"b{k}_b2"],
                          padding=d, dilation=d)
        outs.append(t)
    wc = jnp.concatenate(outs, axis=1)
    wd = _conv_ref(wc, p["down_w"], p["down_b"], padding=0)
    sh = _conv_ref(y, p["short_w"], p["short_b"], padding=0)
    gate = jax.nn.sigmoid(wd + sh)
    return out * gate + x


if __name__ == "__main__":
    # num_feat == sain == 2 is the only configuration in which the reference
    # forward is shape-consistent (shortcut conv, see TODO(synk) in the kernel);
    # H*W = 256 keeps the flattened spatial axis lane-dense.
    B, C, H, W = 2, 2, 16, 16

    key = jax.random.PRNGKey(0)
    keys = iter(jax.random.split(key, 40))

    def rnd(shape, scale=0.1):
        return scale * jax.random.normal(next(keys), shape, dtype=jnp.float32)

    x = jax.random.normal(next(keys), (B, C, H, W), dtype=jnp.float32)

    params = {
        "conv1_w": rnd((C, C, 3, 3)), "conv1_b": rnd((C,)),
        "conv2_w": rnd((C, C, 3, 3)), "conv2_b": rnd((C,)),
        "down_w": rnd((1, 8, 1, 1)), "down_b": rnd((1,)),
        "short_w": rnd((1, C, 1, 1)), "short_b": rnd((1,)),
    }
    for k in range(4):
        params[f"b{k}_w0"] = rnd((2, 2, 1, 1))
        params[f"b{k}_b0"] = rnd((2,))
        params[f"b{k}_w1"] = rnd((2, 2, 3, 3))
        params[f"b{k}_b1"] = rnd((2,))
        if k >= 1:
            params[f"b{k}_w2"] = rnd((2, 2, 3, 3))
            params[f"b{k}_b2"] = rnd((2,))

    out = jax.block_until_ready(my_sa_fft_forward(x, params))
    assert out.shape == (B, C, H, W)

    ref = jax.block_until_ready(reference_forward(x, params))
    max_err = float(jnp.max(jnp.abs(out - ref)))
    assert max_err < 1e-3, f"kernel/reference mismatch: max abs err = {max_err}"

    print("KERNEL_OK")
</pallas_src>

<mosaic_0001>
module attributes {stable_mosaic.version = 11 : i64} {
  func.func @kernel(%arg0: i32, %arg1: memref<1x2x256xf32, #tpu.memory_space<vmem>>, %arg2: memref<9x2x2xf32, #tpu.memory_space<vmem>>, %arg3: memref<2x1xf32, #tpu.memory_space<vmem>>, %arg4: memref<9x2x2xf32, #tpu.memory_space<vmem>>, %arg5: memref<2x1xf32, #tpu.memory_space<vmem>>, %arg6: memref<4x2x2xf32, #tpu.memory_space<vmem>>, %arg7: memref<4x2x1xf32, #tpu.memory_space<vmem>>, %arg8: memref<4x9x2x2xf32, #tpu.memory_space<vmem>>, %arg9: memref<4x2x1xf32, #tpu.memory_space<vmem>>, %arg10: memref<3x9x2x2xf32, #tpu.memory_space<vmem>>, %arg11: memref<3x2x1xf32, #tpu.memory_space<vmem>>, %arg12: memref<1x8xf32, #tpu.memory_space<vmem>>, %arg13: memref<1x1xf32, #tpu.memory_space<vmem>>, %arg14: memref<2x1xf32, #tpu.memory_space<vmem>>, %arg15: memref<1x1xf32, #tpu.memory_space<vmem>>, %arg16: memref<1x2x256xf32, #tpu.memory_space<vmem>>) attributes {dimension_semantics = [#tpu.dimension_semantics<parallel>], iteration_bounds = array<i64: 2>, scalar_prefetch = 0 : i64, scratch_operands = 0 : i64, tpu.core_type = #tpu.core_type<tc>, window_params = [{transform_indices = @transform_0, window_bounds = array<i64: 1, 2, 256>}, {pipeline_mode = #tpu.pipeline_mode<synchronous>, transform_indices = @transform_1, window_bounds = array<i64: 9, 2, 2>}, {pipeline_mode = #tpu.pipeline_mode<synchronous>, transform_indices = @transform_2, window_bounds = array<i64: 2, 1>}, {pipeline_mode = #tpu.pipeline_mode<synchronous>, transform_indices = @transform_3, window_bounds = array<i64: 9, 2, 2>}, {pipeline_mode = #tpu.pipeline_mode<synchronous>, transform_indices = @transform_4, window_bounds = array<i64: 2, 1>}, {pipeline_mode = #tpu.pipeline_mode<synchronous>, transform_indices = @transform_5, window_bounds = array<i64: 4, 2, 2>}, {pipeline_mode = #tpu.pipeline_mode<synchronous>, transform_indices = @transform_6, window_bounds = array<i64: 4, 2, 1>}, {pipeline_mode = #tpu.pipeline_mode<synchronous>, transform_indices = @transform_7, window_bounds = array<i64: 4, 9, 2, 2>}, {pipeline_mode = #tpu.pipeline_mode<synchronous>, transform_indices = @transform_8, window_bounds = array<i64: 4, 2, 1>}, {pipeline_mode = #tpu.pipeline_mode<synchronous>, transform_indices = @transform_9, window_bounds = array<i64: 3, 9, 2, 2>}, {pipeline_mode = #tpu.pipeline_mode<synchronous>, transform_indices = @transform_10, window_bounds = array<i64: 3, 2, 1>}, {pipeline_mode = #tpu.pipeline_mode<synchronous>, transform_indices = @transform_11, window_bounds = array<i64: 1, 8>}, {pipeline_mode = #tpu.pipeline_mode<synchronous>, transform_indices = @transform_12, window_bounds = array<i64: 1, 1>}, {pipeline_mode = #tpu.pipeline_mode<synchronous>, transform_indices = @transform_13, window_bounds = array<i64: 2, 1>}, {pipeline_mode = #tpu.pipeline_mode<synchronous>, transform_indices = @transform_14, window_bounds = array<i64: 1, 1>}, {transform_indices = @transform_15, window_bounds = array<i64: 1, 2, 256>}]} {
    %c0 = arith.constant 0 : index
    %c0_0 = arith.constant 0 : index
    %c0_1 = arith.constant 0 : index
    %0 = vector.load %arg1[%c0, %c0_0, %c0_1] : memref<1x2x256xf32, #tpu.memory_space<vmem>>, vector<1x2x256xf32>
    %1 = vector.shape_cast %0 : vector<1x2x256xf32> to vector<2x256xf32>
    %2 = tpu.iota {dimensions = array<i32: 1>} : vector<1x256xi32>
    %c15_i32 = arith.constant 15 : i32
    %3 = vector.broadcast %c15_i32 : i32 to vector<1x256xi32>
    %4 = arith.andi %2, %3 : vector<1x256xi32>
    %c0_2 = arith.constant 0 : index
    %c0_3 = arith.constant 0 : index
    %5 = vector.load %arg3[%c0_2, %c0_3] : memref<2x1xf32, #tpu.memory_space<vmem>>, vector<2x1xf32>
    %c16_i32 = arith.constant 16 : i32
    %6 = vector.broadcast %c16_i32 : i32 to vector<1x256xi32>
    %7 = arith.cmpi sge, %2, %6 : vector<1x256xi32>
    %c1_i32 = arith.constant 1 : i32
    %8 = vector.broadcast %c1_i32 : i32 to vector<1x256xi32>
    %9 = arith.cmpi sge, %4, %8 : vector<1x256xi32>
    %10 = arith.andi %7, %9 : vector<1x256xi1>
    %c17_i32 = arith.constant 17 : i32
    %11 = tpu.dynamic_rotate %1 by %c17_i32 dim 1 : vector<2x256xf32>, i32 -> vector<2x256xf32>
    %cst = arith.constant 0.000000e+00 : f32
    %12 = vector.shape_cast %10 : vector<1x256xi1> to vector<1x256xi1>
    %13 = vector.broadcast %12 : vector<1x256xi1> to vector<2x256xi1>
    %14 = vector.broadcast %cst : f32 to vector<2x256xf32>
    %15 = arith.select %13, %11, %14 : vector<2x256xi1>, vector<2x256xf32>
    %c0_4 = arith.constant 0 : index
    %c0_5 = arith.constant 0 : index
    %c0_6 = arith.constant 0 : index
    %16 = vector.load %arg2[%c0_4, %c0_5, %c0_6] : memref<9x2x2xf32, #tpu.memory_space<vmem>>, vector<1x2x2xf32>
    %17 = vector.shape_cast %16 : vector<1x2x2xf32> to vector<2x2xf32>
    %18 = vector.extract_strided_slice %17 {offsets = [0, 0], sizes = [2, 1], strides = [1, 1]} : vector<2x2xf32> to vector<2x1xf32>
    %19 = vector.extract_strided_slice %15 {offsets = [0, 0], sizes = [1, 256], strides = [1, 1]} : vector<2x256xf32> to vector<1x256xf32>
    %20 = vector.broadcast %18 : vector<2x1xf32> to vector<2x256xf32>
    %21 = vector.broadcast %19 : vector<1x256xf32> to vector<2x256xf32>
    %22 = arith.mulf %20, %21 : vector<2x256xf32>
    %cst_7 = arith.constant 0.000000e+00 : f32
    %23 = vector.broadcast %cst_7 : f32 to vector<2x256xf32>
    %24 = arith.addf %23, %22 : vector<2x256xf32>
    %25 = vector.extract_strided_slice %17 {offsets = [0, 1], sizes = [2, 1], strides = [1, 1]} : vector<2x2xf32> to vector<2x1xf32>
    %26 = vector.extract_strided_slice %15 {offsets = [1, 0], sizes = [1, 256], strides = [1, 1]} : vector<2x256xf32> to vector<1x256xf32>
    %27 = vector.broadcast %25 : vector<2x1xf32> to vector<2x256xf32>
    %28 = vector.broadcast %26 : vector<1x256xf32> to vector<2x256xf32>
    %29 = arith.mulf %27, %28 : vector<2x256xf32>
    %30 = arith.addf %24, %29 : vector<2x256xf32>
    %c16_i32_8 = arith.constant 16 : i32
    %31 = tpu.dynamic_rotate %1 by %c16_i32_8 dim 1 : vector<2x256xf32>, i32 -> vector<2x256xf32>
    %cst_9 = arith.constant 0.000000e+00 : f32
    %32 = vector.shape_cast %7 : vector<1x256xi1> to vector<1x256xi1>
    %33 = vector.broadcast %32 : vector<1x256xi1> to vector<2x256xi1>
    %34 = vector.broadcast %cst_9 : f32 to vector<2x256xf32>
    %35 = arith.select %33, %31, %34 : vector<2x256xi1>, vector<2x256xf32>
    %c1 = arith.constant 1 : index
    %c0_10 = arith.constant 0 : index
    %c0_11 = arith.constant 0 : index
    %36 = vector.load %arg2[%c1, %c0_10, %c0_11] : memref<9x2x2xf32, #tpu.memory_space<vmem>>, vector<1x2x2xf32>
    %37 = vector.shape_cast %36 : vector<1x2x2xf32> to vector<2x2xf32>
    %38 = vector.extract_strided_slice %37 {offsets = [0, 0], sizes = [2, 1], strides = [1, 1]} : vector<2x2xf32> to vector<2x1xf32>
    %39 = vector.extract_strided_slice %35 {offsets = [0, 0], sizes = [1, 256], strides = [1, 1]} : vector<2x256xf32> to vector<1x256xf32>
    %40 = vector.broadcast %38 : vector<2x1xf32> to vector<2x256xf32>
    %41 = vector.broadcast %39 : vector<1x256xf32> to vector<2x256xf32>
    %42 = arith.mulf %40, %41 : vector<2x256xf32>
    %cst_12 = arith.constant 0.000000e+00 : f32
    %43 = vector.broadcast %cst_12 : f32 to vector<2x256xf32>
    %44 = arith.addf %43, %42 : vector<2x256xf32>
    %45 = vector.extract_strided_slice %37 {offsets = [0, 1], sizes = [2, 1], strides = [1, 1]} : vector<2x2xf32> to vector<2x1xf32>
    %46 = vector.extract_strided_slice %35 {offsets = [1, 0], sizes = [1, 256], strides = [1, 1]} : vector<2x256xf32> to vector<1x256xf32>
    %47 = vector.broadcast %45 : vector<2x1xf32> to vector<2x256xf32>
    %48 = vector.broadcast %46 : vector<1x256xf32> to vector<2x256xf32>
    %49 = arith.mulf %47, %48 : vector<2x256xf32>
    %50 = arith.addf %44, %49 : vector<2x256xf32>
    %51 = arith.addf %30, %50 : vector<2x256xf32>
    %c15_i32_13 = arith.constant 15 : i32
    %52 = vector.broadcast %c15_i32_13 : i32 to vector<1x256xi32>
    %53 = arith.cmpi slt, %4, %52 : vector<1x256xi32>
    %54 = arith.andi %7, %53 : vector<1x256xi1>
    %c15_i32_14 = arith.constant 15 : i32
    %55 = tpu.dynamic_rotate %1 by %c15_i32_14 dim 1 : vector<2x256xf32>, i32 -> vector<2x256xf32>
    %cst_15 = arith.constant 0.000000e+00 : f32
    %56 = vector.shape_cast %54 : vector<1x256xi1> to vector<1x256xi1>
    %57 = vector.broadcast %56 : vector<1x256xi1> to vector<2x256xi1>
    %58 = vector.broadcast %cst_15 : f32 to vector<2x256xf32>
    %59 = arith.select %57, %55, %58 : vector<2x256xi1>, vector<2x256xf32>
    %c2 = arith.constant 2 : index
    %c0_16 = arith.constant 0 : index
    %c0_17 = arith.constant 0 : index
    %60 = vector.load %arg2[%c2, %c0_16, %c0_17] : memref<9x2x2xf32, #tpu.memory_space<vmem>>, vector<1x2x2xf32>
    %61 = vector.shape_cast %60 : vector<1x2x2xf32> to vector<2x2xf32>
    %62 = vector.extract_strided_slice %61 {offsets = [0, 0], sizes = [2, 1], strides = [1, 1]} : vector<2x2xf32> to vector<2x1xf32>
    %63 = vector.extract_strided_slice %59 {offsets = [0, 0], sizes = [1, 256], strides = [1, 1]} : vector<2x256xf32> to vector<1x256xf32>
    %64 = vector.broadcast %62 : vector<2x1xf32> to vector<2x256xf32>
    %65 = vector.broadcast %63 : vector<1x256xf32> to vector<2x256xf32>
    %66 = arith.mulf %64, %65 : vector<2x256xf32>
    %cst_18 = arith.constant 0.000000e+00 : f32
    %67 = vector.broadcast %cst_18 : f32 to vector<2x256xf32>
    %68 = arith.addf %67, %66 : vector<2x256xf32>
    %69 = vector.extract_strided_slice %61 {offsets = [0, 1], sizes = [2, 1], strides = [1, 1]} : vector<2x2xf32> to vector<2x1xf32>
    %70 = vector.extract_strided_slice %59 {offsets = [1, 0], sizes = [1, 256], strides = [1, 1]} : vector<2x256xf32> to vector<1x256xf32>
    %71 = vector.broadcast %69 : vector<2x1xf32> to vector<2x256xf32>
    %72 = vector.broadcast %70 : vector<1x256xf32> to vector<2x256xf32>
    %73 = arith.mulf %71, %72 : vector<2x256xf32>
    %74 = arith.addf %68, %73 : vector<2x256xf32>
    %75 = arith.addf %51, %74 : vector<2x256xf32>
    %c1_i32_19 = arith.constant 1 : i32
    %76 = vector.broadcast %c1_i32_19 : i32 to vector<1x256xi32>
    %77 = arith.cmpi sge, %4, %76 : vector<1x256xi32>
    %c1_i32_20 = arith.constant 1 : i32
    %78 = tpu.dynamic_rotate %1 by %c1_i32_20 dim 1 : vector<2x256xf32>, i32 -> vector<2x256xf32>
    %cst_21 = arith.constant 0.000000e+00 : f32
    %79 = vector.shape_cast %77 : vector<1x256xi1> to vector<1x256xi1>
    %80 = vector.broadcast %79 : vector<1x256xi1> to vector<2x256xi1>
    %81 = vector.broadcast %cst_21 : f32 to vector<2x256xf32>
    %82 = arith.select %80, %78, %81 : vector<2x256xi1>, vector<2x256xf32>
    %c3 = arith.constant 3 : index
    %c0_22 = arith.constant 0 : index
    %c0_23 = arith.constant 0 : index
    %83 = vector.load %arg2[%c3, %c0_22, %c0_23] : memref<9x2x2xf32, #tpu.memory_space<vmem>>, vector<1x2x2xf32>
    %84 = vector.shape_cast %83 : vector<1x2x2xf32> to vector<2x2xf32>
    %85 = vector.extract_strided_slice %84 {offsets = [0, 0], sizes = [2, 1], strides = [1, 1]} : vector<2x2xf32> to vector<2x1xf32>
    %86 = vector.extract_strided_slice %82 {offsets = [0, 0], sizes = [1, 256], strides = [1, 1]} : vector<2x256xf32> to vector<1x256xf32>
    %87 = vector.broadcast %85 : vector<2x1xf32> to vector<2x256xf32>
    %88 = vector.broadcast %86 : vector<1x256xf32> to vector<2x256xf32>
    %89 = arith.mulf %87, %88 : vector<2x256xf32>
    %cst_24 = arith.constant 0.000000e+00 : f32
    %90 = vector.broadcast %cst_24 : f32 to vector<2x256xf32>
    %91 = arith.addf %90, %89 : vector<2x256xf32>
    %92 = vector.extract_strided_slice %84 {offsets = [0, 1], sizes = [2, 1], strides = [1, 1]} : vector<2x2xf32> to vector<2x1xf32>
    %93 = vector.extract_strided_slice %82 {offsets = [1, 0], sizes = [1, 256], strides = [1, 1]} : vector<2x256xf32> to vector<1x256xf32>
    %94 = vector.broadcast %92 : vector<2x1xf32> to vector<2x256xf32>
    %95 = vector.broadcast %93 : vector<1x256xf32> to vector<2x256xf32>
    %96 = arith.mulf %94, %95 : vector<2x256xf32>
    %97 = arith.addf %91, %96 : vector<2x256xf32>
    %98 = arith.addf %75, %97 : vector<2x256xf32>
    %c4 = arith.constant 4 : index
    %c0_25 = arith.constant 0 : index
    %c0_26 = arith.constant 0 : index
    %99 = vector.load %arg2[%c4, %c0_25, %c0_26] : memref<9x2x2xf32, #tpu.memory_space<vmem>>, vector<1x2x2xf32>
    %100 = vector.shape_cast %99 : vector<1x2x2xf32> to vector<2x2xf32>
    %101 = vector.extract_strided_slice %100 {offsets = [0, 0], sizes = [2, 1], strides = [1, 1]} : vector<2x2xf32> to vector<2x1xf32>
    %102 = vector.extract_strided_slice %1 {offsets = [0, 0], sizes = [1, 256], strides = [1, 1]} : vector<2x256xf32> to vector<1x256xf32>
    %103 = vector.broadcast %101 : vector<2x1xf32> to vector<2x256xf32>
    %104 = vector.broadcast %102 : vector<1x256xf32> to vector<2x256xf32>
    %105 = arith.mulf %103, %104 : vector<2x256xf32>
    %cst_27 = arith.constant 0.000000e+00 : f32
    %106 = vector.broadcast %cst_27 : f32 to vector<2x256xf32>
    %107 = arith.addf %106, %105 : vector<2x256xf32>
    %108 = vector.extract_strided_slice %100 {offsets = [0, 1], sizes = [2, 1], strides = [1, 1]} : vector<2x2xf32> to vector<2x1xf32>
    %109 = vector.extract_strided_slice %1 {offsets = [1, 0], sizes = [1, 256], strides = [1, 1]} : vector<2x256xf32> to vector<1x256xf32>
    %110 = vector.broadcast %108 : vector<2x1xf32> to vector<2x256xf32>
    %111 = vector.broadcast %109 : vector<1x256xf32> to vector<2x256xf32>
    %112 = arith.mulf %110, %111 : vector<2x256xf32>
    %113 = arith.addf %107, %112 : vector<2x256xf32>
    %114 = arith.addf %98, %113 : vector<2x256xf32>
    %c15_i32_28 = arith.constant 15 : i32
    %115 = vector.broadcast %c15_i32_28 : i32 to vector<1x256xi32>
    %116 = arith.cmpi slt, %4, %115 : vector<1x256xi32>
    %c255_i32 = arith.constant 255 : i32
    %117 = tpu.dynamic_rotate %1 by %c255_i32 dim 1 : vector<2x256xf32>, i32 -> vector<2x256xf32>
    %cst_29 = arith.constant 0.000000e+00 : f32
    %118 = vector.shape_cast %116 : vector<1x256xi1> to vector<1x256xi1>
    %119 = vector.broadcast %118 : vector<1x256xi1> to vector<2x256xi1>
    %120 = vector.broadcast %cst_29 : f32 to vector<2x256xf32>
    %121 = arith.select %119, %117, %120 : vector<2x256xi1>, vector<2x256xf32>
    %c5 = arith.constant 5 : index
    %c0_30 = arith.constant 0 : index
    %c0_31 = arith.constant 0 : index
    %122 = vector.load %arg2[%c5, %c0_30, %c0_31] : memref<9x2x2xf32, #tpu.memory_space<vmem>>, vector<1x2x2xf32>
    %123 = vector.shape_cast %122 : vector<1x2x2xf32> to vector<2x2xf32>
    %124 = vector.extract_strided_slice %123 {offsets = [0, 0], sizes = [2, 1], strides = [1, 1]} : vector<2x2xf32> to vector<2x1xf32>
    %125 = vector.extract_strided_slice %121 {offsets = [0, 0], sizes = [1, 256], strides = [1, 1]} : vector<2x256xf32> to vector<1x256xf32>
    %126 = vector.broadcast %124 : vector<2x1xf32> to vector<2x256xf32>
    %127 = vector.broadcast %125 : vector<1x256xf32> to vector<2x256xf32>
    %128 = arith.mulf %126, %127 : vector<2x256xf32>
    %cst_32 = arith.constant 0.000000e+00 : f32
    %129 = vector.broadcast %cst_32 : f32 to vector<2x256xf32>
    %130 = arith.addf %129, %128 : vector<2x256xf32>
    %131 = vector.extract_strided_slice %123 {offsets = [0, 1], sizes = [2, 1], strides = [1, 1]} : vector<2x2xf32> to vector<2x1xf32>
    %132 = vector.extract_strided_slice %121 {offsets = [1, 0], sizes = [1, 256], strides = [1, 1]} : vector<2x256xf32> to vector<1x256xf32>
    %133 = vector.broadcast %131 : vector<2x1xf32> to vector<2x256xf32>
    %134 = vector.broadcast %132 : vector<1x256xf32> to vector<2x256xf32>
    %135 = arith.mulf %133, %134 : vector<2x256xf32>
    %136 = arith.addf %130, %135 : vector<2x256xf32>
    %137 = arith.addf %114, %136 : vector<2x256xf32>
    %c240_i32 = arith.constant 240 : i32
    %138 = vector.broadcast %c240_i32 : i32 to vector<1x256xi32>
    %139 = arith.cmpi slt, %2, %138 : vector<1x256xi32>
    %c1_i32_33 = arith.constant 1 : i32
    %140 = vector.broadcast %c1_i32_33 : i32 to vector<1x256xi32>
    %141 = arith.cmpi sge, %4, %140 : vector<1x256xi32>
    %142 = arith.andi %139, %141 : vector<1x256xi1>
    %c241_i32 = arith.constant 241 : i32
    %143 = tpu.dynamic_rotate %1 by %c241_i32 dim 1 : vector<2x256xf32>, i32 -> vector<2x256xf32>
    %cst_34 = arith.constant 0.000000e+00 : f32
    %144 = vector.shape_cast %142 : vector<1x256xi1> to vector<1x256xi1>
    %145 = vector.broadcast %144 : vector<1x256xi1> to vector<2x256xi1>
    %146 = vector.broadcast %cst_34 : f32 to vector<2x256xf32>
    %147 = arith.select %145, %143, %146 : vector<2x256xi1>, vector<2x256xf32>
    %c6 = arith.constant 6 : index
    %c0_35 = arith.constant 0 : index
    %c0_36 = arith.constant 0 : index
    %148 = vector.load %arg2[%c6, %c0_35, %c0_36] : memref<9x2x2xf32, #tpu.memory_space<vmem>>, vector<1x2x2xf32>
    %149 = vector.shape_cast %148 : vector<1x2x2xf32> to vector<2x2xf32>
    %150 = vector.extract_strided_slice %149 {offsets = [0, 0], sizes = [2, 1], strides = [1, 1]} : vector<2x2xf32> to vector<2x1xf32>
    %151 = vector.extract_strided_slice %147 {offsets = [0, 0], sizes = [1, 256], strides = [1, 1]} : vector<2x256xf32> to vector<1x256xf32>
    %152 = vector.broadcast %150 : vector<2x1xf32> to vector<2x256xf32>
    %153 = vector.broadcast %151 : vector<1x256xf32> to vector<2x256xf32>
    %154 = arith.mulf %152, %153 : vector<2x256xf32>
    %cst_37 = arith.constant 0.000000e+00 : f32
    %155 = vector.broadcast %cst_37 : f32 to vector<2x256xf32>
    %156 = arith.addf %155, %154 : vector<2x256xf32>
    %157 = vector.extract_strided_slice %149 {offsets = [0, 1], sizes = [2, 1], strides = [1, 1]} : vector<2x2xf32> to vector<2x1xf32>
    %158 = vector.extract_strided_slice %147 {offsets = [1, 0], sizes = [1, 256], strides = [1, 1]} : vector<2x256xf32> to vector<1x256xf32>
    %159 = vector.broadcast %157 : vector<2x1xf32> to vector<2x256xf32>
    %160 = vector.broadcast %158 : vector<1x256xf32> to vector<2x256xf32>
    %161 = arith.mulf %159, %160 : vector<2x256xf32>
    %162 = arith.addf %156, %161 : vector<2x256xf32>
    %163 = arith.addf %137, %162 : vector<2x256xf32>
    %c240_i32_38 = arith.constant 240 : i32
    %164 = tpu.dynamic_rotate %1 by %c240_i32_38 dim 1 : vector<2x256xf32>, i32 -> vector<2x256xf32>
    %cst_39 = arith.constant 0.000000e+00 : f32
    %165 = vector.shape_cast %139 : vector<1x256xi1> to vector<1x256xi1>
    %166 = vector.broadcast %165 : vector<1x256xi1> to vector<2x256xi1>
    %167 = vector.broadcast %cst_39 : f32 to vector<2x256xf32>
    %168 = arith.select %166, %164, %167 : vector<2x256xi1>, vector<2x256xf32>
    %c7 = arith.constant 7 : index
    %c0_40 = arith.constant 0 : index
    %c0_41 = arith.constant 0 : index
    %169 = vector.load %arg2[%c7, %c0_40, %c0_41] : memref<9x2x2xf32, #tpu.memory_space<vmem>>, vector<1x2x2xf32>
    %170 = vector.shape_cast %169 : vector<1x2x2xf32> to vector<2x2xf32>
    %171 = vector.extract_strided_slice %170 {offsets = [0, 0], sizes = [2, 1], strides = [1, 1]} : vector<2x2xf32> to vector<2x1xf32>
    %172 = vector.extract_strided_slice %168 {offsets = [0, 0], sizes = [1, 256], strides = [1, 1]} : vector<2x256xf32> to vector<1x256xf32>
    %173 = vector.broadcast %171 : vector<2x1xf32> to vector<2x256xf32>
    %174 = vector.broadcast %172 : vector<1x256xf32> to vector<2x256xf32>
    %175 = arith.mulf %173, %174 : vector<2x256xf32>
    %cst_42 = arith.constant 0.000000e+00 : f32
    %176 = vector.broadcast %cst_42 : f32 to vector<2x256xf32>
    %177 = arith.addf %176, %175 : vector<2x256xf32>
    %178 = vector.extract_strided_slice %170 {offsets = [0, 1], sizes = [2, 1], strides = [1, 1]} : vector<2x2xf32> to vector<2x1xf32>
    %179 = vector.extract_strided_slice %168 {offsets = [1, 0], sizes = [1, 256], strides = [1, 1]} : vector<2x256xf32> to vector<1x256xf32>
    %180 = vector.broadcast %178 : vector<2x1xf32> to vector<2x256xf32>
    %181 = vector.broadcast %179 : vector<1x256xf32> to vector<2x256xf32>
    %182 = arith.mulf %180, %181 : vector<2x256xf32>
    %183 = arith.addf %177, %182 : vector<2x256xf32>
    %184 = arith.addf %163, %183 : vector<2x256xf32>
    %c15_i32_43 = arith.constant 15 : i32
    %185 = vector.broadcast %c15_i32_43 : i32 to vector<1x256xi32>
    %186 = arith.cmpi slt, %4, %185 : vector<1x256xi32>
    %187 = arith.andi %139, %186 : vector<1x256xi1>
    %c239_i32 = arith.constant 239 : i32
    %188 = tpu.dynamic_rotate %1 by %c239_i32 dim 1 : vector<2x256xf32>, i32 -> vector<2x256xf32>
    %cst_44 = arith.constant 0.000000e+00 : f32
    %189 = vector.shape_cast %187 : vector<1x256xi1> to vector<1x256xi1>
    %190 = vector.broadcast %189 : vector<1x256xi1> to vector<2x256xi1>
    %191 = vector.broadcast %cst_44 : f32 to vector<2x256xf32>
    %192 = arith.select %190, %188, %191 : vector<2x256xi1>, vector<2x256xf32>
    %c8 = arith.constant 8 : index
    %c0_45 = arith.constant 0 : index
    %c0_46 = arith.constant 0 : index
    %193 = vector.load %arg2[%c8, %c0_45, %c0_46] : memref<9x2x2xf32, #tpu.memory_space<vmem>>, vector<1x2x2xf32>
    %194 = vector.shape_cast %193 : vector<1x2x2xf32> to vector<2x2xf32>
    %195 = vector.extract_strided_slice %194 {offsets = [0, 0], sizes = [2, 1], strides = [1, 1]} : vector<2x2xf32> to vector<2x1xf32>
    %196 = vector.extract_strided_slice %192 {offsets = [0, 0], sizes = [1, 256], strides = [1, 1]} : vector<2x256xf32> to vector<1x256xf32>
    %197 = vector.broadcast %195 : vector<2x1xf32> to vector<2x256xf32>
    %198 = vector.broadcast %196 : vector<1x256xf32> to vector<2x256xf32>
    %199 = arith.mulf %197, %198 : vector<2x256xf32>
    %cst_47 = arith.constant 0.000000e+00 : f32
    %200 = vector.broadcast %cst_47 : f32 to vector<2x256xf32>
    %201 = arith.addf %200, %199 : vector<2x256xf32>
    %202 = vector.extract_strided_slice %194 {offsets = [0, 1], sizes = [2, 1], strides = [1, 1]} : vector<2x2xf32> to vector<2x1xf32>
    %203 = vector.extract_strided_slice %192 {offsets = [1, 0], sizes = [1, 256], strides = [1, 1]} : vector<2x256xf32> to vector<1x256xf32>
    %204 = vector.broadcast %202 : vector<2x1xf32> to vector<2x256xf32>
    %205 = vector.broadcast %203 : vector<1x256xf32> to vector<2x256xf32>
    %206 = arith.mulf %204, %205 : vector<2x256xf32>
    %207 = arith.addf %201, %206 : vector<2x256xf32>
    %208 = arith.addf %184, %207 : vector<2x256xf32>
    %209 = vector.broadcast %5 : vector<2x1xf32> to vector<2x256xf32>
    %210 = arith.addf %208, %209 : vector<2x256xf32>
    %cst_48 = arith.constant 0.000000e+00 : f32
    %211 = vector.broadcast %cst_48 : f32 to vector<2x256xf32>
    %212 = arith.maximumf %210, %211 : vector<2x256xf32>
    %c0_49 = arith.constant 0 : index
    %c0_50 = arith.constant 0 : index
    %213 = vector.load %arg5[%c0_49, %c0_50] : memref<2x1xf32, #tpu.memory_space<vmem>>, vector<2x1xf32>
    %c16_i32_51 = arith.constant 16 : i32
    %214 = vector.broadcast %c16_i32_51 : i32 to vector<1x256xi32>
    %215 = arith.cmpi sge, %2, %214 : vector<1x256xi32>
    %c1_i32_52 = arith.constant 1 : i32
    %216 = vector.broadcast %c1_i32_52 : i32 to vector<1x256xi32>
    %217 = arith.cmpi sge, %4, %216 : vector<1x256xi32>
    %218 = arith.andi %215, %217 : vector<1x256xi1>
    %c17_i32_53 = arith.constant 17 : i32
    %219 = tpu.dynamic_rotate %212 by %c17_i32_53 dim 1 : vector<2x256xf32>, i32 -> vector<2x256xf32>
    %cst_54 = arith.constant 0.000000e+00 : f32
    %220 = vector.shape_cast %218 : vector<1x256xi1> to vector<1x256xi1>
    %221 = vector.broadcast %220 : vector<1x256xi1> to vector<2x256xi1>
    %222 = vector.broadcast %cst_54 : f32 to vector<2x256xf32>
    %223 = arith.select %221, %219, %222 : vector<2x256xi1>, vector<2x256xf32>
    %c0_55 = arith.constant 0 : index
    %c0_56 = arith.constant 0 : index
    %c0_57 = arith.constant 0 : index
    %224 = vector.load %arg4[%c0_55, %c0_56, %c0_57] : memref<9x2x2xf32, #tpu.memory_space<vmem>>, vector<1x2x2xf32>
    %225 = vector.shape_cast %224 : vector<1x2x2xf32> to vector<2x2xf32>
    %226 = vector.extract_strided_slice %225 {offsets = [0, 0], sizes = [2, 1], strides = [1, 1]} : vector<2x2xf32> to vector<2x1xf32>
    %227 = vector.extract_strided_slice %223 {offsets = [0, 0], sizes = [1, 256], strides = [1, 1]} : vector<2x256xf32> to vector<1x256xf32>
    %228 = vector.broadcast %226 : vector<2x1xf32> to vector<2x256xf32>
    %229 = vector.broadcast %227 : vector<1x256xf32> to vector<2x256xf32>
    %230 = arith.mulf %228, %229 : vector<2x256xf32>
    %cst_58 = arith.constant 0.000000e+00 : f32
    %231 = vector.broadcast %cst_58 : f32 to vector<2x256xf32>
    %232 = arith.addf %231, %230 : vector<2x256xf32>
    %233 = vector.extract_strided_slice %225 {offsets = [0, 1], sizes = [2, 1], strides = [1, 1]} : vector<2x2xf32> to vector<2x1xf32>
    %234 = vector.extract_strided_slice %223 {offsets = [1, 0], sizes = [1, 256], strides = [1, 1]} : vector<2x256xf32> to vector<1x256xf32>
    %235 = vector.broadcast %233 : vector<2x1xf32> to vector<2x256xf32>
    %236 = vector.broadcast %234 : vector<1x256xf32> to vector<2x256xf32>
    %237 = arith.mulf %235, %236 : vector<2x256xf32>
    %238 = arith.addf %232, %237 : vector<2x256xf32>
    %c16_i32_59 = arith.constant 16 : i32
    %239 = tpu.dynamic_rotate %212 by %c16_i32_59 dim 1 : vector<2x256xf32>, i32 -> vector<2x256xf32>
    %cst_60 = arith.constant 0.000000e+00 : f32
    %240 = vector.shape_cast %215 : vector<1x256xi1> to vector<1x256xi1>
    %241 = vector.broadcast %240 : vector<1x256xi1> to vector<2x256xi1>
    %242 = vector.broadcast %cst_60 : f32 to vector<2x256xf32>
    %243 = arith.select %241, %239, %242 : vector<2x256xi1>, vector<2x256xf32>
    %c1_61 = arith.constant 1 : index
    %c0_62 = arith.constant 0 : index
    %c0_63 = arith.constant 0 : index
    %244 = vector.load %arg4[%c1_61, %c0_62, %c0_63] : memref<9x2x2xf32, #tpu.memory_space<vmem>>, vector<1x2x2xf32>
    %245 = vector.shape_cast %244 : vector<1x2x2xf32> to vector<2x2xf32>
    %246 = vector.extract_strided_slice %245 {offsets = [0, 0], sizes = [2, 1], strides = [1, 1]} : vector<2x2xf32> to vector<2x1xf32>
    %247 = vector.extract_strided_slice %243 {offsets = [0, 0], sizes = [1, 256], strides = [1, 1]} : vector<2x256xf32> to vector<1x256xf32>
    %248 = vector.broadcast %246 : vector<2x1xf32> to vector<2x256xf32>
    %249 = vector.broadcast %247 : vector<1x256xf32> to vector<2x256xf32>
    %250 = arith.mulf %248, %249 : vector<2x256xf32>
    %cst_64 = arith.constant 0.000000e+00 : f32
    %251 = vector.broadcast %cst_64 : f32 to vector<2x256xf32>
    %252 = arith.addf %251, %250 : vector<2x256xf32>
    %253 = vector.extract_strided_slice %245 {offsets = [0, 1], sizes = [2, 1], strides = [1, 1]} : vector<2x2xf32> to vector<2x1xf32>
    %254 = vector.extract_strided_slice %243 {offsets = [1, 0], sizes = [1, 256], strides = [1, 1]} : vector<2x256xf32> to vector<1x256xf32>
    %255 = vector.broadcast %253 : vector<2x1xf32> to vector<2x256xf32>
    %256 = vector.broadcast %254 : vector<1x256xf32> to vector<2x256xf32>
    %257 = arith.mulf %255, %256 : vector<2x256xf32>
    %258 = arith.addf %252, %257 : vector<2x256xf32>
    %259 = arith.addf %238, %258 : vector<2x256xf32>
    %c15_i32_65 = arith.constant 15 : i32
    %260 = vector.broadcast %c15_i32_65 : i32 to vector<1x256xi32>
    %261 = arith.cmpi slt, %4, %260 : vector<1x256xi32>
    %262 = arith.andi %215, %261 : vector<1x256xi1>
    %c15_i32_66 = arith.constant 15 : i32
    %263 = tpu.dynamic_rotate %212 by %c15_i32_66 dim 1 : vector<2x256xf32>, i32 -> vector<2x256xf32>
    %cst_67 = arith.constant 0.000000e+00 : f32
    %264 = vector.shape_cast %262 : vector<1x256xi1> to vector<1x256xi1>
    %265 = vector.broadcast %264 : vector<1x256xi1> to vector<2x256xi1>
    %266 = vector.broadcast %cst_67 : f32 to vector<2x256xf32>
    %267 = arith.select %265, %263, %266 : vector<2x256xi1>, vector<2x256xf32>
    %c2_68 = arith.constant 2 : index
    %c0_69 = arith.constant 0 : index
    %c0_70 = arith.constant 0 : index
    %268 = vector.load %arg4[%c2_68, %c0_69, %c0_70] : memref<9x2x2xf32, #tpu.memory_space<vmem>>, vector<1x2x2xf32>
    %269 = vector.shape_cast %268 : vector<1x2x2xf32> to vector<2x2xf32>
    %270 = vector.extract_strided_slice %269 {offsets = [0, 0], sizes = [2, 1], strides = [1, 1]} : vector<2x2xf32> to vector<2x1xf32>
    %271 = vector.extract_strided_slice %267 {offsets = [0, 0], sizes = [1, 256], strides = [1, 1]} : vector<2x256xf32> to vector<1x256xf32>
    %272 = vector.broadcast %270 : vector<2x1xf32> to vector<2x256xf32>
    %273 = vector.broadcast %271 : vector<1x256xf32> to vector<2x256xf32>
    %274 = arith.mulf %272, %273 : vector<2x256xf32>
    %cst_71 = arith.constant 0.000000e+00 : f32
    %275 = vector.broadcast %cst_71 : f32 to vector<2x256xf32>
    %276 = arith.addf %275, %274 : vector<2x256xf32>
    %277 = vector.extract_strided_slice %269 {offsets = [0, 1], sizes = [2, 1], strides = [1, 1]} : vector<2x2xf32> to vector<2x1xf32>
    %278 = vector.extract_strided_slice %267 {offsets = [1, 0], sizes = [1, 256], strides = [1, 1]} : vector<2x256xf32> to vector<1x256xf32>
    %279 = vector.broadcast %277 : vector<2x1xf32> to vector<2x256xf32>
    %280 = vector.broadcast %278 : vector<1x256xf32> to vector<2x256xf32>
    %281 = arith.mulf %279, %280 : vector<2x256xf32>
    %282 = arith.addf %276, %281 : vector<2x256xf32>
    %283 = arith.addf %259, %282 : vector<2x256xf32>
    %c1_i32_72 = arith.constant 1 : i32
    %284 = vector.broadcast %c1_i32_72 : i32 to vector<1x256xi32>
    %285 = arith.cmpi sge, %4, %284 : vector<1x256xi32>
    %c1_i32_73 = arith.constant 1 : i32
    %286 = tpu.dynamic_rotate %212 by %c1_i32_73 dim 1 : vector<2x256xf32>, i32 -> vector<2x256xf32>
    %cst_74 = arith.constant 0.000000e+00 : f32
    %287 = vector.shape_cast %285 : vector<1x256xi1> to vector<1x256xi1>
    %288 = vector.broadcast %287 : vector<1x256xi1> to vector<2x256xi1>
    %289 = vector.broadcast %cst_74 : f32 to vector<2x256xf32>
    %290 = arith.select %288, %286, %289 : vector<2x256xi1>, vector<2x256xf32>
    %c3_75 = arith.constant 3 : index
    %c0_76 = arith.constant 0 : index
    %c0_77 = arith.constant 0 : index
    %291 = vector.load %arg4[%c3_75, %c0_76, %c0_77] : memref<9x2x2xf32, #tpu.memory_space<vmem>>, vector<1x2x2xf32>
    %292 = vector.shape_cast %291 : vector<1x2x2xf32> to vector<2x2xf32>
    %293 = vector.extract_strided_slice %292 {offsets = [0, 0], sizes = [2, 1], strides = [1, 1]} : vector<2x2xf32> to vector<2x1xf32>
    %294 = vector.extract_strided_slice %290 {offsets = [0, 0], sizes = [1, 256], strides = [1, 1]} : vector<2x256xf32> to vector<1x256xf32>
    %295 = vector.broadcast %293 : vector<2x1xf32> to vector<2x256xf32>
    %296 = vector.broadcast %294 : vector<1x256xf32> to vector<2x256xf32>
    %297 = arith.mulf %295, %296 : vector<2x256xf32>
    %cst_78 = arith.constant 0.000000e+00 : f32
    %298 = vector.broadcast %cst_78 : f32 to vector<2x256xf32>
    %299 = arith.addf %298, %297 : vector<2x256xf32>
    %300 = vector.extract_strided_slice %292 {offsets = [0, 1], sizes = [2, 1], strides = [1, 1]} : vector<2x2xf32> to vector<2x1xf32>
    %301 = vector.extract_strided_slice %290 {offsets = [1, 0], sizes = [1, 256], strides = [1, 1]} : vector<2x256xf32> to vector<1x256xf32>
    %302 = vector.broadcast %300 : vector<2x1xf32> to vector<2x256xf32>
    %303 = vector.broadcast %301 : vector<1x256xf32> to vector<2x256xf32>
    %304 = arith.mulf %302, %303 : vector<2x256xf32>
    %305 = arith.addf %299, %304 : vector<2x256xf32>
    %306 = arith.addf %283, %305 : vector<2x256xf32>
    %c4_79 = arith.constant 4 : index
    %c0_80 = arith.constant 0 : index
    %c0_81 = arith.constant 0 : index
    %307 = vector.load %arg4[%c4_79, %c0_80, %c0_81] : memref<9x2x2xf32, #tpu.memory_space<vmem>>, vector<1x2x2xf32>
    %308 = vector.shape_cast %307 : vector<1x2x2xf32> to vector<2x2xf32>
    %309 = vector.extract_strided_slice %308 {offsets = [0, 0], sizes = [2, 1], strides = [1, 1]} : vector<2x2xf32> to vector<2x1xf32>
    %310 = vector.extract_strided_slice %212 {offsets = [0, 0], sizes = [1, 256], strides = [1, 1]} : vector<2x256xf32> to vector<1x256xf32>
    %311 = vector.broadcast %309 : vector<2x1xf32> to vector<2x256xf32>
    %312 = vector.broadcast %310 : vector<1x256xf32> to vector<2x256xf32>
    %313 = arith.mulf %311, %312 : vector<2x256xf32>
    %cst_82 = arith.constant 0.000000e+00 : f32
    %314 = vector.broadcast %cst_82 : f32 to vector<2x256xf32>
    %315 = arith.addf %314, %313 : vector<2x256xf32>
    %316 = vector.extract_strided_slice %308 {offsets = [0, 1], sizes = [2, 1], strides = [1, 1]} : vector<2x2xf32> to vector<2x1xf32>
    %317 = vector.extract_strided_slice %212 {offsets = [1, 0], sizes = [1, 256], strides = [1, 1]} : vector<2x256xf32> to vector<1x256xf32>
    %318 = vector.broadcast %316 : vector<2x1xf32> to vector<2x256xf32>
    %319 = vector.broadcast %317 : vector<1x256xf32> to vector<2x256xf32>
    %320 = arith.mulf %318, %319 : vector<2x256xf32>
    %321 = arith.addf %315, %320 : vector<2x256xf32>
    %322 = arith.addf %306, %321 : vector<2x256xf32>
    %c15_i32_83 = arith.constant 15 : i32
    %323 = vector.broadcast %c15_i32_83 : i32 to vector<1x256xi32>
    %324 = arith.cmpi slt, %4, %323 : vector<1x256xi32>
    %c255_i32_84 = arith.constant 255 : i32
    %325 = tpu.dynamic_rotate %212 by %c255_i32_84 dim 1 : vector<2x256xf32>, i32 -> vector<2x256xf32>
    %cst_85 = arith.constant 0.000000e+00 : f32
    %326 = vector.shape_cast %324 : vector<1x256xi1> to vector<1x256xi1>
    %327 = vector.broadcast %326 : vector<1x256xi1> to vector<2x256xi1>
    %328 = vector.broadcast %cst_85 : f32 to vector<2x256xf32>
    %329 = arith.select %327, %325, %328 : vector<2x256xi1>, vector<2x256xf32>
    %c5_86 = arith.constant 5 : index
    %c0_87 = arith.constant 0 : index
    %c0_88 = arith.constant 0 : index
    %330 = vector.load %arg4[%c5_86, %c0_87, %c0_88] : memref<9x2x2xf32, #tpu.memory_space<vmem>>, vector<1x2x2xf32>
    %331 = vector.shape_cast %330 : vector<1x2x2xf32> to vector<2x2xf32>
    %332 = vector.extract_strided_slice %331 {offsets = [0, 0], sizes = [2, 1], strides = [1, 1]} : vector<2x2xf32> to vector<2x1xf32>
    %333 = vector.extract_strided_slice %329 {offsets = [0, 0], sizes = [1, 256], strides = [1, 1]} : vector<2x256xf32> to vector<1x256xf32>
    %334 = vector.broadcast %332 : vector<2x1xf32> to vector<2x256xf32>
    %335 = vector.broadcast %333 : vector<1x256xf32> to vector<2x256xf32>
    %336 = arith.mulf %334, %335 : vector<2x256xf32>
    %cst_89 = arith.constant 0.000000e+00 : f32
    %337 = vector.broadcast %cst_89 : f32 to vector<2x256xf32>
    %338 = arith.addf %337, %336 : vector<2x256xf32>
    %339 = vector.extract_strided_slice %331 {offsets = [0, 1], sizes = [2, 1], strides = [1, 1]} : vector<2x2xf32> to vector<2x1xf32>
    %340 = vector.extract_strided_slice %329 {offsets = [1, 0], sizes = [1, 256], strides = [1, 1]} : vector<2x256xf32> to vector<1x256xf32>
    %341 = vector.broadcast %339 : vector<2x1xf32> to vector<2x256xf32>
    %342 = vector.broadcast %340 : vector<1x256xf32> to vector<2x256xf32>
    %343 = arith.mulf %341, %342 : vector<2x256xf32>
    %344 = arith.addf %338, %343 : vector<2x256xf32>
    %345 = arith.addf %322, %344 : vector<2x256xf32>
    %c240_i32_90 = arith.constant 240 : i32
    %346 = vector.broadcast %c240_i32_90 : i32 to vector<1x256xi32>
    %347 = arith.cmpi slt, %2, %346 : vector<1x256xi32>
    %c1_i32_91 = arith.constant 1 : i32
    %348 = vector.broadcast %c1_i32_91 : i32 to vector<1x256xi32>
    %349 = arith.cmpi sge, %4, %348 : vector<1x256xi32>
    %350 = arith.andi %347, %349 : vector<1x256xi1>
    %c241_i32_92 = arith.constant 241 : i32
    %351 = tpu.dynamic_rotate %212 by %c241_i32_92 dim 1 : vector<2x256xf32>, i32 -> vector<2x256xf32>
    %cst_93 = arith.constant 0.000000e+00 : f32
    %352 = vector.shape_cast %350 : vector<1x256xi1> to vector<1x256xi1>
    %353 = vector.broadcast %352 : vector<1x256xi1> to vector<2x256xi1>
    %354 = vector.broadcast %cst_93 : f32 to vector<2x256xf32>
    %355 = arith.select %353, %351, %354 : vector<2x256xi1>, vector<2x256xf32>
    %c6_94 = arith.constant 6 : index
    %c0_95 = arith.constant 0 : index
    %c0_96 = arith.constant 0 : index
    %356 = vector.load %arg4[%c6_94, %c0_95, %c0_96] : memref<9x2x2xf32, #tpu.memory_space<vmem>>, vector<1x2x2xf32>
    %357 = vector.shape_cast %356 : vector<1x2x2xf32> to vector<2x2xf32>
    %358 = vector.extract_strided_slice %357 {offsets = [0, 0], sizes = [2, 1], strides = [1, 1]} : vector<2x2xf32> to vector<2x1xf32>
    %359 = vector.extract_strided_slice %355 {offsets = [0, 0], sizes = [1, 256], strides = [1, 1]} : vector<2x256xf32> to vector<1x256xf32>
    %360 = vector.broadcast %358 : vector<2x1xf32> to vector<2x256xf32>
    %361 = vector.broadcast %359 : vector<1x256xf32> to vector<2x256xf32>
    %362 = arith.mulf %360, %361 : vector<2x256xf32>
    %cst_97 = arith.constant 0.000000e+00 : f32
    %363 = vector.broadcast %cst_97 : f32 to vector<2x256xf32>
    %364 = arith.addf %363, %362 : vector<2x256xf32>
    %365 = vector.extract_strided_slice %357 {offsets = [0, 1], sizes = [2, 1], strides = [1, 1]} : vector<2x2xf32> to vector<2x1xf32>
    %366 = vector.extract_strided_slice %355 {offsets = [1, 0], sizes = [1, 256], strides = [1, 1]} : vector<2x256xf32> to vector<1x256xf32>
    %367 = vector.broadcast %365 : vector<2x1xf32> to vector<2x256xf32>
    %368 = vector.broadcast %366 : vector<1x256xf32> to vector<2x256xf32>
    %369 = arith.mulf %367, %368 : vector<2x256xf32>
    %370 = arith.addf %364, %369 : vector<2x256xf32>
    %371 = arith.addf %345, %370 : vector<2x256xf32>
    %c240_i32_98 = arith.constant 240 : i32
    %372 = tpu.dynamic_rotate %212 by %c240_i32_98 dim 1 : vector<2x256xf32>, i32 -> vector<2x256xf32>
    %cst_99 = arith.constant 0.000000e+00 : f32
    %373 = vector.shape_cast %347 : vector<1x256xi1> to vector<1x256xi1>
    %374 = vector.broadcast %373 : vector<1x256xi1> to vector<2x256xi1>
    %375 = vector.broadcast %cst_99 : f32 to vector<2x256xf32>
    %376 = arith.select %374, %372, %375 : vector<2x256xi1>, vector<2x256xf32>
    %c7_100 = arith.constant 7 : index
    %c0_101 = arith.constant 0 : index
    %c0_102 = arith.constant 0 : index
    %377 = vector.load %arg4[%c7_100, %c0_101, %c0_102] : memref<9x2x2xf32, #tpu.memory_space<vmem>>, vector<1x2x2xf32>
    %378 = vector.shape_cast %377 : vector<1x2x2xf32> to vector<2x2xf32>
    %379 = vector.extract_strided_slice %378 {offsets = [0, 0], sizes = [2, 1], strides = [1, 1]} : vector<2x2xf32> to vector<2x1xf32>
    %380 = vector.extract_strided_slice %376 {offsets = [0, 0], sizes = [1, 256], strides = [1, 1]} : vector<2x256xf32> to vector<1x256xf32>
    %381 = vector.broadcast %379 : vector<2x1xf32> to vector<2x256xf32>
    %382 = vector.broadcast %380 : vector<1x256xf32> to vector<2x256xf32>
    %383 = arith.mulf %381, %382 : vector<2x256xf32>
    %cst_103 = arith.constant 0.000000e+00 : f32
    %384 = vector.broadcast %cst_103 : f32 to vector<2x256xf32>
    %385 = arith.addf %384, %383 : vector<2x256xf32>
    %386 = vector.extract_strided_slice %378 {offsets = [0, 1], sizes = [2, 1], strides = [1, 1]} : vector<2x2xf32> to vector<2x1xf32>
    %387 = vector.extract_strided_slice %376 {offsets = [1, 0], sizes = [1, 256], strides = [1, 1]} : vector<2x256xf32> to vector<1x256xf32>
    %388 = vector.broadcast %386 : vector<2x1xf32> to vector<2x256xf32>
    %389 = vector.broadcast %387 : vector<1x256xf32> to vector<2x256xf32>
    %390 = arith.mulf %388, %389 : vector<2x256xf32>
    %391 = arith.addf %385, %390 : vector<2x256xf32>
    %392 = arith.addf %371, %391 : vector<2x256xf32>
    %c15_i32_104 = arith.constant 15 : i32
    %393 = vector.broadcast %c15_i32_104 : i32 to vector<1x256xi32>
    %394 = arith.cmpi slt, %4, %393 : vector<1x256xi32>
    %395 = arith.andi %347, %394 : vector<1x256xi1>
    %c239_i32_105 = arith.constant 239 : i32
    %396 = tpu.dynamic_rotate %212 by %c239_i32_105 dim 1 : vector<2x256xf32>, i32 -> vector<2x256xf32>
    %cst_106 = arith.constant 0.000000e+00 : f32
    %397 = vector.shape_cast %395 : vector<1x256xi1> to vector<1x256xi1>
    %398 = vector.broadcast %397 : vector<1x256xi1> to vector<2x256xi1>
    %399 = vector.broadcast %cst_106 : f32 to vector<2x256xf32>
    %400 = arith.select %398, %396, %399 : vector<2x256xi1>, vector<2x256xf32>
    %c8_107 = arith.constant 8 : index
    %c0_108 = arith.constant 0 : index
    %c0_109 = arith.constant 0 : index
    %401 = vector.load %arg4[%c8_107, %c0_108, %c0_109] : memref<9x2x2xf32, #tpu.memory_space<vmem>>, vector<1x2x2xf32>
    %402 = vector.shape_cast %401 : vector<1x2x2xf32> to vector<2x2xf32>
    %403 = vector.extract_strided_slice %402 {offsets = [0, 0], sizes = [2, 1], strides = [1, 1]} : vector<2x2xf32> to vector<2x1xf32>
    %404 = vector.extract_strided_slice %400 {offsets = [0, 0], sizes = [1, 256], strides = [1, 1]} : vector<2x256xf32> to vector<1x256xf32>
    %405 = vector.broadcast %403 : vector<2x1xf32> to vector<2x256xf32>
    %406 = vector.broadcast %404 : vector<1x256xf32> to vector<2x256xf32>
    %407 = arith.mulf %405, %406 : vector<2x256xf32>
    %cst_110 = arith.constant 0.000000e+00 : f32
    %408 = vector.broadcast %cst_110 : f32 to vector<2x256xf32>
    %409 = arith.addf %408, %407 : vector<2x256xf32>
    %410 = vector.extract_strided_slice %402 {offsets = [0, 1], sizes = [2, 1], strides = [1, 1]} : vector<2x2xf32> to vector<2x1xf32>
    %411 = vector.extract_strided_slice %400 {offsets = [1, 0], sizes = [1, 256], strides = [1, 1]} : vector<2x256xf32> to vector<1x256xf32>
    %412 = vector.broadcast %410 : vector<2x1xf32> to vector<2x256xf32>
    %413 = vector.broadcast %411 : vector<1x256xf32> to vector<2x256xf32>
    %414 = arith.mulf %412, %413 : vector<2x256xf32>
    %415 = arith.addf %409, %414 : vector<2x256xf32>
    %416 = arith.addf %392, %415 : vector<2x256xf32>
    %417 = vector.broadcast %213 : vector<2x1xf32> to vector<2x256xf32>
    %418 = arith.addf %416, %417 : vector<2x256xf32>
    %c32_i32 = arith.constant 32 : i32
    %419 = vector.broadcast %c32_i32 : i32 to vector<1x256xi32>
    %420 = arith.cmpi slt, %2, %419 : vector<1x256xi32>
    %c224_i32 = arith.constant 224 : i32
    %421 = vector.broadcast %c224_i32 : i32 to vector<1x256xi32>
    %422 = arith.cmpi sge, %2, %421 : vector<1x256xi32>
    %423 = arith.ori %420, %422 : vector<1x256xi1>
    %c2_i32 = arith.constant 2 : i32
    %424 = vector.broadcast %c2_i32 : i32 to vector<1x256xi32>
    %425 = arith.cmpi slt, %4, %424 : vector<1x256xi32>
    %c14_i32 = arith.constant 14 : i32
    %426 = vector.broadcast %c14_i32 : i32 to vector<1x256xi32>
    %427 = arith.cmpi sge, %4, %426 : vector<1x256xi32>
    %428 = arith.ori %425, %427 : vector<1x256xi1>
    %429 = arith.andi %423, %428 : vector<1x256xi1>
    %cst_111 = arith.constant 0.000000e+00 : f32
    %cst_112 = arith.constant 1.000000e+00 : f32
    %430 = vector.broadcast %cst_111 : f32 to vector<1x256xf32>
    %431 = vector.broadcast %cst_112 : f32 to vector<1x256xf32>
    %432 = arith.select %429, %430, %431 : vector<1x256xi1>, vector<1x256xf32>
    %433 = vector.broadcast %432 : vector<1x256xf32> to vector<2x256xf32>
    %434 = arith.mulf %418, %433 : vector<2x256xf32>
    %cst_113 = arith.constant dense<0xFF800000> : vector<256xf32>
    %435 = vector.multi_reduction <maximumf>, %434, %cst_113 [0] : vector<2x256xf32> to vector<256xf32>
    %436 = vector.shape_cast %435 : vector<256xf32> to vector<1x256xf32>
    %cst_114 = arith.constant dense<0.000000e+00> : vector<256xf32>
    %437 = vector.multi_reduction <add>, %434, %cst_114 [0] : vector<2x256xf32> to vector<256xf32>
    %438 = vector.shape_cast %437 : vector<256xf32> to vector<1x256xf32>
    %cst_115 = arith.constant 5.000000e-01 : f32
    %439 = vector.broadcast %cst_115 : f32 to vector<1x256xf32>
    %440 = arith.mulf %438, %439 : vector<1x256xf32>
    %c0_116 = arith.constant 0 : index
    %c0_117 = arith.constant 0 : index
    %441 = vector.load %arg12[%c0_116, %c0_117] : memref<1x8xf32, #tpu.memory_space<vmem>>, vector<1x8xf32>
    %c0_118 = arith.constant 0 : index
    %c0_119 = arith.constant 0 : index
    %c0_120 = arith.constant 0 : index
    %442 = vector.load %arg6[%c0_118, %c0_119, %c0_120] : memref<4x2x2xf32, #tpu.memory_space<vmem>>, vector<1x2x2xf32>
    %443 = vector.shape_cast %442 : vector<1x2x2xf32> to vector<2x2xf32>
    %444 = vector.extract_strided_slice %443 {offsets = [0, 0], sizes = [2, 1], strides = [1, 1]} : vector<2x2xf32> to vector<2x1xf32>
    %445 = vector.broadcast %444 : vector<2x1xf32> to vector<2x256xf32>
    %446 = vector.broadcast %436 : vector<1x256xf32> to vector<2x256xf32>
    %447 = arith.mulf %445, %446 : vector<2x256xf32>
    %448 = vector.extract_strided_slice %443 {offsets = [0, 1], sizes = [2, 1], strides = [1, 1]} : vector<2x2xf32> to vector<2x1xf32>
    %449 = vector.broadcast %448 : vector<2x1xf32> to vector<2x256xf32>
    %450 = vector.broadcast %440 : vector<1x256xf32> to vector<2x256xf32>
    %451 = arith.mulf %449, %450 : vector<2x256xf32>
    %452 = arith.addf %447, %451 : vector<2x256xf32>
    %c0_121 = arith.constant 0 : index
    %c0_122 = arith.constant 0 : index
    %c0_123 = arith.constant 0 : index
    %453 = vector.load %arg7[%c0_121, %c0_122, %c0_123] : memref<4x2x1xf32, #tpu.memory_space<vmem>>, vector<1x2x1xf32>
    %454 = vector.shape_cast %453 : vector<1x2x1xf32> to vector<2x1xf32>
    %455 = vector.broadcast %454 : vector<2x1xf32> to vector<2x256xf32>
    %456 = arith.addf %452, %455 : vector<2x256xf32>
    %cst_124 = arith.constant 0.000000e+00 : f32
    %457 = vector.broadcast %cst_124 : f32 to vector<2x256xf32>
    %458 = arith.maximumf %456, %457 : vector<2x256xf32>
    %c0_125 = arith.constant 0 : index
    %c0_126 = arith.constant 0 : index
    %c0_127 = arith.constant 0 : index
    %459 = vector.load %arg9[%c0_125, %c0_126, %c0_127] : memref<4x2x1xf32, #tpu.memory_space<vmem>>, vector<1x2x1xf32>
    %460 = vector.shape_cast %459 : vector<1x2x1xf32> to vector<2x1xf32>
    %c16_i32_128 = arith.constant 16 : i32
    %461 = vector.broadcast %c16_i32_128 : i32 to vector<1x256xi32>
    %462 = arith.cmpi sge, %2, %461 : vector<1x256xi32>
    %c1_i32_129 = arith.constant 1 : i32
    %463 = vector.broadcast %c1_i32_129 : i32 to vector<1x256xi32>
    %464 = arith.cmpi sge, %4, %463 : vector<1x256xi32>
    %465 = arith.andi %462, %464 : vector<1x256xi1>
    %c17_i32_130 = arith.constant 17 : i32
    %466 = tpu.dynamic_rotate %458 by %c17_i32_130 dim 1 : vector<2x256xf32>, i32 -> vector<2x256xf32>
    %cst_131 = arith.constant 0.000000e+00 : f32
    %467 = vector.shape_cast %465 : vector<1x256xi1> to vector<1x256xi1>
    %468 = vector.broadcast %467 : vector<1x256xi1> to vector<2x256xi1>
    %469 = vector.broadcast %cst_131 : f32 to vector<2x256xf32>
    %470 = arith.select %468, %466, %469 : vector<2x256xi1>, vector<2x256xf32>
    %c0_132 = arith.constant 0 : index
    %c0_133 = arith.constant 0 : index
    %c0_134 = arith.constant 0 : index
    %c0_135 = arith.constant 0 : index
    %471 = vector.load %arg8[%c0_132, %c0_133, %c0_134, %c0_135] : memref<4x9x2x2xf32, #tpu.memory_space<vmem>>, vector<1x1x2x2xf32>
    %472 = vector.shape_cast %471 : vector<1x1x2x2xf32> to vector<2x2xf32>
    %473 = vector.extract_strided_slice %472 {offsets = [0, 0], sizes = [2, 1], strides = [1, 1]} : vector<2x2xf32> to vector<2x1xf32>
    %474 = vector.extract_strided_slice %470 {offsets = [0, 0], sizes = [1, 256], strides = [1, 1]} : vector<2x256xf32> to vector<1x256xf32>
    %475 = vector.broadcast %473 : vector<2x1xf32> to vector<2x256xf32>
    %476 = vector.broadcast %474 : vector<1x256xf32> to vector<2x256xf32>
    %477 = arith.mulf %475, %476 : vector<2x256xf32>
    %cst_136 = arith.constant 0.000000e+00 : f32
    %478 = vector.broadcast %cst_136 : f32 to vector<2x256xf32>
    %479 = arith.addf %478, %477 : vector<2x256xf32>
    %480 = vector.extract_strided_slice %472 {offsets = [0, 1], sizes = [2, 1], strides = [1, 1]} : vector<2x2xf32> to vector<2x1xf32>
    %481 = vector.extract_strided_slice %470 {offsets = [1, 0], sizes = [1, 256], strides = [1, 1]} : vector<2x256xf32> to vector<1x256xf32>
    %482 = vector.broadcast %480 : vector<2x1xf32> to vector<2x256xf32>
    %483 = vector.broadcast %481 : vector<1x256xf32> to vector<2x256xf32>
    %484 = arith.mulf %482, %483 : vector<2x256xf32>
    %485 = arith.addf %479, %484 : vector<2x256xf32>
    %c16_i32_137 = arith.constant 16 : i32
    %486 = tpu.dynamic_rotate %458 by %c16_i32_137 dim 1 : vector<2x256xf32>, i32 -> vector<2x256xf32>
    %cst_138 = arith.constant 0.000000e+00 : f32
    %487 = vector.shape_cast %462 : vector<1x256xi1> to vector<1x256xi1>
    %488 = vector.broadcast %487 : vector<1x256xi1> to vector<2x256xi1>
    %489 = vector.broadcast %cst_138 : f32 to vector<2x256xf32>
    %490 = arith.select %488, %486, %489 : vector<2x256xi1>, vector<2x256xf32>
    %c0_139 = arith.constant 0 : index
    %c1_140 = arith.constant 1 : index
    %c0_141 = arith.constant 0 : index
    %c0_142 = arith.constant 0 : index
    %491 = vector.load %arg8[%c0_139, %c1_140, %c0_141, %c0_142] : memref<4x9x2x2xf32, #tpu.memory_space<vmem>>, vector<1x1x2x2xf32>
    %492 = vector.shape_cast %491 : vector<1x1x2x2xf32> to vector<2x2xf32>
    %493 = vector.extract_strided_slice %492 {offsets = [0, 0], sizes = [2, 1], strides = [1, 1]} : vector<2x2xf32> to vector<2x1xf32>
    %494 = vector.extract_strided_slice %490 {offsets = [0, 0], sizes = [1, 256], strides = [1, 1]} : vector<2x256xf32> to vector<1x256xf32>
    %495 = vector.broadcast %493 : vector<2x1xf32> to vector<2x256xf32>
    %496 = vector.broadcast %494 : vector<1x256xf32> to vector<2x256xf32>
    %497 = arith.mulf %495, %496 : vector<2x256xf32>
    %cst_143 = arith.constant 0.000000e+00 : f32
    %498 = vector.broadcast %cst_143 : f32 to vector<2x256xf32>
    %499 = arith.addf %498, %497 : vector<2x256xf32>
    %500 = vector.extract_strided_slice %492 {offsets = [0, 1], sizes = [2, 1], strides = [1, 1]} : vector<2x2xf32> to vector<2x1xf32>
    %501 = vector.extract_strided_slice %490 {offsets = [1, 0], sizes = [1, 256], strides = [1, 1]} : vector<2x256xf32> to vector<1x256xf32>
    %502 = vector.broadcast %500 : vector<2x1xf32> to vector<2x256xf32>
    %503 = vector.broadcast %501 : vector<1x256xf32> to vector<2x256xf32>
    %504 = arith.mulf %502, %503 : vector<2x256xf32>
    %505 = arith.addf %499, %504 : vector<2x256xf32>
    %506 = arith.addf %485, %505 : vector<2x256xf32>
    %c15_i32_144 = arith.constant 15 : i32
    %507 = vector.broadcast %c15_i32_144 : i32 to vector<1x256xi32>
    %508 = arith.cmpi slt, %4, %507 : vector<1x256xi32>
    %509 = arith.andi %462, %508 : vector<1x256xi1>
    %c15_i32_145 = arith.constant 15 : i32
    %510 = tpu.dynamic_rotate %458 by %c15_i32_145 dim 1 : vector<2x256xf32>, i32 -> vector<2x256xf32>
    %cst_146 = arith.constant 0.000000e+00 : f32
    %511 = vector.shape_cast %509 : vector<1x256xi1> to vector<1x256xi1>
    %512 = vector.broadcast %511 : vector<1x256xi1> to vector<2x256xi1>
    %513 = vector.broadcast %cst_146 : f32 to vector<2x256xf32>
    %514 = arith.select %512, %510, %513 : vector<2x256xi1>, vector<2x256xf32>
    %c0_147 = arith.constant 0 : index
    %c2_148 = arith.constant 2 : index
    %c0_149 = arith.constant 0 : index
    %c0_150 = arith.constant 0 : index
    %515 = vector.load %arg8[%c0_147, %c2_148, %c0_149, %c0_150] : memref<4x9x2x2xf32, #tpu.memory_space<vmem>>, vector<1x1x2x2xf32>
    %516 = vector.shape_cast %515 : vector<1x1x2x2xf32> to vector<2x2xf32>
    %517 = vector.extract_strided_slice %516 {offsets = [0, 0], sizes = [2, 1], strides = [1, 1]} : vector<2x2xf32> to vector<2x1xf32>
    %518 = vector.extract_strided_slice %514 {offsets = [0, 0], sizes = [1, 256], strides = [1, 1]} : vector<2x256xf32> to vector<1x256xf32>
    %519 = vector.broadcast %517 : vector<2x1xf32> to vector<2x256xf32>
    %520 = vector.broadcast %518 : vector<1x256xf32> to vector<2x256xf32>
    %521 = arith.mulf %519, %520 : vector<2x256xf32>
    %cst_151 = arith.constant 0.000000e+00 : f32
    %522 = vector.broadcast %cst_151 : f32 to vector<2x256xf32>
    %523 = arith.addf %522, %521 : vector<2x256xf32>
    %524 = vector.extract_strided_slice %516 {offsets = [0, 1], sizes = [2, 1], strides = [1, 1]} : vector<2x2xf32> to vector<2x1xf32>
    %525 = vector.extract_strided_slice %514 {offsets = [1, 0], sizes = [1, 256], strides = [1, 1]} : vector<2x256xf32> to vector<1x256xf32>
    %526 = vector.broadcast %524 : vector<2x1xf32> to vector<2x256xf32>
    %527 = vector.broadcast %525 : vector<1x256xf32> to vector<2x256xf32>
    %528 = arith.mulf %526, %527 : vector<2x256xf32>
    %529 = arith.addf %523, %528 : vector<2x256xf32>
    %530 = arith.addf %506, %529 : vector<2x256xf32>
    %c1_i32_152 = arith.constant 1 : i32
    %531 = vector.broadcast %c1_i32_152 : i32 to vector<1x256xi32>
    %532 = arith.cmpi sge, %4, %531 : vector<1x256xi32>
    %c1_i32_153 = arith.constant 1 : i32
    %533 = tpu.dynamic_rotate %458 by %c1_i32_153 dim 1 : vector<2x256xf32>, i32 -> vector<2x256xf32>
    %cst_154 = arith.constant 0.000000e+00 : f32
    %534 = vector.shape_cast %532 : vector<1x256xi1> to vector<1x256xi1>
    %535 = vector.broadcast %534 : vector<1x256xi1> to vector<2x256xi1>
    %536 = vector.broadcast %cst_154 : f32 to vector<2x256xf32>
    %537 = arith.select %535, %533, %536 : vector<2x256xi1>, vector<2x256xf32>
    %c0_155 = arith.constant 0 : index
    %c3_156 = arith.constant 3 : index
    %c0_157 = arith.constant 0 : index
    %c0_158 = arith.constant 0 : index
    %538 = vector.load %arg8[%c0_155, %c3_156, %c0_157, %c0_158] : memref<4x9x2x2xf32, #tpu.memory_space<vmem>>, vector<1x1x2x2xf32>
    %539 = vector.shape_cast %538 : vector<1x1x2x2xf32> to vector<2x2xf32>
    %540 = vector.extract_strided_slice %539 {offsets = [0, 0], sizes = [2, 1], strides = [1, 1]} : vector<2x2xf32> to vector<2x1xf32>
    %541 = vector.extract_strided_slice %537 {offsets = [0, 0], sizes = [1, 256], strides = [1, 1]} : vector<2x256xf32> to vector<1x256xf32>
    %542 = vector.broadcast %540 : vector<2x1xf32> to vector<2x256xf32>
    %543 = vector.broadcast %541 : vector<1x256xf32> to vector<2x256xf32>
    %544 = arith.mulf %542, %543 : vector<2x256xf32>
    %cst_159 = arith.constant 0.000000e+00 : f32
    %545 = vector.broadcast %cst_159 : f32 to vector<2x256xf32>
    %546 = arith.addf %545, %544 : vector<2x256xf32>
    %547 = vector.extract_strided_slice %539 {offsets = [0, 1], sizes = [2, 1], strides = [1, 1]} : vector<2x2xf32> to vector<2x1xf32>
    %548 = vector.extract_strided_slice %537 {offsets = [1, 0], sizes = [1, 256], strides = [1, 1]} : vector<2x256xf32> to vector<1x256xf32>
    %549 = vector.broadcast %547 : vector<2x1xf32> to vector<2x256xf32>
    %550 = vector.broadcast %548 : vector<1x256xf32> to vector<2x256xf32>
    %551 = arith.mulf %549, %550 : vector<2x256xf32>
    %552 = arith.addf %546, %551 : vector<2x256xf32>
    %553 = arith.addf %530, %552 : vector<2x256xf32>
    %c0_160 = arith.constant 0 : index
    %c4_161 = arith.constant 4 : index
    %c0_162 = arith.constant 0 : index
    %c0_163 = arith.constant 0 : index
    %554 = vector.load %arg8[%c0_160, %c4_161, %c0_162, %c0_163] : memref<4x9x2x2xf32, #tpu.memory_space<vmem>>, vector<1x1x2x2xf32>
    %555 = vector.shape_cast %554 : vector<1x1x2x2xf32> to vector<2x2xf32>
    %556 = vector.extract_strided_slice %555 {offsets = [0, 0], sizes = [2, 1], strides = [1, 1]} : vector<2x2xf32> to vector<2x1xf32>
    %557 = vector.extract_strided_slice %458 {offsets = [0, 0], sizes = [1, 256], strides = [1, 1]} : vector<2x256xf32> to vector<1x256xf32>
    %558 = vector.broadcast %556 : vector<2x1xf32> to vector<2x256xf32>
    %559 = vector.broadcast %557 : vector<1x256xf32> to vector<2x256xf32>
    %560 = arith.mulf %558, %559 : vector<2x256xf32>
    %cst_164 = arith.constant 0.000000e+00 : f32
    %561 = vector.broadcast %cst_164 : f32 to vector<2x256xf32>
    %562 = arith.addf %561, %560 : vector<2x256xf32>
    %563 = vector.extract_strided_slice %555 {offsets = [0, 1], sizes = [2, 1], strides = [1, 1]} : vector<2x2xf32> to vector<2x1xf32>
    %564 = vector.extract_strided_slice %458 {offsets = [1, 0], sizes = [1, 256], strides = [1, 1]} : vector<2x256xf32> to vector<1x256xf32>
    %565 = vector.broadcast %563 : vector<2x1xf32> to vector<2x256xf32>
    %566 = vector.broadcast %564 : vector<1x256xf32> to vector<2x256xf32>
    %567 = arith.mulf %565, %566 : vector<2x256xf32>
    %568 = arith.addf %562, %567 : vector<2x256xf32>
    %569 = arith.addf %553, %568 : vector<2x256xf32>
    %c15_i32_165 = arith.constant 15 : i32
    %570 = vector.broadcast %c15_i32_165 : i32 to vector<1x256xi32>
    %571 = arith.cmpi slt, %4, %570 : vector<1x256xi32>
    %c255_i32_166 = arith.constant 255 : i32
    %572 = tpu.dynamic_rotate %458 by %c255_i32_166 dim 1 : vector<2x256xf32>, i32 -> vector<2x256xf32>
    %cst_167 = arith.constant 0.000000e+00 : f32
    %573 = vector.shape_cast %571 : vector<1x256xi1> to vector<1x256xi1>
    %574 = vector.broadcast %573 : vector<1x256xi1> to vector<2x256xi1>
    %575 = vector.broadcast %cst_167 : f32 to vector<2x256xf32>
    %576 = arith.select %574, %572, %575 : vector<2x256xi1>, vector<2x256xf32>
    %c0_168 = arith.constant 0 : index
    %c5_169 = arith.constant 5 : index
    %c0_170 = arith.constant 0 : index
    %c0_171 = arith.constant 0 : index
    %577 = vector.load %arg8[%c0_168, %c5_169, %c0_170, %c0_171] : memref<4x9x2x2xf32, #tpu.memory_space<vmem>>, vector<1x1x2x2xf32>
    %578 = vector.shape_cast %577 : vector<1x1x2x2xf32> to vector<2x2xf32>
    %579 = vector.extract_strided_slice %578 {offsets = [0, 0], sizes = [2, 1], strides = [1, 1]} : vector<2x2xf32> to vector<2x1xf32>
    %580 = vector.extract_strided_slice %576 {offsets = [0, 0], sizes = [1, 256], strides = [1, 1]} : vector<2x256xf32> to vector<1x256xf32>
    %581 = vector.broadcast %579 : vector<2x1xf32> to vector<2x256xf32>
    %582 = vector.broadcast %580 : vector<1x256xf32> to vector<2x256xf32>
    %583 = arith.mulf %581, %582 : vector<2x256xf32>
    %cst_172 = arith.constant 0.000000e+00 : f32
    %584 = vector.broadcast %cst_172 : f32 to vector<2x256xf32>
    %585 = arith.addf %584, %583 : vector<2x256xf32>
    %586 = vector.extract_strided_slice %578 {offsets = [0, 1], sizes = [2, 1], strides = [1, 1]} : vector<2x2xf32> to vector<2x1xf32>
    %587 = vector.extract_strided_slice %576 {offsets = [1, 0], sizes = [1, 256], strides = [1, 1]} : vector<2x256xf32> to vector<1x256xf32>
    %588 = vector.broadcast %586 : vector<2x1xf32> to vector<2x256xf32>
    %589 = vector.broadcast %587 : vector<1x256xf32> to vector<2x256xf32>
    %590 = arith.mulf %588, %589 : vector<2x256xf32>
    %591 = arith.addf %585, %590 : vector<2x256xf32>
    %592 = arith.addf %569, %591 : vector<2x256xf32>
    %c240_i32_173 = arith.constant 240 : i32
    %593 = vector.broadcast %c240_i32_173 : i32 to vector<1x256xi32>
    %594 = arith.cmpi slt, %2, %593 : vector<1x256xi32>
    %c1_i32_174 = arith.constant 1 : i32
    %595 = vector.broadcast %c1_i32_174 : i32 to vector<1x256xi32>
    %596 = arith.cmpi sge, %4, %595 : vector<1x256xi32>
    %597 = arith.andi %594, %596 : vector<1x256xi1>
    %c241_i32_175 = arith.constant 241 : i32
    %598 = tpu.dynamic_rotate %458 by %c241_i32_175 dim 1 : vector<2x256xf32>, i32 -> vector<2x256xf32>
    %cst_176 = arith.constant 0.000000e+00 : f32
    %599 = vector.shape_cast %597 : vector<1x256xi1> to vector<1x256xi1>
    %600 = vector.broadcast %599 : vector<1x256xi1> to vector<2x256xi1>
    %601 = vector.broadcast %cst_176 : f32 to vector<2x256xf32>
    %602 = arith.select %600, %598, %601 : vector<2x256xi1>, vector<2x256xf32>
    %c0_177 = arith.constant 0 : index
    %c6_178 = arith.constant 6 : index
    %c0_179 = arith.constant 0 : index
    %c0_180 = arith.constant 0 : index
    %603 = vector.load %arg8[%c0_177, %c6_178, %c0_179, %c0_180] : memref<4x9x2x2xf32, #tpu.memory_space<vmem>>, vector<1x1x2x2xf32>
    %604 = vector.shape_cast %603 : vector<1x1x2x2xf32> to vector<2x2xf32>
    %605 = vector.extract_strided_slice %604 {offsets = [0, 0], sizes = [2, 1], strides = [1, 1]} : vector<2x2xf32> to vector<2x1xf32>
    %606 = vector.extract_strided_slice %602 {offsets = [0, 0], sizes = [1, 256], strides = [1, 1]} : vector<2x256xf32> to vector<1x256xf32>
    %607 = vector.broadcast %605 : vector<2x1xf32> to vector<2x256xf32>
    %608 = vector.broadcast %606 : vector<1x256xf32> to vector<2x256xf32>
    %609 = arith.mulf %607, %608 : vector<2x256xf32>
    %cst_181 = arith.constant 0.000000e+00 : f32
    %610 = vector.broadcast %cst_181 : f32 to vector<2x256xf32>
    %611 = arith.addf %610, %609 : vector<2x256xf32>
    %612 = vector.extract_strided_slice %604 {offsets = [0, 1], sizes = [2, 1], strides = [1, 1]} : vector<2x2xf32> to vector<2x1xf32>
    %613 = vector.extract_strided_slice %602 {offsets = [1, 0], sizes = [1, 256], strides = [1, 1]} : vector<2x256xf32> to vector<1x256xf32>
    %614 = vector.broadcast %612 : vector<2x1xf32> to vector<2x256xf32>
    %615 = vector.broadcast %613 : vector<1x256xf32> to vector<2x256xf32>
    %616 = arith.mulf %614, %615 : vector<2x256xf32>
    %617 = arith.addf %611, %616 : vector<2x256xf32>
    %618 = arith.addf %592, %617 : vector<2x256xf32>
    %c240_i32_182 = arith.constant 240 : i32
    %619 = tpu.dynamic_rotate %458 by %c240_i32_182 dim 1 : vector<2x256xf32>, i32 -> vector<2x256xf32>
    %cst_183 = arith.constant 0.000000e+00 : f32
    %620 = vector.shape_cast %594 : vector<1x256xi1> to vector<1x256xi1>
    %621 = vector.broadcast %620 : vector<1x256xi1> to vector<2x256xi1>
    %622 = vector.broadcast %cst_183 : f32 to vector<2x256xf32>
    %623 = arith.select %621, %619, %622 : vector<2x256xi1>, vector<2x256xf32>
    %c0_184 = arith.constant 0 : index
    %c7_185 = arith.constant 7 : index
    %c0_186 = arith.constant 0 : index
    %c0_187 = arith.constant 0 : index
    %624 = vector.load %arg8[%c0_184, %c7_185, %c0_186, %c0_187] : memref<4x9x2x2xf32, #tpu.memory_space<vmem>>, vector<1x1x2x2xf32>
    %625 = vector.shape_cast %624 : vector<1x1x2x2xf32> to vector<2x2xf32>
    %626 = vector.extract_strided_slice %625 {offsets = [0, 0], sizes = [2, 1], strides = [1, 1]} : vector<2x2xf32> to vector<2x1xf32>
    %627 = vector.extract_strided_slice %623 {offsets = [0, 0], sizes = [1, 256], strides = [1, 1]} : vector<2x256xf32> to vector<1x256xf32>
    %628 = vector.broadcast %626 : vector<2x1xf32> to vector<2x256xf32>
    %629 = vector.broadcast %627 : vector<1x256xf32> to vector<2x256xf32>
    %630 = arith.mulf %628, %629 : vector<2x256xf32>
    %cst_188 = arith.constant 0.000000e+00 : f32
    %631 = vector.broadcast %cst_188 : f32 to vector<2x256xf32>
    %632 = arith.addf %631, %630 : vector<2x256xf32>
    %633 = vector.extract_strided_slice %625 {offsets = [0, 1], sizes = [2, 1], strides = [1, 1]} : vector<2x2xf32> to vector<2x1xf32>
    %634 = vector.extract_strided_slice %623 {offsets = [1, 0], sizes = [1, 256], strides = [1, 1]} : vector<2x256xf32> to vector<1x256xf32>
    %635 = vector.broadcast %633 : vector<2x1xf32> to vector<2x256xf32>
    %636 = vector.broadcast %634 : vector<1x256xf32> to vector<2x256xf32>
    %637 = arith.mulf %635, %636 : vector<2x256xf32>
    %638 = arith.addf %632, %637 : vector<2x256xf32>
    %639 = arith.addf %618, %638 : vector<2x256xf32>
    %c15_i32_189 = arith.constant 15 : i32
    %640 = vector.broadcast %c15_i32_189 : i32 to vector<1x256xi32>
    %641 = arith.cmpi slt, %4, %640 : vector<1x256xi32>
    %642 = arith.andi %594, %641 : vector<1x256xi1>
    %c239_i32_190 = arith.constant 239 : i32
    %643 = tpu.dynamic_rotate %458 by %c239_i32_190 dim 1 : vector<2x256xf32>, i32 -> vector<2x256xf32>
    %cst_191 = arith.constant 0.000000e+00 : f32
    %644 = vector.shape_cast %642 : vector<1x256xi1> to vector<1x256xi1>
    %645 = vector.broadcast %644 : vector<1x256xi1> to vector<2x256xi1>
    %646 = vector.broadcast %cst_191 : f32 to vector<2x256xf32>
    %647 = arith.select %645, %643, %646 : vector<2x256xi1>, vector<2x256xf32>
    %c0_192 = arith.constant 0 : index
    %c8_193 = arith.constant 8 : index
    %c0_194 = arith.constant 0 : index
    %c0_195 = arith.constant 0 : index
    %648 = vector.load %arg8[%c0_192, %c8_193, %c0_194, %c0_195] : memref<4x9x2x2xf32, #tpu.memory_space<vmem>>, vector<1x1x2x2xf32>
    %649 = vector.shape_cast %648 : vector<1x1x2x2xf32> to vector<2x2xf32>
    %650 = vector.extract_strided_slice %649 {offsets = [0, 0], sizes = [2, 1], strides = [1, 1]} : vector<2x2xf32> to vector<2x1xf32>
    %651 = vector.extract_strided_slice %647 {offsets = [0, 0], sizes = [1, 256], strides = [1, 1]} : vector<2x256xf32> to vector<1x256xf32>
    %652 = vector.broadcast %650 : vector<2x1xf32> to vector<2x256xf32>
    %653 = vector.broadcast %651 : vector<1x256xf32> to vector<2x256xf32>
    %654 = arith.mulf %652, %653 : vector<2x256xf32>
    %cst_196 = arith.constant 0.000000e+00 : f32
    %655 = vector.broadcast %cst_196 : f32 to vector<2x256xf32>
    %656 = arith.addf %655, %654 : vector<2x256xf32>
    %657 = vector.extract_strided_slice %649 {offsets = [0, 1], sizes = [2, 1], strides = [1, 1]} : vector<2x2xf32> to vector<2x1xf32>
    %658 = vector.extract_strided_slice %647 {offsets = [1, 0], sizes = [1, 256], strides = [1, 1]} : vector<2x256xf32> to vector<1x256xf32>
    %659 = vector.broadcast %657 : vector<2x1xf32> to vector<2x256xf32>
    %660 = vector.broadcast %658 : vector<1x256xf32> to vector<2x256xf32>
    %661 = arith.mulf %659, %660 : vector<2x256xf32>
    %662 = arith.addf %656, %661 : vector<2x256xf32>
    %663 = arith.addf %639, %662 : vector<2x256xf32>
    %664 = vector.broadcast %460 : vector<2x1xf32> to vector<2x256xf32>
    %665 = arith.addf %663, %664 : vector<2x256xf32>
    %666 = vector.extract_strided_slice %441 {offsets = [0, 0], sizes = [1, 1], strides = [1, 1]} : vector<1x8xf32> to vector<1x1xf32>
    %667 = vector.extract_strided_slice %665 {offsets = [0, 0], sizes = [1, 256], strides = [1, 1]} : vector<2x256xf32> to vector<1x256xf32>
    %668 = vector.broadcast %666 : vector<1x1xf32> to vector<1x256xf32>
    %669 = arith.mulf %668, %667 : vector<1x256xf32>
    %670 = vector.extract_strided_slice %441 {offsets = [0, 1], sizes = [1, 1], strides = [1, 1]} : vector<1x8xf32> to vector<1x1xf32>
    %671 = vector.extract_strided_slice %665 {offsets = [1, 0], sizes = [1, 256], strides = [1, 1]} : vector<2x256xf32> to vector<1x256xf32>
    %672 = vector.broadcast %670 : vector<1x1xf32> to vector<1x256xf32>
    %673 = arith.mulf %672, %671 : vector<1x256xf32>
    %674 = arith.addf %669, %673 : vector<1x256xf32>
    %c1_197 = arith.constant 1 : index
    %c0_198 = arith.constant 0 : index
    %c0_199 = arith.constant 0 : index
    %675 = vector.load %arg6[%c1_197, %c0_198, %c0_199] : memref<4x2x2xf32, #tpu.memory_space<vmem>>, vector<1x2x2xf32>
    %676 = vector.shape_cast %675 : vector<1x2x2xf32> to vector<2x2xf32>
    %677 = vector.extract_strided_slice %676 {offsets = [0, 0], sizes = [2, 1], strides = [1, 1]} : vector<2x2xf32> to vector<2x1xf32>
    %678 = vector.broadcast %677 : vector<2x1xf32> to vector<2x256xf32>
    %679 = vector.broadcast %436 : vector<1x256xf32> to vector<2x256xf32>
    %680 = arith.mulf %678, %679 : vector<2x256xf32>
    %681 = vector.extract_strided_slice %676 {offsets = [0, 1], sizes = [2, 1], strides = [1, 1]} : vector<2x2xf32> to vector<2x1xf32>
    %682 = vector.broadcast %681 : vector<2x1xf32> to vector<2x256xf32>
    %683 = vector.broadcast %440 : vector<1x256xf32> to vector<2x256xf32>
    %684 = arith.mulf %682, %683 : vector<2x256xf32>
    %685 = arith.addf %680, %684 : vector<2x256xf32>
    %c1_200 = arith.constant 1 : index
    %c0_201 = arith.constant 0 : index
    %c0_202 = arith.constant 0 : index
    %686 = vector.load %arg7[%c1_200, %c0_201, %c0_202] : memref<4x2x1xf32, #tpu.memory_space<vmem>>, vector<1x2x1xf32>
    %687 = vector.shape_cast %686 : vector<1x2x1xf32> to vector<2x1xf32>
    %688 = vector.broadcast %687 : vector<2x1xf32> to vector<2x256xf32>
    %689 = arith.addf %685, %688 : vector<2x256xf32>
    %cst_203 = arith.constant 0.000000e+00 : f32
    %690 = vector.broadcast %cst_203 : f32 to vector<2x256xf32>
    %691 = arith.maximumf %689, %690 : vector<2x256xf32>
    %c1_204 = arith.constant 1 : index
    %c0_205 = arith.constant 0 : index
    %c0_206 = arith.constant 0 : index
    %692 = vector.load %arg9[%c1_204, %c0_205, %c0_206] : memref<4x2x1xf32, #tpu.memory_space<vmem>>, vector<1x2x1xf32>
    %693 = vector.shape_cast %692 : vector<1x2x1xf32> to vector<2x1xf32>
    %c16_i32_207 = arith.constant 16 : i32
    %694 = vector.broadcast %c16_i32_207 : i32 to vector<1x256xi32>
    %695 = arith.cmpi sge, %2, %694 : vector<1x256xi32>
    %c1_i32_208 = arith.constant 1 : i32
    %696 = vector.broadcast %c1_i32_208 : i32 to vector<1x256xi32>
    %697 = arith.cmpi sge, %4, %696 : vector<1x256xi32>
    %698 = arith.andi %695, %697 : vector<1x256xi1>
    %c17_i32_209 = arith.constant 17 : i32
    %699 = tpu.dynamic_rotate %691 by %c17_i32_209 dim 1 : vector<2x256xf32>, i32 -> vector<2x256xf32>
    %cst_210 = arith.constant 0.000000e+00 : f32
    %700 = vector.shape_cast %698 : vector<1x256xi1> to vector<1x256xi1>
    %701 = vector.broadcast %700 : vector<1x256xi1> to vector<2x256xi1>
    %702 = vector.broadcast %cst_210 : f32 to vector<2x256xf32>
    %703 = arith.select %701, %699, %702 : vector<2x256xi1>, vector<2x256xf32>
    %c1_211 = arith.constant 1 : index
    %c0_212 = arith.constant 0 : index
    %c0_213 = arith.constant 0 : index
    %c0_214 = arith.constant 0 : index
    %704 = vector.load %arg8[%c1_211, %c0_212, %c0_213, %c0_214] : memref<4x9x2x2xf32, #tpu.memory_space<vmem>>, vector<1x1x2x2xf32>
    %705 = vector.shape_cast %704 : vector<1x1x2x2xf32> to vector<2x2xf32>
    %706 = vector.extract_strided_slice %705 {offsets = [0, 0], sizes = [2, 1], strides = [1, 1]} : vector<2x2xf32> to vector<2x1xf32>
    %707 = vector.extract_strided_slice %703 {offsets = [0, 0], sizes = [1, 256], strides = [1, 1]} : vector<2x256xf32> to vector<1x256xf32>
    %708 = vector.broadcast %706 : vector<2x1xf32> to vector<2x256xf32>
    %709 = vector.broadcast %707 : vector<1x256xf32> to vector<2x256xf32>
    %710 = arith.mulf %708, %709 : vector<2x256xf32>
    %cst_215 = arith.constant 0.000000e+00 : f32
    %711 = vector.broadcast %cst_215 : f32 to vector<2x256xf32>
    %712 = arith.addf %711, %710 : vector<2x256xf32>
    %713 = vector.extract_strided_slice %705 {offsets = [0, 1], sizes = [2, 1], strides = [1, 1]} : vector<2x2xf32> to vector<2x1xf32>
    %714 = vector.extract_strided_slice %703 {offsets = [1, 0], sizes = [1, 256], strides = [1, 1]} : vector<2x256xf32> to vector<1x256xf32>
    %715 = vector.broadcast %713 : vector<2x1xf32> to vector<2x256xf32>
    %716 = vector.broadcast %714 : vector<1x256xf32> to vector<2x256xf32>
    %717 = arith.mulf %715, %716 : vector<2x256xf32>
    %718 = arith.addf %712, %717 : vector<2x256xf32>
    %c16_i32_216 = arith.constant 16 : i32
    %719 = tpu.dynamic_rotate %691 by %c16_i32_216 dim 1 : vector<2x256xf32>, i32 -> vector<2x256xf32>
    %cst_217 = arith.constant 0.000000e+00 : f32
    %720 = vector.shape_cast %695 : vector<1x256xi1> to vector<1x256xi1>
    %721 = vector.broadcast %720 : vector<1x256xi1> to vector<2x256xi1>
    %722 = vector.broadcast %cst_217 : f32 to vector<2x256xf32>
    %723 = arith.select %721, %719, %722 : vector<2x256xi1>, vector<2x256xf32>
    %c1_218 = arith.constant 1 : index
    %c1_219 = arith.constant 1 : index
    %c0_220 = arith.constant 0 : index
    %c0_221 = arith.constant 0 : index
    %724 = vector.load %arg8[%c1_218, %c1_219, %c0_220, %c0_221] : memref<4x9x2x2xf32, #tpu.memory_space<vmem>>, vector<1x1x2x2xf32>
    %725 = vector.shape_cast %724 : vector<1x1x2x2xf32> to vector<2x2xf32>
    %726 = vector.extract_strided_slice %725 {offsets = [0, 0], sizes = [2, 1], strides = [1, 1]} : vector<2x2xf32> to vector<2x1xf32>
    %727 = vector.extract_strided_slice %723 {offsets = [0, 0], sizes = [1, 256], strides = [1, 1]} : vector<2x256xf32> to vector<1x256xf32>
    %728 = vector.broadcast %726 : vector<2x1xf32> to vector<2x256xf32>
    %729 = vector.broadcast %727 : vector<1x256xf32> to vector<2x256xf32>
    %730 = arith.mulf %728, %729 : vector<2x256xf32>
    %cst_222 = arith.constant 0.000000e+00 : f32
    %731 = vector.broadcast %cst_222 : f32 to vector<2x256xf32>
    %732 = arith.addf %731, %730 : vector<2x256xf32>
    %733 = vector.extract_strided_slice %725 {offsets = [0, 1], sizes = [2, 1], strides = [1, 1]} : vector<2x2xf32> to vector<2x1xf32>
    %734 = vector.extract_strided_slice %723 {offsets = [1, 0], sizes = [1, 256], strides = [1, 1]} : vector<2x256xf32> to vector<1x256xf32>
    %735 = vector.broadcast %733 : vector<2x1xf32> to vector<2x256xf32>
    %736 = vector.broadcast %734 : vector<1x256xf32> to vector<2x256xf32>
    %737 = arith.mulf %735, %736 : vector<2x256xf32>
    %738 = arith.addf %732, %737 : vector<2x256xf32>
    %739 = arith.addf %718, %738 : vector<2x256xf32>
    %c15_i32_223 = arith.constant 15 : i32
    %740 = vector.broadcast %c15_i32_223 : i32 to vector<1x256xi32>
    %741 = arith.cmpi slt, %4, %740 : vector<1x256xi32>
    %742 = arith.andi %695, %741 : vector<1x256xi1>
    %c15_i32_224 = arith.constant 15 : i32
    %743 = tpu.dynamic_rotate %691 by %c15_i32_224 dim 1 : vector<2x256xf32>, i32 -> vector<2x256xf32>
    %cst_225 = arith.constant 0.000000e+00 : f32
    %744 = vector.shape_cast %742 : vector<1x256xi1> to vector<1x256xi1>
    %745 = vector.broadcast %744 : vector<1x256xi1> to vector<2x256xi1>
    %746 = vector.broadcast %cst_225 : f32 to vector<2x256xf32>
    %747 = arith.select %745, %743, %746 : vector<2x256xi1>, vector<2x256xf32>
    %c1_226 = arith.constant 1 : index
    %c2_227 = arith.constant 2 : index
    %c0_228 = arith.constant 0 : index
    %c0_229 = arith.constant 0 : index
    %748 = vector.load %arg8[%c1_226, %c2_227, %c0_228, %c0_229] : memref<4x9x2x2xf32, #tpu.memory_space<vmem>>, vector<1x1x2x2xf32>
    %749 = vector.shape_cast %748 : vector<1x1x2x2xf32> to vector<2x2xf32>
    %750 = vector.extract_strided_slice %749 {offsets = [0, 0], sizes = [2, 1], strides = [1, 1]} : vector<2x2xf32> to vector<2x1xf32>
    %751 = vector.extract_strided_slice %747 {offsets = [0, 0], sizes = [1, 256], strides = [1, 1]} : vector<2x256xf32> to vector<1x256xf32>
    %752 = vector.broadcast %750 : vector<2x1xf32> to vector<2x256xf32>
    %753 = vector.broadcast %751 : vector<1x256xf32> to vector<2x256xf32>
    %754 = arith.mulf %752, %753 : vector<2x256xf32>
    %cst_230 = arith.constant 0.000000e+00 : f32
    %755 = vector.broadcast %cst_230 : f32 to vector<2x256xf32>
    %756 = arith.addf %755, %754 : vector<2x256xf32>
    %757 = vector.extract_strided_slice %749 {offsets = [0, 1], sizes = [2, 1], strides = [1, 1]} : vector<2x2xf32> to vector<2x1xf32>
    %758 = vector.extract_strided_slice %747 {offsets = [1, 0], sizes = [1, 256], strides = [1, 1]} : vector<2x256xf32> to vector<1x256xf32>
    %759 = vector.broadcast %757 : vector<2x1xf32> to vector<2x256xf32>
    %760 = vector.broadcast %758 : vector<1x256xf32> to vector<2x256xf32>
    %761 = arith.mulf %759, %760 : vector<2x256xf32>
    %762 = arith.addf %756, %761 : vector<2x256xf32>
    %763 = arith.addf %739, %762 : vector<2x256xf32>
    %c1_i32_231 = arith.constant 1 : i32
    %764 = vector.broadcast %c1_i32_231 : i32 to vector<1x256xi32>
    %765 = arith.cmpi sge, %4, %764 : vector<1x256xi32>
    %c1_i32_232 = arith.constant 1 : i32
    %766 = tpu.dynamic_rotate %691 by %c1_i32_232 dim 1 : vector<2x256xf32>, i32 -> vector<2x256xf32>
    %cst_233 = arith.constant 0.000000e+00 : f32
    %767 = vector.shape_cast %765 : vector<1x256xi1> to vector<1x256xi1>
    %768 = vector.broadcast %767 : vector<1x256xi1> to vector<2x256xi1>
    %769 = vector.broadcast %cst_233 : f32 to vector<2x256xf32>
    %770 = arith.select %768, %766, %769 : vector<2x256xi1>, vector<2x256xf32>
    %c1_234 = arith.constant 1 : index
    %c3_235 = arith.constant 3 : index
    %c0_236 = arith.constant 0 : index
    %c0_237 = arith.constant 0 : index
    %771 = vector.load %arg8[%c1_234, %c3_235, %c0_236, %c0_237] : memref<4x9x2x2xf32, #tpu.memory_space<vmem>>, vector<1x1x2x2xf32>
    %772 = vector.shape_cast %771 : vector<1x1x2x2xf32> to vector<2x2xf32>
    %773 = vector.extract_strided_slice %772 {offsets = [0, 0], sizes = [2, 1], strides = [1, 1]} : vector<2x2xf32> to vector<2x1xf32>
    %774 = vector.extract_strided_slice %770 {offsets = [0, 0], sizes = [1, 256], strides = [1, 1]} : vector<2x256xf32> to vector<1x256xf32>
    %775 = vector.broadcast %773 : vector<2x1xf32> to vector<2x256xf32>
    %776 = vector.broadcast %774 : vector<1x256xf32> to vector<2x256xf32>
    %777 = arith.mulf %775, %776 : vector<2x256xf32>
    %cst_238 = arith.constant 0.000000e+00 : f32
    %778 = vector.broadcast %cst_238 : f32 to vector<2x256xf32>
    %779 = arith.addf %778, %777 : vector<2x256xf32>
    %780 = vector.extract_strided_slice %772 {offsets = [0, 1], sizes = [2, 1], strides = [1, 1]} : vector<2x2xf32> to vector<2x1xf32>
    %781 = vector.extract_strided_slice %770 {offsets = [1, 0], sizes = [1, 256], strides = [1, 1]} : vector<2x256xf32> to vector<1x256xf32>
    %782 = vector.broadcast %780 : vector<2x1xf32> to vector<2x256xf32>
    %783 = vector.broadcast %781 : vector<1x256xf32> to vector<2x256xf32>
    %784 = arith.mulf %782, %783 : vector<2x256xf32>
    %785 = arith.addf %779, %784 : vector<2x256xf32>
    %786 = arith.addf %763, %785 : vector<2x256xf32>
    %c1_239 = arith.constant 1 : index
    %c4_240 = arith.constant 4 : index
    %c0_241 = arith.constant 0 : index
    %c0_242 = arith.constant 0 : index
    %787 = vector.load %arg8[%c1_239, %c4_240, %c0_241, %c0_242] : memref<4x9x2x2xf32, #tpu.memory_space<vmem>>, vector<1x1x2x2xf32>
    %788 = vector.shape_cast %787 : vector<1x1x2x2xf32> to vector<2x2xf32>
    %789 = vector.extract_strided_slice %788 {offsets = [0, 0], sizes = [2, 1], strides = [1, 1]} : vector<2x2xf32> to vector<2x1xf32>
    %790 = vector.extract_strided_slice %691 {offsets = [0, 0], sizes = [1, 256], strides = [1, 1]} : vector<2x256xf32> to vector<1x256xf32>
    %791 = vector.broadcast %789 : vector<2x1xf32> to vector<2x256xf32>
    %792 = vector.broadcast %790 : vector<1x256xf32> to vector<2x256xf32>
    %793 = arith.mulf %791, %792 : vector<2x256xf32>
    %cst_243 = arith.constant 0.000000e+00 : f32
    %794 = vector.broadcast %cst_243 : f32 to vector<2x256xf32>
    %795 = arith.addf %794, %793 : vector<2x256xf32>
    %796 = vector.extract_strided_slice %788 {offsets = [0, 1], sizes = [2, 1], strides = [1, 1]} : vector<2x2xf32> to vector<2x1xf32>
    %797 = vector.extract_strided_slice %691 {offsets = [1, 0], sizes = [1, 256], strides = [1, 1]} : vector<2x256xf32> to vector<1x256xf32>
    %798 = vector.broadcast %796 : vector<2x1xf32> to vector<2x256xf32>
    %799 = vector.broadcast %797 : vector<1x256xf32> to vector<2x256xf32>
    %800 = arith.mulf %798, %799 : vector<2x256xf32>
    %801 = arith.addf %795, %800 : vector<2x256xf32>
    %802 = arith.addf %786, %801 : vector<2x256xf32>
    %c15_i32_244 = arith.constant 15 : i32
    %803 = vector.broadcast %c15_i32_244 : i32 to vector<1x256xi32>
    %804 = arith.cmpi slt, %4, %803 : vector<1x256xi32>
    %c255_i32_245 = arith.constant 255 : i32
    %805 = tpu.dynamic_rotate %691 by %c255_i32_245 dim 1 : vector<2x256xf32>, i32 -> vector<2x256xf32>
    %cst_246 = arith.constant 0.000000e+00 : f32
    %806 = vector.shape_cast %804 : vector<1x256xi1> to vector<1x256xi1>
    %807 = vector.broadcast %806 : vector<1x256xi1> to vector<2x256xi1>
    %808 = vector.broadcast %cst_246 : f32 to vector<2x256xf32>
    %809 = arith.select %807, %805, %808 : vector<2x256xi1>, vector<2x256xf32>
    %c1_247 = arith.constant 1 : index
    %c5_248 = arith.constant 5 : index
    %c0_249 = arith.constant 0 : index
    %c0_250 = arith.constant 0 : index
    %810 = vector.load %arg8[%c1_247, %c5_248, %c0_249, %c0_250] : memref<4x9x2x2xf32, #tpu.memory_space<vmem>>, vector<1x1x2x2xf32>
    %811 = vector.shape_cast %810 : vector<1x1x2x2xf32> to vector<2x2xf32>
    %812 = vector.extract_strided_slice %811 {offsets = [0, 0], sizes = [2, 1], strides = [1, 1]} : vector<2x2xf32> to vector<2x1xf32>
    %813 = vector.extract_strided_slice %809 {offsets = [0, 0], sizes = [1, 256], strides = [1, 1]} : vector<2x256xf32> to vector<1x256xf32>
    %814 = vector.broadcast %812 : vector<2x1xf32> to vector<2x256xf32>
    %815 = vector.broadcast %813 : vector<1x256xf32> to vector<2x256xf32>
    %816 = arith.mulf %814, %815 : vector<2x256xf32>
    %cst_251 = arith.constant 0.000000e+00 : f32
    %817 = vector.broadcast %cst_251 : f32 to vector<2x256xf32>
    %818 = arith.addf %817, %816 : vector<2x256xf32>
    %819 = vector.extract_strided_slice %811 {offsets = [0, 1], sizes = [2, 1], strides = [1, 1]} : vector<2x2xf32> to vector<2x1xf32>
    %820 = vector.extract_strided_slice %809 {offsets = [1, 0], sizes = [1, 256], strides = [1, 1]} : vector<2x256xf32> to vector<1x256xf32>
    %821 = vector.broadcast %819 : vector<2x1xf32> to vector<2x256xf32>
    %822 = vector.broadcast %820 : vector<1x256xf32> to vector<2x256xf32>
    %823 = arith.mulf %821, %822 : vector<2x256xf32>
    %824 = arith.addf %818, %823 : vector<2x256xf32>
    %825 = arith.addf %802, %824 : vector<2x256xf32>
    %c240_i32_252 = arith.constant 240 : i32
    %826 = vector.broadcast %c240_i32_252 : i32 to vector<1x256xi32>
    %827 = arith.cmpi slt, %2, %826 : vector<1x256xi32>
    %c1_i32_253 = arith.constant 1 : i32
    %828 = vector.broadcast %c1_i32_253 : i32 to vector<1x256xi32>
    %829 = arith.cmpi sge, %4, %828 : vector<1x256xi32>
    %830 = arith.andi %827, %829 : vector<1x256xi1>
    %c241_i32_254 = arith.constant 241 : i32
    %831 = tpu.dynamic_rotate %691 by %c241_i32_254 dim 1 : vector<2x256xf32>, i32 -> vector<2x256xf32>
    %cst_255 = arith.constant 0.000000e+00 : f32
    %832 = vector.shape_cast %830 : vector<1x256xi1> to vector<1x256xi1>
    %833 = vector.broadcast %832 : vector<1x256xi1> to vector<2x256xi1>
    %834 = vector.broadcast %cst_255 : f32 to vector<2x256xf32>
    %835 = arith.select %833, %831, %834 : vector<2x256xi1>, vector<2x256xf32>
    %c1_256 = arith.constant 1 : index
    %c6_257 = arith.constant 6 : index
    %c0_258 = arith.constant 0 : index
    %c0_259 = arith.constant 0 : index
    %836 = vector.load %arg8[%c1_256, %c6_257, %c0_258, %c0_259] : memref<4x9x2x2xf32, #tpu.memory_space<vmem>>, vector<1x1x2x2xf32>
    %837 = vector.shape_cast %836 : vector<1x1x2x2xf32> to vector<2x2xf32>
    %838 = vector.extract_strided_slice %837 {offsets = [0, 0], sizes = [2, 1], strides = [1, 1]} : vector<2x2xf32> to vector<2x1xf32>
    %839 = vector.extract_strided_slice %835 {offsets = [0, 0], sizes = [1, 256], strides = [1, 1]} : vector<2x256xf32> to vector<1x256xf32>
    %840 = vector.broadcast %838 : vector<2x1xf32> to vector<2x256xf32>
    %841 = vector.broadcast %839 : vector<1x256xf32> to vector<2x256xf32>
    %842 = arith.mulf %840, %841 : vector<2x256xf32>
    %cst_260 = arith.constant 0.000000e+00 : f32
    %843 = vector.broadcast %cst_260 : f32 to vector<2x256xf32>
    %844 = arith.addf %843, %842 : vector<2x256xf32>
    %845 = vector.extract_strided_slice %837 {offsets = [0, 1], sizes = [2, 1], strides = [1, 1]} : vector<2x2xf32> to vector<2x1xf32>
    %846 = vector.extract_strided_slice %835 {offsets = [1, 0], sizes = [1, 256], strides = [1, 1]} : vector<2x256xf32> to vector<1x256xf32>
    %847 = vector.broadcast %845 : vector<2x1xf32> to vector<2x256xf32>
    %848 = vector.broadcast %846 : vector<1x256xf32> to vector<2x256xf32>
    %849 = arith.mulf %847, %848 : vector<2x256xf32>
    %850 = arith.addf %844, %849 : vector<2x256xf32>
    %851 = arith.addf %825, %850 : vector<2x256xf32>
    %c240_i32_261 = arith.constant 240 : i32
    %852 = tpu.dynamic_rotate %691 by %c240_i32_261 dim 1 : vector<2x256xf32>, i32 -> vector<2x256xf32>
    %cst_262 = arith.constant 0.000000e+00 : f32
    %853 = vector.shape_cast %827 : vector<1x256xi1> to vector<1x256xi1>
    %854 = vector.broadcast %853 : vector<1x256xi1> to vector<2x256xi1>
    %855 = vector.broadcast %cst_262 : f32 to vector<2x256xf32>
    %856 = arith.select %854, %852, %855 : vector<2x256xi1>, vector<2x256xf32>
    %c1_263 = arith.constant 1 : index
    %c7_264 = arith.constant 7 : index
    %c0_265 = arith.constant 0 : index
    %c0_266 = arith.constant 0 : index
    %857 = vector.load %arg8[%c1_263, %c7_264, %c0_265, %c0_266] : memref<4x9x2x2xf32, #tpu.memory_space<vmem>>, vector<1x1x2x2xf32>
    %858 = vector.shape_cast %857 : vector<1x1x2x2xf32> to vector<2x2xf32>
    %859 = vector.extract_strided_slice %858 {offsets = [0, 0], sizes = [2, 1], strides = [1, 1]} : vector<2x2xf32> to vector<2x1xf32>
    %860 = vector.extract_strided_slice %856 {offsets = [0, 0], sizes = [1, 256], strides = [1, 1]} : vector<2x256xf32> to vector<1x256xf32>
    %861 = vector.broadcast %859 : vector<2x1xf32> to vector<2x256xf32>
    %862 = vector.broadcast %860 : vector<1x256xf32> to vector<2x256xf32>
    %863 = arith.mulf %861, %862 : vector<2x256xf32>
    %cst_267 = arith.constant 0.000000e+00 : f32
    %864 = vector.broadcast %cst_267 : f32 to vector<2x256xf32>
    %865 = arith.addf %864, %863 : vector<2x256xf32>
    %866 = vector.extract_strided_slice %858 {offsets = [0, 1], sizes = [2, 1], strides = [1, 1]} : vector<2x2xf32> to vector<2x1xf32>
    %867 = vector.extract_strided_slice %856 {offsets = [1, 0], sizes = [1, 256], strides = [1, 1]} : vector<2x256xf32> to vector<1x256xf32>
    %868 = vector.broadcast %866 : vector<2x1xf32> to vector<2x256xf32>
    %869 = vector.broadcast %867 : vector<1x256xf32> to vector<2x256xf32>
    %870 = arith.mulf %868, %869 : vector<2x256xf32>
    %871 = arith.addf %865, %870 : vector<2x256xf32>
    %872 = arith.addf %851, %871 : vector<2x256xf32>
    %c15_i32_268 = arith.constant 15 : i32
    %873 = vector.broadcast %c15_i32_268 : i32 to vector<1x256xi32>
    %874 = arith.cmpi slt, %4, %873 : vector<1x256xi32>
    %875 = arith.andi %827, %874 : vector<1x256xi1>
    %c239_i32_269 = arith.constant 239 : i32
    %876 = tpu.dynamic_rotate %691 by %c239_i32_269 dim 1 : vector<2x256xf32>, i32 -> vector<2x256xf32>
    %cst_270 = arith.constant 0.000000e+00 : f32
    %877 = vector.shape_cast %875 : vector<1x256xi1> to vector<1x256xi1>
    %878 = vector.broadcast %877 : vector<1x256xi1> to vector<2x256xi1>
    %879 = vector.broadcast %cst_270 : f32 to vector<2x256xf32>
    %880 = arith.select %878, %876, %879 : vector<2x256xi1>, vector<2x256xf32>
    %c1_271 = arith.constant 1 : index
    %c8_272 = arith.constant 8 : index
    %c0_273 = arith.constant 0 : index
    %c0_274 = arith.constant 0 : index
    %881 = vector.load %arg8[%c1_271, %c8_272, %c0_273, %c0_274] : memref<4x9x2x2xf32, #tpu.memory_space<vmem>>, vector<1x1x2x2xf32>
    %882 = vector.shape_cast %881 : vector<1x1x2x2xf32> to vector<2x2xf32>
    %883 = vector.extract_strided_slice %882 {offsets = [0, 0], sizes = [2, 1], strides = [1, 1]} : vector<2x2xf32> to vector<2x1xf32>
    %884 = vector.extract_strided_slice %880 {offsets = [0, 0], sizes = [1, 256], strides = [1, 1]} : vector<2x256xf32> to vector<1x256xf32>
    %885 = vector.broadcast %883 : vector<2x1xf32> to vector<2x256xf32>
    %886 = vector.broadcast %884 : vector<1x256xf32> to vector<2x256xf32>
    %887 = arith.mulf %885, %886 : vector<2x256xf32>
    %cst_275 = arith.constant 0.000000e+00 : f32
    %888 = vector.broadcast %cst_275 : f32 to vector<2x256xf32>
    %889 = arith.addf %888, %887 : vector<2x256xf32>
    %890 = vector.extract_strided_slice %882 {offsets = [0, 1], sizes = [2, 1], strides = [1, 1]} : vector<2x2xf32> to vector<2x1xf32>
    %891 = vector.extract_strided_slice %880 {offsets = [1, 0], sizes = [1, 256], strides = [1, 1]} : vector<2x256xf32> to vector<1x256xf32>
    %892 = vector.broadcast %890 : vector<2x1xf32> to vector<2x256xf32>
    %893 = vector.broadcast %891 : vector<1x256xf32> to vector<2x256xf32>
    %894 = arith.mulf %892, %893 : vector<2x256xf32>
    %895 = arith.addf %889, %894 : vector<2x256xf32>
    %896 = arith.addf %872, %895 : vector<2x256xf32>
    %897 = vector.broadcast %693 : vector<2x1xf32> to vector<2x256xf32>
    %898 = arith.addf %896, %897 : vector<2x256xf32>
    %cst_276 = arith.constant 0.000000e+00 : f32
    %899 = vector.broadcast %cst_276 : f32 to vector<2x256xf32>
    %900 = arith.maximumf %898, %899 : vector<2x256xf32>
    %c0_277 = arith.constant 0 : index
    %c0_278 = arith.constant 0 : index
    %c0_279 = arith.constant 0 : index
    %901 = vector.load %arg11[%c0_277, %c0_278, %c0_279] : memref<3x2x1xf32, #tpu.memory_space<vmem>>, vector<1x2x1xf32>
    %902 = vector.shape_cast %901 : vector<1x2x1xf32> to vector<2x1xf32>
    %c48_i32 = arith.constant 48 : i32
    %903 = vector.broadcast %c48_i32 : i32 to vector<1x256xi32>
    %904 = arith.cmpi sge, %2, %903 : vector<1x256xi32>
    %c3_i32 = arith.constant 3 : i32
    %905 = vector.broadcast %c3_i32 : i32 to vector<1x256xi32>
    %906 = arith.cmpi sge, %4, %905 : vector<1x256xi32>
    %907 = arith.andi %904, %906 : vector<1x256xi1>
    %c51_i32 = arith.constant 51 : i32
    %908 = tpu.dynamic_rotate %900 by %c51_i32 dim 1 : vector<2x256xf32>, i32 -> vector<2x256xf32>
    %cst_280 = arith.constant 0.000000e+00 : f32
    %909 = vector.shape_cast %907 : vector<1x256xi1> to vector<1x256xi1>
    %910 = vector.broadcast %909 : vector<1x256xi1> to vector<2x256xi1>
    %911 = vector.broadcast %cst_280 : f32 to vector<2x256xf32>
    %912 = arith.select %910, %908, %911 : vector<2x256xi1>, vector<2x256xf32>
    %c0_281 = arith.constant 0 : index
    %c0_282 = arith.constant 0 : index
    %c0_283 = arith.constant 0 : index
    %c0_284 = arith.constant 0 : index
    %913 = vector.load %arg10[%c0_281, %c0_282, %c0_283, %c0_284] : memref<3x9x2x2xf32, #tpu.memory_space<vmem>>, vector<1x1x2x2xf32>
    %914 = vector.shape_cast %913 : vector<1x1x2x2xf32> to vector<2x2xf32>
    %915 = vector.extract_strided_slice %914 {offsets = [0, 0], sizes = [2, 1], strides = [1, 1]} : vector<2x2xf32> to vector<2x1xf32>
    %916 = vector.extract_strided_slice %912 {offsets = [0, 0], sizes = [1, 256], strides = [1, 1]} : vector<2x256xf32> to vector<1x256xf32>
    %917 = vector.broadcast %915 : vector<2x1xf32> to vector<2x256xf32>
    %918 = vector.broadcast %916 : vector<1x256xf32> to vector<2x256xf32>
    %919 = arith.mulf %917, %918 : vector<2x256xf32>
    %cst_285 = arith.constant 0.000000e+00 : f32
    %920 = vector.broadcast %cst_285 : f32 to vector<2x256xf32>
    %921 = arith.addf %920, %919 : vector<2x256xf32>
    %922 = vector.extract_strided_slice %914 {offsets = [0, 1], sizes = [2, 1], strides = [1, 1]} : vector<2x2xf32> to vector<2x1xf32>
    %923 = vector.extract_strided_slice %912 {offsets = [1, 0], sizes = [1, 256], strides = [1, 1]} : vector<2x256xf32> to vector<1x256xf32>
    %924 = vector.broadcast %922 : vector<2x1xf32> to vector<2x256xf32>
    %925 = vector.broadcast %923 : vector<1x256xf32> to vector<2x256xf32>
    %926 = arith.mulf %924, %925 : vector<2x256xf32>
    %927 = arith.addf %921, %926 : vector<2x256xf32>
    %c48_i32_286 = arith.constant 48 : i32
    %928 = tpu.dynamic_rotate %900 by %c48_i32_286 dim 1 : vector<2x256xf32>, i32 -> vector<2x256xf32>
    %cst_287 = arith.constant 0.000000e+00 : f32
    %929 = vector.shape_cast %904 : vector<1x256xi1> to vector<1x256xi1>
    %930 = vector.broadcast %929 : vector<1x256xi1> to vector<2x256xi1>
    %931 = vector.broadcast %cst_287 : f32 to vector<2x256xf32>
    %932 = arith.select %930, %928, %931 : vector<2x256xi1>, vector<2x256xf32>
    %c0_288 = arith.constant 0 : index
    %c1_289 = arith.constant 1 : index
    %c0_290 = arith.constant 0 : index
    %c0_291 = arith.constant 0 : index
    %933 = vector.load %arg10[%c0_288, %c1_289, %c0_290, %c0_291] : memref<3x9x2x2xf32, #tpu.memory_space<vmem>>, vector<1x1x2x2xf32>
    %934 = vector.shape_cast %933 : vector<1x1x2x2xf32> to vector<2x2xf32>
    %935 = vector.extract_strided_slice %934 {offsets = [0, 0], sizes = [2, 1], strides = [1, 1]} : vector<2x2xf32> to vector<2x1xf32>
    %936 = vector.extract_strided_slice %932 {offsets = [0, 0], sizes = [1, 256], strides = [1, 1]} : vector<2x256xf32> to vector<1x256xf32>
    %937 = vector.broadcast %935 : vector<2x1xf32> to vector<2x256xf32>
    %938 = vector.broadcast %936 : vector<1x256xf32> to vector<2x256xf32>
    %939 = arith.mulf %937, %938 : vector<2x256xf32>
    %cst_292 = arith.constant 0.000000e+00 : f32
    %940 = vector.broadcast %cst_292 : f32 to vector<2x256xf32>
    %941 = arith.addf %940, %939 : vector<2x256xf32>
    %942 = vector.extract_strided_slice %934 {offsets = [0, 1], sizes = [2, 1], strides = [1, 1]} : vector<2x2xf32> to vector<2x1xf32>
    %943 = vector.extract_strided_slice %932 {offsets = [1, 0], sizes = [1, 256], strides = [1, 1]} : vector<2x256xf32> to vector<1x256xf32>
    %944 = vector.broadcast %942 : vector<2x1xf32> to vector<2x256xf32>
    %945 = vector.broadcast %943 : vector<1x256xf32> to vector<2x256xf32>
    %946 = arith.mulf %944, %945 : vector<2x256xf32>
    %947 = arith.addf %941, %946 : vector<2x256xf32>
    %948 = arith.addf %927, %947 : vector<2x256xf32>
    %c13_i32 = arith.constant 13 : i32
    %949 = vector.broadcast %c13_i32 : i32 to vector<1x256xi32>
    %950 = arith.cmpi slt, %4, %949 : vector<1x256xi32>
    %951 = arith.andi %904, %950 : vector<1x256xi1>
    %c45_i32 = arith.constant 45 : i32
    %952 = tpu.dynamic_rotate %900 by %c45_i32 dim 1 : vector<2x256xf32>, i32 -> vector<2x256xf32>
    %cst_293 = arith.constant 0.000000e+00 : f32
    %953 = vector.shape_cast %951 : vector<1x256xi1> to vector<1x256xi1>
    %954 = vector.broadcast %953 : vector<1x256xi1> to vector<2x256xi1>
    %955 = vector.broadcast %cst_293 : f32 to vector<2x256xf32>
    %956 = arith.select %954, %952, %955 : vector<2x256xi1>, vector<2x256xf32>
    %c0_294 = arith.constant 0 : index
    %c2_295 = arith.constant 2 : index
    %c0_296 = arith.constant 0 : index
    %c0_297 = arith.constant 0 : index
    %957 = vector.load %arg10[%c0_294, %c2_295, %c0_296, %c0_297] : memref<3x9x2x2xf32, #tpu.memory_space<vmem>>, vector<1x1x2x2xf32>
    %958 = vector.shape_cast %957 : vector<1x1x2x2xf32> to vector<2x2xf32>
    %959 = vector.extract_strided_slice %958 {offsets = [0, 0], sizes = [2, 1], strides = [1, 1]} : vector<2x2xf32> to vector<2x1xf32>
    %960 = vector.extract_strided_slice %956 {offsets = [0, 0], sizes = [1, 256], strides = [1, 1]} : vector<2x256xf32> to vector<1x256xf32>
    %961 = vector.broadcast %959 : vector<2x1xf32> to vector<2x256xf32>
    %962 = vector.broadcast %960 : vector<1x256xf32> to vector<2x256xf32>
    %963 = arith.mulf %961, %962 : vector<2x256xf32>
    %cst_298 = arith.constant 0.000000e+00 : f32
    %964 = vector.broadcast %cst_298 : f32 to vector<2x256xf32>
    %965 = arith.addf %964, %963 : vector<2x256xf32>
    %966 = vector.extract_strided_slice %958 {offsets = [0, 1], sizes = [2, 1], strides = [1, 1]} : vector<2x2xf32> to vector<2x1xf32>
    %967 = vector.extract_strided_slice %956 {offsets = [1, 0], sizes = [1, 256], strides = [1, 1]} : vector<2x256xf32> to vector<1x256xf32>
    %968 = vector.broadcast %966 : vector<2x1xf32> to vector<2x256xf32>
    %969 = vector.broadcast %967 : vector<1x256xf32> to vector<2x256xf32>
    %970 = arith.mulf %968, %969 : vector<2x256xf32>
    %971 = arith.addf %965, %970 : vector<2x256xf32>
    %972 = arith.addf %948, %971 : vector<2x256xf32>
    %c3_i32_299 = arith.constant 3 : i32
    %973 = vector.broadcast %c3_i32_299 : i32 to vector<1x256xi32>
    %974 = arith.cmpi sge, %4, %973 : vector<1x256xi32>
    %c3_i32_300 = arith.constant 3 : i32
    %975 = tpu.dynamic_rotate %900 by %c3_i32_300 dim 1 : vector<2x256xf32>, i32 -> vector<2x256xf32>
    %cst_301 = arith.constant 0.000000e+00 : f32
    %976 = vector.shape_cast %974 : vector<1x256xi1> to vector<1x256xi1>
    %977 = vector.broadcast %976 : vector<1x256xi1> to vector<2x256xi1>
    %978 = vector.broadcast %cst_301 : f32 to vector<2x256xf32>
    %979 = arith.select %977, %975, %978 : vector<2x256xi1>, vector<2x256xf32>
    %c0_302 = arith.constant 0 : index
    %c3_303 = arith.constant 3 : index
    %c0_304 = arith.constant 0 : index
    %c0_305 = arith.constant 0 : index
    %980 = vector.load %arg10[%c0_302, %c3_303, %c0_304, %c0_305] : memref<3x9x2x2xf32, #tpu.memory_space<vmem>>, vector<1x1x2x2xf32>
    %981 = vector.shape_cast %980 : vector<1x1x2x2xf32> to vector<2x2xf32>
    %982 = vector.extract_strided_slice %981 {offsets = [0, 0], sizes = [2, 1], strides = [1, 1]} : vector<2x2xf32> to vector<2x1xf32>
    %983 = vector.extract_strided_slice %979 {offsets = [0, 0], sizes = [1, 256], strides = [1, 1]} : vector<2x256xf32> to vector<1x256xf32>
    %984 = vector.broadcast %982 : vector<2x1xf32> to vector<2x256xf32>
    %985 = vector.broadcast %983 : vector<1x256xf32> to vector<2x256xf32>
    %986 = arith.mulf %984, %985 : vector<2x256xf32>
    %cst_306 = arith.constant 0.000000e+00 : f32
    %987 = vector.broadcast %cst_306 : f32 to vector<2x256xf32>
    %988 = arith.addf %987, %986 : vector<2x256xf32>
    %989 = vector.extract_strided_slice %981 {offsets = [0, 1], sizes = [2, 1], strides = [1, 1]} : vector<2x2xf32> to vector<2x1xf32>
    %990 = vector.extract_strided_slice %979 {offsets = [1, 0], sizes = [1, 256], strides = [1, 1]} : vector<2x256xf32> to vector<1x256xf32>
    %991 = vector.broadcast %989 : vector<2x1xf32> to vector<2x256xf32>
    %992 = vector.broadcast %990 : vector<1x256xf32> to vector<2x256xf32>
    %993 = arith.mulf %991, %992 : vector<2x256xf32>
    %994 = arith.addf %988, %993 : vector<2x256xf32>
    %995 = arith.addf %972, %994 : vector<2x256xf32>
    %c0_307 = arith.constant 0 : index
    %c4_308 = arith.constant 4 : index
    %c0_309 = arith.constant 0 : index
    %c0_310 = arith.constant 0 : index
    %996 = vector.load %arg10[%c0_307, %c4_308, %c0_309, %c0_310] : memref<3x9x2x2xf32, #tpu.memory_space<vmem>>, vector<1x1x2x2xf32>
    %997 = vector.shape_cast %996 : vector<1x1x2x2xf32> to vector<2x2xf32>
    %998 = vector.extract_strided_slice %997 {offsets = [0, 0], sizes = [2, 1], strides = [1, 1]} : vector<2x2xf32> to vector<2x1xf32>
    %999 = vector.extract_strided_slice %900 {offsets = [0, 0], sizes = [1, 256], strides = [1, 1]} : vector<2x256xf32> to vector<1x256xf32>
    %1000 = vector.broadcast %998 : vector<2x1xf32> to vector<2x256xf32>
    %1001 = vector.broadcast %999 : vector<1x256xf32> to vector<2x256xf32>
    %1002 = arith.mulf %1000, %1001 : vector<2x256xf32>
    %cst_311 = arith.constant 0.000000e+00 : f32
    %1003 = vector.broadcast %cst_311 : f32 to vector<2x256xf32>
    %1004 = arith.addf %1003, %1002 : vector<2x256xf32>
    %1005 = vector.extract_strided_slice %997 {offsets = [0, 1], sizes = [2, 1], strides = [1, 1]} : vector<2x2xf32> to vector<2x1xf32>
    %1006 = vector.extract_strided_slice %900 {offsets = [1, 0], sizes = [1, 256], strides = [1, 1]} : vector<2x256xf32> to vector<1x256xf32>
    %1007 = vector.broadcast %1005 : vector<2x1xf32> to vector<2x256xf32>
    %1008 = vector.broadcast %1006 : vector<1x256xf32> to vector<2x256xf32>
    %1009 = arith.mulf %1007, %1008 : vector<2x256xf32>
    %1010 = arith.addf %1004, %1009 : vector<2x256xf32>
    %1011 = arith.addf %995, %1010 : vector<2x256xf32>
    %c13_i32_312 = arith.constant 13 : i32
    %1012 = vector.broadcast %c13_i32_312 : i32 to vector<1x256xi32>
    %1013 = arith.cmpi slt, %4, %1012 : vector<1x256xi32>
    %c253_i32 = arith.constant 253 : i32
    %1014 = tpu.dynamic_rotate %900 by %c253_i32 dim 1 : vector<2x256xf32>, i32 -> vector<2x256xf32>
    %cst_313 = arith.constant 0.000000e+00 : f32
    %1015 = vector.shape_cast %1013 : vector<1x256xi1> to vector<1x256xi1>
    %1016 = vector.broadcast %1015 : vector<1x256xi1> to vector<2x256xi1>
    %1017 = vector.broadcast %cst_313 : f32 to vector<2x256xf32>
    %1018 = arith.select %1016, %1014, %1017 : vector<2x256xi1>, vector<2x256xf32>
    %c0_314 = arith.constant 0 : index
    %c5_315 = arith.constant 5 : index
    %c0_316 = arith.constant 0 : index
    %c0_317 = arith.constant 0 : index
    %1019 = vector.load %arg10[%c0_314, %c5_315, %c0_316, %c0_317] : memref<3x9x2x2xf32, #tpu.memory_space<vmem>>, vector<1x1x2x2xf32>
    %1020 = vector.shape_cast %1019 : vector<1x1x2x2xf32> to vector<2x2xf32>
    %1021 = vector.extract_strided_slice %1020 {offsets = [0, 0], sizes = [2, 1], strides = [1, 1]} : vector<2x2xf32> to vector<2x1xf32>
    %1022 = vector.extract_strided_slice %1018 {offsets = [0, 0], sizes = [1, 256], strides = [1, 1]} : vector<2x256xf32> to vector<1x256xf32>
    %1023 = vector.broadcast %1021 : vector<2x1xf32> to vector<2x256xf32>
    %1024 = vector.broadcast %1022 : vector<1x256xf32> to vector<2x256xf32>
    %1025 = arith.mulf %1023, %1024 : vector<2x256xf32>
    %cst_318 = arith.constant 0.000000e+00 : f32
    %1026 = vector.broadcast %cst_318 : f32 to vector<2x256xf32>
    %1027 = arith.addf %1026, %1025 : vector<2x256xf32>
    %1028 = vector.extract_strided_slice %1020 {offsets = [0, 1], sizes = [2, 1], strides = [1, 1]} : vector<2x2xf32> to vector<2x1xf32>
    %1029 = vector.extract_strided_slice %1018 {offsets = [1, 0], sizes = [1, 256], strides = [1, 1]} : vector<2x256xf32> to vector<1x256xf32>
    %1030 = vector.broadcast %1028 : vector<2x1xf32> to vector<2x256xf32>
    %1031 = vector.broadcast %1029 : vector<1x256xf32> to vector<2x256xf32>
    %1032 = arith.mulf %1030, %1031 : vector<2x256xf32>
    %1033 = arith.addf %1027, %1032 : vector<2x256xf32>
    %1034 = arith.addf %1011, %1033 : vector<2x256xf32>
    %c208_i32 = arith.constant 208 : i32
    %1035 = vector.broadcast %c208_i32 : i32 to vector<1x256xi32>
    %1036 = arith.cmpi slt, %2, %1035 : vector<1x256xi32>
    %c3_i32_319 = arith.constant 3 : i32
    %1037 = vector.broadcast %c3_i32_319 : i32 to vector<1x256xi32>
    %1038 = arith.cmpi sge, %4, %1037 : vector<1x256xi32>
    %1039 = arith.andi %1036, %1038 : vector<1x256xi1>
    %c211_i32 = arith.constant 211 : i32
    %1040 = tpu.dynamic_rotate %900 by %c211_i32 dim 1 : vector<2x256xf32>, i32 -> vector<2x256xf32>
    %cst_320 = arith.constant 0.000000e+00 : f32
    %1041 = vector.shape_cast %1039 : vector<1x256xi1> to vector<1x256xi1>
    %1042 = vector.broadcast %1041 : vector<1x256xi1> to vector<2x256xi1>
    %1043 = vector.broadcast %cst_320 : f32 to vector<2x256xf32>
    %1044 = arith.select %1042, %1040, %1043 : vector<2x256xi1>, vector<2x256xf32>
    %c0_321 = arith.constant 0 : index
    %c6_322 = arith.constant 6 : index
    %c0_323 = arith.constant 0 : index
    %c0_324 = arith.constant 0 : index
    %1045 = vector.load %arg10[%c0_321, %c6_322, %c0_323, %c0_324] : memref<3x9x2x2xf32, #tpu.memory_space<vmem>>, vector<1x1x2x2xf32>
    %1046 = vector.shape_cast %1045 : vector<1x1x2x2xf32> to vector<2x2xf32>
    %1047 = vector.extract_strided_slice %1046 {offsets = [0, 0], sizes = [2, 1], strides = [1, 1]} : vector<2x2xf32> to vector<2x1xf32>
    %1048 = vector.extract_strided_slice %1044 {offsets = [0, 0], sizes = [1, 256], strides = [1, 1]} : vector<2x256xf32> to vector<1x256xf32>
    %1049 = vector.broadcast %1047 : vector<2x1xf32> to vector<2x256xf32>
    %1050 = vector.broadcast %1048 : vector<1x256xf32> to vector<2x256xf32>
    %1051 = arith.mulf %1049, %1050 : vector<2x256xf32>
    %cst_325 = arith.constant 0.000000e+00 : f32
    %1052 = vector.broadcast %cst_325 : f32 to vector<2x256xf32>
    %1053 = arith.addf %1052, %1051 : vector<2x256xf32>
    %1054 = vector.extract_strided_slice %1046 {offsets = [0, 1], sizes = [2, 1], strides = [1, 1]} : vector<2x2xf32> to vector<2x1xf32>
    %1055 = vector.extract_strided_slice %1044 {offsets = [1, 0], sizes = [1, 256], strides = [1, 1]} : vector<2x256xf32> to vector<1x256xf32>
    %1056 = vector.broadcast %1054 : vector<2x1xf32> to vector<2x256xf32>
    %1057 = vector.broadcast %1055 : vector<1x256xf32> to vector<2x256xf32>
    %1058 = arith.mulf %1056, %1057 : vector<2x256xf32>
    %1059 = arith.addf %1053, %1058 : vector<2x256xf32>
    %1060 = arith.addf %1034, %1059 : vector<2x256xf32>
    %c208_i32_326 = arith.constant 208 : i32
    %1061 = tpu.dynamic_rotate %900 by %c208_i32_326 dim 1 : vector<2x256xf32>, i32 -> vector<2x256xf32>
    %cst_327 = arith.constant 0.000000e+00 : f32
    %1062 = vector.shape_cast %1036 : vector<1x256xi1> to vector<1x256xi1>
    %1063 = vector.broadcast %1062 : vector<1x256xi1> to vector<2x256xi1>
    %1064 = vector.broadcast %cst_327 : f32 to vector<2x256xf32>
    %1065 = arith.select %1063, %1061, %1064 : vector<2x256xi1>, vector<2x256xf32>
    %c0_328 = arith.constant 0 : index
    %c7_329 = arith.constant 7 : index
    %c0_330 = arith.constant 0 : index
    %c0_331 = arith.constant 0 : index
    %1066 = vector.load %arg10[%c0_328, %c7_329, %c0_330, %c0_331] : memref<3x9x2x2xf32, #tpu.memory_space<vmem>>, vector<1x1x2x2xf32>
    %1067 = vector.shape_cast %1066 : vector<1x1x2x2xf32> to vector<2x2xf32>
    %1068 = vector.extract_strided_slice %1067 {offsets = [0, 0], sizes = [2, 1], strides = [1, 1]} : vector<2x2xf32> to vector<2x1xf32>
    %1069 = vector.extract_strided_slice %1065 {offsets = [0, 0], sizes = [1, 256], strides = [1, 1]} : vector<2x256xf32> to vector<1x256xf32>
    %1070 = vector.broadcast %1068 : vector<2x1xf32> to vector<2x256xf32>
    %1071 = vector.broadcast %1069 : vector<1x256xf32> to vector<2x256xf32>
    %1072 = arith.mulf %1070, %1071 : vector<2x256xf32>
    %cst_332 = arith.constant 0.000000e+00 : f32
    %1073 = vector.broadcast %cst_332 : f32 to vector<2x256xf32>
    %1074 = arith.addf %1073, %1072 : vector<2x256xf32>
    %1075 = vector.extract_strided_slice %1067 {offsets = [0, 1], sizes = [2, 1], strides = [1, 1]} : vector<2x2xf32> to vector<2x1xf32>
    %1076 = vector.extract_strided_slice %1065 {offsets = [1, 0], sizes = [1, 256], strides = [1, 1]} : vector<2x256xf32> to vector<1x256xf32>
    %1077 = vector.broadcast %1075 : vector<2x1xf32> to vector<2x256xf32>
    %1078 = vector.broadcast %1076 : vector<1x256xf32> to vector<2x256xf32>
    %1079 = arith.mulf %1077, %1078 : vector<2x256xf32>
    %1080 = arith.addf %1074, %1079 : vector<2x256xf32>
    %1081 = arith.addf %1060, %1080 : vector<2x256xf32>
    %c13_i32_333 = arith.constant 13 : i32
    %1082 = vector.broadcast %c13_i32_333 : i32 to vector<1x256xi32>
    %1083 = arith.cmpi slt, %4, %1082 : vector<1x256xi32>
    %1084 = arith.andi %1036, %1083 : vector<1x256xi1>
    %c205_i32 = arith.constant 205 : i32
    %1085 = tpu.dynamic_rotate %900 by %c205_i32 dim 1 : vector<2x256xf32>, i32 -> vector<2x256xf32>
    %cst_334 = arith.constant 0.000000e+00 : f32
    %1086 = vector.shape_cast %1084 : vector<1x256xi1> to vector<1x256xi1>
    %1087 = vector.broadcast %1086 : vector<1x256xi1> to vector<2x256xi1>
    %1088 = vector.broadcast %cst_334 : f32 to vector<2x256xf32>
    %1089 = arith.select %1087, %1085, %1088 : vector<2x256xi1>, vector<2x256xf32>
    %c0_335 = arith.constant 0 : index
    %c8_336 = arith.constant 8 : index
    %c0_337 = arith.constant 0 : index
    %c0_338 = arith.constant 0 : index
    %1090 = vector.load %arg10[%c0_335, %c8_336, %c0_337, %c0_338] : memref<3x9x2x2xf32, #tpu.memory_space<vmem>>, vector<1x1x2x2xf32>
    %1091 = vector.shape_cast %1090 : vector<1x1x2x2xf32> to vector<2x2xf32>
    %1092 = vector.extract_strided_slice %1091 {offsets = [0, 0], sizes = [2, 1], strides = [1, 1]} : vector<2x2xf32> to vector<2x1xf32>
    %1093 = vector.extract_strided_slice %1089 {offsets = [0, 0], sizes = [1, 256], strides = [1, 1]} : vector<2x256xf32> to vector<1x256xf32>
    %1094 = vector.broadcast %1092 : vector<2x1xf32> to vector<2x256xf32>
    %1095 = vector.broadcast %1093 : vector<1x256xf32> to vector<2x256xf32>
    %1096 = arith.mulf %1094, %1095 : vector<2x256xf32>
    %cst_339 = arith.constant 0.000000e+00 : f32
    %1097 = vector.broadcast %cst_339 : f32 to vector<2x256xf32>
    %1098 = arith.addf %1097, %1096 : vector<2x256xf32>
    %1099 = vector.extract_strided_slice %1091 {offsets = [0, 1], sizes = [2, 1], strides = [1, 1]} : vector<2x2xf32> to vector<2x1xf32>
    %1100 = vector.extract_strided_slice %1089 {offsets = [1, 0], sizes = [1, 256], strides = [1, 1]} : vector<2x256xf32> to vector<1x256xf32>
    %1101 = vector.broadcast %1099 : vector<2x1xf32> to vector<2x256xf32>
    %1102 = vector.broadcast %1100 : vector<1x256xf32> to vector<2x256xf32>
    %1103 = arith.mulf %1101, %1102 : vector<2x256xf32>
    %1104 = arith.addf %1098, %1103 : vector<2x256xf32>
    %1105 = arith.addf %1081, %1104 : vector<2x256xf32>
    %1106 = vector.broadcast %902 : vector<2x1xf32> to vector<2x256xf32>
    %1107 = arith.addf %1105, %1106 : vector<2x256xf32>
    %1108 = vector.extract_strided_slice %441 {offsets = [0, 2], sizes = [1, 1], strides = [1, 1]} : vector<1x8xf32> to vector<1x1xf32>
    %1109 = vector.extract_strided_slice %1107 {offsets = [0, 0], sizes = [1, 256], strides = [1, 1]} : vector<2x256xf32> to vector<1x256xf32>
    %1110 = vector.broadcast %1108 : vector<1x1xf32> to vector<1x256xf32>
    %1111 = arith.mulf %1110, %1109 : vector<1x256xf32>
    %1112 = vector.extract_strided_slice %441 {offsets = [0, 3], sizes = [1, 1], strides = [1, 1]} : vector<1x8xf32> to vector<1x1xf32>
    %1113 = vector.extract_strided_slice %1107 {offsets = [1, 0], sizes = [1, 256], strides = [1, 1]} : vector<2x256xf32> to vector<1x256xf32>
    %1114 = vector.broadcast %1112 : vector<1x1xf32> to vector<1x256xf32>
    %1115 = arith.mulf %1114, %1113 : vector<1x256xf32>
    %1116 = arith.addf %1111, %1115 : vector<1x256xf32>
    %1117 = arith.addf %674, %1116 : vector<1x256xf32>
    %c2_340 = arith.constant 2 : index
    %c0_341 = arith.constant 0 : index
    %c0_342 = arith.constant 0 : index
    %1118 = vector.load %arg6[%c2_340, %c0_341, %c0_342] : memref<4x2x2xf32, #tpu.memory_space<vmem>>, vector<1x2x2xf32>
    %1119 = vector.shape_cast %1118 : vector<1x2x2xf32> to vector<2x2xf32>
    %1120 = vector.extract_strided_slice %1119 {offsets = [0, 0], sizes = [2, 1], strides = [1, 1]} : vector<2x2xf32> to vector<2x1xf32>
    %1121 = vector.broadcast %1120 : vector<2x1xf32> to vector<2x256xf32>
    %1122 = vector.broadcast %436 : vector<1x256xf32> to vector<2x256xf32>
    %1123 = arith.mulf %1121, %1122 : vector<2x256xf32>
    %1124 = vector.extract_strided_slice %1119 {offsets = [0, 1], sizes = [2, 1], strides = [1, 1]} : vector<2x2xf32> to vector<2x1xf32>
    %1125 = vector.broadcast %1124 : vector<2x1xf32> to vector<2x256xf32>
    %1126 = vector.broadcast %440 : vector<1x256xf32> to vector<2x256xf32>
    %1127 = arith.mulf %1125, %1126 : vector<2x256xf32>
    %1128 = arith.addf %1123, %1127 : vector<2x256xf32>
    %c2_343 = arith.constant 2 : index
    %c0_344 = arith.constant 0 : index
    %c0_345 = arith.constant 0 : index
    %1129 = vector.load %arg7[%c2_343, %c0_344, %c0_345] : memref<4x2x1xf32, #tpu.memory_space<vmem>>, vector<1x2x1xf32>
    %1130 = vector.shape_cast %1129 : vector<1x2x1xf32> to vector<2x1xf32>
    %1131 = vector.broadcast %1130 : vector<2x1xf32> to vector<2x256xf32>
    %1132 = arith.addf %1128, %1131 : vector<2x256xf32>
    %cst_346 = arith.constant 0.000000e+00 : f32
    %1133 = vector.broadcast %cst_346 : f32 to vector<2x256xf32>
    %1134 = arith.maximumf %1132, %1133 : vector<2x256xf32>
    %c2_347 = arith.constant 2 : index
    %c0_348 = arith.constant 0 : index
    %c0_349 = arith.constant 0 : index
    %1135 = vector.load %arg9[%c2_347, %c0_348, %c0_349] : memref<4x2x1xf32, #tpu.memory_space<vmem>>, vector<1x2x1xf32>
    %1136 = vector.shape_cast %1135 : vector<1x2x1xf32> to vector<2x1xf32>
    %c16_i32_350 = arith.constant 16 : i32
    %1137 = vector.broadcast %c16_i32_350 : i32 to vector<1x256xi32>
    %1138 = arith.cmpi sge, %2, %1137 : vector<1x256xi32>
    %c1_i32_351 = arith.constant 1 : i32
    %1139 = vector.broadcast %c1_i32_351 : i32 to vector<1x256xi32>
    %1140 = arith.cmpi sge, %4, %1139 : vector<1x256xi32>
    %1141 = arith.andi %1138, %1140 : vector<1x256xi1>
    %c17_i32_352 = arith.constant 17 : i32
    %1142 = tpu.dynamic_rotate %1134 by %c17_i32_352 dim 1 : vector<2x256xf32>, i32 -> vector<2x256xf32>
    %cst_353 = arith.constant 0.000000e+00 : f32
    %1143 = vector.shape_cast %1141 : vector<1x256xi1> to vector<1x256xi1>
    %1144 = vector.broadcast %1143 : vector<1x256xi1> to vector<2x256xi1>
    %1145 = vector.broadcast %cst_353 : f32 to vector<2x256xf32>
    %1146 = arith.select %1144, %1142, %1145 : vector<2x256xi1>, vector<2x256xf32>
    %c2_354 = arith.constant 2 : index
    %c0_355 = arith.constant 0 : index
    %c0_356 = arith.constant 0 : index
    %c0_357 = arith.constant 0 : index
    %1147 = vector.load %arg8[%c2_354, %c0_355, %c0_356, %c0_357] : memref<4x9x2x2xf32, #tpu.memory_space<vmem>>, vector<1x1x2x2xf32>
    %1148 = vector.shape_cast %1147 : vector<1x1x2x2xf32> to vector<2x2xf32>
    %1149 = vector.extract_strided_slice %1148 {offsets = [0, 0], sizes = [2, 1], strides = [1, 1]} : vector<2x2xf32> to vector<2x1xf32>
    %1150 = vector.extract_strided_slice %1146 {offsets = [0, 0], sizes = [1, 256], strides = [1, 1]} : vector<2x256xf32> to vector<1x256xf32>
    %1151 = vector.broadcast %1149 : vector<2x1xf32> to vector<2x256xf32>
    %1152 = vector.broadcast %1150 : vector<1x256xf32> to vector<2x256xf32>
    %1153 = arith.mulf %1151, %1152 : vector<2x256xf32>
    %cst_358 = arith.constant 0.000000e+00 : f32
    %1154 = vector.broadcast %cst_358 : f32 to vector<2x256xf32>
    %1155 = arith.addf %1154, %1153 : vector<2x256xf32>
    %1156 = vector.extract_strided_slice %1148 {offsets = [0, 1], sizes = [2, 1], strides = [1, 1]} : vector<2x2xf32> to vector<2x1xf32>
    %1157 = vector.extract_strided_slice %1146 {offsets = [1, 0], sizes = [1, 256], strides = [1, 1]} : vector<2x256xf32> to vector<1x256xf32>
    %1158 = vector.broadcast %1156 : vector<2x1xf32> to vector<2x256xf32>
    %1159 = vector.broadcast %1157 : vector<1x256xf32> to vector<2x256xf32>
    %1160 = arith.mulf %1158, %1159 : vector<2x256xf32>
    %1161 = arith.addf %1155, %1160 : vector<2x256xf32>
    %c16_i32_359 = arith.constant 16 : i32
    %1162 = tpu.dynamic_rotate %1134 by %c16_i32_359 dim 1 : vector<2x256xf32>, i32 -> vector<2x256xf32>
    %cst_360 = arith.constant 0.000000e+00 : f32
    %1163 = vector.shape_cast %1138 : vector<1x256xi1> to vector<1x256xi1>
    %1164 = vector.broadcast %1163 : vector<1x256xi1> to vector<2x256xi1>
    %1165 = vector.broadcast %cst_360 : f32 to vector<2x256xf32>
    %1166 = arith.select %1164, %1162, %1165 : vector<2x256xi1>, vector<2x256xf32>
    %c2_361 = arith.constant 2 : index
    %c1_362 = arith.constant 1 : index
    %c0_363 = arith.constant 0 : index
    %c0_364 = arith.constant 0 : index
    %1167 = vector.load %arg8[%c2_361, %c1_362, %c0_363, %c0_364] : memref<4x9x2x2xf32, #tpu.memory_space<vmem>>, vector<1x1x2x2xf32>
    %1168 = vector.shape_cast %1167 : vector<1x1x2x2xf32> to vector<2x2xf32>
    %1169 = vector.extract_strided_slice %1168 {offsets = [0, 0], sizes = [2, 1], strides = [1, 1]} : vector<2x2xf32> to vector<2x1xf32>
    %1170 = vector.extract_strided_slice %1166 {offsets = [0, 0], sizes = [1, 256], strides = [1, 1]} : vector<2x256xf32> to vector<1x256xf32>
    %1171 = vector.broadcast %1169 : vector<2x1xf32> to vector<2x256xf32>
    %1172 = vector.broadcast %1170 : vector<1x256xf32> to vector<2x256xf32>
    %1173 = arith.mulf %1171, %1172 : vector<2x256xf32>
    %cst_365 = arith.constant 0.000000e+00 : f32
    %1174 = vector.broadcast %cst_365 : f32 to vector<2x256xf32>
    %1175 = arith.addf %1174, %1173 : vector<2x256xf32>
    %1176 = vector.extract_strided_slice %1168 {offsets = [0, 1], sizes = [2, 1], strides = [1, 1]} : vector<2x2xf32> to vector<2x1xf32>
    %1177 = vector.extract_strided_slice %1166 {offsets = [1, 0], sizes = [1, 256], strides = [1, 1]} : vector<2x256xf32> to vector<1x256xf32>
    %1178 = vector.broadcast %1176 : vector<2x1xf32> to vector<2x256xf32>
    %1179 = vector.broadcast %1177 : vector<1x256xf32> to vector<2x256xf32>
    %1180 = arith.mulf %1178, %1179 : vector<2x256xf32>
    %1181 = arith.addf %1175, %1180 : vector<2x256xf32>
    %1182 = arith.addf %1161, %1181 : vector<2x256xf32>
    %c15_i32_366 = arith.constant 15 : i32
    %1183 = vector.broadcast %c15_i32_366 : i32 to vector<1x256xi32>
    %1184 = arith.cmpi slt, %4, %1183 : vector<1x256xi32>
    %1185 = arith.andi %1138, %1184 : vector<1x256xi1>
    %c15_i32_367 = arith.constant 15 : i32
    %1186 = tpu.dynamic_rotate %1134 by %c15_i32_367 dim 1 : vector<2x256xf32>, i32 -> vector<2x256xf32>
    %cst_368 = arith.constant 0.000000e+00 : f32
    %1187 = vector.shape_cast %1185 : vector<1x256xi1> to vector<1x256xi1>
    %1188 = vector.broadcast %1187 : vector<1x256xi1> to vector<2x256xi1>
    %1189 = vector.broadcast %cst_368 : f32 to vector<2x256xf32>
    %1190 = arith.select %1188, %1186, %1189 : vector<2x256xi1>, vector<2x256xf32>
    %c2_369 = arith.constant 2 : index
    %c2_370 = arith.constant 2 : index
    %c0_371 = arith.constant 0 : index
    %c0_372 = arith.constant 0 : index
    %1191 = vector.load %arg8[%c2_369, %c2_370, %c0_371, %c0_372] : memref<4x9x2x2xf32, #tpu.memory_space<vmem>>, vector<1x1x2x2xf32>
    %1192 = vector.shape_cast %1191 : vector<1x1x2x2xf32> to vector<2x2xf32>
    %1193 = vector.extract_strided_slice %1192 {offsets = [0, 0], sizes = [2, 1], strides = [1, 1]} : vector<2x2xf32> to vector<2x1xf32>
    %1194 = vector.extract_strided_slice %1190 {offsets = [0, 0], sizes = [1, 256], strides = [1, 1]} : vector<2x256xf32> to vector<1x256xf32>
    %1195 = vector.broadcast %1193 : vector<2x1xf32> to vector<2x256xf32>
    %1196 = vector.broadcast %1194 : vector<1x256xf32> to vector<2x256xf32>
    %1197 = arith.mulf %1195, %1196 : vector<2x256xf32>
    %cst_373 = arith.constant 0.000000e+00 : f32
    %1198 = vector.broadcast %cst_373 : f32 to vector<2x256xf32>
    %1199 = arith.addf %1198, %1197 : vector<2x256xf32>
    %1200 = vector.extract_strided_slice %1192 {offsets = [0, 1], sizes = [2, 1], strides = [1, 1]} : vector<2x2xf32> to vector<2x1xf32>
    %1201 = vector.extract_strided_slice %1190 {offsets = [1, 0], sizes = [1, 256], strides = [1, 1]} : vector<2x256xf32> to vector<1x256xf32>
    %1202 = vector.broadcast %1200 : vector<2x1xf32> to vector<2x256xf32>
    %1203 = vector.broadcast %1201 : vector<1x256xf32> to vector<2x256xf32>
    %1204 = arith.mulf %1202, %1203 : vector<2x256xf32>
    %1205 = arith.addf %1199, %1204 : vector<2x256xf32>
    %1206 = arith.addf %1182, %1205 : vector<2x256xf32>
    %c1_i32_374 = arith.constant 1 : i32
    %1207 = vector.broadcast %c1_i32_374 : i32 to vector<1x256xi32>
    %1208 = arith.cmpi sge, %4, %1207 : vector<1x256xi32>
    %c1_i32_375 = arith.constant 1 : i32
    %1209 = tpu.dynamic_rotate %1134 by %c1_i32_375 dim 1 : vector<2x256xf32>, i32 -> vector<2x256xf32>
    %cst_376 = arith.constant 0.000000e+00 : f32
    %1210 = vector.shape_cast %1208 : vector<1x256xi1> to vector<1x256xi1>
    %1211 = vector.broadcast %1210 : vector<1x256xi1> to vector<2x256xi1>
    %1212 = vector.broadcast %cst_376 : f32 to vector<2x256xf32>
    %1213 = arith.select %1211, %1209, %1212 : vector<2x256xi1>, vector<2x256xf32>
    %c2_377 = arith.constant 2 : index
    %c3_378 = arith.constant 3 : index
    %c0_379 = arith.constant 0 : index
    %c0_380 = arith.constant 0 : index
    %1214 = vector.load %arg8[%c2_377, %c3_378, %c0_379, %c0_380] : memref<4x9x2x2xf32, #tpu.memory_space<vmem>>, vector<1x1x2x2xf32>
    %1215 = vector.shape_cast %1214 : vector<1x1x2x2xf32> to vector<2x2xf32>
    %1216 = vector.extract_strided_slice %1215 {offsets = [0, 0], sizes = [2, 1], strides = [1, 1]} : vector<2x2xf32> to vector<2x1xf32>
    %1217 = vector.extract_strided_slice %1213 {offsets = [0, 0], sizes = [1, 256], strides = [1, 1]} : vector<2x256xf32> to vector<1x256xf32>
    %1218 = vector.broadcast %1216 : vector<2x1xf32> to vector<2x256xf32>
    %1219 = vector.broadcast %1217 : vector<1x256xf32> to vector<2x256xf32>
    %1220 = arith.mulf %1218, %1219 : vector<2x256xf32>
    %cst_381 = arith.constant 0.000000e+00 : f32
    %1221 = vector.broadcast %cst_381 : f32 to vector<2x256xf32>
    %1222 = arith.addf %1221, %1220 : vector<2x256xf32>
    %1223 = vector.extract_strided_slice %1215 {offsets = [0, 1], sizes = [2, 1], strides = [1, 1]} : vector<2x2xf32> to vector<2x1xf32>
    %1224 = vector.extract_strided_slice %1213 {offsets = [1, 0], sizes = [1, 256], strides = [1, 1]} : vector<2x256xf32> to vector<1x256xf32>
    %1225 = vector.broadcast %1223 : vector<2x1xf32> to vector<2x256xf32>
    %1226 = vector.broadcast %1224 : vector<1x256xf32> to vector<2x256xf32>
    %1227 = arith.mulf %1225, %1226 : vector<2x256xf32>
    %1228 = arith.addf %1222, %1227 : vector<2x256xf32>
    %1229 = arith.addf %1206, %1228 : vector<2x256xf32>
    %c2_382 = arith.constant 2 : index
    %c4_383 = arith.constant 4 : index
    %c0_384 = arith.constant 0 : index
    %c0_385 = arith.constant 0 : index
    %1230 = vector.load %arg8[%c2_382, %c4_383, %c0_384, %c0_385] : memref<4x9x2x2xf32, #tpu.memory_space<vmem>>, vector<1x1x2x2xf32>
    %1231 = vector.shape_cast %1230 : vector<1x1x2x2xf32> to vector<2x2xf32>
    %1232 = vector.extract_strided_slice %1231 {offsets = [0, 0], sizes = [2, 1], strides = [1, 1]} : vector<2x2xf32> to vector<2x1xf32>
    %1233 = vector.extract_strided_slice %1134 {offsets = [0, 0], sizes = [1, 256], strides = [1, 1]} : vector<2x256xf32> to vector<1x256xf32>
    %1234 = vector.broadcast %1232 : vector<2x1xf32> to vector<2x256xf32>
    %1235 = vector.broadcast %1233 : vector<1x256xf32> to vector<2x256xf32>
    %1236 = arith.mulf %1234, %1235 : vector<2x256xf32>
    %cst_386 = arith.constant 0.000000e+00 : f32
    %1237 = vector.broadcast %cst_386 : f32 to vector<2x256xf32>
    %1238 = arith.addf %1237, %1236 : vector<2x256xf32>
    %1239 = vector.extract_strided_slice %1231 {offsets = [0, 1], sizes = [2, 1], strides = [1, 1]} : vector<2x2xf32> to vector<2x1xf32>
    %1240 = vector.extract_strided_slice %1134 {offsets = [1, 0], sizes = [1, 256], strides = [1, 1]} : vector<2x256xf32> to vector<1x256xf32>
    %1241 = vector.broadcast %1239 : vector<2x1xf32> to vector<2x256xf32>
    %1242 = vector.broadcast %1240 : vector<1x256xf32> to vector<2x256xf32>
    %1243 = arith.mulf %1241, %1242 : vector<2x256xf32>
    %1244 = arith.addf %1238, %1243 : vector<2x256xf32>
    %1245 = arith.addf %1229, %1244 : vector<2x256xf32>
    %c15_i32_387 = arith.constant 15 : i32
    %1246 = vector.broadcast %c15_i32_387 : i32 to vector<1x256xi32>
    %1247 = arith.cmpi slt, %4, %1246 : vector<1x256xi32>
    %c255_i32_388 = arith.constant 255 : i32
    %1248 = tpu.dynamic_rotate %1134 by %c255_i32_388 dim 1 : vector<2x256xf32>, i32 -> vector<2x256xf32>
    %cst_389 = arith.constant 0.000000e+00 : f32
    %1249 = vector.shape_cast %1247 : vector<1x256xi1> to vector<1x256xi1>
    %1250 = vector.broadcast %1249 : vector<1x256xi1> to vector<2x256xi1>
    %1251 = vector.broadcast %cst_389 : f32 to vector<2x256xf32>
    %1252 = arith.select %1250, %1248, %1251 : vector<2x256xi1>, vector<2x256xf32>
    %c2_390 = arith.constant 2 : index
    %c5_391 = arith.constant 5 : index
    %c0_392 = arith.constant 0 : index
    %c0_393 = arith.constant 0 : index
    %1253 = vector.load %arg8[%c2_390, %c5_391, %c0_392, %c0_393] : memref<4x9x2x2xf32, #tpu.memory_space<vmem>>, vector<1x1x2x2xf32>
    %1254 = vector.shape_cast %1253 : vector<1x1x2x2xf32> to vector<2x2xf32>
    %1255 = vector.extract_strided_slice %1254 {offsets = [0, 0], sizes = [2, 1], strides = [1, 1]} : vector<2x2xf32> to vector<2x1xf32>
    %1256 = vector.extract_strided_slice %1252 {offsets = [0, 0], sizes = [1, 256], strides = [1, 1]} : vector<2x256xf32> to vector<1x256xf32>
    %1257 = vector.broadcast %1255 : vector<2x1xf32> to vector<2x256xf32>
    %1258 = vector.broadcast %1256 : vector<1x256xf32> to vector<2x256xf32>
    %1259 = arith.mulf %1257, %1258 : vector<2x256xf32>
    %cst_394 = arith.constant 0.000000e+00 : f32
    %1260 = vector.broadcast %cst_394 : f32 to vector<2x256xf32>
    %1261 = arith.addf %1260, %1259 : vector<2x256xf32>
    %1262 = vector.extract_strided_slice %1254 {offsets = [0, 1], sizes = [2, 1], strides = [1, 1]} : vector<2x2xf32> to vector<2x1xf32>
    %1263 = vector.extract_strided_slice %1252 {offsets = [1, 0], sizes = [1, 256], strides = [1, 1]} : vector<2x256xf32> to vector<1x256xf32>
    %1264 = vector.broadcast %1262 : vector<2x1xf32> to vector<2x256xf32>
    %1265 = vector.broadcast %1263 : vector<1x256xf32> to vector<2x256xf32>
    %1266 = arith.mulf %1264, %1265 : vector<2x256xf32>
    %1267 = arith.addf %1261, %1266 : vector<2x256xf32>
    %1268 = arith.addf %1245, %1267 : vector<2x256xf32>
    %c240_i32_395 = arith.constant 240 : i32
    %1269 = vector.broadcast %c240_i32_395 : i32 to vector<1x256xi32>
    %1270 = arith.cmpi slt, %2, %1269 : vector<1x256xi32>
    %c1_i32_396 = arith.constant 1 : i32
    %1271 = vector.broadcast %c1_i32_396 : i32 to vector<1x256xi32>
    %1272 = arith.cmpi sge, %4, %1271 : vector<1x256xi32>
    %1273 = arith.andi %1270, %1272 : vector<1x256xi1>
    %c241_i32_397 = arith.constant 241 : i32
    %1274 = tpu.dynamic_rotate %1134 by %c241_i32_397 dim 1 : vector<2x256xf32>, i32 -> vector<2x256xf32>
    %cst_398 = arith.constant 0.000000e+00 : f32
    %1275 = vector.shape_cast %1273 : vector<1x256xi1> to vector<1x256xi1>
    %1276 = vector.broadcast %1275 : vector<1x256xi1> to vector<2x256xi1>
    %1277 = vector.broadcast %cst_398 : f32 to vector<2x256xf32>
    %1278 = arith.select %1276, %1274, %1277 : vector<2x256xi1>, vector<2x256xf32>
    %c2_399 = arith.constant 2 : index
    %c6_400 = arith.constant 6 : index
    %c0_401 = arith.constant 0 : index
    %c0_402 = arith.constant 0 : index
    %1279 = vector.load %arg8[%c2_399, %c6_400, %c0_401, %c0_402] : memref<4x9x2x2xf32, #tpu.memory_space<vmem>>, vector<1x1x2x2xf32>
    %1280 = vector.shape_cast %1279 : vector<1x1x2x2xf32> to vector<2x2xf32>
    %1281 = vector.extract_strided_slice %1280 {offsets = [0, 0], sizes = [2, 1], strides = [1, 1]} : vector<2x2xf32> to vector<2x1xf32>
    %1282 = vector.extract_strided_slice %1278 {offsets = [0, 0], sizes = [1, 256], strides = [1, 1]} : vector<2x256xf32> to vector<1x256xf32>
    %1283 = vector.broadcast %1281 : vector<2x1xf32> to vector<2x256xf32>
    %1284 = vector.broadcast %1282 : vector<1x256xf32> to vector<2x256xf32>
    %1285 = arith.mulf %1283, %1284 : vector<2x256xf32>
    %cst_403 = arith.constant 0.000000e+00 : f32
    %1286 = vector.broadcast %cst_403 : f32 to vector<2x256xf32>
    %1287 = arith.addf %1286, %1285 : vector<2x256xf32>
    %1288 = vector.extract_strided_slice %1280 {offsets = [0, 1], sizes = [2, 1], strides = [1, 1]} : vector<2x2xf32> to vector<2x1xf32>
    %1289 = vector.extract_strided_slice %1278 {offsets = [1, 0], sizes = [1, 256], strides = [1, 1]} : vector<2x256xf32> to vector<1x256xf32>
    %1290 = vector.broadcast %1288 : vector<2x1xf32> to vector<2x256xf32>
    %1291 = vector.broadcast %1289 : vector<1x256xf32> to vector<2x256xf32>
    %1292 = arith.mulf %1290, %1291 : vector<2x256xf32>
    %1293 = arith.addf %1287, %1292 : vector<2x256xf32>
    %1294 = arith.addf %1268, %1293 : vector<2x256xf32>
    %c240_i32_404 = arith.constant 240 : i32
    %1295 = tpu.dynamic_rotate %1134 by %c240_i32_404 dim 1 : vector<2x256xf32>, i32 -> vector<2x256xf32>
    %cst_405 = arith.constant 0.000000e+00 : f32
    %1296 = vector.shape_cast %1270 : vector<1x256xi1> to vector<1x256xi1>
    %1297 = vector.broadcast %1296 : vector<1x256xi1> to vector<2x256xi1>
    %1298 = vector.broadcast %cst_405 : f32 to vector<2x256xf32>
    %1299 = arith.select %1297, %1295, %1298 : vector<2x256xi1>, vector<2x256xf32>
    %c2_406 = arith.constant 2 : index
    %c7_407 = arith.constant 7 : index
    %c0_408 = arith.constant 0 : index
    %c0_409 = arith.constant 0 : index
    %1300 = vector.load %arg8[%c2_406, %c7_407, %c0_408, %c0_409] : memref<4x9x2x2xf32, #tpu.memory_space<vmem>>, vector<1x1x2x2xf32>
    %1301 = vector.shape_cast %1300 : vector<1x1x2x2xf32> to vector<2x2xf32>
    %1302 = vector.extract_strided_slice %1301 {offsets = [0, 0], sizes = [2, 1], strides = [1, 1]} : vector<2x2xf32> to vector<2x1xf32>
    %1303 = vector.extract_strided_slice %1299 {offsets = [0, 0], sizes = [1, 256], strides = [1, 1]} : vector<2x256xf32> to vector<1x256xf32>
    %1304 = vector.broadcast %1302 : vector<2x1xf32> to vector<2x256xf32>
    %1305 = vector.broadcast %1303 : vector<1x256xf32> to vector<2x256xf32>
    %1306 = arith.mulf %1304, %1305 : vector<2x256xf32>
    %cst_410 = arith.constant 0.000000e+00 : f32
    %1307 = vector.broadcast %cst_410 : f32 to vector<2x256xf32>
    %1308 = arith.addf %1307, %1306 : vector<2x256xf32>
    %1309 = vector.extract_strided_slice %1301 {offsets = [0, 1], sizes = [2, 1], strides = [1, 1]} : vector<2x2xf32> to vector<2x1xf32>
    %1310 = vector.extract_strided_slice %1299 {offsets = [1, 0], sizes = [1, 256], strides = [1, 1]} : vector<2x256xf32> to vector<1x256xf32>
    %1311 = vector.broadcast %1309 : vector<2x1xf32> to vector<2x256xf32>
    %1312 = vector.broadcast %1310 : vector<1x256xf32> to vector<2x256xf32>
    %1313 = arith.mulf %1311, %1312 : vector<2x256xf32>
    %1314 = arith.addf %1308, %1313 : vector<2x256xf32>
    %1315 = arith.addf %1294, %1314 : vector<2x256xf32>
    %c15_i32_411 = arith.constant 15 : i32
    %1316 = vector.broadcast %c15_i32_411 : i32 to vector<1x256xi32>
    %1317 = arith.cmpi slt, %4, %1316 : vector<1x256xi32>
    %1318 = arith.andi %1270, %1317 : vector<1x256xi1>
    %c239_i32_412 = arith.constant 239 : i32
    %1319 = tpu.dynamic_rotate %1134 by %c239_i32_412 dim 1 : vector<2x256xf32>, i32 -> vector<2x256xf32>
    %cst_413 = arith.constant 0.000000e+00 : f32
    %1320 = vector.shape_cast %1318 : vector<1x256xi1> to vector<1x256xi1>
    %1321 = vector.broadcast %1320 : vector<1x256xi1> to vector<2x256xi1>
    %1322 = vector.broadcast %cst_413 : f32 to vector<2x256xf32>
    %1323 = arith.select %1321, %1319, %1322 : vector<2x256xi1>, vector<2x256xf32>
    %c2_414 = arith.constant 2 : index
    %c8_415 = arith.constant 8 : index
    %c0_416 = arith.constant 0 : index
    %c0_417 = arith.constant 0 : index
    %1324 = vector.load %arg8[%c2_414, %c8_415, %c0_416, %c0_417] : memref<4x9x2x2xf32, #tpu.memory_space<vmem>>, vector<1x1x2x2xf32>
    %1325 = vector.shape_cast %1324 : vector<1x1x2x2xf32> to vector<2x2xf32>
    %1326 = vector.extract_strided_slice %1325 {offsets = [0, 0], sizes = [2, 1], strides = [1, 1]} : vector<2x2xf32> to vector<2x1xf32>
    %1327 = vector.extract_strided_slice %1323 {offsets = [0, 0], sizes = [1, 256], strides = [1, 1]} : vector<2x256xf32> to vector<1x256xf32>
    %1328 = vector.broadcast %1326 : vector<2x1xf32> to vector<2x256xf32>
    %1329 = vector.broadcast %1327 : vector<1x256xf32> to vector<2x256xf32>
    %1330 = arith.mulf %1328, %1329 : vector<2x256xf32>
    %cst_418 = arith.constant 0.000000e+00 : f32
    %1331 = vector.broadcast %cst_418 : f32 to vector<2x256xf32>
    %1332 = arith.addf %1331, %1330 : vector<2x256xf32>
    %1333 = vector.extract_strided_slice %1325 {offsets = [0, 1], sizes = [2, 1], strides = [1, 1]} : vector<2x2xf32> to vector<2x1xf32>
    %1334 = vector.extract_strided_slice %1323 {offsets = [1, 0], sizes = [1, 256], strides = [1, 1]} : vector<2x256xf32> to vector<1x256xf32>
    %1335 = vector.broadcast %1333 : vector<2x1xf32> to vector<2x256xf32>
    %1336 = vector.broadcast %1334 : vector<1x256xf32> to vector<2x256xf32>
    %1337 = arith.mulf %1335, %1336 : vector<2x256xf32>
    %1338 = arith.addf %1332, %1337 : vector<2x256xf32>
    %1339 = arith.addf %1315, %1338 : vector<2x256xf32>
    %1340 = vector.broadcast %1136 : vector<2x1xf32> to vector<2x256xf32>
    %1341 = arith.addf %1339, %1340 : vector<2x256xf32>
    %cst_419 = arith.constant 0.000000e+00 : f32
    %1342 = vector.broadcast %cst_419 : f32 to vector<2x256xf32>
    %1343 = arith.maximumf %1341, %1342 : vector<2x256xf32>
    %c1_420 = arith.constant 1 : index
    %c0_421 = arith.constant 0 : index
    %c0_422 = arith.constant 0 : index
    %1344 = vector.load %arg11[%c1_420, %c0_421, %c0_422] : memref<3x2x1xf32, #tpu.memory_space<vmem>>, vector<1x2x1xf32>
    %1345 = vector.shape_cast %1344 : vector<1x2x1xf32> to vector<2x1xf32>
    %c80_i32 = arith.constant 80 : i32
    %1346 = vector.broadcast %c80_i32 : i32 to vector<1x256xi32>
    %1347 = arith.cmpi sge, %2, %1346 : vector<1x256xi32>
    %c5_i32 = arith.constant 5 : i32
    %1348 = vector.broadcast %c5_i32 : i32 to vector<1x256xi32>
    %1349 = arith.cmpi sge, %4, %1348 : vector<1x256xi32>
    %1350 = arith.andi %1347, %1349 : vector<1x256xi1>
    %c85_i32 = arith.constant 85 : i32
    %1351 = tpu.dynamic_rotate %1343 by %c85_i32 dim 1 : vector<2x256xf32>, i32 -> vector<2x256xf32>
    %cst_423 = arith.constant 0.000000e+00 : f32
    %1352 = vector.shape_cast %1350 : vector<1x256xi1> to vector<1x256xi1>
    %1353 = vector.broadcast %1352 : vector<1x256xi1> to vector<2x256xi1>
    %1354 = vector.broadcast %cst_423 : f32 to vector<2x256xf32>
    %1355 = arith.select %1353, %1351, %1354 : vector<2x256xi1>, vector<2x256xf32>
    %c1_424 = arith.constant 1 : index
    %c0_425 = arith.constant 0 : index
    %c0_426 = arith.constant 0 : index
    %c0_427 = arith.constant 0 : index
    %1356 = vector.load %arg10[%c1_424, %c0_425, %c0_426, %c0_427] : memref<3x9x2x2xf32, #tpu.memory_space<vmem>>, vector<1x1x2x2xf32>
    %1357 = vector.shape_cast %1356 : vector<1x1x2x2xf32> to vector<2x2xf32>
    %1358 = vector.extract_strided_slice %1357 {offsets = [0, 0], sizes = [2, 1], strides = [1, 1]} : vector<2x2xf32> to vector<2x1xf32>
    %1359 = vector.extract_strided_slice %1355 {offsets = [0, 0], sizes = [1, 256], strides = [1, 1]} : vector<2x256xf32> to vector<1x256xf32>
    %1360 = vector.broadcast %1358 : vector<2x1xf32> to vector<2x256xf32>
    %1361 = vector.broadcast %1359 : vector<1x256xf32> to vector<2x256xf32>
    %1362 = arith.mulf %1360, %1361 : vector<2x256xf32>
    %cst_428 = arith.constant 0.000000e+00 : f32
    %1363 = vector.broadcast %cst_428 : f32 to vector<2x256xf32>
    %1364 = arith.addf %1363, %1362 : vector<2x256xf32>
    %1365 = vector.extract_strided_slice %1357 {offsets = [0, 1], sizes = [2, 1], strides = [1, 1]} : vector<2x2xf32> to vector<2x1xf32>
    %1366 = vector.extract_strided_slice %1355 {offsets = [1, 0], sizes = [1, 256], strides = [1, 1]} : vector<2x256xf32> to vector<1x256xf32>
    %1367 = vector.broadcast %1365 : vector<2x1xf32> to vector<2x256xf32>
    %1368 = vector.broadcast %1366 : vector<1x256xf32> to vector<2x256xf32>
    %1369 = arith.mulf %1367, %1368 : vector<2x256xf32>
    %1370 = arith.addf %1364, %1369 : vector<2x256xf32>
    %c80_i32_429 = arith.constant 80 : i32
    %1371 = tpu.dynamic_rotate %1343 by %c80_i32_429 dim 1 : vector<2x256xf32>, i32 -> vector<2x256xf32>
    %cst_430 = arith.constant 0.000000e+00 : f32
    %1372 = vector.shape_cast %1347 : vector<1x256xi1> to vector<1x256xi1>
    %1373 = vector.broadcast %1372 : vector<1x256xi1> to vector<2x256xi1>
    %1374 = vector.broadcast %cst_430 : f32 to vector<2x256xf32>
    %1375 = arith.select %1373, %1371, %1374 : vector<2x256xi1>, vector<2x256xf32>
    %c1_431 = arith.constant 1 : index
    %c1_432 = arith.constant 1 : index
    %c0_433 = arith.constant 0 : index
    %c0_434 = arith.constant 0 : index
    %1376 = vector.load %arg10[%c1_431, %c1_432, %c0_433, %c0_434] : memref<3x9x2x2xf32, #tpu.memory_space<vmem>>, vector<1x1x2x2xf32>
    %1377 = vector.shape_cast %1376 : vector<1x1x2x2xf32> to vector<2x2xf32>
    %1378 = vector.extract_strided_slice %1377 {offsets = [0, 0], sizes = [2, 1], strides = [1, 1]} : vector<2x2xf32> to vector<2x1xf32>
    %1379 = vector.extract_strided_slice %1375 {offsets = [0, 0], sizes = [1, 256], strides = [1, 1]} : vector<2x256xf32> to vector<1x256xf32>
    %1380 = vector.broadcast %1378 : vector<2x1xf32> to vector<2x256xf32>
    %1381 = vector.broadcast %1379 : vector<1x256xf32> to vector<2x256xf32>
    %1382 = arith.mulf %1380, %1381 : vector<2x256xf32>
    %cst_435 = arith.constant 0.000000e+00 : f32
    %1383 = vector.broadcast %cst_435 : f32 to vector<2x256xf32>
    %1384 = arith.addf %1383, %1382 : vector<2x256xf32>
    %1385 = vector.extract_strided_slice %1377 {offsets = [0, 1], sizes = [2, 1], strides = [1, 1]} : vector<2x2xf32> to vector<2x1xf32>
    %1386 = vector.extract_strided_slice %1375 {offsets = [1, 0], sizes = [1, 256], strides = [1, 1]} : vector<2x256xf32> to vector<1x256xf32>
    %1387 = vector.broadcast %1385 : vector<2x1xf32> to vector<2x256xf32>
    %1388 = vector.broadcast %1386 : vector<1x256xf32> to vector<2x256xf32>
    %1389 = arith.mulf %1387, %1388 : vector<2x256xf32>
    %1390 = arith.addf %1384, %1389 : vector<2x256xf32>
    %1391 = arith.addf %1370, %1390 : vector<2x256xf32>
    %c11_i32 = arith.constant 11 : i32
    %1392 = vector.broadcast %c11_i32 : i32 to vector<1x256xi32>
    %1393 = arith.cmpi slt, %4, %1392 : vector<1x256xi32>
    %1394 = arith.andi %1347, %1393 : vector<1x256xi1>
    %c75_i32 = arith.constant 75 : i32
    %1395 = tpu.dynamic_rotate %1343 by %c75_i32 dim 1 : vector<2x256xf32>, i32 -> vector<2x256xf32>
    %cst_436 = arith.constant 0.000000e+00 : f32
    %1396 = vector.shape_cast %1394 : vector<1x256xi1> to vector<1x256xi1>
    %1397 = vector.broadcast %1396 : vector<1x256xi1> to vector<2x256xi1>
    %1398 = vector.broadcast %cst_436 : f32 to vector<2x256xf32>
    %1399 = arith.select %1397, %1395, %1398 : vector<2x256xi1>, vector<2x256xf32>
    %c1_437 = arith.constant 1 : index
    %c2_438 = arith.constant 2 : index
    %c0_439 = arith.constant 0 : index
    %c0_440 = arith.constant 0 : index
    %1400 = vector.load %arg10[%c1_437, %c2_438, %c0_439, %c0_440] : memref<3x9x2x2xf32, #tpu.memory_space<vmem>>, vector<1x1x2x2xf32>
    %1401 = vector.shape_cast %1400 : vector<1x1x2x2xf32> to vector<2x2xf32>
    %1402 = vector.extract_strided_slice %1401 {offsets = [0, 0], sizes = [2, 1], strides = [1, 1]} : vector<2x2xf32> to vector<2x1xf32>
    %1403 = vector.extract_strided_slice %1399 {offsets = [0, 0], sizes = [1, 256], strides = [1, 1]} : vector<2x256xf32> to vector<1x256xf32>
    %1404 = vector.broadcast %1402 : vector<2x1xf32> to vector<2x256xf32>
    %1405 = vector.broadcast %1403 : vector<1x256xf32> to vector<2x256xf32>
    %1406 = arith.mulf %1404, %1405 : vector<2x256xf32>
    %cst_441 = arith.constant 0.000000e+00 : f32
    %1407 = vector.broadcast %cst_441 : f32 to vector<2x256xf32>
    %1408 = arith.addf %1407, %1406 : vector<2x256xf32>
    %1409 = vector.extract_strided_slice %1401 {offsets = [0, 1], sizes = [2, 1], strides = [1, 1]} : vector<2x2xf32> to vector<2x1xf32>
    %1410 = vector.extract_strided_slice %1399 {offsets = [1, 0], sizes = [1, 256], strides = [1, 1]} : vector<2x256xf32> to vector<1x256xf32>
    %1411 = vector.broadcast %1409 : vector<2x1xf32> to vector<2x256xf32>
    %1412 = vector.broadcast %1410 : vector<1x256xf32> to vector<2x256xf32>
    %1413 = arith.mulf %1411, %1412 : vector<2x256xf32>
    %1414 = arith.addf %1408, %1413 : vector<2x256xf32>
    %1415 = arith.addf %1391, %1414 : vector<2x256xf32>
    %c5_i32_442 = arith.constant 5 : i32
    %1416 = vector.broadcast %c5_i32_442 : i32 to vector<1x256xi32>
    %1417 = arith.cmpi sge, %4, %1416 : vector<1x256xi32>
    %c5_i32_443 = arith.constant 5 : i32
    %1418 = tpu.dynamic_rotate %1343 by %c5_i32_443 dim 1 : vector<2x256xf32>, i32 -> vector<2x256xf32>
    %cst_444 = arith.constant 0.000000e+00 : f32
    %1419 = vector.shape_cast %1417 : vector<1x256xi1> to vector<1x256xi1>
    %1420 = vector.broadcast %1419 : vector<1x256xi1> to vector<2x256xi1>
    %1421 = vector.broadcast %cst_444 : f32 to vector<2x256xf32>
    %1422 = arith.select %1420, %1418, %1421 : vector<2x256xi1>, vector<2x256xf32>
    %c1_445 = arith.constant 1 : index
    %c3_446 = arith.constant 3 : index
    %c0_447 = arith.constant 0 : index
    %c0_448 = arith.constant 0 : index
    %1423 = vector.load %arg10[%c1_445, %c3_446, %c0_447, %c0_448] : memref<3x9x2x2xf32, #tpu.memory_space<vmem>>, vector<1x1x2x2xf32>
    %1424 = vector.shape_cast %1423 : vector<1x1x2x2xf32> to vector<2x2xf32>
    %1425 = vector.extract_strided_slice %1424 {offsets = [0, 0], sizes = [2, 1], strides = [1, 1]} : vector<2x2xf32> to vector<2x1xf32>
    %1426 = vector.extract_strided_slice %1422 {offsets = [0, 0], sizes = [1, 256], strides = [1, 1]} : vector<2x256xf32> to vector<1x256xf32>
    %1427 = vector.broadcast %1425 : vector<2x1xf32> to vector<2x256xf32>
    %1428 = vector.broadcast %1426 : vector<1x256xf32> to vector<2x256xf32>
    %1429 = arith.mulf %1427, %1428 : vector<2x256xf32>
    %cst_449 = arith.constant 0.000000e+00 : f32
    %1430 = vector.broadcast %cst_449 : f32 to vector<2x256xf32>
    %1431 = arith.addf %1430, %1429 : vector<2x256xf32>
    %1432 = vector.extract_strided_slice %1424 {offsets = [0, 1], sizes = [2, 1], strides = [1, 1]} : vector<2x2xf32> to vector<2x1xf32>
    %1433 = vector.extract_strided_slice %1422 {offsets = [1, 0], sizes = [1, 256], strides = [1, 1]} : vector<2x256xf32> to vector<1x256xf32>
    %1434 = vector.broadcast %1432 : vector<2x1xf32> to vector<2x256xf32>
    %1435 = vector.broadcast %1433 : vector<1x256xf32> to vector<2x256xf32>
    %1436 = arith.mulf %1434, %1435 : vector<2x256xf32>
    %1437 = arith.addf %1431, %1436 : vector<2x256xf32>
    %1438 = arith.addf %1415, %1437 : vector<2x256xf32>
    %c1_450 = arith.constant 1 : index
    %c4_451 = arith.constant 4 : index
    %c0_452 = arith.constant 0 : index
    %c0_453 = arith.constant 0 : index
    %1439 = vector.load %arg10[%c1_450, %c4_451, %c0_452, %c0_453] : memref<3x9x2x2xf32, #tpu.memory_space<vmem>>, vector<1x1x2x2xf32>
    %1440 = vector.shape_cast %1439 : vector<1x1x2x2xf32> to vector<2x2xf32>
    %1441 = vector.extract_strided_slice %1440 {offsets = [0, 0], sizes = [2, 1], strides = [1, 1]} : vector<2x2xf32> to vector<2x1xf32>
    %1442 = vector.extract_strided_slice %1343 {offsets = [0, 0], sizes = [1, 256], strides = [1, 1]} : vector<2x256xf32> to vector<1x256xf32>
    %1443 = vector.broadcast %1441 : vector<2x1xf32> to vector<2x256xf32>
    %1444 = vector.broadcast %1442 : vector<1x256xf32> to vector<2x256xf32>
    %1445 = arith.mulf %1443, %1444 : vector<2x256xf32>
    %cst_454 = arith.constant 0.000000e+00 : f32
    %1446 = vector.broadcast %cst_454 : f32 to vector<2x256xf32>
    %1447 = arith.addf %1446, %1445 : vector<2x256xf32>
    %1448 = vector.extract_strided_slice %1440 {offsets = [0, 1], sizes = [2, 1], strides = [1, 1]} : vector<2x2xf32> to vector<2x1xf32>
    %1449 = vector.extract_strided_slice %1343 {offsets = [1, 0], sizes = [1, 256], strides = [1, 1]} : vector<2x256xf32> to vector<1x256xf32>
    %1450 = vector.broadcast %1448 : vector<2x1xf32> to vector<2x256xf32>
    %1451 = vector.broadcast %1449 : vector<1x256xf32> to vector<2x256xf32>
    %1452 = arith.mulf %1450, %1451 : vector<2x256xf32>
    %1453 = arith.addf %1447, %1452 : vector<2x256xf32>
    %1454 = arith.addf %1438, %1453 : vector<2x256xf32>
    %c11_i32_455 = arith.constant 11 : i32
    %1455 = vector.broadcast %c11_i32_455 : i32 to vector<1x256xi32>
    %1456 = arith.cmpi slt, %4, %1455 : vector<1x256xi32>
    %c251_i32 = arith.constant 251 : i32
    %1457 = tpu.dynamic_rotate %1343 by %c251_i32 dim 1 : vector<2x256xf32>, i32 -> vector<2x256xf32>
    %cst_456 = arith.constant 0.000000e+00 : f32
    %1458 = vector.shape_cast %1456 : vector<1x256xi1> to vector<1x256xi1>
    %1459 = vector.broadcast %1458 : vector<1x256xi1> to vector<2x256xi1>
    %1460 = vector.broadcast %cst_456 : f32 to vector<2x256xf32>
    %1461 = arith.select %1459, %1457, %1460 : vector<2x256xi1>, vector<2x256xf32>
    %c1_457 = arith.constant 1 : index
    %c5_458 = arith.constant 5 : index
    %c0_459 = arith.constant 0 : index
    %c0_460 = arith.constant 0 : index
    %1462 = vector.load %arg10[%c1_457, %c5_458, %c0_459, %c0_460] : memref<3x9x2x2xf32, #tpu.memory_space<vmem>>, vector<1x1x2x2xf32>
    %1463 = vector.shape_cast %1462 : vector<1x1x2x2xf32> to vector<2x2xf32>
    %1464 = vector.extract_strided_slice %1463 {offsets = [0, 0], sizes = [2, 1], strides = [1, 1]} : vector<2x2xf32> to vector<2x1xf32>
    %1465 = vector.extract_strided_slice %1461 {offsets = [0, 0], sizes = [1, 256], strides = [1, 1]} : vector<2x256xf32> to vector<1x256xf32>
    %1466 = vector.broadcast %1464 : vector<2x1xf32> to vector<2x256xf32>
    %1467 = vector.broadcast %1465 : vector<1x256xf32> to vector<2x256xf32>
    %1468 = arith.mulf %1466, %1467 : vector<2x256xf32>
    %cst_461 = arith.constant 0.000000e+00 : f32
    %1469 = vector.broadcast %cst_461 : f32 to vector<2x256xf32>
    %1470 = arith.addf %1469, %1468 : vector<2x256xf32>
    %1471 = vector.extract_strided_slice %1463 {offsets = [0, 1], sizes = [2, 1], strides = [1, 1]} : vector<2x2xf32> to vector<2x1xf32>
    %1472 = vector.extract_strided_slice %1461 {offsets = [1, 0], sizes = [1, 256], strides = [1, 1]} : vector<2x256xf32> to vector<1x256xf32>
    %1473 = vector.broadcast %1471 : vector<2x1xf32> to vector<2x256xf32>
    %1474 = vector.broadcast %1472 : vector<1x256xf32> to vector<2x256xf32>
    %1475 = arith.mulf %1473, %1474 : vector<2x256xf32>
    %1476 = arith.addf %1470, %1475 : vector<2x256xf32>
    %1477 = arith.addf %1454, %1476 : vector<2x256xf32>
    %c176_i32 = arith.constant 176 : i32
    %1478 = vector.broadcast %c176_i32 : i32 to vector<1x256xi32>
    %1479 = arith.cmpi slt, %2, %1478 : vector<1x256xi32>
    %c5_i32_462 = arith.constant 5 : i32
    %1480 = vector.broadcast %c5_i32_462 : i32 to vector<1x256xi32>
    %1481 = arith.cmpi sge, %4, %1480 : vector<1x256xi32>
    %1482 = arith.andi %1479, %1481 : vector<1x256xi1>
    %c181_i32 = arith.constant 181 : i32
    %1483 = tpu.dynamic_rotate %1343 by %c181_i32 dim 1 : vector<2x256xf32>, i32 -> vector<2x256xf32>
    %cst_463 = arith.constant 0.000000e+00 : f32
    %1484 = vector.shape_cast %1482 : vector<1x256xi1> to vector<1x256xi1>
    %1485 = vector.broadcast %1484 : vector<1x256xi1> to vector<2x256xi1>
    %1486 = vector.broadcast %cst_463 : f32 to vector<2x256xf32>
    %1487 = arith.select %1485, %1483, %1486 : vector<2x256xi1>, vector<2x256xf32>
    %c1_464 = arith.constant 1 : index
    %c6_465 = arith.constant 6 : index
    %c0_466 = arith.constant 0 : index
    %c0_467 = arith.constant 0 : index
    %1488 = vector.load %arg10[%c1_464, %c6_465, %c0_466, %c0_467] : memref<3x9x2x2xf32, #tpu.memory_space<vmem>>, vector<1x1x2x2xf32>
    %1489 = vector.shape_cast %1488 : vector<1x1x2x2xf32> to vector<2x2xf32>
    %1490 = vector.extract_strided_slice %1489 {offsets = [0, 0], sizes = [2, 1], strides = [1, 1]} : vector<2x2xf32> to vector<2x1xf32>
    %1491 = vector.extract_strided_slice %1487 {offsets = [0, 0], sizes = [1, 256], strides = [1, 1]} : vector<2x256xf32> to vector<1x256xf32>
    %1492 = vector.broadcast %1490 : vector<2x1xf32> to vector<2x256xf32>
    %1493 = vector.broadcast %1491 : vector<1x256xf32> to vector<2x256xf32>
    %1494 = arith.mulf %1492, %1493 : vector<2x256xf32>
    %cst_468 = arith.constant 0.000000e+00 : f32
    %1495 = vector.broadcast %cst_468 : f32 to vector<2x256xf32>
    %1496 = arith.addf %1495, %1494 : vector<2x256xf32>
    %1497 = vector.extract_strided_slice %1489 {offsets = [0, 1], sizes = [2, 1], strides = [1, 1]} : vector<2x2xf32> to vector<2x1xf32>
    %1498 = vector.extract_strided_slice %1487 {offsets = [1, 0], sizes = [1, 256], strides = [1, 1]} : vector<2x256xf32> to vector<1x256xf32>
    %1499 = vector.broadcast %1497 : vector<2x1xf32> to vector<2x256xf32>
    %1500 = vector.broadcast %1498 : vector<1x256xf32> to vector<2x256xf32>
    %1501 = arith.mulf %1499, %1500 : vector<2x256xf32>
    %1502 = arith.addf %1496, %1501 : vector<2x256xf32>
    %1503 = arith.addf %1477, %1502 : vector<2x256xf32>
    %c176_i32_469 = arith.constant 176 : i32
    %1504 = tpu.dynamic_rotate %1343 by %c176_i32_469 dim 1 : vector<2x256xf32>, i32 -> vector<2x256xf32>
    %cst_470 = arith.constant 0.000000e+00 : f32
    %1505 = vector.shape_cast %1479 : vector<1x256xi1> to vector<1x256xi1>
    %1506 = vector.broadcast %1505 : vector<1x256xi1> to vector<2x256xi1>
    %1507 = vector.broadcast %cst_470 : f32 to vector<2x256xf32>
    %1508 = arith.select %1506, %1504, %1507 : vector<2x256xi1>, vector<2x256xf32>
    %c1_471 = arith.constant 1 : index
    %c7_472 = arith.constant 7 : index
    %c0_473 = arith.constant 0 : index
    %c0_474 = arith.constant 0 : index
    %1509 = vector.load %arg10[%c1_471, %c7_472, %c0_473, %c0_474] : memref<3x9x2x2xf32, #tpu.memory_space<vmem>>, vector<1x1x2x2xf32>
    %1510 = vector.shape_cast %1509 : vector<1x1x2x2xf32> to vector<2x2xf32>
    %1511 = vector.extract_strided_slice %1510 {offsets = [0, 0], sizes = [2, 1], strides = [1, 1]} : vector<2x2xf32> to vector<2x1xf32>
    %1512 = vector.extract_strided_slice %1508 {offsets = [0, 0], sizes = [1, 256], strides = [1, 1]} : vector<2x256xf32> to vector<1x256xf32>
    %1513 = vector.broadcast %1511 : vector<2x1xf32> to vector<2x256xf32>
    %1514 = vector.broadcast %1512 : vector<1x256xf32> to vector<2x256xf32>
    %1515 = arith.mulf %1513, %1514 : vector<2x256xf32>
    %cst_475 = arith.constant 0.000000e+00 : f32
    %1516 = vector.broadcast %cst_475 : f32 to vector<2x256xf32>
    %1517 = arith.addf %1516, %1515 : vector<2x256xf32>
    %1518 = vector.extract_strided_slice %1510 {offsets = [0, 1], sizes = [2, 1], strides = [1, 1]} : vector<2x2xf32> to vector<2x1xf32>
    %1519 = vector.extract_strided_slice %1508 {offsets = [1, 0], sizes = [1, 256], strides = [1, 1]} : vector<2x256xf32> to vector<1x256xf32>
    %1520 = vector.broadcast %1518 : vector<2x1xf32> to vector<2x256xf32>
    %1521 = vector.broadcast %1519 : vector<1x256xf32> to vector<2x256xf32>
    %1522 = arith.mulf %1520, %1521 : vector<2x256xf32>
    %1523 = arith.addf %1517, %1522 : vector<2x256xf32>
    %1524 = arith.addf %1503, %1523 : vector<2x256xf32>
    %c11_i32_476 = arith.constant 11 : i32
    %1525 = vector.broadcast %c11_i32_476 : i32 to vector<1x256xi32>
    %1526 = arith.cmpi slt, %4, %1525 : vector<1x256xi32>
    %1527 = arith.andi %1479, %1526 : vector<1x256xi1>
    %c171_i32 = arith.constant 171 : i32
    %1528 = tpu.dynamic_rotate %1343 by %c171_i32 dim 1 : vector<2x256xf32>, i32 -> vector<2x256xf32>
    %cst_477 = arith.constant 0.000000e+00 : f32
    %1529 = vector.shape_cast %1527 : vector<1x256xi1> to vector<1x256xi1>
    %1530 = vector.broadcast %1529 : vector<1x256xi1> to vector<2x256xi1>
    %1531 = vector.broadcast %cst_477 : f32 to vector<2x256xf32>
    %1532 = arith.select %1530, %1528, %1531 : vector<2x256xi1>, vector<2x256xf32>
    %c1_478 = arith.constant 1 : index
    %c8_479 = arith.constant 8 : index
    %c0_480 = arith.constant 0 : index
    %c0_481 = arith.constant 0 : index
    %1533 = vector.load %arg10[%c1_478, %c8_479, %c0_480, %c0_481] : memref<3x9x2x2xf32, #tpu.memory_space<vmem>>, vector<1x1x2x2xf32>
    %1534 = vector.shape_cast %1533 : vector<1x1x2x2xf32> to vector<2x2xf32>
    %1535 = vector.extract_strided_slice %1534 {offsets = [0, 0], sizes = [2, 1], strides = [1, 1]} : vector<2x2xf32> to vector<2x1xf32>
    %1536 = vector.extract_strided_slice %1532 {offsets = [0, 0], sizes = [1, 256], strides = [1, 1]} : vector<2x256xf32> to vector<1x256xf32>
    %1537 = vector.broadcast %1535 : vector<2x1xf32> to vector<2x256xf32>
    %1538 = vector.broadcast %1536 : vector<1x256xf32> to vector<2x256xf32>
    %1539 = arith.mulf %1537, %1538 : vector<2x256xf32>
    %cst_482 = arith.constant 0.000000e+00 : f32
    %1540 = vector.broadcast %cst_482 : f32 to vector<2x256xf32>
    %1541 = arith.addf %1540, %1539 : vector<2x256xf32>
    %1542 = vector.extract_strided_slice %1534 {offsets = [0, 1], sizes = [2, 1], strides = [1, 1]} : vector<2x2xf32> to vector<2x1xf32>
    %1543 = vector.extract_strided_slice %1532 {offsets = [1, 0], sizes = [1, 256], strides = [1, 1]} : vector<2x256xf32> to vector<1x256xf32>
    %1544 = vector.broadcast %1542 : vector<2x1xf32> to vector<2x256xf32>
    %1545 = vector.broadcast %1543 : vector<1x256xf32> to vector<2x256xf32>
    %1546 = arith.mulf %1544, %1545 : vector<2x256xf32>
    %1547 = arith.addf %1541, %1546 : vector<2x256xf32>
    %1548 = arith.addf %1524, %1547 : vector<2x256xf32>
    %1549 = vector.broadcast %1345 : vector<2x1xf32> to vector<2x256xf32>
    %1550 = arith.addf %1548, %1549 : vector<2x256xf32>
    %1551 = vector.extract_strided_slice %441 {offsets = [0, 4], sizes = [1, 1], strides = [1, 1]} : vector<1x8xf32> to vector<1x1xf32>
    %1552 = vector.extract_strided_slice %1550 {offsets = [0, 0], sizes = [1, 256], strides = [1, 1]} : vector<2x256xf32> to vector<1x256xf32>
    %1553 = vector.broadcast %1551 : vector<1x1xf32> to vector<1x256xf32>
    %1554 = arith.mulf %1553, %1552 : vector<1x256xf32>
    %1555 = vector.extract_strided_slice %441 {offsets = [0, 5], sizes = [1, 1], strides = [1, 1]} : vector<1x8xf32> to vector<1x1xf32>
    %1556 = vector.extract_strided_slice %1550 {offsets = [1, 0], sizes = [1, 256], strides = [1, 1]} : vector<2x256xf32> to vector<1x256xf32>
    %1557 = vector.broadcast %1555 : vector<1x1xf32> to vector<1x256xf32>
    %1558 = arith.mulf %1557, %1556 : vector<1x256xf32>
    %1559 = arith.addf %1554, %1558 : vector<1x256xf32>
    %1560 = arith.addf %1117, %1559 : vector<1x256xf32>
    %c3_483 = arith.constant 3 : index
    %c0_484 = arith.constant 0 : index
    %c0_485 = arith.constant 0 : index
    %1561 = vector.load %arg6[%c3_483, %c0_484, %c0_485] : memref<4x2x2xf32, #tpu.memory_space<vmem>>, vector<1x2x2xf32>
    %1562 = vector.shape_cast %1561 : vector<1x2x2xf32> to vector<2x2xf32>
    %1563 = vector.extract_strided_slice %1562 {offsets = [0, 0], sizes = [2, 1], strides = [1, 1]} : vector<2x2xf32> to vector<2x1xf32>
    %1564 = vector.broadcast %1563 : vector<2x1xf32> to vector<2x256xf32>
    %1565 = vector.broadcast %436 : vector<1x256xf32> to vector<2x256xf32>
    %1566 = arith.mulf %1564, %1565 : vector<2x256xf32>
    %1567 = vector.extract_strided_slice %1562 {offsets = [0, 1], sizes = [2, 1], strides = [1, 1]} : vector<2x2xf32> to vector<2x1xf32>
    %1568 = vector.broadcast %1567 : vector<2x1xf32> to vector<2x256xf32>
    %1569 = vector.broadcast %440 : vector<1x256xf32> to vector<2x256xf32>
    %1570 = arith.mulf %1568, %1569 : vector<2x256xf32>
    %1571 = arith.addf %1566, %1570 : vector<2x256xf32>
    %c3_486 = arith.constant 3 : index
    %c0_487 = arith.constant 0 : index
    %c0_488 = arith.constant 0 : index
    %1572 = vector.load %arg7[%c3_486, %c0_487, %c0_488] : memref<4x2x1xf32, #tpu.memory_space<vmem>>, vector<1x2x1xf32>
    %1573 = vector.shape_cast %1572 : vector<1x2x1xf32> to vector<2x1xf32>
    %1574 = vector.broadcast %1573 : vector<2x1xf32> to vector<2x256xf32>
    %1575 = arith.addf %1571, %1574 : vector<2x256xf32>
    %cst_489 = arith.constant 0.000000e+00 : f32
    %1576 = vector.broadcast %cst_489 : f32 to vector<2x256xf32>
    %1577 = arith.maximumf %1575, %1576 : vector<2x256xf32>
    %c3_490 = arith.constant 3 : index
    %c0_491 = arith.constant 0 : index
    %c0_492 = arith.constant 0 : index
    %1578 = vector.load %arg9[%c3_490, %c0_491, %c0_492] : memref<4x2x1xf32, #tpu.memory_space<vmem>>, vector<1x2x1xf32>
    %1579 = vector.shape_cast %1578 : vector<1x2x1xf32> to vector<2x1xf32>
    %c16_i32_493 = arith.constant 16 : i32
    %1580 = vector.broadcast %c16_i32_493 : i32 to vector<1x256xi32>
    %1581 = arith.cmpi sge, %2, %1580 : vector<1x256xi32>
    %c1_i32_494 = arith.constant 1 : i32
    %1582 = vector.broadcast %c1_i32_494 : i32 to vector<1x256xi32>
    %1583 = arith.cmpi sge, %4, %1582 : vector<1x256xi32>
    %1584 = arith.andi %1581, %1583 : vector<1x256xi1>
    %c17_i32_495 = arith.constant 17 : i32
    %1585 = tpu.dynamic_rotate %1577 by %c17_i32_495 dim 1 : vector<2x256xf32>, i32 -> vector<2x256xf32>
    %cst_496 = arith.constant 0.000000e+00 : f32
    %1586 = vector.shape_cast %1584 : vector<1x256xi1> to vector<1x256xi1>
    %1587 = vector.broadcast %1586 : vector<1x256xi1> to vector<2x256xi1>
    %1588 = vector.broadcast %cst_496 : f32 to vector<2x256xf32>
    %1589 = arith.select %1587, %1585, %1588 : vector<2x256xi1>, vector<2x256xf32>
    %c3_497 = arith.constant 3 : index
    %c0_498 = arith.constant 0 : index
    %c0_499 = arith.constant 0 : index
    %c0_500 = arith.constant 0 : index
    %1590 = vector.load %arg8[%c3_497, %c0_498, %c0_499, %c0_500] : memref<4x9x2x2xf32, #tpu.memory_space<vmem>>, vector<1x1x2x2xf32>
    %1591 = vector.shape_cast %1590 : vector<1x1x2x2xf32> to vector<2x2xf32>
    %1592 = vector.extract_strided_slice %1591 {offsets = [0, 0], sizes = [2, 1], strides = [1, 1]} : vector<2x2xf32> to vector<2x1xf32>
    %1593 = vector.extract_strided_slice %1589 {offsets = [0, 0], sizes = [1, 256], strides = [1, 1]} : vector<2x256xf32> to vector<1x256xf32>
    %1594 = vector.broadcast %1592 : vector<2x1xf32> to vector<2x256xf32>
    %1595 = vector.broadcast %1593 : vector<1x256xf32> to vector<2x256xf32>
    %1596 = arith.mulf %1594, %1595 : vector<2x256xf32>
    %cst_501 = arith.constant 0.000000e+00 : f32
    %1597 = vector.broadcast %cst_501 : f32 to vector<2x256xf32>
    %1598 = arith.addf %1597, %1596 : vector<2x256xf32>
    %1599 = vector.extract_strided_slice %1591 {offsets = [0, 1], sizes = [2, 1], strides = [1, 1]} : vector<2x2xf32> to vector<2x1xf32>
    %1600 = vector.extract_strided_slice %1589 {offsets = [1, 0], sizes = [1, 256], strides = [1, 1]} : vector<2x256xf32> to vector<1x256xf32>
    %1601 = vector.broadcast %1599 : vector<2x1xf32> to vector<2x256xf32>
    %1602 = vector.broadcast %1600 : vector<1x256xf32> to vector<2x256xf32>
    %1603 = arith.mulf %1601, %1602 : vector<2x256xf32>
    %1604 = arith.addf %1598, %1603 : vector<2x256xf32>
    %c16_i32_502 = arith.constant 16 : i32
    %1605 = tpu.dynamic_rotate %1577 by %c16_i32_502 dim 1 : vector<2x256xf32>, i32 -> vector<2x256xf32>
    %cst_503 = arith.constant 0.000000e+00 : f32
    %1606 = vector.shape_cast %1581 : vector<1x256xi1> to vector<1x256xi1>
    %1607 = vector.broadcast %1606 : vector<1x256xi1> to vector<2x256xi1>
    %1608 = vector.broadcast %cst_503 : f32 to vector<2x256xf32>
    %1609 = arith.select %1607, %1605, %1608 : vector<2x256xi1>, vector<2x256xf32>
    %c3_504 = arith.constant 3 : index
    %c1_505 = arith.constant 1 : index
    %c0_506 = arith.constant 0 : index
    %c0_507 = arith.constant 0 : index
    %1610 = vector.load %arg8[%c3_504, %c1_505, %c0_506, %c0_507] : memref<4x9x2x2xf32, #tpu.memory_space<vmem>>, vector<1x1x2x2xf32>
    %1611 = vector.shape_cast %1610 : vector<1x1x2x2xf32> to vector<2x2xf32>
    %1612 = vector.extract_strided_slice %1611 {offsets = [0, 0], sizes = [2, 1], strides = [1, 1]} : vector<2x2xf32> to vector<2x1xf32>
    %1613 = vector.extract_strided_slice %1609 {offsets = [0, 0], sizes = [1, 256], strides = [1, 1]} : vector<2x256xf32> to vector<1x256xf32>
    %1614 = vector.broadcast %1612 : vector<2x1xf32> to vector<2x256xf32>
    %1615 = vector.broadcast %1613 : vector<1x256xf32> to vector<2x256xf32>
    %1616 = arith.mulf %1614, %1615 : vector<2x256xf32>
    %cst_508 = arith.constant 0.000000e+00 : f32
    %1617 = vector.broadcast %cst_508 : f32 to vector<2x256xf32>
    %1618 = arith.addf %1617, %1616 : vector<2x256xf32>
    %1619 = vector.extract_strided_slice %1611 {offsets = [0, 1], sizes = [2, 1], strides = [1, 1]} : vector<2x2xf32> to vector<2x1xf32>
    %1620 = vector.extract_strided_slice %1609 {offsets = [1, 0], sizes = [1, 256], strides = [1, 1]} : vector<2x256xf32> to vector<1x256xf32>
    %1621 = vector.broadcast %1619 : vector<2x1xf32> to vector<2x256xf32>
    %1622 = vector.broadcast %1620 : vector<1x256xf32> to vector<2x256xf32>
    %1623 = arith.mulf %1621, %1622 : vector<2x256xf32>
    %1624 = arith.addf %1618, %1623 : vector<2x256xf32>
    %1625 = arith.addf %1604, %1624 : vector<2x256xf32>
    %c15_i32_509 = arith.constant 15 : i32
    %1626 = vector.broadcast %c15_i32_509 : i32 to vector<1x256xi32>
    %1627 = arith.cmpi slt, %4, %1626 : vector<1x256xi32>
    %1628 = arith.andi %1581, %1627 : vector<1x256xi1>
    %c15_i32_510 = arith.constant 15 : i32
    %1629 = tpu.dynamic_rotate %1577 by %c15_i32_510 dim 1 : vector<2x256xf32>, i32 -> vector<2x256xf32>
    %cst_511 = arith.constant 0.000000e+00 : f32
    %1630 = vector.shape_cast %1628 : vector<1x256xi1> to vector<1x256xi1>
    %1631 = vector.broadcast %1630 : vector<1x256xi1> to vector<2x256xi1>
    %1632 = vector.broadcast %cst_511 : f32 to vector<2x256xf32>
    %1633 = arith.select %1631, %1629, %1632 : vector<2x256xi1>, vector<2x256xf32>
    %c3_512 = arith.constant 3 : index
    %c2_513 = arith.constant 2 : index
    %c0_514 = arith.constant 0 : index
    %c0_515 = arith.constant 0 : index
    %1634 = vector.load %arg8[%c3_512, %c2_513, %c0_514, %c0_515] : memref<4x9x2x2xf32, #tpu.memory_space<vmem>>, vector<1x1x2x2xf32>
    %1635 = vector.shape_cast %1634 : vector<1x1x2x2xf32> to vector<2x2xf32>
    %1636 = vector.extract_strided_slice %1635 {offsets = [0, 0], sizes = [2, 1], strides = [1, 1]} : vector<2x2xf32> to vector<2x1xf32>
    %1637 = vector.extract_strided_slice %1633 {offsets = [0, 0], sizes = [1, 256], strides = [1, 1]} : vector<2x256xf32> to vector<1x256xf32>
    %1638 = vector.broadcast %1636 : vector<2x1xf32> to vector<2x256xf32>
    %1639 = vector.broadcast %1637 : vector<1x256xf32> to vector<2x256xf32>
    %1640 = arith.mulf %1638, %1639 : vector<2x256xf32>
    %cst_516 = arith.constant 0.000000e+00 : f32
    %1641 = vector.broadcast %cst_516 : f32 to vector<2x256xf32>
    %1642 = arith.addf %1641, %1640 : vector<2x256xf32>
    %1643 = vector.extract_strided_slice %1635 {offsets = [0, 1], sizes = [2, 1], strides = [1, 1]} : vector<2x2xf32> to vector<2x1xf32>
    %1644 = vector.extract_strided_slice %1633 {offsets = [1, 0], sizes = [1, 256], strides = [1, 1]} : vector<2x256xf32> to vector<1x256xf32>
    %1645 = vector.broadcast %1643 : vector<2x1xf32> to vector<2x256xf32>
    %1646 = vector.broadcast %1644 : vector<1x256xf32> to vector<2x256xf32>
    %1647 = arith.mulf %1645, %1646 : vector<2x256xf32>
    %1648 = arith.addf %1642, %1647 : vector<2x256xf32>
    %1649 = arith.addf %1625, %1648 : vector<2x256xf32>
    %c1_i32_517 = arith.constant 1 : i32
    %1650 = vector.broadcast %c1_i32_517 : i32 to vector<1x256xi32>
    %1651 = arith.cmpi sge, %4, %1650 : vector<1x256xi32>
    %c1_i32_518 = arith.constant 1 : i32
    %1652 = tpu.dynamic_rotate %1577 by %c1_i32_518 dim 1 : vector<2x256xf32>, i32 -> vector<2x256xf32>
    %cst_519 = arith.constant 0.000000e+00 : f32
    %1653 = vector.shape_cast %1651 : vector<1x256xi1> to vector<1x256xi1>
    %1654 = vector.broadcast %1653 : vector<1x256xi1> to vector<2x256xi1>
    %1655 = vector.broadcast %cst_519 : f32 to vector<2x256xf32>
    %1656 = arith.select %1654, %1652, %1655 : vector<2x256xi1>, vector<2x256xf32>
    %c3_520 = arith.constant 3 : index
    %c3_521 = arith.constant 3 : index
    %c0_522 = arith.constant 0 : index
    %c0_523 = arith.constant 0 : index
    %1657 = vector.load %arg8[%c3_520, %c3_521, %c0_522, %c0_523] : memref<4x9x2x2xf32, #tpu.memory_space<vmem>>, vector<1x1x2x2xf32>
    %1658 = vector.shape_cast %1657 : vector<1x1x2x2xf32> to vector<2x2xf32>
    %1659 = vector.extract_strided_slice %1658 {offsets = [0, 0], sizes = [2, 1], strides = [1, 1]} : vector<2x2xf32> to vector<2x1xf32>
    %1660 = vector.extract_strided_slice %1656 {offsets = [0, 0], sizes = [1, 256], strides = [1, 1]} : vector<2x256xf32> to vector<1x256xf32>
    %1661 = vector.broadcast %1659 : vector<2x1xf32> to vector<2x256xf32>
    %1662 = vector.broadcast %1660 : vector<1x256xf32> to vector<2x256xf32>
    %1663 = arith.mulf %1661, %1662 : vector<2x256xf32>
    %cst_524 = arith.constant 0.000000e+00 : f32
    %1664 = vector.broadcast %cst_524 : f32 to vector<2x256xf32>
    %1665 = arith.addf %1664, %1663 : vector<2x256xf32>
    %1666 = vector.extract_strided_slice %1658 {offsets = [0, 1], sizes = [2, 1], strides = [1, 1]} : vector<2x2xf32> to vector<2x1xf32>
    %1667 = vector.extract_strided_slice %1656 {offsets = [1, 0], sizes = [1, 256], strides = [1, 1]} : vector<2x256xf32> to vector<1x256xf32>
    %1668 = vector.broadcast %1666 : vector<2x1xf32> to vector<2x256xf32>
    %1669 = vector.broadcast %1667 : vector<1x256xf32> to vector<2x256xf32>
    %1670 = arith.mulf %1668, %1669 : vector<2x256xf32>
    %1671 = arith.addf %1665, %1670 : vector<2x256xf32>
    %1672 = arith.addf %1649, %1671 : vector<2x256xf32>
    %c3_525 = arith.constant 3 : index
    %c4_526 = arith.constant 4 : index
    %c0_527 = arith.constant 0 : index
    %c0_528 = arith.constant 0 : index
    %1673 = vector.load %arg8[%c3_525, %c4_526, %c0_527, %c0_528] : memref<4x9x2x2xf32, #tpu.memory_space<vmem>>, vector<1x1x2x2xf32>
    %1674 = vector.shape_cast %1673 : vector<1x1x2x2xf32> to vector<2x2xf32>
    %1675 = vector.extract_strided_slice %1674 {offsets = [0, 0], sizes = [2, 1], strides = [1, 1]} : vector<2x2xf32> to vector<2x1xf32>
    %1676 = vector.extract_strided_slice %1577 {offsets = [0, 0], sizes = [1, 256], strides = [1, 1]} : vector<2x256xf32> to vector<1x256xf32>
    %1677 = vector.broadcast %1675 : vector<2x1xf32> to vector<2x256xf32>
    %1678 = vector.broadcast %1676 : vector<1x256xf32> to vector<2x256xf32>
    %1679 = arith.mulf %1677, %1678 : vector<2x256xf32>
    %cst_529 = arith.constant 0.000000e+00 : f32
    %1680 = vector.broadcast %cst_529 : f32 to vector<2x256xf32>
    %1681 = arith.addf %1680, %1679 : vector<2x256xf32>
    %1682 = vector.extract_strided_slice %1674 {offsets = [0, 1], sizes = [2, 1], strides = [1, 1]} : vector<2x2xf32> to vector<2x1xf32>
    %1683 = vector.extract_strided_slice %1577 {offsets = [1, 0], sizes = [1, 256], strides = [1, 1]} : vector<2x256xf32> to vector<1x256xf32>
    %1684 = vector.broadcast %1682 : vector<2x1xf32> to vector<2x256xf32>
    %1685 = vector.broadcast %1683 : vector<1x256xf32> to vector<2x256xf32>
    %1686 = arith.mulf %1684, %1685 : vector<2x256xf32>
    %1687 = arith.addf %1681, %1686 : vector<2x256xf32>
    %1688 = arith.addf %1672, %1687 : vector<2x256xf32>
    %c15_i32_530 = arith.constant 15 : i32
    %1689 = vector.broadcast %c15_i32_530 : i32 to vector<1x256xi32>
    %1690 = arith.cmpi slt, %4, %1689 : vector<1x256xi32>
    %c255_i32_531 = arith.constant 255 : i32
    %1691 = tpu.dynamic_rotate %1577 by %c255_i32_531 dim 1 : vector<2x256xf32>, i32 -> vector<2x256xf32>
    %cst_532 = arith.constant 0.000000e+00 : f32
    %1692 = vector.shape_cast %1690 : vector<1x256xi1> to vector<1x256xi1>
    %1693 = vector.broadcast %1692 : vector<1x256xi1> to vector<2x256xi1>
    %1694 = vector.broadcast %cst_532 : f32 to vector<2x256xf32>
    %1695 = arith.select %1693, %1691, %1694 : vector<2x256xi1>, vector<2x256xf32>
    %c3_533 = arith.constant 3 : index
    %c5_534 = arith.constant 5 : index
    %c0_535 = arith.constant 0 : index
    %c0_536 = arith.constant 0 : index
    %1696 = vector.load %arg8[%c3_533, %c5_534, %c0_535, %c0_536] : memref<4x9x2x2xf32, #tpu.memory_space<vmem>>, vector<1x1x2x2xf32>
    %1697 = vector.shape_cast %1696 : vector<1x1x2x2xf32> to vector<2x2xf32>
    %1698 = vector.extract_strided_slice %1697 {offsets = [0, 0], sizes = [2, 1], strides = [1, 1]} : vector<2x2xf32> to vector<2x1xf32>
    %1699 = vector.extract_strided_slice %1695 {offsets = [0, 0], sizes = [1, 256], strides = [1, 1]} : vector<2x256xf32> to vector<1x256xf32>
    %1700 = vector.broadcast %1698 : vector<2x1xf32> to vector<2x256xf32>
    %1701 = vector.broadcast %1699 : vector<1x256xf32> to vector<2x256xf32>
    %1702 = arith.mulf %1700, %1701 : vector<2x256xf32>
    %cst_537 = arith.constant 0.000000e+00 : f32
    %1703 = vector.broadcast %cst_537 : f32 to vector<2x256xf32>
    %1704 = arith.addf %1703, %1702 : vector<2x256xf32>
    %1705 = vector.extract_strided_slice %1697 {offsets = [0, 1], sizes = [2, 1], strides = [1, 1]} : vector<2x2xf32> to vector<2x1xf32>
    %1706 = vector.extract_strided_slice %1695 {offsets = [1, 0], sizes = [1, 256], strides = [1, 1]} : vector<2x256xf32> to vector<1x256xf32>
    %1707 = vector.broadcast %1705 : vector<2x1xf32> to vector<2x256xf32>
    %1708 = vector.broadcast %1706 : vector<1x256xf32> to vector<2x256xf32>
    %1709 = arith.mulf %1707, %1708 : vector<2x256xf32>
    %1710 = arith.addf %1704, %1709 : vector<2x256xf32>
    %1711 = arith.addf %1688, %1710 : vector<2x256xf32>
    %c240_i32_538 = arith.constant 240 : i32
    %1712 = vector.broadcast %c240_i32_538 : i32 to vector<1x256xi32>
    %1713 = arith.cmpi slt, %2, %1712 : vector<1x256xi32>
    %c1_i32_539 = arith.constant 1 : i32
    %1714 = vector.broadcast %c1_i32_539 : i32 to vector<1x256xi32>
    %1715 = arith.cmpi sge, %4, %1714 : vector<1x256xi32>
    %1716 = arith.andi %1713, %1715 : vector<1x256xi1>
    %c241_i32_540 = arith.constant 241 : i32
    %1717 = tpu.dynamic_rotate %1577 by %c241_i32_540 dim 1 : vector<2x256xf32>, i32 -> vector<2x256xf32>
    %cst_541 = arith.constant 0.000000e+00 : f32
    %1718 = vector.shape_cast %1716 : vector<1x256xi1> to vector<1x256xi1>
    %1719 = vector.broadcast %1718 : vector<1x256xi1> to vector<2x256xi1>
    %1720 = vector.broadcast %cst_541 : f32 to vector<2x256xf32>
    %1721 = arith.select %1719, %1717, %1720 : vector<2x256xi1>, vector<2x256xf32>
    %c3_542 = arith.constant 3 : index
    %c6_543 = arith.constant 6 : index
    %c0_544 = arith.constant 0 : index
    %c0_545 = arith.constant 0 : index
    %1722 = vector.load %arg8[%c3_542, %c6_543, %c0_544, %c0_545] : memref<4x9x2x2xf32, #tpu.memory_space<vmem>>, vector<1x1x2x2xf32>
    %1723 = vector.shape_cast %1722 : vector<1x1x2x2xf32> to vector<2x2xf32>
    %1724 = vector.extract_strided_slice %1723 {offsets = [0, 0], sizes = [2, 1], strides = [1, 1]} : vector<2x2xf32> to vector<2x1xf32>
    %1725 = vector.extract_strided_slice %1721 {offsets = [0, 0], sizes = [1, 256], strides = [1, 1]} : vector<2x256xf32> to vector<1x256xf32>
    %1726 = vector.broadcast %1724 : vector<2x1xf32> to vector<2x256xf32>
    %1727 = vector.broadcast %1725 : vector<1x256xf32> to vector<2x256xf32>
    %1728 = arith.mulf %1726, %1727 : vector<2x256xf32>
    %cst_546 = arith.constant 0.000000e+00 : f32
    %1729 = vector.broadcast %cst_546 : f32 to vector<2x256xf32>
    %1730 = arith.addf %1729, %1728 : vector<2x256xf32>
    %1731 = vector.extract_strided_slice %1723 {offsets = [0, 1], sizes = [2, 1], strides = [1, 1]} : vector<2x2xf32> to vector<2x1xf32>
    %1732 = vector.extract_strided_slice %1721 {offsets = [1, 0], sizes = [1, 256], strides = [1, 1]} : vector<2x256xf32> to vector<1x256xf32>
    %1733 = vector.broadcast %1731 : vector<2x1xf32> to vector<2x256xf32>
    %1734 = vector.broadcast %1732 : vector<1x256xf32> to vector<2x256xf32>
    %1735 = arith.mulf %1733, %1734 : vector<2x256xf32>
    %1736 = arith.addf %1730, %1735 : vector<2x256xf32>
    %1737 = arith.addf %1711, %1736 : vector<2x256xf32>
    %c240_i32_547 = arith.constant 240 : i32
    %1738 = tpu.dynamic_rotate %1577 by %c240_i32_547 dim 1 : vector<2x256xf32>, i32 -> vector<2x256xf32>
    %cst_548 = arith.constant 0.000000e+00 : f32
    %1739 = vector.shape_cast %1713 : vector<1x256xi1> to vector<1x256xi1>
    %1740 = vector.broadcast %1739 : vector<1x256xi1> to vector<2x256xi1>
    %1741 = vector.broadcast %cst_548 : f32 to vector<2x256xf32>
    %1742 = arith.select %1740, %1738, %1741 : vector<2x256xi1>, vector<2x256xf32>
    %c3_549 = arith.constant 3 : index
    %c7_550 = arith.constant 7 : index
    %c0_551 = arith.constant 0 : index
    %c0_552 = arith.constant 0 : index
    %1743 = vector.load %arg8[%c3_549, %c7_550, %c0_551, %c0_552] : memref<4x9x2x2xf32, #tpu.memory_space<vmem>>, vector<1x1x2x2xf32>
    %1744 = vector.shape_cast %1743 : vector<1x1x2x2xf32> to vector<2x2xf32>
    %1745 = vector.extract_strided_slice %1744 {offsets = [0, 0], sizes = [2, 1], strides = [1, 1]} : vector<2x2xf32> to vector<2x1xf32>
    %1746 = vector.extract_strided_slice %1742 {offsets = [0, 0], sizes = [1, 256], strides = [1, 1]} : vector<2x256xf32> to vector<1x256xf32>
    %1747 = vector.broadcast %1745 : vector<2x1xf32> to vector<2x256xf32>
    %1748 = vector.broadcast %1746 : vector<1x256xf32> to vector<2x256xf32>
    %1749 = arith.mulf %1747, %1748 : vector<2x256xf32>
    %cst_553 = arith.constant 0.000000e+00 : f32
    %1750 = vector.broadcast %cst_553 : f32 to vector<2x256xf32>
    %1751 = arith.addf %1750, %1749 : vector<2x256xf32>
    %1752 = vector.extract_strided_slice %1744 {offsets = [0, 1], sizes = [2, 1], strides = [1, 1]} : vector<2x2xf32> to vector<2x1xf32>
    %1753 = vector.extract_strided_slice %1742 {offsets = [1, 0], sizes = [1, 256], strides = [1, 1]} : vector<2x256xf32> to vector<1x256xf32>
    %1754 = vector.broadcast %1752 : vector<2x1xf32> to vector<2x256xf32>
    %1755 = vector.broadcast %1753 : vector<1x256xf32> to vector<2x256xf32>
    %1756 = arith.mulf %1754, %1755 : vector<2x256xf32>
    %1757 = arith.addf %1751, %1756 : vector<2x256xf32>
    %1758 = arith.addf %1737, %1757 : vector<2x256xf32>
    %c15_i32_554 = arith.constant 15 : i32
    %1759 = vector.broadcast %c15_i32_554 : i32 to vector<1x256xi32>
    %1760 = arith.cmpi slt, %4, %1759 : vector<1x256xi32>
    %1761 = arith.andi %1713, %1760 : vector<1x256xi1>
    %c239_i32_555 = arith.constant 239 : i32
    %1762 = tpu.dynamic_rotate %1577 by %c239_i32_555 dim 1 : vector<2x256xf32>, i32 -> vector<2x256xf32>
    %cst_556 = arith.constant 0.000000e+00 : f32
    %1763 = vector.shape_cast %1761 : vector<1x256xi1> to vector<1x256xi1>
    %1764 = vector.broadcast %1763 : vector<1x256xi1> to vector<2x256xi1>
    %1765 = vector.broadcast %cst_556 : f32 to vector<2x256xf32>
    %1766 = arith.select %1764, %1762, %1765 : vector<2x256xi1>, vector<2x256xf32>
    %c3_557 = arith.constant 3 : index
    %c8_558 = arith.constant 8 : index
    %c0_559 = arith.constant 0 : index
    %c0_560 = arith.constant 0 : index
    %1767 = vector.load %arg8[%c3_557, %c8_558, %c0_559, %c0_560] : memref<4x9x2x2xf32, #tpu.memory_space<vmem>>, vector<1x1x2x2xf32>
    %1768 = vector.shape_cast %1767 : vector<1x1x2x2xf32> to vector<2x2xf32>
    %1769 = vector.extract_strided_slice %1768 {offsets = [0, 0], sizes = [2, 1], strides = [1, 1]} : vector<2x2xf32> to vector<2x1xf32>
    %1770 = vector.extract_strided_slice %1766 {offsets = [0, 0], sizes = [1, 256], strides = [1, 1]} : vector<2x256xf32> to vector<1x256xf32>
    %1771 = vector.broadcast %1769 : vector<2x1xf32> to vector<2x256xf32>
    %1772 = vector.broadcast %1770 : vector<1x256xf32> to vector<2x256xf32>
    %1773 = arith.mulf %1771, %1772 : vector<2x256xf32>
    %cst_561 = arith.constant 0.000000e+00 : f32
    %1774 = vector.broadcast %cst_561 : f32 to vector<2x256xf32>
    %1775 = arith.addf %1774, %1773 : vector<2x256xf32>
    %1776 = vector.extract_strided_slice %1768 {offsets = [0, 1], sizes = [2, 1], strides = [1, 1]} : vector<2x2xf32> to vector<2x1xf32>
    %1777 = vector.extract_strided_slice %1766 {offsets = [1, 0], sizes = [1, 256], strides = [1, 1]} : vector<2x256xf32> to vector<1x256xf32>
    %1778 = vector.broadcast %1776 : vector<2x1xf32> to vector<2x256xf32>
    %1779 = vector.broadcast %1777 : vector<1x256xf32> to vector<2x256xf32>
    %1780 = arith.mulf %1778, %1779 : vector<2x256xf32>
    %1781 = arith.addf %1775, %1780 : vector<2x256xf32>
    %1782 = arith.addf %1758, %1781 : vector<2x256xf32>
    %1783 = vector.broadcast %1579 : vector<2x1xf32> to vector<2x256xf32>
    %1784 = arith.addf %1782, %1783 : vector<2x256xf32>
    %cst_562 = arith.constant 0.000000e+00 : f32
    %1785 = vector.broadcast %cst_562 : f32 to vector<2x256xf32>
    %1786 = arith.maximumf %1784, %1785 : vector<2x256xf32>
    %c2_563 = arith.constant 2 : index
    %c0_564 = arith.constant 0 : index
    %c0_565 = arith.constant 0 : index
    %1787 = vector.load %arg11[%c2_563, %c0_564, %c0_565] : memref<3x2x1xf32, #tpu.memory_space<vmem>>, vector<1x2x1xf32>
    %1788 = vector.shape_cast %1787 : vector<1x2x1xf32> to vector<2x1xf32>
    %c112_i32 = arith.constant 112 : i32
    %1789 = vector.broadcast %c112_i32 : i32 to vector<1x256xi32>
    %1790 = arith.cmpi sge, %2, %1789 : vector<1x256xi32>
    %c7_i32 = arith.constant 7 : i32
    %1791 = vector.broadcast %c7_i32 : i32 to vector<1x256xi32>
    %1792 = arith.cmpi sge, %4, %1791 : vector<1x256xi32>
    %1793 = arith.andi %1790, %1792 : vector<1x256xi1>
    %c119_i32 = arith.constant 119 : i32
    %1794 = tpu.dynamic_rotate %1786 by %c119_i32 dim 1 : vector<2x256xf32>, i32 -> vector<2x256xf32>
    %cst_566 = arith.constant 0.000000e+00 : f32
    %1795 = vector.shape_cast %1793 : vector<1x256xi1> to vector<1x256xi1>
    %1796 = vector.broadcast %1795 : vector<1x256xi1> to vector<2x256xi1>
    %1797 = vector.broadcast %cst_566 : f32 to vector<2x256xf32>
    %1798 = arith.select %1796, %1794, %1797 : vector<2x256xi1>, vector<2x256xf32>
    %c2_567 = arith.constant 2 : index
    %c0_568 = arith.constant 0 : index
    %c0_569 = arith.constant 0 : index
    %c0_570 = arith.constant 0 : index
    %1799 = vector.load %arg10[%c2_567, %c0_568, %c0_569, %c0_570] : memref<3x9x2x2xf32, #tpu.memory_space<vmem>>, vector<1x1x2x2xf32>
    %1800 = vector.shape_cast %1799 : vector<1x1x2x2xf32> to vector<2x2xf32>
    %1801 = vector.extract_strided_slice %1800 {offsets = [0, 0], sizes = [2, 1], strides = [1, 1]} : vector<2x2xf32> to vector<2x1xf32>
    %1802 = vector.extract_strided_slice %1798 {offsets = [0, 0], sizes = [1, 256], strides = [1, 1]} : vector<2x256xf32> to vector<1x256xf32>
    %1803 = vector.broadcast %1801 : vector<2x1xf32> to vector<2x256xf32>
    %1804 = vector.broadcast %1802 : vector<1x256xf32> to vector<2x256xf32>
    %1805 = arith.mulf %1803, %1804 : vector<2x256xf32>
    %cst_571 = arith.constant 0.000000e+00 : f32
    %1806 = vector.broadcast %cst_571 : f32 to vector<2x256xf32>
    %1807 = arith.addf %1806, %1805 : vector<2x256xf32>
    %1808 = vector.extract_strided_slice %1800 {offsets = [0, 1], sizes = [2, 1], strides = [1, 1]} : vector<2x2xf32> to vector<2x1xf32>
    %1809 = vector.extract_strided_slice %1798 {offsets = [1, 0], sizes = [1, 256], strides = [1, 1]} : vector<2x256xf32> to vector<1x256xf32>
    %1810 = vector.broadcast %1808 : vector<2x1xf32> to vector<2x256xf32>
    %1811 = vector.broadcast %1809 : vector<1x256xf32> to vector<2x256xf32>
    %1812 = arith.mulf %1810, %1811 : vector<2x256xf32>
    %1813 = arith.addf %1807, %1812 : vector<2x256xf32>
    %c112_i32_572 = arith.constant 112 : i32
    %1814 = tpu.dynamic_rotate %1786 by %c112_i32_572 dim 1 : vector<2x256xf32>, i32 -> vector<2x256xf32>
    %cst_573 = arith.constant 0.000000e+00 : f32
    %1815 = vector.shape_cast %1790 : vector<1x256xi1> to vector<1x256xi1>
    %1816 = vector.broadcast %1815 : vector<1x256xi1> to vector<2x256xi1>
    %1817 = vector.broadcast %cst_573 : f32 to vector<2x256xf32>
    %1818 = arith.select %1816, %1814, %1817 : vector<2x256xi1>, vector<2x256xf32>
    %c2_574 = arith.constant 2 : index
    %c1_575 = arith.constant 1 : index
    %c0_576 = arith.constant 0 : index
    %c0_577 = arith.constant 0 : index
    %1819 = vector.load %arg10[%c2_574, %c1_575, %c0_576, %c0_577] : memref<3x9x2x2xf32, #tpu.memory_space<vmem>>, vector<1x1x2x2xf32>
    %1820 = vector.shape_cast %1819 : vector<1x1x2x2xf32> to vector<2x2xf32>
    %1821 = vector.extract_strided_slice %1820 {offsets = [0, 0], sizes = [2, 1], strides = [1, 1]} : vector<2x2xf32> to vector<2x1xf32>
    %1822 = vector.extract_strided_slice %1818 {offsets = [0, 0], sizes = [1, 256], strides = [1, 1]} : vector<2x256xf32> to vector<1x256xf32>
    %1823 = vector.broadcast %1821 : vector<2x1xf32> to vector<2x256xf32>
    %1824 = vector.broadcast %1822 : vector<1x256xf32> to vector<2x256xf32>
    %1825 = arith.mulf %1823, %1824 : vector<2x256xf32>
    %cst_578 = arith.constant 0.000000e+00 : f32
    %1826 = vector.broadcast %cst_578 : f32 to vector<2x256xf32>
    %1827 = arith.addf %1826, %1825 : vector<2x256xf32>
    %1828 = vector.extract_strided_slice %1820 {offsets = [0, 1], sizes = [2, 1], strides = [1, 1]} : vector<2x2xf32> to vector<2x1xf32>
    %1829 = vector.extract_strided_slice %1818 {offsets = [1, 0], sizes = [1, 256], strides = [1, 1]} : vector<2x256xf32> to vector<1x256xf32>
    %1830 = vector.broadcast %1828 : vector<2x1xf32> to vector<2x256xf32>
    %1831 = vector.broadcast %1829 : vector<1x256xf32> to vector<2x256xf32>
    %1832 = arith.mulf %1830, %1831 : vector<2x256xf32>
    %1833 = arith.addf %1827, %1832 : vector<2x256xf32>
    %1834 = arith.addf %1813, %1833 : vector<2x256xf32>
    %c9_i32 = arith.constant 9 : i32
    %1835 = vector.broadcast %c9_i32 : i32 to vector<1x256xi32>
    %1836 = arith.cmpi slt, %4, %1835 : vector<1x256xi32>
    %1837 = arith.andi %1790, %1836 : vector<1x256xi1>
    %c105_i32 = arith.constant 105 : i32
    %1838 = tpu.dynamic_rotate %1786 by %c105_i32 dim 1 : vector<2x256xf32>, i32 -> vector<2x256xf32>
    %cst_579 = arith.constant 0.000000e+00 : f32
    %1839 = vector.shape_cast %1837 : vector<1x256xi1> to vector<1x256xi1>
    %1840 = vector.broadcast %1839 : vector<1x256xi1> to vector<2x256xi1>
    %1841 = vector.broadcast %cst_579 : f32 to vector<2x256xf32>
    %1842 = arith.select %1840, %1838, %1841 : vector<2x256xi1>, vector<2x256xf32>
    %c2_580 = arith.constant 2 : index
    %c2_581 = arith.constant 2 : index
    %c0_582 = arith.constant 0 : index
    %c0_583 = arith.constant 0 : index
    %1843 = vector.load %arg10[%c2_580, %c2_581, %c0_582, %c0_583] : memref<3x9x2x2xf32, #tpu.memory_space<vmem>>, vector<1x1x2x2xf32>
    %1844 = vector.shape_cast %1843 : vector<1x1x2x2xf32> to vector<2x2xf32>
    %1845 = vector.extract_strided_slice %1844 {offsets = [0, 0], sizes = [2, 1], strides = [1, 1]} : vector<2x2xf32> to vector<2x1xf32>
    %1846 = vector.extract_strided_slice %1842 {offsets = [0, 0], sizes = [1, 256], strides = [1, 1]} : vector<2x256xf32> to vector<1x256xf32>
    %1847 = vector.broadcast %1845 : vector<2x1xf32> to vector<2x256xf32>
    %1848 = vector.broadcast %1846 : vector<1x256xf32> to vector<2x256xf32>
    %1849 = arith.mulf %1847, %1848 : vector<2x256xf32>
    %cst_584 = arith.constant 0.000000e+00 : f32
    %1850 = vector.broadcast %cst_584 : f32 to vector<2x256xf32>
    %1851 = arith.addf %1850, %1849 : vector<2x256xf32>
    %1852 = vector.extract_strided_slice %1844 {offsets = [0, 1], sizes = [2, 1], strides = [1, 1]} : vector<2x2xf32> to vector<2x1xf32>
    %1853 = vector.extract_strided_slice %1842 {offsets = [1, 0], sizes = [1, 256], strides = [1, 1]} : vector<2x256xf32> to vector<1x256xf32>
    %1854 = vector.broadcast %1852 : vector<2x1xf32> to vector<2x256xf32>
    %1855 = vector.broadcast %1853 : vector<1x256xf32> to vector<2x256xf32>
    %1856 = arith.mulf %1854, %1855 : vector<2x256xf32>
    %1857 = arith.addf %1851, %1856 : vector<2x256xf32>
    %1858 = arith.addf %1834, %1857 : vector<2x256xf32>
    %c7_i32_585 = arith.constant 7 : i32
    %1859 = vector.broadcast %c7_i32_585 : i32 to vector<1x256xi32>
    %1860 = arith.cmpi sge, %4, %1859 : vector<1x256xi32>
    %c7_i32_586 = arith.constant 7 : i32
    %1861 = tpu.dynamic_rotate %1786 by %c7_i32_586 dim 1 : vector<2x256xf32>, i32 -> vector<2x256xf32>
    %cst_587 = arith.constant 0.000000e+00 : f32
    %1862 = vector.shape_cast %1860 : vector<1x256xi1> to vector<1x256xi1>
    %1863 = vector.broadcast %1862 : vector<1x256xi1> to vector<2x256xi1>
    %1864 = vector.broadcast %cst_587 : f32 to vector<2x256xf32>
    %1865 = arith.select %1863, %1861, %1864 : vector<2x256xi1>, vector<2x256xf32>
    %c2_588 = arith.constant 2 : index
    %c3_589 = arith.constant 3 : index
    %c0_590 = arith.constant 0 : index
    %c0_591 = arith.constant 0 : index
    %1866 = vector.load %arg10[%c2_588, %c3_589, %c0_590, %c0_591] : memref<3x9x2x2xf32, #tpu.memory_space<vmem>>, vector<1x1x2x2xf32>
    %1867 = vector.shape_cast %1866 : vector<1x1x2x2xf32> to vector<2x2xf32>
    %1868 = vector.extract_strided_slice %1867 {offsets = [0, 0], sizes = [2, 1], strides = [1, 1]} : vector<2x2xf32> to vector<2x1xf32>
    %1869 = vector.extract_strided_slice %1865 {offsets = [0, 0], sizes = [1, 256], strides = [1, 1]} : vector<2x256xf32> to vector<1x256xf32>
    %1870 = vector.broadcast %1868 : vector<2x1xf32> to vector<2x256xf32>
    %1871 = vector.broadcast %1869 : vector<1x256xf32> to vector<2x256xf32>
    %1872 = arith.mulf %1870, %1871 : vector<2x256xf32>
    %cst_592 = arith.constant 0.000000e+00 : f32
    %1873 = vector.broadcast %cst_592 : f32 to vector<2x256xf32>
    %1874 = arith.addf %1873, %1872 : vector<2x256xf32>
    %1875 = vector.extract_strided_slice %1867 {offsets = [0, 1], sizes = [2, 1], strides = [1, 1]} : vector<2x2xf32> to vector<2x1xf32>
    %1876 = vector.extract_strided_slice %1865 {offsets = [1, 0], sizes = [1, 256], strides = [1, 1]} : vector<2x256xf32> to vector<1x256xf32>
    %1877 = vector.broadcast %1875 : vector<2x1xf32> to vector<2x256xf32>
    %1878 = vector.broadcast %1876 : vector<1x256xf32> to vector<2x256xf32>
    %1879 = arith.mulf %1877, %1878 : vector<2x256xf32>
    %1880 = arith.addf %1874, %1879 : vector<2x256xf32>
    %1881 = arith.addf %1858, %1880 : vector<2x256xf32>
    %c2_593 = arith.constant 2 : index
    %c4_594 = arith.constant 4 : index
    %c0_595 = arith.constant 0 : index
    %c0_596 = arith.constant 0 : index
    %1882 = vector.load %arg10[%c2_593, %c4_594, %c0_595, %c0_596] : memref<3x9x2x2xf32, #tpu.memory_space<vmem>>, vector<1x1x2x2xf32>
    %1883 = vector.shape_cast %1882 : vector<1x1x2x2xf32> to vector<2x2xf32>
    %1884 = vector.extract_strided_slice %1883 {offsets = [0, 0], sizes = [2, 1], strides = [1, 1]} : vector<2x2xf32> to vector<2x1xf32>
    %1885 = vector.extract_strided_slice %1786 {offsets = [0, 0], sizes = [1, 256], strides = [1, 1]} : vector<2x256xf32> to vector<1x256xf32>
    %1886 = vector.broadcast %1884 : vector<2x1xf32> to vector<2x256xf32>
    %1887 = vector.broadcast %1885 : vector<1x256xf32> to vector<2x256xf32>
    %1888 = arith.mulf %1886, %1887 : vector<2x256xf32>
    %cst_597 = arith.constant 0.000000e+00 : f32
    %1889 = vector.broadcast %cst_597 : f32 to vector<2x256xf32>
    %1890 = arith.addf %1889, %1888 : vector<2x256xf32>
    %1891 = vector.extract_strided_slice %1883 {offsets = [0, 1], sizes = [2, 1], strides = [1, 1]} : vector<2x2xf32> to vector<2x1xf32>
    %1892 = vector.extract_strided_slice %1786 {offsets = [1, 0], sizes = [1, 256], strides = [1, 1]} : vector<2x256xf32> to vector<1x256xf32>
    %1893 = vector.broadcast %1891 : vector<2x1xf32> to vector<2x256xf32>
    %1894 = vector.broadcast %1892 : vector<1x256xf32> to vector<2x256xf32>
    %1895 = arith.mulf %1893, %1894 : vector<2x256xf32>
    %1896 = arith.addf %1890, %1895 : vector<2x256xf32>
    %1897 = arith.addf %1881, %1896 : vector<2x256xf32>
    %c9_i32_598 = arith.constant 9 : i32
    %1898 = vector.broadcast %c9_i32_598 : i32 to vector<1x256xi32>
    %1899 = arith.cmpi slt, %4, %1898 : vector<1x256xi32>
    %c249_i32 = arith.constant 249 : i32
    %1900 = tpu.dynamic_rotate %1786 by %c249_i32 dim 1 : vector<2x256xf32>, i32 -> vector<2x256xf32>
    %cst_599 = arith.constant 0.000000e+00 : f32
    %1901 = vector.shape_cast %1899 : vector<1x256xi1> to vector<1x256xi1>
    %1902 = vector.broadcast %1901 : vector<1x256xi1> to vector<2x256xi1>
    %1903 = vector.broadcast %cst_599 : f32 to vector<2x256xf32>
    %1904 = arith.select %1902, %1900, %1903 : vector<2x256xi1>, vector<2x256xf32>
    %c2_600 = arith.constant 2 : index
    %c5_601 = arith.constant 5 : index
    %c0_602 = arith.constant 0 : index
    %c0_603 = arith.constant 0 : index
    %1905 = vector.load %arg10[%c2_600, %c5_601, %c0_602, %c0_603] : memref<3x9x2x2xf32, #tpu.memory_space<vmem>>, vector<1x1x2x2xf32>
    %1906 = vector.shape_cast %1905 : vector<1x1x2x2xf32> to vector<2x2xf32>
    %1907 = vector.extract_strided_slice %1906 {offsets = [0, 0], sizes = [2, 1], strides = [1, 1]} : vector<2x2xf32> to vector<2x1xf32>
    %1908 = vector.extract_strided_slice %1904 {offsets = [0, 0], sizes = [1, 256], strides = [1, 1]} : vector<2x256xf32> to vector<1x256xf32>
    %1909 = vector.broadcast %1907 : vector<2x1xf32> to vector<2x256xf32>
    %1910 = vector.broadcast %1908 : vector<1x256xf32> to vector<2x256xf32>
    %1911 = arith.mulf %1909, %1910 : vector<2x256xf32>
    %cst_604 = arith.constant 0.000000e+00 : f32
    %1912 = vector.broadcast %cst_604 : f32 to vector<2x256xf32>
    %1913 = arith.addf %1912, %1911 : vector<2x256xf32>
    %1914 = vector.extract_strided_slice %1906 {offsets = [0, 1], sizes = [2, 1], strides = [1, 1]} : vector<2x2xf32> to vector<2x1xf32>
    %1915 = vector.extract_strided_slice %1904 {offsets = [1, 0], sizes = [1, 256], strides = [1, 1]} : vector<2x256xf32> to vector<1x256xf32>
    %1916 = vector.broadcast %1914 : vector<2x1xf32> to vector<2x256xf32>
    %1917 = vector.broadcast %1915 : vector<1x256xf32> to vector<2x256xf32>
    %1918 = arith.mulf %1916, %1917 : vector<2x256xf32>
    %1919 = arith.addf %1913, %1918 : vector<2x256xf32>
    %1920 = arith.addf %1897, %1919 : vector<2x256xf32>
    %c144_i32 = arith.constant 144 : i32
    %1921 = vector.broadcast %c144_i32 : i32 to vector<1x256xi32>
    %1922 = arith.cmpi slt, %2, %1921 : vector<1x256xi32>
    %c7_i32_605 = arith.constant 7 : i32
    %1923 = vector.broadcast %c7_i32_605 : i32 to vector<1x256xi32>
    %1924 = arith.cmpi sge, %4, %1923 : vector<1x256xi32>
    %1925 = arith.andi %1922, %1924 : vector<1x256xi1>
    %c151_i32 = arith.constant 151 : i32
    %1926 = tpu.dynamic_rotate %1786 by %c151_i32 dim 1 : vector<2x256xf32>, i32 -> vector<2x256xf32>
    %cst_606 = arith.constant 0.000000e+00 : f32
    %1927 = vector.shape_cast %1925 : vector<1x256xi1> to vector<1x256xi1>
    %1928 = vector.broadcast %1927 : vector<1x256xi1> to vector<2x256xi1>
    %1929 = vector.broadcast %cst_606 : f32 to vector<2x256xf32>
    %1930 = arith.select %1928, %1926, %1929 : vector<2x256xi1>, vector<2x256xf32>
    %c2_607 = arith.constant 2 : index
    %c6_608 = arith.constant 6 : index
    %c0_609 = arith.constant 0 : index
    %c0_610 = arith.constant 0 : index
    %1931 = vector.load %arg10[%c2_607, %c6_608, %c0_609, %c0_610] : memref<3x9x2x2xf32, #tpu.memory_space<vmem>>, vector<1x1x2x2xf32>
    %1932 = vector.shape_cast %1931 : vector<1x1x2x2xf32> to vector<2x2xf32>
    %1933 = vector.extract_strided_slice %1932 {offsets = [0, 0], sizes = [2, 1], strides = [1, 1]} : vector<2x2xf32> to vector<2x1xf32>
    %1934 = vector.extract_strided_slice %1930 {offsets = [0, 0], sizes = [1, 256], strides = [1, 1]} : vector<2x256xf32> to vector<1x256xf32>
    %1935 = vector.broadcast %1933 : vector<2x1xf32> to vector<2x256xf32>
    %1936 = vector.broadcast %1934 : vector<1x256xf32> to vector<2x256xf32>
    %1937 = arith.mulf %1935, %1936 : vector<2x256xf32>
    %cst_611 = arith.constant 0.000000e+00 : f32
    %1938 = vector.broadcast %cst_611 : f32 to vector<2x256xf32>
    %1939 = arith.addf %1938, %1937 : vector<2x256xf32>
    %1940 = vector.extract_strided_slice %1932 {offsets = [0, 1], sizes = [2, 1], strides = [1, 1]} : vector<2x2xf32> to vector<2x1xf32>
    %1941 = vector.extract_strided_slice %1930 {offsets = [1, 0], sizes = [1, 256], strides = [1, 1]} : vector<2x256xf32> to vector<1x256xf32>
    %1942 = vector.broadcast %1940 : vector<2x1xf32> to vector<2x256xf32>
    %1943 = vector.broadcast %1941 : vector<1x256xf32> to vector<2x256xf32>
    %1944 = arith.mulf %1942, %1943 : vector<2x256xf32>
    %1945 = arith.addf %1939, %1944 : vector<2x256xf32>
    %1946 = arith.addf %1920, %1945 : vector<2x256xf32>
    %c144_i32_612 = arith.constant 144 : i32
    %1947 = tpu.dynamic_rotate %1786 by %c144_i32_612 dim 1 : vector<2x256xf32>, i32 -> vector<2x256xf32>
    %cst_613 = arith.constant 0.000000e+00 : f32
    %1948 = vector.shape_cast %1922 : vector<1x256xi1> to vector<1x256xi1>
    %1949 = vector.broadcast %1948 : vector<1x256xi1> to vector<2x256xi1>
    %1950 = vector.broadcast %cst_613 : f32 to vector<2x256xf32>
    %1951 = arith.select %1949, %1947, %1950 : vector<2x256xi1>, vector<2x256xf32>
    %c2_614 = arith.constant 2 : index
    %c7_615 = arith.constant 7 : index
    %c0_616 = arith.constant 0 : index
    %c0_617 = arith.constant 0 : index
    %1952 = vector.load %arg10[%c2_614, %c7_615, %c0_616, %c0_617] : memref<3x9x2x2xf32, #tpu.memory_space<vmem>>, vector<1x1x2x2xf32>
    %1953 = vector.shape_cast %1952 : vector<1x1x2x2xf32> to vector<2x2xf32>
    %1954 = vector.extract_strided_slice %1953 {offsets = [0, 0], sizes = [2, 1], strides = [1, 1]} : vector<2x2xf32> to vector<2x1xf32>
    %1955 = vector.extract_strided_slice %1951 {offsets = [0, 0], sizes = [1, 256], strides = [1, 1]} : vector<2x256xf32> to vector<1x256xf32>
    %1956 = vector.broadcast %1954 : vector<2x1xf32> to vector<2x256xf32>
    %1957 = vector.broadcast %1955 : vector<1x256xf32> to vector<2x256xf32>
    %1958 = arith.mulf %1956, %1957 : vector<2x256xf32>
    %cst_618 = arith.constant 0.000000e+00 : f32
    %1959 = vector.broadcast %cst_618 : f32 to vector<2x256xf32>
    %1960 = arith.addf %1959, %1958 : vector<2x256xf32>
    %1961 = vector.extract_strided_slice %1953 {offsets = [0, 1], sizes = [2, 1], strides = [1, 1]} : vector<2x2xf32> to vector<2x1xf32>
    %1962 = vector.extract_strided_slice %1951 {offsets = [1, 0], sizes = [1, 256], strides = [1, 1]} : vector<2x256xf32> to vector<1x256xf32>
    %1963 = vector.broadcast %1961 : vector<2x1xf32> to vector<2x256xf32>
    %1964 = vector.broadcast %1962 : vector<1x256xf32> to vector<2x256xf32>
    %1965 = arith.mulf %1963, %1964 : vector<2x256xf32>
    %1966 = arith.addf %1960, %1965 : vector<2x256xf32>
    %1967 = arith.addf %1946, %1966 : vector<2x256xf32>
    %c9_i32_619 = arith.constant 9 : i32
    %1968 = vector.broadcast %c9_i32_619 : i32 to vector<1x256xi32>
    %1969 = arith.cmpi slt, %4, %1968 : vector<1x256xi32>
    %1970 = arith.andi %1922, %1969 : vector<1x256xi1>
    %c137_i32 = arith.constant 137 : i32
    %1971 = tpu.dynamic_rotate %1786 by %c137_i32 dim 1 : vector<2x256xf32>, i32 -> vector<2x256xf32>
    %cst_620 = arith.constant 0.000000e+00 : f32
    %1972 = vector.shape_cast %1970 : vector<1x256xi1> to vector<1x256xi1>
    %1973 = vector.broadcast %1972 : vector<1x256xi1> to vector<2x256xi1>
    %1974 = vector.broadcast %cst_620 : f32 to vector<2x256xf32>
    %1975 = arith.select %1973, %1971, %1974 : vector<2x256xi1>, vector<2x256xf32>
    %c2_621 = arith.constant 2 : index
    %c8_622 = arith.constant 8 : index
    %c0_623 = arith.constant 0 : index
    %c0_624 = arith.constant 0 : index
    %1976 = vector.load %arg10[%c2_621, %c8_622, %c0_623, %c0_624] : memref<3x9x2x2xf32, #tpu.memory_space<vmem>>, vector<1x1x2x2xf32>
    %1977 = vector.shape_cast %1976 : vector<1x1x2x2xf32> to vector<2x2xf32>
    %1978 = vector.extract_strided_slice %1977 {offsets = [0, 0], sizes = [2, 1], strides = [1, 1]} : vector<2x2xf32> to vector<2x1xf32>
    %1979 = vector.extract_strided_slice %1975 {offsets = [0, 0], sizes = [1, 256], strides = [1, 1]} : vector<2x256xf32> to vector<1x256xf32>
    %1980 = vector.broadcast %1978 : vector<2x1xf32> to vector<2x256xf32>
    %1981 = vector.broadcast %1979 : vector<1x256xf32> to vector<2x256xf32>
    %1982 = arith.mulf %1980, %1981 : vector<2x256xf32>
    %cst_625 = arith.constant 0.000000e+00 : f32
    %1983 = vector.broadcast %cst_625 : f32 to vector<2x256xf32>
    %1984 = arith.addf %1983, %1982 : vector<2x256xf32>
    %1985 = vector.extract_strided_slice %1977 {offsets = [0, 1], sizes = [2, 1], strides = [1, 1]} : vector<2x2xf32> to vector<2x1xf32>
    %1986 = vector.extract_strided_slice %1975 {offsets = [1, 0], sizes = [1, 256], strides = [1, 1]} : vector<2x256xf32> to vector<1x256xf32>
    %1987 = vector.broadcast %1985 : vector<2x1xf32> to vector<2x256xf32>
    %1988 = vector.broadcast %1986 : vector<1x256xf32> to vector<2x256xf32>
    %1989 = arith.mulf %1987, %1988 : vector<2x256xf32>
    %1990 = arith.addf %1984, %1989 : vector<2x256xf32>
    %1991 = arith.addf %1967, %1990 : vector<2x256xf32>
    %1992 = vector.broadcast %1788 : vector<2x1xf32> to vector<2x256xf32>
    %1993 = arith.addf %1991, %1992 : vector<2x256xf32>
    %1994 = vector.extract_strided_slice %441 {offsets = [0, 6], sizes = [1, 1], strides = [1, 1]} : vector<1x8xf32> to vector<1x1xf32>
    %1995 = vector.extract_strided_slice %1993 {offsets = [0, 0], sizes = [1, 256], strides = [1, 1]} : vector<2x256xf32> to vector<1x256xf32>
    %1996 = vector.broadcast %1994 : vector<1x1xf32> to vector<1x256xf32>
    %1997 = arith.mulf %1996, %1995 : vector<1x256xf32>
    %1998 = vector.extract_strided_slice %441 {offsets = [0, 7], sizes = [1, 1], strides = [1, 1]} : vector<1x8xf32> to vector<1x1xf32>
    %1999 = vector.extract_strided_slice %1993 {offsets = [1, 0], sizes = [1, 256], strides = [1, 1]} : vector<2x256xf32> to vector<1x256xf32>
    %2000 = vector.broadcast %1998 : vector<1x1xf32> to vector<1x256xf32>
    %2001 = arith.mulf %2000, %1999 : vector<1x256xf32>
    %2002 = arith.addf %1997, %2001 : vector<1x256xf32>
    %2003 = arith.addf %1560, %2002 : vector<1x256xf32>
    %c0_626 = arith.constant 0 : index
    %c0_627 = arith.constant 0 : index
    %2004 = vector.load %arg13[%c0_626, %c0_627] : memref<1x1xf32, #tpu.memory_space<vmem>>, vector<1x1xf32>
    %2005 = vector.broadcast %2004 : vector<1x1xf32> to vector<1x256xf32>
    %2006 = arith.addf %2003, %2005 : vector<1x256xf32>
    %c0_628 = arith.constant 0 : index
    %c0_629 = arith.constant 0 : index
    %2007 = vector.load %arg14[%c0_628, %c0_629] : memref<2x1xf32, #tpu.memory_space<vmem>>, vector<2x1xf32>
    %2008 = vector.broadcast %2007 : vector<2x1xf32> to vector<2x256xf32>
    %2009 = arith.mulf %434, %2008 : vector<2x256xf32>
    %cst_630 = arith.constant dense<0.000000e+00> : vector<256xf32>
    %2010 = vector.multi_reduction <add>, %2009, %cst_630 [0] : vector<2x256xf32> to vector<256xf32>
    %2011 = vector.shape_cast %2010 : vector<256xf32> to vector<1x256xf32>
    %c0_631 = arith.constant 0 : index
    %c0_632 = arith.constant 0 : index
    %2012 = vector.load %arg15[%c0_631, %c0_632] : memref<1x1xf32, #tpu.memory_space<vmem>>, vector<1x1xf32>
    %2013 = vector.broadcast %2012 : vector<1x1xf32> to vector<1x256xf32>
    %2014 = arith.addf %2011, %2013 : vector<1x256xf32>
    %2015 = arith.addf %2006, %2014 : vector<1x256xf32>
    %cst_633 = arith.constant 0.000000e+00 : f32
    %2016 = vector.broadcast %cst_633 : f32 to vector<1x256xf32>
    %2017 = arith.subf %2016, %2015 : vector<1x256xf32>
    %2018 = math.exp %2017 : vector<1x256xf32>
    %cst_634 = arith.constant 1.000000e+00 : f32
    %2019 = vector.broadcast %cst_634 : f32 to vector<1x256xf32>
    %2020 = arith.addf %2019, %2018 : vector<1x256xf32>
    %cst_635 = arith.constant 1.000000e+00 : f32
    %2021 = vector.broadcast %cst_635 : f32 to vector<1x256xf32>
    %2022 = arith.divf %2021, %2020 : vector<1x256xf32>
    %2023 = vector.broadcast %2022 : vector<1x256xf32> to vector<2x256xf32>
    %2024 = arith.mulf %418, %2023 : vector<2x256xf32>
    %2025 = arith.addf %2024, %1 : vector<2x256xf32>
    %c0_636 = arith.constant 0 : index
    %c0_637 = arith.constant 0 : index
    %c0_638 = arith.constant 0 : index
    %2026 = vector.load %arg16[%c0_636, %c0_637, %c0_638] : memref<1x2x256xf32, #tpu.memory_space<vmem>>, vector<1x2x256xf32>
    %2027 = vector.shape_cast %2026 : vector<1x2x256xf32> to vector<2x256xf32>
    %2028 = vector.shape_cast %2025 : vector<2x256xf32> to vector<1x2x256xf32>
    tpu.vector_store %arg16[%c0_636, %c0_637, %c0_638], %2028 {strides = array<i32>} : memref<1x2x256xf32, #tpu.memory_space<vmem>>, vector<1x2x256xf32>,
    return
  }
  func.func @transform_0(%arg0: i32) -> (i32, i32, i32) {
    %c0_i32 = arith.constant 0 : i32
    %c0_i32_0 = arith.constant 0 : i32
    %c0_i32_1 = arith.constant 0 : i32
    return %arg0, %c0_i32, %c0_i32_0 : i32, i32, i32
  }
  func.func @transform_1(%arg0: i32) -> (i32, i32, i32) {
    %c0_i32 = arith.constant 0 : i32
    %c0_i32_0 = arith.constant 0 : i32
    %c0_i32_1 = arith.constant 0 : i32
    %c0_i32_2 = arith.constant 0 : i32
    return %c0_i32, %c0_i32_0, %c0_i32_1 : i32, i32, i32
  }
  func.func @transform_2(%arg0: i32) -> (i32, i32) {
    %c0_i32 = arith.constant 0 : i32
    %c0_i32_0 = arith.constant 0 : i32
    %c0_i32_1 = arith.constant 0 : i32
    return %c0_i32, %c0_i32_0 : i32, i32
  }
  func.func @transform_3(%arg0: i32) -> (i32, i32, i32) {
    %c0_i32 = arith.constant 0 : i32
    %c0_i32_0 = arith.constant 0 : i32
    %c0_i32_1 = arith.constant 0 : i32
    %c0_i32_2 = arith.constant 0 : i32
    return %c0_i32, %c0_i32_0, %c0_i32_1 : i32, i32, i32
  }
  func.func @transform_4(%arg0: i32) -> (i32, i32) {
    %c0_i32 = arith.constant 0 : i32
    %c0_i32_0 = arith.constant 0 : i32
    %c0_i32_1 = arith.constant 0 : i32
    return %c0_i32, %c0_i32_0 : i32, i32
  }
  func.func @transform_5(%arg0: i32) -> (i32, i32, i32) {
    %c0_i32 = arith.constant 0 : i32
    %c0_i32_0 = arith.constant 0 : i32
    %c0_i32_1 = arith.constant 0 : i32
    %c0_i32_2 = arith.constant 0 : i32
    return %c0_i32, %c0_i32_0, %c0_i32_1 : i32, i32, i32
  }
  func.func @transform_6(%arg0: i32) -> (i32, i32, i32) {
    %c0_i32 = arith.constant 0 : i32
    %c0_i32_0 = arith.constant 0 : i32
    %c0_i32_1 = arith.constant 0 : i32
    %c0_i32_2 = arith.constant 0 : i32
    return %c0_i32, %c0_i32_0, %c0_i32_1 : i32, i32, i32
  }
  func.func @transform_7(%arg0: i32) -> (i32, i32, i32, i32) {
    %c0_i32 = arith.constant 0 : i32
    %c0_i32_0 = arith.constant 0 : i32
    %c0_i32_1 = arith.constant 0 : i32
    %c0_i32_2 = arith.constant 0 : i32
    %c0_i32_3 = arith.constant 0 : i32
    return %c0_i32, %c0_i32_0, %c0_i32_1, %c0_i32_2 : i32, i32, i32, i32
  }
  func.func @transform_8(%arg0: i32) -> (i32, i32, i32) {
    %c0_i32 = arith.constant 0 : i32
    %c0_i32_0 = arith.constant 0 : i32
    %c0_i32_1 = arith.constant 0 : i32
    %c0_i32_2 = arith.constant 0 : i32
    return %c0_i32, %c0_i32_0, %c0_i32_1 : i32, i32, i32
  }
  func.func @transform_9(%arg0: i32) -> (i32, i32, i32, i32) {
    %c0_i32 = arith.constant 0 : i32
    %c0_i32_0 = arith.constant 0 : i32
    %c0_i32_1 = arith.constant 0 : i32
    %c0_i32_2 = arith.constant 0 : i32
    %c0_i32_3 = arith.constant 0 : i32
    return %c0_i32, %c0_i32_0, %c0_i32_1, %c0_i32_2 : i32, i32, i32, i32
  }
  func.func @transform_10(%arg0: i32) -> (i32, i32, i32) {
    %c0_i32 = arith.constant 0 : i32
    %c0_i32_0 = arith.constant 0 : i32
    %c0_i32_1 = arith.constant 0 : i32
    %c0_i32_2 = arith.constant 0 : i32
    return %c0_i32, %c0_i32_0, %c0_i32_1 : i32, i32, i32
  }
  func.func @transform_11(%arg0: i32) -> (i32, i32) {
    %c0_i32 = arith.constant 0 : i32
    %c0_i32_0 = arith.constant 0 : i32
    %c0_i32_1 = arith.constant 0 : i32
    return %c0_i32, %c0_i32_0 : i32, i32
  }
  func.func @transform_12(%arg0: i32) -> (i32, i32) {
    %c0_i32 = arith.constant 0 : i32
    %c0_i32_0 = arith.constant 0 : i32
    %c0_i32_1 = arith.constant 0 : i32
    return %c0_i32, %c0_i32_0 : i32, i32
  }
  func.func @transform_13(%arg0: i32) -> (i32, i32) {
    %c0_i32 = arith.constant 0 : i32
    %c0_i32_0 = arith.constant 0 : i32
    %c0_i32_1 = arith.constant 0 : i32
    return %c0_i32, %c0_i32_0 : i32, i32
  }
  func.func @transform_14(%arg0: i32) -> (i32, i32) {
    %c0_i32 = arith.constant 0 : i32
    %c0_i32_0 = arith.constant 0 : i32
    %c0_i32_1 = arith.constant 0 : i32
    return %c0_i32, %c0_i32_0 : i32, i32
  }
  func.func @transform_15(%arg0: i32) -> (i32, i32, i32) {
    %c0_i32 = arith.constant 0 : i32
    %c0_i32_0 = arith.constant 0 : i32
    %c0_i32_1 = arith.constant 0 : i32
    return %arg0, %c0_i32, %c0_i32_0 : i32, i32, i32
  }
}

</mosaic_0001>

<bundles_post_ra>
// kernel: tpu_custom_call.1
= control target key start
LH: loop header
LB: loop body
LE: loop exit
PB: predicated region body
PF: predicated region fallthrough
CT: control target
= control target key end

     0   :  { %s8238_s0 = inlined_call_operand.vmem [shape: f32[2,2,256], index: 0, kind: input, shape index: {}]   ;;  %s8239_s1 = inlined_call_operand.vmem [shape: f32[9,2,2], index: 1, kind: input, shape index: {}]   ;;  %s8240_s2 = inlined_call_operand.vmem [shape: f32[2,1], index: 2, kind: input, shape index: {}]   ;;  %s8241_s3 = inlined_call_operand.vmem [shape: f32[9,2,2], index: 3, kind: input, shape index: {}]   ;;  %s8242_s4 = inlined_call_operand.vmem [shape: f32[2,1], index: 4, kind: input, shape index: {}]   ;;  %s8243_s5 = inlined_call_operand.vmem [shape: f32[4,2,2], index: 5, kind: input, shape index: {}]   ;;  %s8244_s6 = inlined_call_operand.vmem [shape: f32[4,2,1], index: 6, kind: input, shape index: {}]   ;;  %s8245_s7 = inlined_call_operand.vmem [shape: f32[4,9,2,2], index: 7, kind: input, shape index: {}]   ;;  %s8246_s8 = inlined_call_operand.vmem [shape: f32[4,2,1], index: 8, kind: input, shape index: {}]   ;;  %s8247_s9 = inlined_call_operand.vmem [shape: f32[3,9,2,2], index: 9, kind: input, shape index: {}]   ;;  %s8248_s10 = inlined_call_operand.vmem [shape: f32[3,2,1], index: 10, kind: input, shape index: {}]   ;;  %s8249_s11 = inlined_call_operand.vmem [shape: f32[1,8], index: 11, kind: input, shape index: {}]   ;;  %s8250_s12 = inlined_call_operand.<no memory space> [shape: f32[1,1], index: 12, kind: input, shape index: {}]   ;;  %s8251_s13 = inlined_call_operand.vmem [shape: f32[2,1], index: 13, kind: input, shape index: {}]   ;;  %s8252_s15 = inlined_call_operand.hbm [shape: f32[2,2,256], index: 15, kind: output, shape index: {}]   ;;  %s8253_s14 = inlined_call_operand.<no memory space> [shape: f32[1,1], index: 14, kind: input, shape index: {}]  }
   0x1   :  { %8406 = sst [smem:[#allocation109_spill]] %s8238_s0  ;;  %v20_v0 = vstv %s8250_s12  ;;  %v22_v1 = vstv %s8253_s14 }
   0x2   :  { %8407 = sst [smem:[#allocation110_spill]] %s8239_s1  ;;  %21 = vst [vmem:[#allocation2] sm:$0x1] %v20_v0  ;;  %23 = vst [vmem:[#allocation3] sm:$0x1] %v22_v1 }
   0x3   :  { %8408 = sst [smem:[#allocation111_spill]] %s8240_s2 }
   0x4   :  { %8409 = sst [smem:[#allocation112_spill]] %s8241_s3 }
   0x5   :  { %8410 = sst [smem:[#allocation113_spill]] %s8242_s4 }
   0x6   :  { %8411 = sst [smem:[#allocation114_spill]] %s8243_s5 }
   0x7   :  { %24 = vsyncpa [#allocation5], 0 }
   0x8   :  { %26 = vsyncpa [#allocation5 + $0x1], 0  ;;  %s5262_s22 = smov 0   ;;  %s5264_s23 = smov 0  }
   0x9   :  { %s5266_s24 = smov 0   ;;  %s5268_s25 = smov 0  }
   0xa LB: > { %8412 = sst [smem:[#allocation7_spill]] %s5131_s24  ;;  %s5283_s12 = sadd.s32 4294967295, %s5135_s25   ;;  %s5135_s25 = sphi %s5268_s25, %s8770_s25   ;;  %s5131_s24 = sphi %s5266_s24, %s8772_s24   ;;  %s5127_s23 = sphi %s5264_s23, %s8774_s23   ;;  %s5123_s22 = sphi %s5262_s22, %s8773_s22  }
   0xb   : > { %s4827_s14 = sadd.s32 4294967294, %s5135_s25   ;;  %s5287_s26 = sadd.s32 1, %s5135_s25  }
   0xc   : > { %8413 = sst [smem:[#allocation8_spill]] %s5287_s26  ;;  %s359_s27 = sadd.s32 1, %s5131_s24 }
   0xd   : > { %s356_s28 = ssub.s32 %s5135_s25, %s5287_s26  ;;  %p369_p0 = scmp.ne.s32.totalorder %s5131_s24, %s5127_s23 }
   0xe   : > { %p357_p1 = scmp.eq.s32.totalorder %s356_s28, 0  ;;  %p370_p2 = scmp.eq.s32.totalorder %s5283_s12, 1 }
   0xf   : > { %p375_p3 = scmp.ne.s32.totalorder %s5127_s23, %s5123_s22  ;;  %p376_p4 = scmp.eq.s32.totalorder %s4827_s14, 1 }
  0x10   : > { %s5298_s29 = scalar_select %p357_p1, %s5131_s24, %s359_s27  }
  0x11   : > { %p5300_p5 = por %p370_p2, %p369_p0  ;;  %p5304_p6 = por %p376_p4, %p375_p3 }
  0x12   : > { %8414 = sst [smem:[#allocation9_spill]] %s5298_s29  ;;  %p4830_p7 = scmp.ge.s32.totalorder %s5135_s25, 1 }
  0x13   : > { %s8416_s16 = scalar_select %p5304_p6, 1, 0 }
  0x14   : > { %p444_p8 = scmp.lt.s32.totalorder %s5135_s25, 3 }
  0x15   : > { %8417 = sst [smem:[#allocation10_spill]] %s8416_s16 }
  0x16   : > { %p445_p9 = pnand %p4830_p7, %p444_p8 }
  0x18   : > { %448 = sbr.rel (%p445_p9) target bundleno = 1650 (0x672), region = 80 }
  0x1f   : > { %s8418_s1 = sld [smem:[#allocation110_spill]]  ;;  %p492_p10 = scmp.lt.s32.totalorder %s5283_s12, 1  ;;  %v498_v3 = vlaneseq  ;;  %v8274_v4 = vmov 0   ;;  %v8272_v5 = vmov 1   ;;  %v5139_v6 = vmov 1983009808  }
  0x20   : > { %5007 = vset.pattern.permute.xlu1 %v8274_v4  ;;  %5010 = vset.pattern.permute.xlu0 %v8272_v5  ;;  %v512_v7 = vunpack.c.l.s4 %v5139_v6  ;;  %s8419_s0 = sld [smem:[#allocation109_spill]]  ;;  %s8260_s28 = smov 17  }
  0x21   : > { %s493_s19 = scalar_select %p492_p10, %s5283_s12, 1  ;;  %v5318_v8 = vshrl.u32 %v498_v3, 7  ;;  %v5497_v6 = vand.u32 127, %v498_v3 }
  0x22   : > { %v513_v9 = vunpack.c.0.s8 %v512_v7  ;;  %s8258_s17 = smov 16   ;;  %s8262_s21 = smov 111  }
  0x23   : > { %s4928_s20 = sshll.u32 %s493_s19, 2  ;;  %v761_v16 = vsub.s32 3, %v5318_v8  ;;  %s8256_s19 = smov 1   ;;  %v735_v21 = vsub.s32 2, %v5318_v8  ;;  %v5467_v52 = vsub.s32 0, %v5318_v8  ;;  %v5470_v53 = vsub.s32 1, %v5318_v8 }
  0x24   : > { %v516_v11 = vsub.s32 %v513_v9, %v5318_v8  ;;  %s8422_s3 = sld [smem:[#allocation112_spill]]  ;;  %s8425_s2 = sld [smem:[#allocation111_spill]]  ;;  %v5504_v9 = vadd.s32 128, %v5497_v6  ;;  %vm8280_vm0 = vcmp.ge.s32.totalorder %v5497_v6, 16  ;;  %vm525_vm2 = vcmp.lt.s32.totalorder %v5497_v6, 17 }
  0x25   : > { %v534_v2 = vld [vmem:[%s8418_s1] sm:$0x3]  ;;  %v5341_v14 = vld [vmem:[%s8418_s1 + $0x2] sm:$0x3]  ;;  %v4835_v15 = vld [vmem:[%s8418_s1 + $0x4] sm:$0x3] }
  0x26   : > { %537 = vperm.xlu1 %5007, %v534_v2   ;;  %s496_s27 = scalar_lea.vmem %s8419_s0, %s4928_s20  ;;  %s8254_s20 = smov 15   ;;  %v4837_v18 = vld [vmem:[%s8418_s1 + $0x8] sm:$0x3]  ;;  %v4836_v19 = vld [vmem:[%s8418_s1 + $0x6] sm:$0x3]  ;;  %8427 = vst [vmem:[#allocation13_spill] sm:$0xff] %v5504_v9 }
  0x27   : > { %v5324_v10 = vld [vmem:[%s496_s27] sm:$0xf]  ;;  %v4839_v20 = vld [vmem:[%s8418_s1 + $0xc] sm:$0x3]  ;;  %v4841_v23 = vld [vmem:[%s8418_s1 + $0x10] sm:$0x3] }
  0x28   : > { %v5328_v12 = vrot.slane %v5324_v10, %v516_v11  ;;  %v5358_v17 = vrot.slane %v5324_v10, %v761_v16  ;;  %v5378_v22 = vrot.slane %v5324_v10, %v735_v21  ;;  %s8266_s27 = smov 127   ;;  %v4838_v25 = vld [vmem:[%s8418_s1 + $0xa] sm:$0x3]  ;;  %v4840_v31 = vld [vmem:[%s8418_s1 + $0xe] sm:$0x3]  ;;  %s8424_s0 = smov 111  }
  0x29   : > { %s8426_s4 = sld [smem:[#allocation113_spill]]  ;;  %v5507_v11 = vand.u32 15, %v5497_v6  ;;  %v5514_v16 = vand.u32 15, %v5504_v9  ;;  %vm8396_vm5 = vcmp.lt.s32.totalorder %v5497_v6, 16  ;;  %vm8281_vm7 = vcmp.lt.s32.totalorder %v5497_v6, 15  ;;  %s8440_s18 = smov 17  }
  0x2a   : > { %5008 = vset.pattern.permute.xlu1 %v8272_v5  ;;  %8420 = vst [vmem:[#allocation11_spill] sm:$0xff] %v5328_v12  ;;  %521 = vrot.lane.b32.xlu0 %v5328_v12, %s8260_s28  ;;  %v5334_v13 = vcombine.high %v5328_v12, %v5328_v12  ;;  %v1003_v24 = vld [vmem:[%s8422_s3] sm:$0x3]  ;;  %v4842_v26 = vld [vmem:[%s8422_s3 + $0x2] sm:$0x3]  ;;  %v772_v55 = vrot.slane %v5358_v17, %v5470_v53  ;;  %vm8270_vm10 = vcmp.lt.s32.totalorder %v5497_v6, 1 }
  0x2b   : > { %553 = vperm.xlu1 %5008, %v534_v2   ;;  %v4843_v27 = vld [vmem:[%s8422_s3 + $0x4] sm:$0x3]  ;;  %v4844_v28 = vld [vmem:[%s8422_s3 + $0x6] sm:$0x3]  ;;  %v4845_v29 = vld [vmem:[%s8422_s3 + $0x8] sm:$0x3]  ;;  %v746_v57 = vrot.slane %v5378_v22, %v5467_v52 }
  0x2c   : > { %8421 = vst [vmem:[#allocation12_spill] sm:$0xff] %v5334_v13  ;;  %v4846_v30 = vld [vmem:[%s8422_s3 + $0xa] sm:$0x3]  ;;  %v4847_v32 = vld [vmem:[%s8422_s3 + $0xc] sm:$0x3]  ;;  %vm8285_vm1 = vcmp.ge.s32.totalorder %v5507_v11, 1 }
  0x2d   : > { %v4848_v33 = vld [vmem:[%s8422_s3 + $0xe] sm:$0x3]  ;;  %v4849_v34 = vld [vmem:[%s8422_s3 + $0x10] sm:$0x3]  ;;  %v503_v35 = vld [vmem:[%s8425_s2] sm:$0x3] }
  0x2e   : > { %568 = vrot.lane.b32.xlu0 %v5328_v12, %s8258_s17  ;;  %vm5527_vm3 = vmand %vm8280_vm0, %vm8285_vm1  ;;  %vm507_vm4 = vcmp.ge.s32.totalorder %v5514_v16, 1  ;;  %vm8286_vm6 = vcmp.lt.s32.totalorder %v5507_v11, 15  ;;  %vm8395_vm9 = vcmp.lt.s32.totalorder %v5514_v16, 15  ;;  %vm8287_vm11 = vcmp.lt.s32.totalorder %v5497_v6, 127  ;;  %s8445_s14 = smov 112   ;;  %s8446_s5 = sld [smem:[#allocation114_spill]] }
  0x2f   : > { %570 = vrot.lane.b32.xlu1 %v5334_v13, %s8258_s17  ;;  %s8423_s17 = smov 113   ;;  %v994_v36 = vld [vmem:[%s8426_s4] sm:$0x3]  ;;  %vm5563_vm8 = vmand %vm8280_vm0, %vm8286_vm6  ;;  %vm8282_vm12 = vcmp.lt.s32.totalorder %v5504_v9, 240  ;;  %vm8271_vm13 = vcmp.lt.s32.totalorder %v5497_v6, 113  ;;  %vm8283_vm14 = vcmp.lt.s32.totalorder %v5497_v6, 112 }
  0x30   : > { %vm8284_vm15 = vcmp.lt.s32.totalorder %v5497_v6, 111  ;;  %s5151_s24 = smov 51   ;;  %s5152_s26 = smov 45  }
  0x31   : > { %s5153_s29 = smov 83   ;;  %s8363_s2 = smov 48  }
  0x32   : > { %523 = vrot.lane.b32.xlu0 %v5334_v13, %s8260_s28  ;;  %s8441_s28 = smov 16   ;;  %s5156_s3 = smov 125  }
  0x33   : > { %601 = vperm.xlu1 %5008, %v5341_v14   ;;  %s5162_s16 = smov 5   ;;  %s8578_s4 = smov 53  }
  0x34   : > { %s4929_s1 = sshll.u32 %s5283_s12, 6  ;;  %s5175_s12 = smov [#allocation4]  }
  0x36   : > { %624 = vrot.lane.b32.xlu0 %v5334_v13, %s8254_s20 }
  0x37   : > { %622 = vrot.lane.b32.xlu1 %v5328_v12, %s8254_s20  ;;  %s8264_s20 = smov 113  }
  0x38   : > { %5009 = vset.pattern.permute.xlu1 %v8274_v4 }
  0x3a   : > { %655 = vperm.xlu0 %5010, %v4835_v15  }
  0x3b   : > { %639 = vperm.xlu1 %5009, %v4835_v15  }
  0x3e   : > { %752 = vperm.xlu0 %5010, %v4837_v18  }
  0x3f   : > { %672 = vrot.lane.b32.xlu1 %v5328_v12, %s8256_s19 }
  0x40   : > { %5011 = vset.pattern.permute.xlu1 %v8272_v5 }
  0x42   : > { %835 = vrot.lane.b32.xlu0 %v5334_v13, %s8264_s20  ;;  %s8443_s20 = smov 1  }
  0x43   : > { %674 = vrot.lane.b32.xlu1 %v5334_v13, %s8256_s19  ;;  %s8268_s19 = smov 112  }
  0x46   : > { %866 = vperm.xlu0 %5010, %v4839_v20  }
  0x47   : > { %705 = vperm.xlu1 %5011, %v4836_v19  }
  0x4a   : > { %937 = vrot.lane.b32.xlu0 %v5334_v13, %s8262_s21  ;;  %s8442_s21 = smov 15  }
  0x4b   : > { %5012 = vset.pattern.permute.xlu1 %v8274_v4 }
  0x4c   : > { %726 = vperm.xlu1 %5012, %v4837_v18   ;;  %v8428_v18 = vmov 0 }
  0x4d   : > { %v8429_v18 = vsel %vm5527_vm3, 4294967295, %v8428_v18 }
  0x4e   : > { %968 = vperm.xlu0 %5010, %v4841_v23   ;;  %8430 = vst [vmem:[#allocation14_spill] sm:$0xff] %v8429_v18 }
  0x50   : > { %779 = vrot.lane.b32.xlu1 %v5328_v12, %s8266_s27 }
  0x51   : > { %5013 = vset.pattern.permute.xlu1 %v8272_v5 }
  0x52   : > { %1022 = vperm.xlu0 %5010, %v1003_v24  }
  0x54   : > { %781 = vrot.lane.b32.xlu1 %v5334_v13, %s8266_s27  ;;  %s8444_s27 = smov 127  }
  0x56   : > { %1065 = vperm.xlu0 %5010, %v4842_v26  }
  0x58   : > { %812 = vperm.xlu1 %5013, %v4838_v25  }
  0x5a   : > { %1110 = vperm.xlu0 %5010, %v4843_v27  }
  0x5c   : > { %833 = vrot.lane.b32.xlu1 %v5328_v12, %s8423_s17 }
  0x5d   : > { %5014 = vset.pattern.permute.xlu1 %v8274_v4 }
  0x5e   : > { %1155 = vperm.xlu0 %5010, %v4844_v28  }
  0x60   : > { %850 = vperm.xlu1 %5014, %v4839_v20  }
  0x62   : > { %1192 = vperm.xlu0 %5010, %v4845_v29  }
  0x64   : > { %883 = vrot.lane.b32.xlu1 %v5328_v12, %s8268_s19 }
  0x65   : > { %5015 = vset.pattern.permute.xlu1 %v8272_v5 }
  0x66   : > { %1237 = vperm.xlu0 %5010, %v4846_v30  }
  0x68   : > { %885 = vrot.lane.b32.xlu1 %v5334_v13, %s8268_s19  ;;  %s5158_s19 = smov 77  }
  0x6a   : > { %1282 = vperm.xlu0 %5010, %v4847_v32  }
  0x6c   : > { %916 = vperm.xlu1 %5015, %v4840_v31  }
  0x6e   : > { %1327 = vperm.xlu0 %5010, %v4848_v33  }
  0x70   : > { %935 = vrot.lane.b32.xlu1 %v5328_v12, %s8424_s0 }
  0x71   : > { %5016 = vset.pattern.permute.xlu1 %v8274_v4 }
  0x72   : > { %1372 = vperm.xlu0 %5010, %v4849_v34  }
  0x74   : > { %952 = vperm.xlu1 %5016, %v4841_v23  }
  0x76   : > { %5017 = vset.pattern.permute.xlu0 %v8274_v4 }
  0x77   : > { %585 = vperm.xlu0 %5017, %v5341_v14  }
  0x78   : > { %987 = vperm.xlu1 %5016, %v503_v35  }
  0x7b   : > { %689 = vperm.xlu0 %5017, %v4836_v19  }
  0x7c   : > { %1006 = vperm.xlu1 %5016, %v1003_v24  }
  0x7f   : > { %796 = vperm.xlu0 %5017, %v4838_v25   ;;  %v758_v25 = vrot.slane %v5324_v10, %v5470_v53 }
  0x80   : > { %1049 = vperm.xlu1 %5016, %v4842_v26   ;;  %v732_v26 = vrot.slane %v5324_v10, %v5467_v52 }
  0x81   : > { %v768_v35 = vrot.slane %v758_v25, %v5470_v53 }
  0x83   : > { %900 = vperm.xlu0 %5017, %v4840_v31  }
  0x84   : > { %1094 = vperm.xlu1 %5016, %v4843_v27  }
  0x88   : > { %1139 = vperm.xlu1 %5016, %v4844_v28  }
  0x8c   : > { %1176 = vperm.xlu1 %5016, %v4845_v29  }
  0x90   : > { %1221 = vperm.xlu1 %5016, %v4846_v30  }
  0x94   : > { %1266 = vperm.xlu1 %5016, %v4847_v32   ;;  %v8431_v32 = vmov 0 }
  0x95   : > { %v8432_v32 = vsel %vm5563_vm8, 4294967295, %v8431_v32 }
  0x96   : > { %8433 = vst [vmem:[#allocation15_spill] sm:$0xff] %v8432_v32 }
  0x98   : > { %1311 = vperm.xlu1 %5016, %v4848_v33  }
  0x9c   : > { %1356 = vperm.xlu1 %5016, %v4849_v34   ;;  %v522_v38 = vpop.permute.xlu0 %521 }
  0xa0   : > { %1391 = vperm.xlu1 %5016, %v994_v36   ;;  %v5448_v40 = vpop.permute.xlu0 %568  ;;  %v742_v36 = vrot.slane %v732_v26, %v5467_v52 }
  0xa4   : > { %5018 = vset.pattern.permute.xlu1 %v8272_v5  ;;  %v524_v42 = vpop.permute.xlu0 %523 }
  0xa5   : > { %v5443_v37 = vpop.permute.xlu1 %537  ;;  %v527_v19 = vsel %vm525_vm2, %v524_v42, %v522_v38  ;;  %v526_v20 = vsel %vm525_vm2, %v522_v38, %v524_v42 }
  0xa6   : > { %v532_v21 = vsel %vm5527_vm3, %v527_v19, 0.0  ;;  %v533_v23 = vsel %vm507_vm4, %v526_v20, 0.0 }
  0xa7   : > { %v543_v27 = vrot.slane %v532_v21, %v5467_v52  ;;  %v559_v28 = vrot.slane %v532_v21, %v5470_v53  ;;  %v547_v29 = vrot.slane %v533_v23, %v5467_v52  ;;  %v563_v30 = vrot.slane %v533_v23, %v5470_v53 }
  0xa8   : > { %v625_v45 = vpop.permute.xlu0 %624 }
  0xa9   : > { %v548_v38 = vmul.f32 %v543_v27, %v5443_v37 }
  0xaa   : > { %v5446_v39 = vpop.permute.xlu1 %553 }
  0xab   : > { %v564_v42 = vmul.f32 %v559_v28, %v5446_v39 }
  0xae   : > { %v5450_v41 = vpop.permute.xlu1 %570 }
  0xaf   : > { %v574_v31 = vsel %vm8396_vm5, %v5450_v41, %v5448_v40  ;;  %v5598_v20 = vsel %vm8396_vm5, %v5448_v40, %v5450_v41  ;;  %v5614_v41 = vadd.f32 %v564_v42, %v548_v38 }
  0xb0   : > { %v611_v28 = vrot.slane %v5598_v20, %v5470_v53  ;;  %v595_v42 = vrot.slane %v5598_v20, %v5467_v52 }
  0xb2   : > { %v5452_v43 = vpop.permute.xlu1 %601 }
  0xb6   : > { %v623_v44 = vpop.permute.xlu1 %622 }
  0xb7   : > { %v628_v10 = vsel %vm8281_vm7, %v625_v45, %v623_v44  ;;  %v627_v34 = vsel %vm8281_vm7, %v623_v44, %v625_v45  ;;  %v549_v44 = vmul.f32 %v547_v29, %v5443_v37  ;;  %v565_v45 = vmul.f32 %v563_v30, %v5446_v39 }
  0xb9   : > { %v5456_v47 = vpop.permute.xlu0 %655  ;;  %v5620_v27 = vadd.f32 %v565_v45, %v549_v44 }
  0xba   : > { %v5454_v46 = vpop.permute.xlu1 %639 }
  0xbd   : > { %v5460_v49 = vpop.permute.xlu0 %752 }
  0xbe   : > { %v5458_v48 = vpop.permute.xlu1 %672  ;;  %v774_v59 = vmul.f32 %v772_v55, %v5460_v49  ;;  %v5581_v55 = vsel %vm8280_vm0, %v574_v31, 0.0 }
  0xbf   : > { %v607_v39 = vrot.slane %v5581_v55, %v5470_v53  ;;  %v591_v45 = vrot.slane %v5581_v55, %v5467_v52 }
  0xc1   : > { %v5464_v51 = vpop.permute.xlu0 %835 }
  0xc2   : > { %v5462_v50 = vpop.permute.xlu1 %674 }
  0xc3   : > { %v678_v37 = vsel %vm8270_vm10, %v5462_v50, %v5458_v48  ;;  %v677_v40 = vsel %vm8270_vm10, %v5458_v48, %v5462_v50  ;;  %vm5638_vm10 = vmand %vm8282_vm12, %vm507_vm4 }
  0xc4   : > { %v5627_v48 = vsel %vm8285_vm1, %v678_v37, 0.0  ;;  %v684_v31 = vsel %vm507_vm4, %v677_v40, 0.0 }
  0xc5   : > { %v5476_v56 = vpop.permute.xlu0 %866  ;;  %v715_v20 = vrot.slane %v684_v31, %v5470_v53 }
  0xc6   : > { %v5472_v54 = vpop.permute.xlu1 %705 }
  0xc9   : > { %v5484_v61 = vpop.permute.xlu0 %937 }
  0xcb   : > { %v5480_v58 = vpop.permute.xlu1 %726 }
  0xcc   : > { %v748_v60 = vmul.f32 %v746_v57, %v5480_v58  ;;  %v633_v57 = vsel %vm5563_vm8, %v628_v10, 0.0  ;;  %v8434_v10 = vmov 0 }
  0xcd   : > { %v5490_v0 = vpop.permute.xlu0 %968  ;;  %v661_v21 = vrot.slane %v633_v57, %v5470_v53  ;;  %v645_v23 = vrot.slane %v633_v57, %v5467_v52  ;;  %v8435_v10 = vsel %vm5638_vm10, 4294967295, %v8434_v10  ;;  %v612_v57 = vmul.f32 %v607_v39, %v5452_v43 }
  0xce   : > { %v5486_v62 = vadd.f32 %v774_v59, %v748_v60  ;;  %v634_v60 = vsel %vm8395_vm9, %v627_v34, 0.0  ;;  %8436 = vst [vmem:[#allocation16_spill] sm:$0xff] %v8435_v10  ;;  %v747_v39 = vmul.f32 %v742_v36, %v5480_v58  ;;  %v699_v36 = vrot.slane %v684_v31, %v5467_v52 }
  0xcf   : > { %v5488_v63 = vpop.permute.xlu1 %779  ;;  %v649_v25 = vrot.slane %v634_v60, %v5467_v52  ;;  %v665_v26 = vrot.slane %v634_v60, %v5470_v53  ;;  %v666_v29 = vmul.f32 %v661_v21, %v5456_v47  ;;  %v650_v60 = vmul.f32 %v645_v23, %v5454_v46 }
  0xd1   : > { %v5494_v2 = vpop.permute.xlu0 %1022  ;;  %v667_v30 = vmul.f32 %v665_v26, %v5456_v47  ;;  %v651_v37 = vmul.f32 %v649_v25, %v5454_v46  ;;  %v613_v46 = vmul.f32 %v611_v28, %v5452_v43  ;;  %v668_v23 = vadd.f32 %v666_v29, %v650_v60 }
  0xd3   : > { %v5492_v1 = vpop.permute.xlu1 %781  ;;  %v669_v25 = vadd.f32 %v667_v30, %v651_v37 }
  0xd4   : > { %v784_v44 = vsel %vm8287_vm11, %v5488_v63, %v5492_v1 }
  0xd5   : > { %v5501_v8 = vpop.permute.xlu0 %1065  ;;  %v790_v26 = vsel %vm8286_vm6, %v784_v44, 0.0 }
  0xd6   : > { %v818_v44 = vrot.slane %v790_v26, %v5470_v53  ;;  %v802_v37 = vrot.slane %v790_v26, %v5467_v52 }
  0xd7   : > { %v5499_v7 = vpop.permute.xlu1 %812 }
  0xd9   : > { %v5511_v15 = vpop.permute.xlu0 %1110 }
  0xdb   : > { %v5509_v14 = vpop.permute.xlu1 %833 }
  0xdc   : > { %v838_v34 = vsel %vm8271_vm13, %v5509_v14, %v5464_v51  ;;  %v839_v47 = vsel %vm8271_vm13, %v5464_v51, %v5509_v14  ;;  %v711_v51 = vrot.slane %v5627_v48, %v5470_v53  ;;  %v785_v14 = vsel %vm8287_vm11, %v5492_v1, %v5488_v63  ;;  %vm5704_vm13 = vmand %vm8282_vm12, %vm8395_vm9 }
  0xdd   : > { %v5521_v17 = vpop.permute.xlu0 %1155  ;;  %v844_v21 = vsel %vm8285_vm1, %v838_v34, 0.0  ;;  %v845_v55 = vsel %vm5638_vm10, %v839_v47, 0.0  ;;  %v773_v63 = vmul.f32 %v768_v35, %v5460_v49  ;;  %v791_v58 = vsel %vm8395_vm9, %v785_v14, 0.0 }
  0xde   : > { %v695_v1 = vrot.slane %v5627_v48, %v5467_v52  ;;  %v872_v34 = vrot.slane %v844_v21, %v5470_v53  ;;  %v876_v47 = vrot.slane %v845_v55, %v5470_v53  ;;  %v856_v43 = vrot.slane %v844_v21, %v5467_v52 }
  0xdf   : > { %v5519_v3 = vpop.permute.xlu1 %850  ;;  %v860_v28 = vrot.slane %v845_v55, %v5467_v52  ;;  %v716_v30 = vmul.f32 %v711_v51, %v5472_v54  ;;  %v717_v49 = vmul.f32 %v715_v20, %v5472_v54  ;;  %v775_v35 = vadd.f32 %v773_v63, %v747_v39 }
  0xe0   : > { %v822_v48 = vrot.slane %v791_v58, %v5470_v53  ;;  %v806_v14 = vrot.slane %v791_v58, %v5467_v52  ;;  %v8437_v54 = vmov 0  ;;  %v861_v55 = vmul.f32 %v856_v43, %v5519_v3 }
  0xe1   : > { %v5538_v22 = vpop.permute.xlu0 %1192  ;;  %v8438_v54 = vsel %vm5704_vm13, 4294967295, %v8437_v54  ;;  %v862_v26 = vmul.f32 %v860_v28, %v5519_v3  ;;  %v877_v63 = vmul.f32 %v872_v34, %v5476_v56  ;;  %v878_v58 = vmul.f32 %v876_v47, %v5476_v56 }
  0xe2   : > { %8439 = vst [vmem:[#allocation17_spill] sm:$0xff] %v8438_v54 }
  0xe3   : > { %v5545_v24 = vpop.permute.xlu1 %883  ;;  %v879_v28 = vadd.f32 %v877_v63, %v861_v55 }
  0xe5   : > { %v5569_v33 = vpop.permute.xlu0 %1237 }
  0xe7   : > { %v5585_v59 = vpop.permute.xlu1 %885 }
  0xe8   : > { %v889_v31 = vsel %vm8283_vm14, %v5585_v59, %v5545_v24  ;;  %v888_v5 = vsel %vm8283_vm14, %v5545_v24, %v5585_v59 }
  0xe9   : > { %v5592_v19 = vpop.permute.xlu0 %1282  ;;  %v895_v4 = vsel %vm8282_vm12, %v889_v31, 0.0  ;;  %v906_v55 = vrot.slane %v888_v5, %v5467_v52 }
  0xeb   : > { %v5650_v38 = vpop.permute.xlu1 %916 }
  0xed   : > { %v5629_v50 = vpop.permute.xlu0 %1327 }
  0xef   : > { %v936_v29 = vpop.permute.xlu1 %935 }
  0xf0   : > { %v940_v51 = vsel %vm8284_vm15, %v936_v29, %v5484_v61  ;;  %v941_v20 = vsel %vm8284_vm15, %v5484_v61, %v936_v29  ;;  %v926_v29 = vrot.slane %v895_v4, %v5470_v53 }
  0xf1   : > { %v5675_v40 = vpop.permute.xlu0 %1372  ;;  %v946_v3 = vsel %vm8286_vm6, %v940_v51, 0.0  ;;  %v947_v56 = vsel %vm5704_vm13, %v941_v20, 0.0 }
  0xf2   : > { %v978_v51 = vrot.slane %v947_v56, %v5470_v53 }
  0xf6   : > { %v586_v60 = vpop.permute.xlu0 %585 }
  0xf7   : > { %v596_v39 = vmul.f32 %v591_v45, %v586_v60  ;;  %v597_v21 = vmul.f32 %v595_v42, %v586_v60  ;;  %v823_v42 = vmul.f32 %v818_v44, %v5499_v7  ;;  %v824_v45 = vmul.f32 %v822_v48, %v5499_v7 }
  0xf8   : > { %v974_v60 = vrot.slane %v946_v3, %v5470_v53 }
  0xf9   : > { %v614_v13 = vadd.f32 %v612_v57, %v596_v39  ;;  %v615_v61 = vadd.f32 %v613_v46, %v597_v21  ;;  %v880_v57 = vadd.f32 %v878_v58, %v862_v26  ;;  %v922_v46 = vrot.slane %v888_v5, %v5470_v53 }
  0xfa   : > { %v690_v34 = vpop.permute.xlu0 %689 }
  0xfb   : > { %v616_v47 = vadd.f32 %v614_v13, %v5614_v41  ;;  %v617_v24 = vadd.f32 %v615_v61, %v5620_v27  ;;  %v700_v59 = vmul.f32 %v695_v1, %v690_v34  ;;  %v701_v43 = vmul.f32 %v699_v36, %v690_v34  ;;  %v953_v1 = vpop.permute.xlu1 %952 }
  0xfc   : > { %v958_v13 = vrot.slane %v946_v3, %v5467_v52  ;;  %v962_v41 = vrot.slane %v947_v56, %v5467_v52  ;;  %v979_v56 = vmul.f32 %v974_v60, %v5490_v0  ;;  %v1462_v60 = vld [vmem:[%s8244_s6] sm:$0x3] }
  0xfd   : > { %v670_v7 = vadd.f32 %v668_v23, %v616_v47  ;;  %v671_v44 = vadd.f32 %v669_v25, %v617_v24  ;;  %v718_v48 = vadd.f32 %v716_v30, %v700_v59  ;;  %v719_v31 = vadd.f32 %v717_v49, %v701_v43 }
  0xfe   : > { %v797_v27 = vpop.permute.xlu0 %796  ;;  %v927_v23 = vmul.f32 %v922_v46, %v5650_v38  ;;  %v928_v25 = vmul.f32 %v926_v29, %v5650_v38  ;;  %v910_v30 = vrot.slane %v895_v4, %v5467_v52  ;;  %v963_v61 = vmul.f32 %v958_v13, %v953_v1  ;;  %v4850_v13 = vld [vmem:[%s8245_s7 + $0x2] sm:$0x3] }
  0xff   : > { %v720_v36 = vadd.f32 %v718_v48, %v670_v7  ;;  %v721_v20 = vadd.f32 %v719_v31, %v671_v44  ;;  %v807_v39 = vmul.f32 %v802_v37, %v797_v27  ;;  %v808_v21 = vmul.f32 %v806_v14, %v797_v27  ;;  %v988_v7 = vpop.permute.xlu1 %987 }
 0x100   : > { %v964_v3 = vmul.f32 %v962_v41, %v953_v1  ;;  %v980_v37 = vmul.f32 %v978_v51, %v5490_v0  ;;  %v8447_v51 = vmov 0   ;;  %v4851_v41 = vld [vmem:[%s8245_s7 + $0x4] sm:$0x3]  ;;  %v8448_v27 = vmov 1   ;;  %v4852_v1 = vld [vmem:[%s8245_s7 + $0x6] sm:$0x3] }
 0x101   : > { %v777_v49 = vadd.f32 %v775_v35, %v720_v36  ;;  %v778_v26 = vadd.f32 %v5486_v62, %v721_v20  ;;  %v825_v63 = vadd.f32 %v823_v42, %v807_v39  ;;  %v826_v58 = vadd.f32 %v824_v45, %v808_v21  ;;  %v4853_v36 = vld [vmem:[%s8245_s7 + $0x8] sm:$0x3]  ;;  %v4854_v20 = vld [vmem:[%s8245_s7 + $0xa] sm:$0x3]  ;;  %v4855_v21 = vld [vmem:[%s8245_s7 + $0xc] sm:$0x3] }
 0x102   : > { %v901_v14 = vpop.permute.xlu0 %900  ;;  %v981_v35 = vadd.f32 %v979_v56, %v963_v61  ;;  %v982_v46 = vadd.f32 %v980_v37, %v964_v3  ;;  %v4858_v3 = vld [vmem:[%s8446_s5 + $0x2] sm:$0x3]  ;;  %v5846_v37 = vld [vmem:[%s8245_s7 + $0x12] sm:$0x3] }
 0x103   : > { %v827_v34 = vadd.f32 %v825_v63, %v777_v49  ;;  %v828_v5 = vadd.f32 %v826_v58, %v778_v26  ;;  %v911_v47 = vmul.f32 %v906_v55, %v901_v14  ;;  %v912_v24 = vmul.f32 %v910_v30, %v901_v14  ;;  %v5807_v39 = vpop.permute.xlu1 %1006  ;;  %v4856_v55 = vld [vmem:[%s8245_s7 + $0xe] sm:$0x3]  ;;  %v1472_v49 = vld [vmem:[%s8246_s8] sm:$0x3]  ;;  %v4859_v26 = vld [vmem:[%s8244_s6 + $0x2] sm:$0x3] }
 0x104   : > { %v5833_v58 = vld [vmem:[%s8249_s11] sm:$0x1] }
 0x105   : > { %v881_v59 = vadd.f32 %v879_v28, %v827_v34  ;;  %v882_v38 = vadd.f32 %v880_v57, %v828_v5  ;;  %v929_v43 = vadd.f32 %v927_v23, %v911_v47  ;;  %v930_v4 = vadd.f32 %v928_v25, %v912_v24  ;;  %v1446_v28 = vld [vmem:[%s8446_s5] sm:$0x3]  ;;  %v4857_v25 = vld [vmem:[%s8245_s7 + $0x10] sm:$0x3]  ;;  %v5854_v34 = vld [vmem:[%s8245_s7 + $0x14] sm:$0x3] }
 0x106   : > { %v1481_v57 = vld [vmem:[%s8245_s7] sm:$0x3]  ;;  %v5860_v5 = vld [vmem:[%s8245_s7 + $0x16] sm:$0x3]  ;;  %v5868_v24 = vld [vmem:[%s8245_s7 + $0x18] sm:$0x3] }
 0x107   : > { %v931_v62 = vadd.f32 %v929_v43, %v881_v59  ;;  %v932_v42 = vadd.f32 %v930_v4, %v882_v38  ;;  %v5815_v23 = vpop.permute.xlu1 %1049  ;;  %v5876_v38 = vld [vmem:[%s8245_s7 + $0x1a] sm:$0x3]  ;;  %v5882_v43 = vld [vmem:[%s8245_s7 + $0x1c] sm:$0x3] }
 0x109   : > { %v983_v45 = vadd.f32 %v981_v35, %v931_v62  ;;  %v984_v29 = vadd.f32 %v982_v46, %v932_v42  ;;  %v5890_v46 = vld [vmem:[%s8245_s7 + $0x1e] sm:$0x3] }
 0x10b   : > { %v990_v44 = vadd.f32 %v988_v7, %v983_v45  ;;  %v991_v48 = vadd.f32 %v988_v7, %v984_v29  ;;  %v5820_v30 = vpop.permute.xlu1 %1094 }
 0x10d   : > { %v5745_v31 = vmax.f32 %v990_v44, 0.0  ;;  %v5747_v0 = vmax.f32 %v991_v48, 0.0 }
 0x10f   : > { %997 = vrot.lane.b32.xlu0 %v5747_v0, %s8440_s18  ;;  %995 = vrot.lane.b32.xlu1 %v5745_v31, %s8440_s18  ;;  %v5828_v63 = vpop.permute.xlu1 %1139  ;;  %v1182_v62 = vrot.slane %v5745_v31, %v5467_v52  ;;  %v1186_v45 = vrot.slane %v5747_v0, %v5467_v52  ;;  %v1198_v29 = vrot.slane %v5745_v31, %v5470_v53 }
 0x110   : > { %v1202_v48 = vrot.slane %v5747_v0, %v5470_v53 }
 0x113   : > { %1039 = vrot.lane.b32.xlu0 %v5747_v0, %s8441_s28  ;;  %1037 = vrot.lane.b32.xlu1 %v5745_v31, %s8441_s28  ;;  %v1177_v61 = vpop.permute.xlu1 %1176 }
 0x117   : > { %1084 = vrot.lane.b32.xlu0 %v5747_v0, %s8442_s21  ;;  %1082 = vrot.lane.b32.xlu1 %v5745_v31, %s8442_s21  ;;  %v5840_v56 = vpop.permute.xlu1 %1221 }
 0x11b   : > { %1129 = vrot.lane.b32.xlu0 %v5747_v0, %s8443_s20  ;;  %1127 = vrot.lane.b32.xlu1 %v5745_v31, %s8443_s20  ;;  %v5848_v14 = vpop.permute.xlu1 %1266 }
 0x11f   : > { %1211 = vrot.lane.b32.xlu0 %v5747_v0, %s8444_s27  ;;  %1209 = vrot.lane.b32.xlu1 %v5745_v31, %s8444_s27  ;;  %v5862_v47 = vpop.permute.xlu1 %1311 }
 0x123   : > { %1256 = vrot.lane.b32.xlu0 %v5747_v0, %s8423_s17  ;;  %1254 = vrot.lane.b32.xlu1 %v5745_v31, %s8423_s17  ;;  %v5870_v59 = vpop.permute.xlu1 %1356 }
 0x127   : > { %1301 = vrot.lane.b32.xlu0 %v5747_v0, %s8445_s14  ;;  %1299 = vrot.lane.b32.xlu1 %v5745_v31, %s8445_s14  ;;  %v5884_v4 = vpop.permute.xlu1 %1391 }
 0x12b   : > { %1346 = vrot.lane.b32.xlu0 %v5747_v0, %s8424_s0  ;;  %1344 = vrot.lane.b32.xlu1 %v5745_v31, %s8424_s0 }
 0x12f   : > { %1449 = vperm.xlu0 %5017, %v1446_v28   ;;  %1455 = vperm.xlu1 %5018, %v1446_v28  }
 0x133   : > { %1484 = vperm.xlu0 %5017, %v1481_v57   ;;  %5019 = vset.pattern.permute.xlu1 %v8447_v51 }
 0x134   : > { %1465 = vperm.xlu1 %5019, %v1462_v60  }
 0x137   : > { %1527 = vperm.xlu0 %5017, %v4850_v13  }
 0x138   : > { %5020 = vset.pattern.permute.xlu1 %v8448_v27 }
 0x139   : > { %1500 = vperm.xlu1 %5020, %v1481_v57  }
 0x13b   : > { %1572 = vperm.xlu0 %5017, %v4851_v41  }
 0x13d   : > { %1543 = vperm.xlu1 %5020, %v4850_v13  }
 0x13f   : > { %1617 = vperm.xlu0 %5017, %v4852_v1  }
 0x141   : > { %1588 = vperm.xlu1 %5020, %v4851_v41   ;;  %v5914_v41 = vld [vmem:[%s8245_s7 + $0x20] sm:$0x3] }
 0x143   : > { %1654 = vperm.xlu0 %5017, %v4853_v36  }
 0x145   : > { %1633 = vperm.xlu1 %5020, %v4852_v1  }
 0x147   : > { %1699 = vperm.xlu0 %5017, %v4854_v20  }
 0x149   : > { %1670 = vperm.xlu1 %5020, %v4853_v36   ;;  %v1187_v36 = vmul.f32 %v1182_v62, %v1177_v61 }
 0x14b   : > { %1744 = vperm.xlu0 %5017, %v4855_v21  }
 0x14d   : > { %1715 = vperm.xlu1 %5020, %v4854_v20   ;;  %v5917_v20 = vmul.f32 %v1186_v45, %v1177_v61  ;;  %v5148_v45 = vmov 3  }
 0x14f   : > { %1789 = vperm.xlu0 %5017, %v4856_v55  }
 0x151   : > { %1760 = vperm.xlu1 %5020, %v4855_v21   ;;  %v1203_v21 = vmul.f32 %v1198_v29, %v5538_v22 }
 0x153   : > { %1834 = vperm.xlu0 %5017, %v4857_v25  }
 0x155   : > { %1805 = vperm.xlu1 %5020, %v4856_v55  }
 0x157   : > { %1869 = vperm.xlu0 %5017, %v1472_v49  }
 0x159   : > { %1850 = vperm.xlu1 %5020, %v4857_v25   ;;  %v5922_v25 = vmul.f32 %v1202_v48, %v5538_v22  ;;  %v5937_v22 = vld [vmem:[%s8245_s7 + $0x22] sm:$0x3] }
 0x15b   : > { %1924 = vperm.xlu0 %5017, %v4859_v26  }
 0x15d   : > { %5021 = vset.pattern.permute.xlu1 %v8447_v51 }
 0x15e   : > { %1876 = vperm.xlu1 %5021, %v5833_v58  }
 0x15f   : > { %5033 = vset.pattern.permute.xlu0 %v5148_v45 }
 0x162   : > { %1907 = vperm.xlu1 %5021, %v4858_v3  }
 0x166   : > { %5022 = vset.pattern.permute.xlu1 %v8448_v27 }
 0x167   : > { %1913 = vperm.xlu1 %5022, %v4858_v3  }
 0x16b   : > { %1961 = vperm.xlu1 %5022, %v5846_v37  }
 0x16f   : > { %2004 = vperm.xlu1 %5022, %v5854_v34  }
 0x173   : > { %2049 = vperm.xlu1 %5022, %v5860_v5  }
 0x177   : > { %2094 = vperm.xlu1 %5022, %v5868_v24  }
 0x17b   : > { %2131 = vperm.xlu1 %5022, %v5876_v38  }
 0x17f   : > { %2176 = vperm.xlu1 %5022, %v5882_v43  }
 0x181   : > { %v998_v35 = vpop.permute.xlu0 %997  ;;  %v996_v42 = vpop.permute.xlu1 %995 }
 0x182   : > { %v999_v7 = vsel %vm525_vm2, %v996_v42, %v998_v35  ;;  %v1000_v44 = vsel %vm525_vm2, %v998_v35, %v996_v42 }
 0x183   : > { %v1001_v28 = vsel %vm5527_vm3, %v1000_v44, 0.0  ;;  %v1002_v57 = vsel %vm507_vm4, %v999_v7, 0.0  ;;  %2221 = vperm.xlu1 %5022, %v5890_v46  }
 0x184   : > { %v1012_v60 = vrot.slane %v1001_v28, %v5467_v52  ;;  %v1028_v31 = vrot.slane %v1001_v28, %v5470_v53  ;;  %v1016_v0 = vrot.slane %v1002_v57, %v5467_v52  ;;  %v1032_v55 = vrot.slane %v1002_v57, %v5470_v53 }
 0x185   : > { %v1040_v13 = vpop.permute.xlu0 %1039  ;;  %v1038_v1 = vpop.permute.xlu1 %1037 }
 0x186   : > { %v1041_v49 = vsel %vm8396_vm5, %v1038_v1, %v1040_v13  ;;  %v1042_v26 = vsel %vm8396_vm5, %v1040_v13, %v1038_v1  ;;  %v1017_v3 = vmul.f32 %v1012_v60, %v5807_v39  ;;  %v1033_v61 = vmul.f32 %v1028_v31, %v5494_v2 }
 0x187   : > { %2266 = vperm.xlu1 %5022, %v5914_v41   ;;  %v1043_v35 = vsel %vm8280_vm0, %v1042_v26, 0.0  ;;  %v1059_v62 = vrot.slane %v1041_v49, %v5467_v52  ;;  %v1018_v29 = vmul.f32 %v1016_v0, %v5807_v39  ;;  %v1075_v48 = vrot.slane %v1041_v49, %v5470_v53 }
 0x188   : > { %v1055_v7 = vrot.slane %v1043_v35, %v5467_v52  ;;  %v1071_v44 = vrot.slane %v1043_v35, %v5470_v53  ;;  %v1034_v57 = vmul.f32 %v1032_v55, %v5494_v2  ;;  %v1035_v2 = vadd.f32 %v1033_v61, %v1017_v3 }
 0x189   : > { %v1085_v42 = vpop.permute.xlu0 %1084  ;;  %v1083_v28 = vpop.permute.xlu1 %1082  ;;  %v1061_v60 = vmul.f32 %v1059_v62, %v5815_v23  ;;  %v1077_v0 = vmul.f32 %v1075_v48, %v5501_v8  ;;  %vm8449_vm0 = vcmp.lt.s32.totalorder %v5497_v6, 1 }
 0x18a   : > { %v1086_v31 = vsel %vm8281_vm7, %v1083_v28, %v1085_v42  ;;  %v1087_v13 = vsel %vm8281_vm7, %v1085_v42, %v1083_v28  ;;  %v1060_v1 = vmul.f32 %v1055_v7, %v5815_v23  ;;  %v1076_v39 = vmul.f32 %v1071_v44, %v5501_v8  ;;  %v2357_v44 = vld [vmem:[%s8247_s9] sm:$0x3]  ;;  %vm8450_vm7 = vmmov %vm8449_vm0 }
 0x18b   : > { %v1088_v49 = vsel %vm5563_vm8, %v1087_v13, 0.0  ;;  %2311 = vperm.xlu1 %5022, %v5937_v22   ;;  %v1089_v55 = vsel %vm8395_vm9, %v1086_v31, 0.0  ;;  %v1079_v23 = vadd.f32 %v1077_v0, %v1061_v60  ;;  %v1205_v60 = vadd.f32 %v1203_v21, %v1187_v36 }
 0x18c   : > { %v1100_v26 = vrot.slane %v1088_v49, %v5467_v52  ;;  %v1116_v35 = vrot.slane %v1088_v49, %v5470_v53  ;;  %v1078_v42 = vadd.f32 %v1076_v39, %v1060_v1  ;;  %v1104_v45 = vrot.slane %v1089_v55, %v5467_v52 }
 0x18d   : > { %v1130_v62 = vpop.permute.xlu0 %1129  ;;  %v1120_v8 = vrot.slane %v1089_v55, %v5470_v53  ;;  %v1128_v7 = vpop.permute.xlu1 %1127  ;;  %v1036_v31 = vadd.f32 %v1034_v57, %v1018_v29 }
 0x18e   : > { %v1105_v3 = vmul.f32 %v1100_v26, %v5820_v30  ;;  %v1121_v61 = vmul.f32 %v1116_v35, %v5511_v15  ;;  %v1131_v48 = vsel %vm8449_vm0, %v1128_v7, %v1130_v62  ;;  %v1132_v28 = vsel %vm8450_vm7, %v1130_v62, %v1128_v7 }
 0x18f   : > { %v1106_v13 = vmul.f32 %v1104_v45, %v5820_v30  ;;  %v1122_v1 = vmul.f32 %v1120_v8, %v5511_v15  ;;  %5023 = vset.pattern.permute.xlu1 %v8447_v51  ;;  %v1080_v39 = vadd.f32 %v1078_v42, %v1035_v2  ;;  %v1133_v49 = vsel %vm8285_vm1, %v1132_v28, 0.0  ;;  %v5988_v42 = vld [vmem:[%s8247_s9 + $0x2] sm:$0x3] }
 0x190   : > { %v1123_v0 = vadd.f32 %v1121_v61, %v1105_v3  ;;  %v1134_v55 = vsel %vm507_vm4, %v1131_v48, 0.0  ;;  %2360 = vperm.xlu1 %5023, %v2357_v44   ;;  %v1145_v36 = vrot.slane %v1133_v49, %v5467_v52  ;;  %v1161_v30 = vrot.slane %v1133_v49, %v5470_v53 }
 0x191   : > { %v1212_v26 = vpop.permute.xlu0 %1211  ;;  %v1124_v35 = vadd.f32 %v1122_v1, %v1106_v13  ;;  %v1149_v21 = vrot.slane %v1134_v55, %v5467_v52  ;;  %v1210_v15 = vpop.permute.xlu1 %1209  ;;  %v1081_v29 = vadd.f32 %v1079_v23, %v1036_v31  ;;  %v1165_v57 = vrot.slane %v1134_v55, %v5470_v53 }
 0x192   : > { %v1213_v2 = vsel %vm8287_vm11, %v1210_v15, %v1212_v26  ;;  %v1214_v62 = vsel %vm8287_vm11, %v1212_v26, %v1210_v15  ;;  %v1125_v45 = vadd.f32 %v1123_v0, %v1080_v39  ;;  %v1150_v8 = vmul.f32 %v1145_v36, %v5828_v63 }
 0x193   : > { %v1151_v7 = vmul.f32 %v1149_v21, %v5828_v63  ;;  %v1166_v23 = vmul.f32 %v1161_v30, %v5521_v17  ;;  %v1126_v44 = vadd.f32 %v1124_v35, %v1081_v29  ;;  %v1167_v3 = vmul.f32 %v1165_v57, %v5521_v17 }
 0x194   : > { %v1215_v61 = vsel %vm8286_vm6, %v1213_v2, 0.0  ;;  %v1216_v48 = vsel %vm8395_vm9, %v1214_v62, 0.0  ;;  %5024 = vset.pattern.permute.xlu1 %v8448_v27  ;;  %vm8451_vm0 = vcmp.lt.s32.totalorder %v5497_v6, 113  ;;  %v1206_v62 = vadd.f32 %v5922_v25, %v5917_v20 }
 0x195   : > { %v1257_v28 = vpop.permute.xlu0 %1256  ;;  %v1168_v31 = vadd.f32 %v1166_v23, %v1150_v8  ;;  %v1227_v13 = vrot.slane %v1215_v61, %v5467_v52  ;;  %v1231_v1 = vrot.slane %v1216_v48, %v5467_v52  ;;  %v1243_v63 = vrot.slane %v1215_v61, %v5470_v53  ;;  %v1255_v39 = vpop.permute.xlu1 %1254  ;;  %2424 = vperm.xlu1 %5024, %v5988_v42   ;;  %vm8452_vm7 = vmmov %vm8451_vm0 }
 0x196   : > { %v1169_v17 = vadd.f32 %v1167_v3, %v1151_v7  ;;  %v1247_v0 = vrot.slane %v1216_v48, %v5470_v53  ;;  %v1258_v49 = vsel %vm8451_vm0, %v1255_v39, %v1257_v28  ;;  %v1259_v55 = vsel %vm8452_vm7, %v1257_v28, %v1255_v39 }
 0x197   : > { %v1170_v26 = vadd.f32 %v1168_v31, %v1125_v45  ;;  %v1232_v35 = vmul.f32 %v1227_v13, %v5840_v56  ;;  %v1233_v36 = vmul.f32 %v1231_v1, %v5840_v56  ;;  %v1248_v21 = vmul.f32 %v1243_v63, %v5569_v33 }
 0x198   : > { %v1171_v30 = vadd.f32 %v1169_v17, %v1126_v44  ;;  %v1249_v15 = vmul.f32 %v1247_v0, %v5569_v33  ;;  %v1260_v29 = vsel %vm8285_vm1, %v1258_v49, 0.0  ;;  %v1261_v57 = vsel %vm5638_vm10, %v1259_v55, 0.0 }
 0x199   : > { %v1302_v2 = vpop.permute.xlu0 %1301  ;;  %v1272_v45 = vrot.slane %v1260_v29, %v5467_v52  ;;  %v1276_v8 = vrot.slane %v1261_v57, %v5467_v52  ;;  %v1300_v56 = vpop.permute.xlu1 %1299  ;;  %vm1402_vm0 = vcmp.lt.s32.totalorder %v5507_v11, 2  ;;  %5025 = vset.pattern.permute.xlu1 %v8447_v51  ;;  %v1207_v33 = vadd.f32 %v1205_v60, %v1170_v26 }
 0x19a   : > { %v1250_v7 = vadd.f32 %v1248_v21, %v1232_v35  ;;  %v1288_v23 = vrot.slane %v1260_v29, %v5470_v53  ;;  %v1292_v44 = vrot.slane %v1261_v57, %v5470_v53  ;;  %v1208_v3 = vadd.f32 %v1206_v62, %v1171_v30 }
 0x19b   : > { %v1277_v61 = vmul.f32 %v1272_v45, %v5848_v14  ;;  %v1303_v20 = vsel %vm8283_vm14, %v1300_v56, %v1302_v2  ;;  %vm1403_vm7 = vcmp.lt.s32.totalorder %v5514_v16, 2  ;;  %v1251_v25 = vadd.f32 %v1249_v15, %v1233_v36 }
 0x19c   : > { %v1278_v48 = vmul.f32 %v1276_v8, %v5848_v14  ;;  %v1293_v28 = vmul.f32 %v1288_v23, %v5592_v19  ;;  %v1304_v60 = vsel %vm8283_vm14, %v1302_v2, %v1300_v56  ;;  %v1294_v13 = vmul.f32 %v1292_v44, %v5592_v19 }
 0x19d   : > { %v1347_v31 = vpop.permute.xlu0 %1346  ;;  %v1306_v1 = vsel %vm8282_vm12, %v1304_v60, 0.0  ;;  %v1317_v63 = vrot.slane %v1303_v20, %v5467_v52  ;;  %v1333_v39 = vrot.slane %v1303_v20, %v5470_v53  ;;  %v1345_v17 = vpop.permute.xlu1 %1344  ;;  %v1252_v0 = vadd.f32 %v1250_v7, %v1207_v33 }
 0x19e   : > { %v1295_v49 = vadd.f32 %v1293_v28, %v1277_v61  ;;  %v1321_v14 = vrot.slane %v1306_v1, %v5467_v52  ;;  %v1337_v55 = vrot.slane %v1306_v1, %v5470_v53  ;;  %v1348_v19 = vsel %vm8284_vm15, %v1345_v17, %v1347_v31 }
 0x19f   : > { %v1322_v26 = vmul.f32 %v1317_v63, %v5862_v47  ;;  %v1338_v35 = vmul.f32 %v1333_v39, %v5629_v50  ;;  %v1349_v36 = vsel %vm8284_vm15, %v1347_v31, %v1345_v17  ;;  %vm1404_vm12 = vcmp.ge.s32.totalorder %v5507_v11, 14 }
 0x1a0   : > { %v1323_v21 = vmul.f32 %v1321_v14, %v5862_v47  ;;  %v1339_v30 = vmul.f32 %v1337_v55, %v5629_v50  ;;  %vm1405_vm14 = vcmp.ge.s32.totalorder %v5514_v16, 14  ;;  %v1296_v15 = vadd.f32 %v1294_v13, %v1278_v48  ;;  %vm1406_vm1 = vmor %vm1402_vm0, %vm1404_vm12 }
 0x1a1   : > { %v1297_v29 = vadd.f32 %v1295_v49, %v1252_v0  ;;  %v1350_v57 = vsel %vm8286_vm6, %v1348_v19, 0.0  ;;  %v1351_v2 = vsel %vm5704_vm13, %v1349_v36, 0.0  ;;  %v1340_v62 = vadd.f32 %v1338_v35, %v1322_v26  ;;  %vm1407_vm11 = vmor %vm1403_vm7, %vm1405_vm14 }
 0x1a2   : > { %v1362_v45 = vrot.slane %v1350_v57, %v5467_v52  ;;  %v1366_v8 = vrot.slane %v1351_v2, %v5467_v52  ;;  %v1378_v47 = vrot.slane %v1350_v57, %v5470_v53  ;;  %v1253_v50 = vadd.f32 %v1251_v25, %v1208_v3 }
 0x1a3   : > { %v1341_v56 = vadd.f32 %v1339_v30, %v1323_v21  ;;  %vm1396_vm15 = vcmp.lt.s32.totalorder %v5497_v6, 32  ;;  %v1382_v33 = vrot.slane %v1351_v2, %v5470_v53  ;;  %vm1399_vm6 = vcmp.ge.s32.totalorder %v5504_v9, 224 }
 0x1a4   : > { %v1367_v7 = vmul.f32 %v1362_v45, %v5870_v59  ;;  %v1368_v23 = vmul.f32 %v1366_v8, %v5870_v59  ;;  %v1383_v44 = vmul.f32 %v1378_v47, %v5675_v40  ;;  %v1298_v3 = vadd.f32 %v1296_v15, %v1253_v50  ;;  %vm1408_vm12 = vmand %vm1396_vm15, %vm1406_vm1 }
 0x1a5   : > { %v1384_v61 = vmul.f32 %v1382_v33, %v5675_v40  ;;  %v1342_v20 = vadd.f32 %v1340_v62, %v1297_v29  ;;  %vm1409_vm0 = vmand %vm1399_vm6, %vm1407_vm11  ;;  %v5149_v31 = vmov 1.0   ;;  %vm8374_vm14 = vcmask 1041408  }
 0x1a6   : > { %v1385_v25 = vadd.f32 %v1383_v44, %v1367_v7  ;;  %v1343_v48 = vadd.f32 %v1341_v56, %v1298_v3  ;;  %v1410_v13 = vsel %vm1408_vm12, 0.0, %v5149_v31  ;;  %v1411_v63 = vsel %vm1409_vm0, 0.0, %v5149_v31 }
 0x1a7   : > { %v1386_v28 = vadd.f32 %v1384_v61, %v1368_v23  ;;  %vm8520_vm1 = vcmp.lt.s32.totalorder %v5497_v6, 15  ;;  %vm8521_vm6 = vcmp.ge.s32.totalorder %v5497_v6, 16  ;;  %vm8523_vm15 = vcmp.lt.s32.totalorder %v5497_v6, 1 }
 0x1a8   : > { %v1387_v60 = vadd.f32 %v1385_v25, %v1342_v20  ;;  %vm8522_vm11 = vmmov %vm8520_vm1  ;;  %vm8525_vm12 = vcmp.lt.s32.totalorder %v5497_v6, 127  ;;  %vm8526_vm0 = vcmp.ge.s32.totalorder %v5507_v11, 1 }
 0x1a9   : > { %v1388_v1 = vadd.f32 %v1386_v28, %v1343_v48  ;;  %vm8524_vm7 = vmmov %vm8523_vm15 }
 0x1aa   : > { %v6070_v39 = vadd.f32 %v5884_v4, %v1387_v60 }
 0x1ab   : > { %v6073_v59 = vadd.f32 %v5884_v4, %v1388_v1 }
 0x1ac   : > { %8453 = vst [vmem:[#allocation18_spill] sm:$0xff] %v6070_v39  ;;  %v6076_v40 = vmul.f32 %v1410_v13, %v6070_v39 }
 0x1ad   : > { %8454 = vst [vmem:[#allocation19_spill] sm:$0xff] %v6073_v59  ;;  %v6079_v17 = vmul.f32 %v1411_v63, %v6073_v59 }
 0x1ae   : > { %8455 = vst [vmem:[#allocation20_spill] sm:$0xff] %v6076_v40  ;;  %v1450_v0 = vpop.permute.xlu0 %1449  ;;  %v1415_v49 = vsel %vm8374_vm14, %v6076_v40, -inf  ;;  %v1456_v14 = vpop.permute.xlu1 %1455  ;;  %v1429_v55 = vsel %vm8374_vm14, %v6076_v40, 0.0 }
 0x1af   : > { %8456 = vst [vmem:[#allocation21_spill] sm:$0xff] %v6079_v17  ;;  %v1416_v26 = vrot.slane %v1415_v49, 4  ;;  %v1422_v4 = vsel %vm8374_vm14, %v6079_v17, -inf  ;;  %v1436_v35 = vsel %vm8374_vm14, %v6079_v17, 0.0  ;;  %v1430_v19 = vrot.slane %v1429_v55, 4 }
 0x1b0   : > { %v1423_v36 = vrot.slane %v1422_v4, 4  ;;  %v1437_v21 = vrot.slane %v1436_v35, 4 }
 0x1b1   : > { %v1417_v30 = vmax.f32 %v1415_v49, %v1416_v26  ;;  %v1431_v15 = vadd.f32 %v1430_v19, %v1429_v55 }
 0x1b2   : > { %v6089_v29 = vpop.permute.xlu0 %1484  ;;  %v1424_v57 = vmax.f32 %v1422_v4, %v1423_v36  ;;  %v1438_v2 = vadd.f32 %v1437_v21, %v1436_v35 }
 0x1b3   : > { %8457 = vst [vmem:[#allocation22_spill] sm:$0xff] %v6089_v29  ;;  %v1418_v62 = vrot.slane %v1417_v30, 2  ;;  %v1432_v45 = vrot.slane %v1431_v15, 2  ;;  %v1466_v8 = vpop.permute.xlu1 %1465 }
 0x1b4   : > { %v1425_v47 = vrot.slane %v1424_v57, 2  ;;  %v1439_v50 = vrot.slane %v1438_v2, 2 }
 0x1b5   : > { %v1419_v56 = vmax.f32 %v1417_v30, %v1418_v62  ;;  %v1433_v33 = vadd.f32 %v1432_v45, %v1431_v15 }
 0x1b6   : > { %v6091_v7 = vpop.permute.xlu0 %1527  ;;  %v1426_v23 = vmax.f32 %v1424_v57, %v1425_v47  ;;  %v1440_v44 = vadd.f32 %v1439_v50, %v1438_v2 }
 0x1b7   : > { %8458 = vst [vmem:[#allocation23_spill] sm:$0xff] %v6091_v7  ;;  %v1420_v3 = vrot.slane %v1419_v56, 1  ;;  %v1434_v61 = vrot.slane %v1433_v33, 1 }
 0x1b8   : > { %v1427_v20 = vrot.slane %v1426_v23, 1  ;;  %v1441_v25 = vrot.slane %v1440_v44, 1  ;;  %v6093_v48 = vpop.permute.xlu1 %1500 }
 0x1b9   : > { %8459 = vst [vmem:[#allocation24_spill] sm:$0xff] %v6093_v48  ;;  %v6095_v28 = vmax.f32 %v1419_v56, %v1420_v3  ;;  %v1435_v60 = vadd.f32 %v1434_v61, %v1433_v33 }
 0x1ba   : > { %v6097_v31 = vmax.f32 %v1426_v23, %v1427_v20  ;;  %v1442_v13 = vadd.f32 %v1441_v25, %v1440_v44  ;;  %v6099_v1 = vpop.permute.xlu0 %1572 }
 0x1bb   : > { %8460 = vst [vmem:[#allocation25_spill] sm:$0xff] %v6095_v28  ;;  %8462 = vst [vmem:[#allocation27_spill] sm:$0xff] %v6099_v1  ;;  %v6101_v63 = vmul.f32 0.5, %v1435_v60  ;;  %v1452_v26 = vmul.f32 %v1450_v0, %v6095_v28 }
 0x1bc   : > { %8461 = vst [vmem:[#allocation26_spill] sm:$0xff] %v6097_v31  ;;  %v6103_v49 = vmul.f32 0.5, %v1442_v13  ;;  %v6105_v55 = vpop.permute.xlu1 %1543  ;;  %v1453_v35 = vmul.f32 %v1450_v0, %v6097_v31 }
 0x1bd   : > { %8463 = vst [vmem:[#allocation28_spill] sm:$0xff] %v6101_v63  ;;  %8465 = vst [vmem:[#allocation30_spill] sm:$0xff] %v6105_v55  ;;  %v1458_v4 = vmul.f32 %v1456_v14, %v6101_v63 }
 0x1be   : > { %8464 = vst [vmem:[#allocation29_spill] sm:$0xff] %v6103_v49  ;;  %v1459_v19 = vmul.f32 %v1456_v14, %v6103_v49  ;;  %v6111_v30 = vpop.permute.xlu0 %1617 }
 0x1bf   : > { %v1460_v36 = vadd.f32 %v1458_v4, %v1452_v26  ;;  %8466 = vst [vmem:[#allocation31_spill] sm:$0xff] %v6111_v30 }
 0x1c0   : > { %v1461_v21 = vadd.f32 %v1459_v19, %v1453_v35  ;;  %v6113_v15 = vpop.permute.xlu1 %1588 }
 0x1c1   : > { %8467 = vst [vmem:[#allocation32_spill] sm:$0xff] %v6113_v15  ;;  %v1468_v57 = vadd.f32 %v1466_v8, %v1460_v36 }
 0x1c2   : > { %v1469_v2 = vadd.f32 %v1466_v8, %v1461_v21  ;;  %v6123_v0 = vpop.permute.xlu0 %1654 }
 0x1c3   : > { %v6115_v62 = vmax.f32 %v1468_v57, 0.0  ;;  %8471 = vst [vmem:[#allocation36_spill] sm:$0xff] %v6123_v0 }
 0x1c4   : > { %v6117_v45 = vmax.f32 %v1469_v2, 0.0  ;;  %v6119_v47 = vpop.permute.xlu1 %1633 }
 0x1c5   : > { %8468 = vst [vmem:[#allocation33_spill] sm:$0xff] %v6115_v62  ;;  %8470 = vst [vmem:[#allocation35_spill] sm:$0xff] %v6119_v47  ;;  %1473 = vrot.lane.b32.xlu0 %v6115_v62, %s8440_s18 }
 0x1c6   : > { %8469 = vst [vmem:[#allocation34_spill] sm:$0xff] %v6117_v45  ;;  %1475 = vrot.lane.b32.xlu1 %v6117_v45, %s8440_s18  ;;  %v6133_v8 = vpop.permute.xlu0 %1699 }
 0x1c7   : > { %8473 = vst [vmem:[#allocation38_spill] sm:$0xff] %v6133_v8 }
 0x1c8   : > { %v6127_v14 = vpop.permute.xlu1 %1670 }
 0x1c9   : > { %8472 = vst [vmem:[#allocation37_spill] sm:$0xff] %v6127_v14  ;;  %1515 = vrot.lane.b32.xlu0 %v6115_v62, %s8441_s28 }
 0x1ca   : > { %1517 = vrot.lane.b32.xlu1 %v6117_v45, %s8441_s28  ;;  %v6145_v33 = vpop.permute.xlu0 %1744 }
 0x1cb   : > { %8476 = vst [vmem:[#allocation41_spill] sm:$0xff] %v6145_v33 }
 0x1cc   : > { %v6135_v50 = vpop.permute.xlu1 %1715 }
 0x1cd   : > { %8474 = vst [vmem:[#allocation39_spill] sm:$0xff] %v6135_v50  ;;  %1560 = vrot.lane.b32.xlu0 %v6115_v62, %s8442_s21 }
 0x1ce   : > { %1562 = vrot.lane.b32.xlu1 %v6117_v45, %s8442_s21  ;;  %v6155_v44 = vpop.permute.xlu0 %1789 }
 0x1cf   : > { %8478 = vst [vmem:[#allocation43_spill] sm:$0xff] %v6155_v44 }
 0x1d0   : > { %v6141_v56 = vpop.permute.xlu1 %1760 }
 0x1d1   : > { %8475 = vst [vmem:[#allocation40_spill] sm:$0xff] %v6141_v56  ;;  %1605 = vrot.lane.b32.xlu0 %v6115_v62, %s8443_s20 }
 0x1d2   : > { %1607 = vrot.lane.b32.xlu1 %v6117_v45, %s8443_s20  ;;  %v6167_v20 = vpop.permute.xlu0 %1834 }
 0x1d3   : > { %8481 = vst [vmem:[#allocation46_spill] sm:$0xff] %v6167_v20 }
 0x1d4   : > { %v6149_v23 = vpop.permute.xlu1 %1805 }
 0x1d5   : > { %8477 = vst [vmem:[#allocation42_spill] sm:$0xff] %v6149_v23  ;;  %1687 = vrot.lane.b32.xlu0 %v6115_v62, %s8444_s27 }
 0x1d6   : > { %1689 = vrot.lane.b32.xlu1 %v6117_v45, %s8444_s27  ;;  %v6175_v60 = vpop.permute.xlu0 %1869 }
 0x1d7   : > { %8482 = vst [vmem:[#allocation47_spill] sm:$0xff] %v6175_v60 }
 0x1d8   : > { %v6157_v3 = vpop.permute.xlu1 %1850 }
 0x1d9   : > { %8479 = vst [vmem:[#allocation44_spill] sm:$0xff] %v6157_v3  ;;  %1732 = vrot.lane.b32.xlu0 %v6115_v62, %s8423_s17 }
 0x1da   : > { %1734 = vrot.lane.b32.xlu1 %v6117_v45, %s8423_s17  ;;  %v1925_v57 = vpop.permute.xlu0 %1924 }
 0x1dd   : > { %1777 = vrot.lane.b32.xlu0 %v6115_v62, %s8445_s14  ;;  %v6165_v61 = vpop.permute.xlu1 %1876 }
 0x1de   : > { %8480 = vst [vmem:[#allocation45_spill] sm:$0xff] %v6165_v61  ;;  %1779 = vrot.lane.b32.xlu1 %v6117_v45, %s8445_s14 }
 0x1e1   : > { %1822 = vrot.lane.b32.xlu0 %v6115_v62, %s8424_s0  ;;  %v1908_v25 = vpop.permute.xlu1 %1907 }
 0x1e2   : > { %1824 = vrot.lane.b32.xlu1 %v6117_v45, %s8424_s0  ;;  %v1910_v26 = vmul.f32 %v1908_v25, %v6095_v28  ;;  %v1911_v4 = vmul.f32 %v1908_v25, %v6097_v31 }
 0x1e6   : > { %v1914_v13 = vpop.permute.xlu1 %1913 }
 0x1e7   : > { %v1916_v35 = vmul.f32 %v1914_v13, %v6101_v63  ;;  %v1917_v19 = vmul.f32 %v1914_v13, %v6103_v49 }
 0x1e9   : > { %v1918_v36 = vadd.f32 %v1916_v35, %v1910_v26  ;;  %v1919_v21 = vadd.f32 %v1917_v19, %v1911_v4  ;;  %v6233_v35 = vld [vmem:[%s8247_s9 + $0x4] sm:$0x3]  ;;  %v4872_v19 = vld [vmem:[%s8247_s9 + $0x6] sm:$0x3] }
 0x1ea   : > { %v6197_v25 = vpop.permute.xlu1 %1961  ;;  %8483 = vst [vmem:[#allocation48_spill] sm:$0xff] %v6233_v35 }
 0x1eb   : > { %v1927_v2 = vadd.f32 %v1925_v57, %v1918_v36  ;;  %v1928_v12 = vadd.f32 %v1925_v57, %v1919_v21  ;;  %v6265_v57 = vld [vmem:[%s8247_s9 + $0xc] sm:$0x3] }
 0x1ec   : > { %8485 = vst [vmem:[#allocation50_spill] sm:$0xff] %v6265_v57 }
 0x1ed   : > { %v6181_v59 = vmax.f32 %v1927_v2, 0.0  ;;  %v6187_v39 = vmax.f32 %v1928_v12, 0.0  ;;  %v6282_v2 = vld [vmem:[%s8247_s9 + $0x10] sm:$0x3] }
 0x1ee   : > { %v6203_v12 = vpop.permute.xlu1 %2004  ;;  %8487 = vst [vmem:[#allocation52_spill] sm:$0xff] %v6282_v2 }
 0x1ef   : > { %1933 = vrot.lane.b32.xlu1 %v6181_v59, %s8440_s18  ;;  %1976 = vrot.lane.b32.xlu0 %v6181_v59, %s8441_s28 }
 0x1f2   : > { %v6213_v13 = vpop.permute.xlu1 %2049 }
 0x1f3   : > { %1935 = vrot.lane.b32.xlu1 %v6187_v39, %s8440_s18  ;;  %2021 = vrot.lane.b32.xlu0 %v6181_v59, %s8442_s21 }
 0x1f6   : > { %v6219_v26 = vpop.permute.xlu1 %2094 }
 0x1f7   : > { %1978 = vrot.lane.b32.xlu1 %v6187_v39, %s8441_s28  ;;  %2066 = vrot.lane.b32.xlu0 %v6181_v59, %s8443_s20 }
 0x1fa   : > { %v6227_v4 = vpop.permute.xlu1 %2131 }
 0x1fb   : > { %2023 = vrot.lane.b32.xlu1 %v6187_v39, %s8442_s21  ;;  %2148 = vrot.lane.b32.xlu0 %v6181_v59, %s8444_s27 }
 0x1fe   : > { %v6240_v36 = vpop.permute.xlu1 %2176 }
 0x1ff   : > { %2068 = vrot.lane.b32.xlu1 %v6187_v39, %s8443_s20  ;;  %2193 = vrot.lane.b32.xlu0 %v6181_v59, %s8423_s17 }
 0x202   : > { %v6249_v21 = vpop.permute.xlu1 %2221 }
 0x203   : > { %2150 = vrot.lane.b32.xlu1 %v6187_v39, %s8444_s27  ;;  %2238 = vrot.lane.b32.xlu0 %v6181_v59, %s8445_s14 }
 0x207   : > { %2195 = vrot.lane.b32.xlu1 %v6187_v39, %s8423_s17  ;;  %2283 = vrot.lane.b32.xlu0 %v6181_v59, %s8424_s0 }
 0x20b   : > { %2240 = vrot.lane.b32.xlu1 %v6187_v39, %s8445_s14  ;;  %2806 = vperm.xlu0 %5033, %v5833_v58  }
 0x20f   : > { %2285 = vrot.lane.b32.xlu1 %v6187_v39, %s8424_s0  ;;  %5034 = vset.pattern.permute.xlu0 %v8447_v51 }
 0x210   : > { %1945 = vperm.xlu0 %5034, %v5846_v37   ;;  %v6247_v37 = vld [vmem:[%s8247_s9 + $0x8] sm:$0x3] }
 0x211   : > { %8484 = vst [vmem:[#allocation49_spill] sm:$0xff] %v6247_v37 }
 0x213   : > { %2462 = vperm.xlu1 %5025, %v6233_v35  }
 0x214   : > { %1988 = vperm.xlu0 %5034, %v5854_v34   ;;  %v4874_v34 = vld [vmem:[%s8247_s9 + $0xa] sm:$0x3] }
 0x217   : > { %5026 = vset.pattern.permute.xlu1 %v8448_v27 }
 0x218   : > { %2528 = vperm.xlu1 %5026, %v4872_v19   ;;  %2033 = vperm.xlu0 %5034, %v5860_v5   ;;  %v6259_v5 = vpop.permute.xlu1 %2266 }
 0x21c   : > { %5027 = vset.pattern.permute.xlu1 %v8447_v51  ;;  %2078 = vperm.xlu0 %5034, %v5868_v24   ;;  %v6269_v24 = vpop.permute.xlu1 %2311 }
 0x21d   : > { %2549 = vperm.xlu1 %5027, %v6247_v37  }
 0x220   : > { %2115 = vperm.xlu0 %5034, %v5876_v38   ;;  %v4876_v38 = vld [vmem:[%s8247_s9 + $0xe] sm:$0x3] }
 0x221   : > { %5028 = vset.pattern.permute.xlu1 %v8448_v27 }
 0x222   : > { %2615 = vperm.xlu1 %5028, %v4874_v34  }
 0x224   : > { %2160 = vperm.xlu0 %5034, %v5882_v43   ;;  %v6277_v43 = vpop.permute.xlu1 %2360 }
 0x225   : > { %8486 = vst [vmem:[#allocation51_spill] sm:$0xff] %v6277_v43 }
 0x226   : > { %5029 = vset.pattern.permute.xlu1 %v8447_v51 }
 0x227   : > { %2653 = vperm.xlu1 %5029, %v6265_v57  }
 0x228   : > { %2205 = vperm.xlu0 %5034, %v5890_v46   ;;  %v4860_v46 = vld [vmem:[%s8246_s8 + $0x2] sm:$0x3]  ;;  %v6290_v17 = vpop.permute.xlu1 %2424 }
 0x229   : > { %8488 = vst [vmem:[#allocation53_spill] sm:$0xff] %v6290_v17 }
 0x22b   : > { %5030 = vset.pattern.permute.xlu1 %v8448_v27 }
 0x22c   : > { %2719 = vperm.xlu1 %5030, %v4876_v38   ;;  %2250 = vperm.xlu0 %5034, %v5914_v41   ;;  %v2337_v41 = vld [vmem:[%s8248_s10] sm:$0x3] }
 0x230   : > { %5031 = vset.pattern.permute.xlu1 %v8447_v51  ;;  %2295 = vperm.xlu0 %5034, %v5937_v22   ;;  %v5150_v22 = vmov 2  }
 0x231   : > { %2755 = vperm.xlu1 %5031, %v6282_v2  }
 0x234   : > { %2330 = vperm.xlu0 %5034, %v4860_v46   ;;  %v4878_v46 = vld [vmem:[%s8446_s5 + $0x4] sm:$0x3] }
 0x235   : > { %2790 = vperm.xlu1 %5031, %v2337_v41  }
 0x237   : > { %v6295_v40 = vpop.permute.xlu0 %1473 }
 0x238   : > { %8489 = vst [vmem:[#allocation54_spill] sm:$0xff] %v6295_v40  ;;  %v6297_v61 = vpop.permute.xlu1 %1475  ;;  %2408 = vperm.xlu0 %5034, %v5988_v42  }
 0x239   : > { %8490 = vst [vmem:[#allocation55_spill] sm:$0xff] %v6297_v61  ;;  %5032 = vset.pattern.permute.xlu1 %v5150_v22  ;;  %v6324_v22 = vld [vmem:[%s8245_s7 + $0x24] sm:$0x3] }
 0x23a   : > { %2796 = vperm.xlu1 %5032, %v5833_v58  }
 0x23b   : > { %v6301_v60 = vpop.permute.xlu0 %1515 }
 0x23c   : > { %8491 = vst [vmem:[#allocation56_spill] sm:$0xff] %v6301_v60  ;;  %v6303_v3 = vpop.permute.xlu1 %1517  ;;  %2512 = vperm.xlu0 %5034, %v4872_v19   ;;  %v4879_v19 = vld [vmem:[%s8244_s6 + $0x4] sm:$0x3] }
 0x23d   : > { %8492 = vst [vmem:[#allocation57_spill] sm:$0xff] %v6303_v3 }
 0x23e   : > { %5035 = vset.pattern.permute.xlu1 %v8447_v51 }
 0x23f   : > { %2829 = vperm.xlu1 %5035, %v4878_v46   ;;  %v6311_v20 = vpop.permute.xlu0 %1560 }
 0x240   : > { %v6309_v41 = vpop.permute.xlu1 %1562  ;;  %8494 = vst [vmem:[#allocation59_spill] sm:$0xff] %v6311_v20  ;;  %2599 = vperm.xlu0 %5034, %v4874_v34  }
 0x241   : > { %8493 = vst [vmem:[#allocation58_spill] sm:$0xff] %v6309_v41 }
 0x243   : > { %5036 = vset.pattern.permute.xlu1 %v8448_v27  ;;  %v6316_v42 = vpop.permute.xlu0 %1605 }
 0x244   : > { %2835 = vperm.xlu1 %5036, %v4878_v46   ;;  %v6314_v58 = vpop.permute.xlu1 %1607  ;;  %2703 = vperm.xlu0 %5034, %v4876_v38   ;;  %8496 = vst [vmem:[#allocation61_spill] sm:$0xff] %v6316_v42 }
 0x245   : > { %8495 = vst [vmem:[#allocation60_spill] sm:$0xff] %v6314_v58 }
 0x247   : > { %v6328_v34 = vpop.permute.xlu0 %1687 }
 0x248   : > { %2846 = vperm.xlu0 %5034, %v4879_v19   ;;  %v6326_v43 = vpop.permute.xlu1 %1689  ;;  %8498 = vst [vmem:[#allocation63_spill] sm:$0xff] %v6328_v34 }
 0x249   : > { %8497 = vst [vmem:[#allocation62_spill] sm:$0xff] %v6326_v43 }
 0x24b   : > { %v6333_v38 = vpop.permute.xlu0 %1732 }
 0x24c   : > { %2867 = vperm.xlu0 %5034, %v6324_v22   ;;  %v6331_v46 = vpop.permute.xlu1 %1734  ;;  %8500 = vst [vmem:[#allocation65_spill] sm:$0xff] %v6333_v38 }
 0x24d   : > { %8499 = vst [vmem:[#allocation64_spill] sm:$0xff] %v6331_v46 }
 0x24f   : > { %v6337_v23 = vpop.permute.xlu0 %1777 }
 0x250   : > { %v6335_v17 = vpop.permute.xlu1 %1779  ;;  %8502 = vst [vmem:[#allocation67_spill] sm:$0xff] %v6337_v23 }
 0x251   : > { %8501 = vst [vmem:[#allocation66_spill] sm:$0xff] %v6335_v17 }
 0x253   : > { %v6341_v44 = vpop.permute.xlu0 %1822 }
 0x254   : > { %v6339_v19 = vpop.permute.xlu1 %1824  ;;  %8504 = vst [vmem:[#allocation69_spill] sm:$0xff] %v6341_v44 }
 0x255   : > { %8503 = vst [vmem:[#allocation68_spill] sm:$0xff] %v6339_v19 }
 0x261   : > { %v1934_v56 = vpop.permute.xlu1 %1933  ;;  %v1977_v33 = vpop.permute.xlu0 %1976 }
 0x265   : > { %v1936_v50 = vpop.permute.xlu1 %1935  ;;  %v2022_v8 = vpop.permute.xlu0 %2021 }
 0x269   : > { %v1979_v0 = vpop.permute.xlu1 %1978  ;;  %v6343_v14 = vpop.permute.xlu0 %2066 }
 0x26d   : > { %v2024_v45 = vpop.permute.xlu1 %2023  ;;  %v6345_v47 = vpop.permute.xlu0 %2148 }
 0x271   : > { %v6347_v46 = vpop.permute.xlu1 %2068  ;;  %v6349_v38 = vpop.permute.xlu0 %2193 }
 0x275   : > { %v6351_v17 = vpop.permute.xlu1 %2150  ;;  %v6353_v23 = vpop.permute.xlu0 %2238 }
 0x279   : > { %v6355_v19 = vpop.permute.xlu1 %2195  ;;  %v6357_v44 = vpop.permute.xlu0 %2283 }
 0x27d   : > { %v6359_v30 = vpop.permute.xlu1 %2240 }
 0x281   : > { %v6363_v34 = vpop.permute.xlu1 %2285 }
 0x28a   : > { %v6361_v62 = vpop.permute.xlu0 %2806 }
 0x28b   : > { %8505 = vst [vmem:[#allocation70_spill] sm:$0xff] %v6361_v62 }
 0x28f   : > { %v6365_v43 = vpop.permute.xlu0 %1945 }
 0x292   : > { %v6367_v15 = vpop.permute.xlu1 %2462 }
 0x293   : > { %8506 = vst [vmem:[#allocation71_spill] sm:$0xff] %v6367_v15  ;;  %v6369_v1 = vpop.permute.xlu0 %1988 }
 0x297   : > { %v6371_v48 = vpop.permute.xlu1 %2528  ;;  %v6373_v29 = vpop.permute.xlu0 %2033 }
 0x298   : > { %8507 = vst [vmem:[#allocation72_spill] sm:$0xff] %v6371_v48 }
 0x29b   : > { %v6375_v55 = vpop.permute.xlu0 %2078 }
 0x29c   : > { %v6377_v7 = vpop.permute.xlu1 %2549 }
 0x29d   : > { %8508 = vst [vmem:[#allocation73_spill] sm:$0xff] %v6377_v7 }
 0x29f   : > { %v6379_v58 = vpop.permute.xlu0 %2115  ;;  %v8672_v54 = vld [vmem:[#allocation72_spill] sm:$0xff] }
 0x2a1   : > { %v6381_v42 = vpop.permute.xlu1 %2615 }
 0x2a2   : > { %8509 = vst [vmem:[#allocation74_spill] sm:$0xff] %v6381_v42 }
 0x2a3   : > { %v6383_v62 = vpop.permute.xlu0 %2160 }
 0x2a6   : > { %v6385_v41 = vpop.permute.xlu1 %2653 }
 0x2a7   : > { %8510 = vst [vmem:[#allocation75_spill] sm:$0xff] %v6385_v41  ;;  %v6387_v20 = vpop.permute.xlu0 %2205 }
 0x2ab   : > { %v6389_v15 = vpop.permute.xlu1 %2719  ;;  %v6391_v61 = vpop.permute.xlu0 %2250 }
 0x2ac   : > { %8511 = vst [vmem:[#allocation76_spill] sm:$0xff] %v6389_v15 }
 0x2af   : > { %v6393_v48 = vpop.permute.xlu0 %2295 }
 0x2b0   : > { %v6395_v40 = vpop.permute.xlu1 %2755 }
 0x2b1   : > { %8512 = vst [vmem:[#allocation77_spill] sm:$0xff] %v6395_v40 }
 0x2b3   : > { %v6397_v3 = vpop.permute.xlu0 %2330 }
 0x2b4   : > { %8513 = vst [vmem:[#allocation78_spill] sm:$0xff] %v6397_v3  ;;  %v6399_v7 = vpop.permute.xlu1 %2790 }
 0x2b5   : > { %8514 = vst [vmem:[#allocation79_spill] sm:$0xff] %v6399_v7 }
 0x2b7   : > { %v6401_v60 = vpop.permute.xlu0 %2408 }
 0x2b8   : > { %8515 = vst [vmem:[#allocation80_spill] sm:$0xff] %v6401_v60 }
 0x2b9   : > { %v6403_v42 = vpop.permute.xlu1 %2796 }
 0x2ba   : > { %8516 = vst [vmem:[#allocation81_spill] sm:$0xff] %v6403_v42  ;;  %v1938_v42 = vsel %vm525_vm2, %v1936_v50, %v1934_v56 }
 0x2bb   : > { %v6405_v51 = vpop.permute.xlu0 %2512 }
 0x2bc   : > { %8517 = vst [vmem:[#allocation82_spill] sm:$0xff] %v6405_v51  ;;  %v1937_v51 = vsel %vm525_vm2, %v1934_v56, %v1936_v50 }
 0x2be   : > { %v2830_v41 = vpop.permute.xlu1 %2829 }
 0x2bf   : > { %v6407_v2 = vpop.permute.xlu0 %2599  ;;  %v2832_v57 = vmul.f32 %v2830_v41, %v6095_v28  ;;  %v2833_v7 = vmul.f32 %v2830_v41, %v6097_v31  ;;  %v1981_v28 = vsel %vm8396_vm5, %v1979_v0, %v1977_v33  ;;  %v2025_v41 = vsel %vm8522_vm11, %v2022_v8, %v2024_v45 }
 0x2c0   : > { %8518 = vst [vmem:[#allocation83_spill] sm:$0xff] %v6407_v2  ;;  %vm8529_vm11 = vcmp.lt.s32.totalorder %v5507_v11, 15 }
 0x2c3   : > { %v2836_v15 = vpop.permute.xlu1 %2835  ;;  %v6412_v35 = vpop.permute.xlu0 %2703 }
 0x2c4   : > { %v2838_v37 = vmul.f32 %v2836_v15, %v6101_v63  ;;  %v2839_v40 = vmul.f32 %v2836_v15, %v6103_v49  ;;  %8519 = vst [vmem:[#allocation84_spill] sm:$0xff] %v6412_v35  ;;  %v2141_v15 = vrot.slane %v6187_v39, %v5470_v53  ;;  %v2137_v35 = vrot.slane %v6181_v59, %v5470_v53 }
 0x2c6   : > { %v2840_v27 = vadd.f32 %v2838_v37, %v2832_v57  ;;  %v2841_v60 = vadd.f32 %v2839_v40, %v2833_v7  ;;  %v6427_v37 = vsel %vm5527_vm3, %v1938_v42, 0.0  ;;  %v1940_v40 = vsel %vm507_vm4, %v1937_v51, 0.0 }
 0x2c7   : > { %v2847_v2 = vpop.permute.xlu0 %2846  ;;  %v2026_v7 = vsel %vm8520_vm1, %v2024_v45, %v2022_v8  ;;  %v6439_v57 = vsel %vm8521_vm6, %v1981_v28, 0.0  ;;  %v6446_v51 = vmul.f32 %v2137_v35, %v6227_v4  ;;  %v1971_v28 = vrot.slane %v1940_v40, %v5470_v53  ;;  %vm8527_vm1 = vmmov %vm8525_vm12 }
 0x2c8   : > { %v2849_v3 = vadd.f32 %v2847_v2, %v2840_v27  ;;  %v2850_v50 = vadd.f32 %v2847_v2, %v2841_v60  ;;  %v1980_v27 = vsel %vm8396_vm5, %v1977_v33, %v1979_v0  ;;  %v6459_v45 = vsel %vm5563_vm8, %v2026_v7, 0.0  ;;  %v6472_v33 = vld [vmem:[%s8245_s7 + $0x26] sm:$0x3] }
 0x2c9   : > { %v2070_v0 = vsel %vm8523_vm15, %v6343_v14, %v6347_v46  ;;  %v2071_v8 = vsel %vm8524_vm7, %v6347_v46, %v6343_v14  ;;  %v2010_v35 = vrot.slane %v6439_v57, %v5470_v53  ;;  %v2014_v2 = vrot.slane %v1980_v27, %v5470_v53 }
 0x2ca   : > { %v6433_v56 = vmax.f32 %v2849_v3, 0.0  ;;  %v1967_v3 = vrot.slane %v6427_v37, %v5470_v53  ;;  %v2028_v7 = vsel %vm8395_vm9, %v2025_v41, 0.0  ;;  %v6479_v42 = vmax.f32 %v2850_v50, 0.0 }
 0x2cb   : > { %v6482_v60 = vmul.f32 %v2141_v15, %v6227_v4  ;;  %v2153_v14 = vsel %vm8525_vm12, %v6351_v17, %v6345_v47  ;;  %v1955_v31 = vrot.slane %v1940_v40, %v5467_v52  ;;  %v2055_v49 = vrot.slane %v6459_v45, %v5470_v53  ;;  %vm8532_vm12 = vmmov %vm8526_vm0 }
 0x2cc   : > { %2898 = vrot.lane.b32.xlu0 %v6433_v56, %s8441_s28  ;;  %2855 = vrot.lane.b32.xlu1 %v6433_v56, %s8440_s18  ;;  %v6495_v50 = vsel %vm8526_vm0, %v2071_v8, 0.0  ;;  %v2073_v4 = vsel %vm507_vm4, %v2070_v0, 0.0  ;;  %v6500_v15 = vmul.f32 %v1967_v3, %v6197_v25  ;;  %v1998_v40 = vrot.slane %v1980_v27, %v5467_v52 }
 0x2cd   : > { %v2059_v41 = vrot.slane %v2028_v7, %v5470_v53  ;;  %v2152_v8 = vsel %vm8527_vm1, %v6345_v47, %v6351_v17  ;;  %v1973_v46 = vmul.f32 %v1971_v28, %v6197_v25  ;;  %v2016_v0 = vmul.f32 %v2014_v2, %v6203_v12 }
 0x2ce   : > { %v2155_v3 = vsel %vm8395_vm9, %v2153_v14, 0.0  ;;  %v1994_v63 = vrot.slane %v6439_v57, %v5467_v52  ;;  %v2015_v32 = vmul.f32 %v2010_v35, %v6203_v12  ;;  %v2100_v27 = vrot.slane %v6495_v50, %v5470_v53 }
 0x2cf   : > { %v2104_v18 = vrot.slane %v2073_v4, %v5470_v53  ;;  %vm8528_vm6 = vcmp.lt.s32.totalorder %v5497_v6, 113  ;;  %v2039_v47 = vrot.slane %v6459_v45, %v5467_v52  ;;  %v6529_v25 = vsel %vm8529_vm11, %v2152_v8, 0.0 }
 0x2d0   : > { %2910 = vperm.xlu0 %5034, %v6472_v33   ;;  %2857 = vrot.lane.b32.xlu1 %v6479_v42, %s8440_s18  ;;  %v2198_v17 = vsel %vm8528_vm6, %v6355_v19, %v6349_v38  ;;  %v2000_v57 = vmul.f32 %v1998_v40, %v6369_v1  ;;  %v2043_v12 = vrot.slane %v2028_v7, %v5467_v52  ;;  %vm8530_vm15 = vmmov %vm8528_vm6  ;;  %vm8531_vm7 = vcmp.lt.s32.totalorder %v5497_v6, 112 }
 0x2d1   : > { %v2060_v28 = vmul.f32 %v2055_v49, %v6213_v13  ;;  %v2186_v35 = vrot.slane %v2155_v3, %v5470_v53  ;;  %v2197_v45 = vsel %vm8530_vm15, %v6349_v38, %v6355_v19  ;;  %v2061_v2 = vmul.f32 %v2059_v41, %v6213_v13  ;;  %v6548_v49 = vld [vmem:[%s8245_s7 + $0x28] sm:$0x3]  ;;  %vm8536_vm6 = vmmov %vm8531_vm7 }
 0x2d2   : > { %v2084_v14 = vrot.slane %v6495_v50, %v5467_v52  ;;  %v1957_v7 = vmul.f32 %v1955_v31, %v6365_v43  ;;  %v2045_v40 = vmul.f32 %v2043_v12, %v6373_v29  ;;  %v2088_v8 = vrot.slane %v2073_v4, %v5467_v52 }
 0x2d3   : > { %v2243_v38 = vsel %vm8531_vm7, %v6359_v30, %v6353_v23  ;;  %v2105_v19 = vmul.f32 %v2100_v27, %v6219_v26  ;;  %v2106_v50 = vmul.f32 %v2104_v18, %v6219_v26  ;;  %v6565_v41 = vsel %vm8532_vm12, %v2197_v45, 0.0 }
 0x2d4   : > { %2943 = vrot.lane.b32.xlu0 %v6433_v56, %s8442_s21  ;;  %2883 = vperm.xlu1 %5036, %v6324_v22   ;;  %v2200_v22 = vsel %vm5638_vm10, %v2198_v17, 0.0  ;;  %v2018_v31 = vadd.f32 %v2016_v0, %v2000_v57  ;;  %v2090_v17 = vmul.f32 %v2088_v8, %v6375_v55  ;;  %v2166_v4 = vrot.slane %v6529_v25, %v5467_v52 }
 0x2d5   : > { %v2231_v12 = vrot.slane %v2200_v22, %v5470_v53  ;;  %vm8533_vm0 = vcmp.lt.s32.totalorder %v5497_v6, 111  ;;  %v2170_v26 = vrot.slane %v2155_v3, %v5467_v52  ;;  %v2188_v0 = vmul.f32 %v2186_v35, %v6240_v36 }
 0x2d6   : > { %v2288_v18 = vsel %vm8533_vm0, %v6363_v34, %v6357_v44  ;;  %vm8534_vm1 = vcmp.lt.s32.totalorder %v5504_v9, 240  ;;  %v1975_v57 = vadd.f32 %v1973_v46, %v1957_v7  ;;  %v2063_v45 = vadd.f32 %v2061_v2, %v2045_v40  ;;  %vm8538_vm11 = vmmov %vm8533_vm0 }
 0x2d7   : > { %v2245_v27 = vsel %vm8534_vm1, %v2243_v38, 0.0  ;;  %v8535_v8 = vrot.slane %v6187_v39, %v5467_v52  ;;  %v2227_v10 = vrot.slane %v6565_v41, %v5470_v53  ;;  %v6592_v3 = vsel %vm8536_vm6, %v6353_v23, %v6359_v30 }
 0x2d8   : > { %2955 = vperm.xlu0 %5034, %v6548_v49   ;;  %2900 = vrot.lane.b32.xlu1 %v6479_v42, %s8441_s28  ;;  %v1999_v35 = vmul.f32 %v1994_v63, %v6369_v1  ;;  %v2215_v38 = vrot.slane %v2200_v22, %v5467_v52  ;;  %v2290_v46 = vsel %vm5704_vm13, %v2288_v18, 0.0  ;;  %v2020_v2 = vadd.f32 %v2018_v31, %v1975_v57  ;;  %v4884_v22 = vld [vmem:[%s8245_s7 + $0x2a] sm:$0x3] }
 0x2d9   : > { %v2127_v13 = vmul.f32 %v8535_v8, %v6379_v58  ;;  %v2108_v7 = vadd.f32 %v2106_v50, %v2090_v17  ;;  %v2172_v39 = vmul.f32 %v2170_v26, %v6383_v62  ;;  %v2276_v40 = vrot.slane %v2245_v27, %v5470_v53 }
 0x2da   : > { %v8537_v1 = vrot.slane %v6427_v37, %v5467_v52  ;;  %v2044_v30 = vmul.f32 %v2039_v47, %v6373_v29  ;;  %v2233_v23 = vmul.f32 %v2231_v12, %v6249_v21  ;;  %v2065_v50 = vadd.f32 %v2063_v45, %v2020_v2 }
 0x2db   : > { %v2145_v31 = vadd.f32 %v6482_v60, %v2127_v13  ;;  %v2260_v17 = vrot.slane %v2245_v27, %v5467_v52  ;;  %v2321_v18 = vrot.slane %v2290_v46, %v5470_v53  ;;  %v2017_v26 = vadd.f32 %v2015_v32, %v1999_v35 }
 0x2dc   : > { %2988 = vrot.lane.b32.xlu0 %v6433_v56, %s8443_s20  ;;  %2926 = vperm.xlu1 %5036, %v6472_v33   ;;  %v1956_v63 = vmul.f32 %v8537_v1, %v6365_v43  ;;  %v2217_v33 = vmul.f32 %v2215_v38, %v6387_v20  ;;  %v2089_v43 = vmul.f32 %v2084_v14, %v6375_v55  ;;  %v4885_v14 = vld [vmem:[%s8245_s7 + $0x2c] sm:$0x3]  ;;  %vm8540_vm15 = vcmp.lt.s32.totalorder %v5507_v11, 15 }
 0x2dd   : > { %v2305_v29 = vrot.slane %v2290_v46, %v5467_v52  ;;  %v2110_v37 = vadd.f32 %v2108_v7, %v2065_v50  ;;  %v2190_v47 = vadd.f32 %v2188_v0, %v2172_v39  ;;  %v2262_v12 = vmul.f32 %v2260_v17, %v6391_v61 }
 0x2de   : > { %v2287_v60 = vsel %vm8538_vm11, %v6357_v44, %v6363_v34  ;;  %v1974_v13 = vadd.f32 %v6500_v15, %v1956_v63  ;;  %v2062_v32 = vadd.f32 %v2060_v28, %v2044_v30  ;;  %v2278_v55 = vmul.f32 %v2276_v40, %v6259_v5 }
 0x2df   : > { %v8539_v0 = vrot.slane %v6181_v59, %v5467_v52  ;;  %v2147_v57 = vadd.f32 %v2145_v31, %v2110_v37  ;;  %v2235_v45 = vadd.f32 %v2233_v23, %v2217_v33  ;;  %v2307_v8 = vmul.f32 %v2305_v29, %v6393_v48 }
 0x2e0   : > { %3000 = vperm.xlu0 %5034, %v4884_v22   ;;  %2945 = vrot.lane.b32.xlu1 %v6479_v42, %s8442_s21  ;;  %v2019_v35 = vadd.f32 %v2017_v26, %v1974_v13  ;;  %v2107_v44 = vadd.f32 %v2105_v19, %v2089_v43  ;;  %v2211_v34 = vrot.slane %v6565_v41, %v5467_v52  ;;  %v2289_v28 = vsel %vm8540_vm15, %v2287_v60, 0.0  ;;  %v8542_v26 = vld [vmem:[#allocation78_spill] sm:$0xff] }
 0x2e1   : > { %v2126_v27 = vmul.f32 %v8539_v0, %v6379_v58  ;;  %v2323_v15 = vmul.f32 %v2321_v18, %v6269_v24  ;;  %v2171_v38 = vmul.f32 %v2166_v4, %v6383_v62  ;;  %v2192_v46 = vadd.f32 %v2190_v47, %v2147_v57  ;;  %v4888_v47 = vld [vmem:[%s8245_s7 + $0x32] sm:$0x3]  ;;  %v4880_v60 = vld [vmem:[%s8246_s8 + $0x4] sm:$0x3]  ;;  %v8545_v0 = vld [vmem:[#allocation49_spill] sm:$0xff] }
 0x2e2   : > { %v2280_v2 = vadd.f32 %v2278_v55, %v2262_v12  ;;  %v2256_v59 = vrot.slane %v6592_v3, %v5467_v52  ;;  %v2272_v58 = vrot.slane %v6592_v3, %v5470_v53  ;;  %v2064_v19 = vadd.f32 %v2062_v32, %v2019_v35  ;;  %v4889_v12 = vld [vmem:[%s8245_s7 + $0x34] sm:$0x3]  ;;  %v6709_v32 = vld [vmem:[%s8249_s11] sm:$0x1] }
 0x2e3   : > { %v8541_v41 = vrot.slane %v6529_v25, %v5470_v53  ;;  %v2144_v39 = vadd.f32 %v6446_v51, %v2126_v27  ;;  %v2216_v62 = vmul.f32 %v2211_v34, %v6387_v20  ;;  %v2237_v4 = vadd.f32 %v2235_v45, %v2192_v46  ;;  %v5071_v55 = vld [vmem:[%s8247_s9] sm:$0x3]  ;;  %v8546_v27 = vld [vmem:[#allocation50_spill] sm:$0xff]  ;;  %v8547_v57 = vld [vmem:[#allocation52_spill] sm:$0xff] }
 0x2e4   : > { %3037 = vperm.xlu0 %5034, %v4885_v14   ;;  %2971 = vperm.xlu1 %5036, %v6548_v49   ;;  %v2325_v40 = vadd.f32 %v2323_v15, %v2307_v8  ;;  %v2317_v49 = vrot.slane %v2289_v28, %v5470_v53  ;;  %v2109_v1 = vadd.f32 %v2107_v44, %v2064_v19  ;;  %v8543_v13 = vmov 1   ;;  %v6735_v15 = vpop.permute.xlu0 %2867 }
 0x2e5   : > { %v2187_v7 = vmul.f32 %v8541_v41, %v6240_v36  ;;  %v2232_v63 = vmul.f32 %v2227_v10, %v6249_v21  ;;  %v2301_v30 = vrot.slane %v2289_v28, %v5467_v52  ;;  %v2261_v23 = vmul.f32 %v2256_v59, %v6391_v61  ;;  %v4886_v36 = vld [vmem:[%s8245_s7 + $0x2e] sm:$0x3] }
 0x2e6   : > { %v2282_v50 = vadd.f32 %v2280_v2, %v2237_v4  ;;  %v2277_v20 = vmul.f32 %v2272_v58, %v6259_v5  ;;  %v2146_v51 = vadd.f32 %v2144_v39, %v2109_v1  ;;  %v2322_v33 = vmul.f32 %v2317_v49, %v6269_v24 }
 0x2e7   : > { %v2189_v3 = vadd.f32 %v2187_v7, %v2171_v38  ;;  %v2234_v10 = vadd.f32 %v2232_v63, %v2216_v62  ;;  %v2306_v21 = vmul.f32 %v2301_v30, %v6393_v48  ;;  %v8548_v45 = vmov 0  }
 0x2e8   : > { %3070 = vrot.lane.b32.xlu0 %v6433_v56, %s8444_s27  ;;  %2990 = vrot.lane.b32.xlu1 %v6479_v42, %s8443_s20  ;;  %v2327_v25 = vadd.f32 %v2325_v40, %v2282_v50  ;;  %v2279_v61 = vadd.f32 %v2277_v20, %v2261_v23  ;;  %vm8553_vm7 = vcmp.ge.s32.totalorder %v5497_v6, 16  ;;  %vm8554_vm12 = vcmp.lt.s32.totalorder %v5497_v6, 15 }
 0x2e9   : > { %v2191_v31 = vadd.f32 %v2189_v3, %v2146_v51  ;;  %v2324_v18 = vadd.f32 %v2322_v33, %v2306_v21  ;;  %vm8557_vm0 = vmmov %vm8554_vm12  ;;  %vm8561_vm1 = vcmp.lt.s32.totalorder %v5497_v6, 1  ;;  %vm8563_vm11 = vcmp.ge.s32.totalorder %v5507_v11, 1 }
 0x2ea   : > { %v2334_v43 = vadd.f32 %v8542_v26, %v2327_v25  ;;  %vm8562_vm6 = vmmov %vm8561_vm1  ;;  %vm8564_vm15 = vcmp.lt.s32.totalorder %v5497_v6, 127 }
 0x2eb   : > { %v2236_v17 = vadd.f32 %v2234_v10, %v2191_v31 }
 0x2ec   : > { %3082 = vperm.xlu0 %5034, %v4886_v36   ;;  %3016 = vperm.xlu1 %5036, %v4884_v22   ;;  %v6669_v37 = vmax.f32 %v2334_v43, 0.0  ;;  %v4887_v22 = vld [vmem:[%s8245_s7 + $0x30] sm:$0x3] }
 0x2ed   : > { %v2281_v5 = vadd.f32 %v2279_v61, %v2236_v17 }
 0x2ef   : > { %v2326_v29 = vadd.f32 %v2324_v18, %v2281_v5 }
 0x2f0   : > { %3115 = vrot.lane.b32.xlu0 %v6433_v56, %s8423_s17  ;;  %3053 = vperm.xlu1 %5036, %v4885_v14   ;;  %v8544_v14 = vld [vmem:[#allocation48_spill] sm:$0xff] }
 0x2f1   : > { %v2333_v48 = vadd.f32 %v8542_v26, %v2326_v29 }
 0x2f3   : > { %v6676_v24 = vmax.f32 %v2333_v48, 0.0 }
 0x2f4   : > { %2346 = vrot.lane.b32.xlu0 %v6669_v37, %s5151_s24  ;;  %3072 = vrot.lane.b32.xlu1 %v6479_v42, %s8444_s27 }
 0x2f8   : > { %2447 = vrot.lane.b32.xlu0 %v6669_v37, %s5152_s26  ;;  %3098 = vperm.xlu1 %5036, %v4886_v36  }
 0x2fc   : > { %2638 = vrot.lane.b32.xlu0 %v6669_v37, %s5153_s29  ;;  %2344 = vrot.lane.b32.xlu1 %v6676_v24, %s5151_s24  ;;  %s5155_s24 = smov 3  }
 0x300   : > { %3127 = vperm.xlu0 %5034, %v4887_v22   ;;  %2391 = vrot.lane.b32.xlu1 %v6676_v24, %s8363_s2 }
 0x304   : > { %3160 = vrot.lane.b32.xlu0 %v6433_v56, %s8445_s14  ;;  %2393 = vrot.lane.b32.xlu1 %v6669_v37, %s8363_s2  ;;  %s5157_s2 = smov 80  }
 0x308   : > { %3172 = vperm.xlu0 %5034, %v4888_v47   ;;  %2445 = vrot.lane.b32.xlu1 %v6676_v24, %s5152_s26  ;;  %s5160_s26 = smov 75  }
 0x30c   : > { %3205 = vrot.lane.b32.xlu0 %v6433_v56, %s8424_s0  ;;  %2495 = vrot.lane.b32.xlu1 %v6676_v24, %s5155_s24 }
 0x310   : > { %3217 = vperm.xlu0 %5034, %v4889_v12   ;;  %2497 = vrot.lane.b32.xlu1 %v6669_v37, %s5155_s24  ;;  %s8577_s24 = smov 48  }
 0x314   : > { %3252 = vperm.xlu0 %5034, %v4880_v60   ;;  %2582 = vrot.lane.b32.xlu1 %v6676_v24, %s5156_s3 }
 0x318   : > { %5037 = vset.pattern.permute.xlu0 %v8543_v13  ;;  %2584 = vrot.lane.b32.xlu1 %v6669_v37, %s5156_s3  ;;  %s8373_s3 = smov 53  }
 0x319   : > { %1886 = vperm.xlu0 %5037, %v6709_v32  }
 0x31c   : > { %2636 = vrot.lane.b32.xlu1 %v6676_v24, %s5153_s29  ;;  %s5159_s29 = smov 85  }
 0x31d   : > { %2376 = vperm.xlu0 %5037, %v5071_v55  }
 0x320   : > { %2686 = vrot.lane.b32.xlu1 %v6676_v24, %s5157_s2 }
 0x321   : > { %2740 = vrot.lane.b32.xlu0 %v6669_v37, %s5158_s19 }
 0x324   : > { %2688 = vrot.lane.b32.xlu1 %v6669_v37, %s5157_s2 }
 0x325   : > { %2478 = vperm.xlu0 %5037, %v8544_v14  }
 0x328   : > { %2738 = vrot.lane.b32.xlu1 %v6676_v24, %s5158_s19  ;;  %s5164_s19 = smov 43  }
 0x329   : > { %2565 = vperm.xlu0 %5037, %v8545_v0  }
 0x32c   : > { %3117 = vrot.lane.b32.xlu1 %v6479_v42, %s8423_s17 }
 0x32d   : > { %2669 = vperm.xlu0 %5037, %v8546_v27  }
 0x330   : > { %3143 = vperm.xlu1 %5036, %v4887_v22   ;;  %v8675_v22 = vrot.slane %v6676_v24, %v5470_v53 }
 0x331   : > { %2771 = vperm.xlu0 %5037, %v8547_v57   ;;  %v8625_v57 = vld [vmem:[#allocation22_spill] sm:$0xff] }
 0x334   : > { %3162 = vrot.lane.b32.xlu1 %v6479_v42, %s8445_s14 }
 0x338   : > { %3188 = vperm.xlu1 %5036, %v4888_v47  }
 0x33c   : > { %3207 = vrot.lane.b32.xlu1 %v6479_v42, %s8424_s0 }
 0x33e   : > { %v2856_v8 = vpop.permute.xlu1 %2855  ;;  %v2899_v38 = vpop.permute.xlu0 %2898 }
 0x340   : > { %3233 = vperm.xlu1 %5036, %v4889_v12  }
 0x342   : > { %v2858_v35 = vpop.permute.xlu1 %2857 }
 0x343   : > { %v2860_v18 = vsel %vm525_vm2, %v2858_v35, %v2856_v8  ;;  %v2859_v26 = vsel %vm525_vm2, %v2856_v8, %v2858_v35 }
 0x344   : > { %5038 = vset.pattern.permute.xlu1 %v8548_v45  ;;  %v2861_v47 = vsel %vm5527_vm3, %v2860_v18, 0.0  ;;  %v2862_v12 = vsel %vm507_vm4, %v2859_v26, 0.0 }
 0x345   : > { %v2877_v18 = vrot.slane %v2862_v12, %v5467_v52  ;;  %v2889_v26 = vrot.slane %v2861_v47, %v5470_v53 }
 0x34f   : > { %v2911_v2 = vpop.permute.xlu0 %2910 }
 0x353   : > { %v6733_v44 = vpop.permute.xlu1 %2883  ;;  %v2944_v58 = vpop.permute.xlu0 %2943 }
 0x357   : > { %v2901_v34 = vpop.permute.xlu1 %2900  ;;  %v6741_v7 = vpop.permute.xlu0 %2955 }
 0x358   : > { %v2903_v33 = vsel %vm8396_vm5, %v2901_v34, %v2899_v38  ;;  %v2902_v43 = vsel %vm8396_vm5, %v2899_v38, %v2901_v34  ;;  %v2873_v34 = vrot.slane %v2861_v47, %v5467_v52  ;;  %v3043_v38 = vrot.slane %v6433_v56, %v5467_v52 }
 0x359   : > { %v2904_v5 = vsel %vm8553_vm7, %v2903_v33, 0.0  ;;  %v2920_v60 = vrot.slane %v2902_v43, %v5467_v52  ;;  %v2936_v55 = vrot.slane %v2902_v43, %v5470_v53  ;;  %v2893_v43 = vrot.slane %v2862_v12, %v5470_v53  ;;  %vm8565_vm7 = vmmov %vm8564_vm15 }
 0x35a   : > { %v2916_v14 = vrot.slane %v2904_v5, %v5467_v52  ;;  %v2932_v0 = vrot.slane %v2904_v5, %v5470_v53  ;;  %v2878_v47 = vmul.f32 %v2873_v34, %v6735_v15  ;;  %v3047_v12 = vrot.slane %v6479_v42, %v5467_v52 }
 0x35b   : > { %v2927_v28 = vpop.permute.xlu1 %2926  ;;  %v2989_v62 = vpop.permute.xlu0 %2988 }
 0x35f   : > { %v2946_v46 = vpop.permute.xlu1 %2945  ;;  %v6749_v49 = vpop.permute.xlu0 %3000 }
 0x360   : > { %v2948_v29 = vsel %vm8554_vm12, %v2946_v46, %v2944_v58  ;;  %v2947_v27 = vsel %vm8557_vm0, %v2944_v58, %v2946_v46  ;;  %vm8566_vm12 = vcmp.lt.s32.totalorder %v5497_v6, 113 }
 0x361   : > { %v2949_v8 = vsel %vm5563_vm8, %v2948_v29, 0.0  ;;  %v2950_v58 = vsel %vm8395_vm9, %v2947_v27, 0.0  ;;  %v3063_v27 = vrot.slane %v6479_v42, %v5470_v53  ;;  %vm8567_vm0 = vmmov %vm8566_vm12 }
 0x362   : > { %v2961_v5 = vrot.slane %v2949_v8, %v5467_v52  ;;  %v2977_v29 = vrot.slane %v2949_v8, %v5470_v53  ;;  %v2894_v8 = vmul.f32 %v2889_v26, %v6733_v44 }
 0x363   : > { %v6737_v59 = vpop.permute.xlu1 %2971  ;;  %v6753_v63 = vpop.permute.xlu0 %3037 }
 0x364   : > { %v2982_v42 = vmul.f32 %v2977_v29, %v6737_v59 }
 0x367   : > { %v2991_v19 = vpop.permute.xlu1 %2990  ;;  %v6759_v23 = vpop.permute.xlu0 %3070 }
 0x368   : > { %v2993_v46 = vsel %vm8561_vm1, %v2991_v19, %v2989_v62  ;;  %vm8568_vm1 = vcmp.lt.s32.totalorder %v5507_v11, 15 }
 0x36b   : > { %v6739_v41 = vpop.permute.xlu1 %3016  ;;  %v6763_v20 = vpop.permute.xlu0 %3082 }
 0x36f   : > { %v6743_v39 = vpop.permute.xlu1 %3053  ;;  %v6769_v10 = vpop.permute.xlu0 %3115 }
 0x373   : > { %v6745_v4 = vpop.permute.xlu1 %3072  ;;  %v6773_v25 = vpop.permute.xlu0 %2346 }
 0x377   : > { %v6747_v40 = vpop.permute.xlu1 %3098  ;;  %v6781_v17 = vpop.permute.xlu0 %2447 }
 0x37b   : > { %v6751_v1 = vpop.permute.xlu1 %2344  ;;  %v6807_v35 = vpop.permute.xlu0 %2638 }
 0x37c   : > { %8559 = vst [vmem:[#allocation14_spill] sm:$0xff] %v6807_v35  ;;  %v2937_v35 = vmul.f32 %v2932_v0, %v2927_v28 }
 0x37f   : > { %v6755_v30 = vpop.permute.xlu1 %2391 }
 0x383   : > { %v6757_v3 = vpop.permute.xlu1 %2393 }
 0x387   : > { %v6761_v50 = vpop.permute.xlu1 %2445 }
 0x38b   : > { %v6765_v36 = vpop.permute.xlu1 %2495 }
 0x38f   : > { %v6767_v51 = vpop.permute.xlu1 %2497 }
 0x390   : > { %8549 = vst [vmem:[#allocation78_spill] sm:$0xff] %v6767_v51 }
 0x393   : > { %v6771_v21 = vpop.permute.xlu1 %2582 }
 0x394   : > { %8550 = vst [vmem:[#allocation48_spill] sm:$0xff] %v6771_v21  ;;  %v2938_v21 = vmul.f32 %v2936_v55, %v2927_v28  ;;  %v2966_v55 = vmul.f32 %v2961_v5, %v6741_v7 }
 0x397   : > { %v6775_v31 = vpop.permute.xlu1 %2584 }
 0x398   : > { %8551 = vst [vmem:[#allocation49_spill] sm:$0xff] %v6775_v31  ;;  %v2994_v31 = vsel %vm8563_vm11, %v2993_v46, 0.0 }
 0x399   : > { %v3006_v26 = vrot.slane %v2994_v31, %v5467_v52 }
 0x39b   : > { %v6777_v61 = vpop.permute.xlu1 %2636 }
 0x39c   : > { %8552 = vst [vmem:[#allocation50_spill] sm:$0xff] %v6777_v61  ;;  %v2921_v61 = vmul.f32 %v2916_v14, %v2911_v2  ;;  %v2981_v14 = vrot.slane %v2950_v58, %v5470_v53 }
 0x39e   : > { %v2939_v0 = vadd.f32 %v2937_v35, %v2921_v61  ;;  %v2983_v46 = vmul.f32 %v2981_v14, %v6737_v59 }
 0x39f   : > { %v6793_v48 = vpop.permute.xlu1 %2686 }
 0x3a0   : > { %8555 = vst [vmem:[#allocation52_spill] sm:$0xff] %v6793_v48  ;;  %v2992_v48 = vsel %vm8562_vm6, %v2989_v62, %v2991_v19  ;;  %v2895_v19 = vmul.f32 %v2893_v43, %v6733_v44  ;;  %v6839_v62 = vpop.permute.xlu0 %3127  ;;  %v3022_v44 = vrot.slane %v2994_v31, %v5470_v53  ;;  %v3059_v31 = vrot.slane %v6433_v56, %v5470_v53  ;;  %vm8569_vm6 = vmmov %vm8563_vm11 }
 0x3a1   : > { %v2995_v28 = vsel %vm507_vm4, %v2992_v48, 0.0  ;;  %vm8571_vm11 = vcmp.lt.s32.totalorder %v5497_v6, 112 }
 0x3a2   : > { %v3010_v43 = vrot.slane %v2995_v28, %v5467_v52  ;;  %v3026_v48 = vrot.slane %v2995_v28, %v5470_v53 }
 0x3a3   : > { %v6812_v33 = vpop.permute.xlu1 %2688 }
 0x3a4   : > { %8560 = vst [vmem:[#allocation85_spill] sm:$0xff] %v6812_v33  ;;  %v2922_v33 = vmul.f32 %v2920_v60, %v2911_v2  ;;  %v2965_v2 = vrot.slane %v2950_v58, %v5467_v52  ;;  %v2879_v60 = vmul.f32 %v2877_v18, %v6735_v15  ;;  %v3074_v15 = vsel %vm8564_vm15, %v6759_v23, %v6745_v4  ;;  %v3161_v59 = vpop.permute.xlu0 %3160  ;;  %vm8572_vm15 = vmmov %vm8571_vm11 }
 0x3a5   : > { %v3075_v18 = vsel %vm8565_vm7, %v6745_v4, %v6759_v23  ;;  %v2984_v58 = vadd.f32 %v2982_v42, %v2966_v55  ;;  %v3011_v4 = vmul.f32 %v3006_v26, %v6749_v49  ;;  %v3027_v23 = vmul.f32 %v3022_v44, %v6739_v41 }
 0x3a6   : > { %v2940_v34 = vadd.f32 %v2938_v21, %v2922_v33  ;;  %v2896_v21 = vadd.f32 %v2894_v8, %v2878_v47  ;;  %v2897_v35 = vadd.f32 %v2895_v19, %v2879_v60  ;;  %v2967_v33 = vmul.f32 %v2965_v2, %v6741_v7 }
 0x3a7   : > { %v6832_v51 = vpop.permute.xlu1 %2738  ;;  %v3076_v7 = vsel %vm8568_vm1, %v3074_v15, 0.0  ;;  %v3077_v56 = vsel %vm8395_vm9, %v3075_v18, 0.0  ;;  %v3012_v19 = vmul.f32 %v3010_v43, %v6749_v49  ;;  %v3028_v2 = vmul.f32 %v3026_v48, %v6739_v41 }
 0x3a8   : > { %v2941_v47 = vadd.f32 %v2939_v0, %v2896_v21  ;;  %v2942_v8 = vadd.f32 %v2940_v34, %v2897_v35  ;;  %v3049_v60 = vmul.f32 %v3047_v12, %v6753_v63  ;;  %v3088_v26 = vrot.slane %v3076_v7, %v5467_v52 }
 0x3a9   : > { %v3092_v0 = vrot.slane %v3077_v56, %v5467_v52  ;;  %v3104_v34 = vrot.slane %v3076_v7, %v5470_v53  ;;  %v3108_v49 = vrot.slane %v3077_v56, %v5470_v53  ;;  %v2985_v41 = vadd.f32 %v2983_v46, %v2967_v33 }
 0x3aa   : > { %v2986_v44 = vadd.f32 %v2984_v58, %v2941_v47  ;;  %v3029_v43 = vadd.f32 %v3027_v23, %v3011_v4  ;;  %v3065_v12 = vmul.f32 %v3063_v27, %v6743_v39  ;;  %vm8573_vm7 = vcmp.lt.s32.totalorder %v5504_v9, 240 }
 0x3ab   : > { %v3118_v61 = vpop.permute.xlu1 %3117  ;;  %v3109_v27 = vmul.f32 %v3104_v34, %v6747_v40  ;;  %v3110_v58 = vmul.f32 %v3108_v49, %v6747_v40 }
 0x3ac   : > { %v3119_v5 = vsel %vm8566_vm12, %v6769_v10, %v3118_v61  ;;  %v3120_v29 = vsel %vm8567_vm0, %v3118_v61, %v6769_v10  ;;  %v3048_v10 = vmul.f32 %v3043_v38, %v6753_v63  ;;  %v3064_v38 = vmul.f32 %v3059_v31, %v6743_v39  ;;  %v3173_v61 = vpop.permute.xlu0 %3172 }
 0x3ad   : > { %v3121_v55 = vsel %vm8569_vm6, %v3119_v5, 0.0  ;;  %v3122_v42 = vsel %vm5638_vm10, %v3120_v29, 0.0  ;;  %v3030_v63 = vadd.f32 %v3028_v2, %v3012_v19  ;;  %v3093_v31 = vmul.f32 %v3088_v26, %v6763_v20 }
 0x3ae   : > { %v3133_v48 = vrot.slane %v3121_v55, %v5467_v52  ;;  %v3137_v15 = vrot.slane %v3122_v42, %v5467_v52  ;;  %v3149_v21 = vrot.slane %v3121_v55, %v5470_v53  ;;  %v3153_v35 = vrot.slane %v3122_v42, %v5470_v53 }
 0x3af   : > { %v3144_v28 = vpop.permute.xlu1 %3143  ;;  %v3094_v39 = vmul.f32 %v3092_v0, %v6763_v20  ;;  %v2987_v5 = vadd.f32 %v2985_v41, %v2942_v8  ;;  %v3066_v29 = vadd.f32 %v3064_v38, %v3048_v10  ;;  %v3067_v7 = vadd.f32 %v3065_v12, %v3049_v60 }
 0x3b0   : > { %v3138_v20 = vmul.f32 %v3133_v48, %v6839_v62  ;;  %v3139_v2 = vmul.f32 %v3137_v15, %v6839_v62  ;;  %v3154_v40 = vmul.f32 %v3149_v21, %v3144_v28  ;;  %v3155_v8 = vmul.f32 %v3153_v35, %v3144_v28  ;;  %v3206_v0 = vpop.permute.xlu0 %3205 }
 0x3b1   : > { %v3031_v10 = vadd.f32 %v3029_v43, %v2986_v44  ;;  %v3032_v55 = vadd.f32 %v3030_v63, %v2987_v5  ;;  %v3111_v42 = vadd.f32 %v3109_v27, %v3093_v31  ;;  %v3112_v26 = vadd.f32 %v3110_v58, %v3094_v39 }
 0x3b2   : > { %vm8574_vm12 = vcmp.lt.s32.totalorder %v5497_v6, 111  ;;  %vm3261_vm6 = vcmp.ge.s32.totalorder %v5497_v6, 80 }
 0x3b3   : > { %v3163_v18 = vpop.permute.xlu1 %3162  ;;  %v3068_v38 = vadd.f32 %v3066_v29, %v3031_v10  ;;  %v3069_v12 = vadd.f32 %v3067_v7, %v3032_v55  ;;  %vm8575_vm0 = vmmov %vm8574_vm12 }
 0x3b4   : > { %v3164_v33 = vsel %vm8571_vm11, %v3161_v59, %v3163_v18  ;;  %v3165_v46 = vsel %vm8572_vm15, %v3163_v18, %v3161_v59  ;;  %v3218_v27 = vpop.permute.xlu0 %3217  ;;  %vm8399_vm11 = vcmp.ge.s32.totalorder %v5507_v11, 5  ;;  %vm3271_vm15 = vcmp.lt.s32.totalorder %v5497_v6, 85 }
 0x3b5   : > { %v3167_v4 = vsel %vm8573_vm7, %v3165_v46, 0.0  ;;  %v3178_v23 = vrot.slane %v3164_v33, %v5467_v52  ;;  %v3194_v59 = vrot.slane %v3164_v33, %v5470_v53  ;;  %v3156_v33 = vadd.f32 %v3154_v40, %v3138_v20 }
 0x3b6   : > { %v3182_v56 = vrot.slane %v3167_v4, %v5467_v52  ;;  %v3198_v19 = vrot.slane %v3167_v4, %v5470_v53  ;;  %v3157_v46 = vadd.f32 %v3155_v8, %v3139_v2  ;;  %v3113_v4 = vadd.f32 %v3111_v42, %v3068_v38 }
 0x3b7   : > { %v3189_v47 = vpop.permute.xlu1 %3188  ;;  %v3183_v34 = vmul.f32 %v3178_v23, %v3173_v61  ;;  %v3114_v48 = vadd.f32 %v3112_v26, %v3069_v12  ;;  %v5163_v38 = vmov 4   ;;  %v6962_v12 = vld [vmem:[%s8247_s9 + $0x18] sm:$0x3]  ;;  %vm8383_vm7 = vcmp.ge.s32.totalorder %v5514_v16, 5 }
 0x3b8   : > { %v3184_v60 = vmul.f32 %v3182_v56, %v3173_v61  ;;  %v3199_v49 = vmul.f32 %v3194_v59, %v3189_v47  ;;  %v3200_v41 = vmul.f32 %v3198_v19, %v3189_v47  ;;  %v3158_v58 = vadd.f32 %v3156_v33, %v3113_v4  ;;  %v3253_v8 = vpop.permute.xlu0 %3252  ;;  %v4898_v33 = vld [vmem:[%s8247_s9 + $0x20] sm:$0x3]  ;;  %v6983_v4 = vld [vmem:[%s8247_s9 + $0x1c] sm:$0x3] }
 0x3b9   : > { %v3159_v5 = vadd.f32 %v3157_v46, %v3114_v48  ;;  %v4899_v46 = vld [vmem:[%s8247_s9 + $0x22] sm:$0x3]  ;;  %v4901_v48 = vld [vmem:[%s8244_s6 + $0x6] sm:$0x3] }
 0x3ba   : > { %v3201_v44 = vadd.f32 %v3199_v49, %v3183_v34  ;;  %v3202_v43 = vadd.f32 %v3200_v41, %v3184_v60  ;;  %v4893_v34 = vld [vmem:[%s8247_s9 + $0x16] sm:$0x3]  ;;  %v4895_v60 = vld [vmem:[%s8247_s9 + $0x1a] sm:$0x3]  ;;  %v6943_v49 = vld [vmem:[%s8247_s9 + $0x14] sm:$0x3] }
 0x3bb   : > { %v3208_v18 = vpop.permute.xlu1 %3207  ;;  %v4900_v41 = vld [vmem:[%s8446_s5 + $0x6] sm:$0x3] }
 0x3bc   : > { %v3209_v62 = vsel %vm8574_vm12, %v3206_v0, %v3208_v18  ;;  %v3210_v28 = vsel %vm8575_vm0, %v3208_v18, %v3206_v0  ;;  %v3203_v59 = vadd.f32 %v3201_v44, %v3158_v58  ;;  %v3204_v47 = vadd.f32 %v3202_v43, %v3159_v5  ;;  %v4891_v0 = vld [vmem:[%s8247_s9 + $0x12] sm:$0x3]  ;;  %v4897_v18 = vld [vmem:[%s8247_s9 + $0x1e] sm:$0x3]  ;;  %vm3265_vm12 = vmand %vm3261_vm6, %vm8399_vm11 }
 0x3bd   : > { %v3211_v63 = vsel %vm8568_vm1, %v3209_v62, 0.0  ;;  %v3212_v15 = vsel %vm5704_vm13, %v3210_v28, 0.0  ;;  %v6994_v62 = vpop.permute.xlu0 %1886  ;;  %v4890_v28 = vld [vmem:[%s8248_s10 + $0x2] sm:$0x3]  ;;  %vm8398_vm0 = vcmp.lt.s32.totalorder %v5507_v11, 11  ;;  %vm3372_vm1 = vcmp.lt.s32.totalorder %v5497_v6, 75 }
 0x3be   : > { %v3223_v61 = vrot.slane %v3211_v63, %v5467_v52  ;;  %v3227_v21 = vrot.slane %v3212_v15, %v5467_v52  ;;  %v3239_v31 = vrot.slane %v3211_v63, %v5470_v53  ;;  %v3243_v39 = vrot.slane %v3212_v15, %v5470_v53  ;;  %8579 = vst [vmem:[#allocation87_spill] sm:$0xff] %v6994_v62 }
 0x3bf   : > { %v3234_v35 = vpop.permute.xlu1 %3233  ;;  %v5166_v63 = vmov 5  }
 0x3c0   : > { %v3228_v29 = vmul.f32 %v3223_v61, %v3218_v27  ;;  %v3229_v23 = vmul.f32 %v3227_v21, %v3218_v27  ;;  %v3244_v7 = vmul.f32 %v3239_v31, %v3234_v35  ;;  %v3245_v56 = vmul.f32 %v3243_v39, %v3234_v35 }
 0x3c1   : > { %v7000_v44 = vpop.permute.xlu0 %2376 }
 0x3c2   : > { %v3246_v19 = vadd.f32 %v3244_v7, %v3228_v29  ;;  %v3247_v20 = vadd.f32 %v3245_v56, %v3229_v23 }
 0x3c4   : > { %v3248_v2 = vadd.f32 %v3246_v19, %v3203_v59  ;;  %v3249_v40 = vadd.f32 %v3247_v20, %v3204_v47 }
 0x3c5   : > { %v7002_v43 = vpop.permute.xlu0 %2740 }
 0x3c6   : > { %v3255_v10 = vadd.f32 %v3253_v8, %v3248_v2  ;;  %v3256_v55 = vadd.f32 %v3253_v8, %v3249_v40 }
 0x3c8   : > { %v6919_v42 = vmax.f32 %v3255_v10, 0.0  ;;  %v6921_v26 = vmax.f32 %v3256_v55, 0.0 }
 0x3c9   : > { %v7006_v15 = vpop.permute.xlu0 %2478 }
 0x3ca   : > { %8576 = vst [vmem:[#allocation86_spill] sm:$0xff] %v6919_v42  ;;  %3269 = vrot.lane.b32.xlu0 %v6921_v26, %s5159_s29  ;;  %3267 = vrot.lane.b32.xlu1 %v6919_v42, %s5159_s29  ;;  %s5169_s29 = smov 7  }
 0x3cd   : > { %v7008_v61 = vpop.permute.xlu0 %2565 }
 0x3ce   : > { %3300 = vperm.xlu0 %5037, %v4891_v0   ;;  %3284 = vperm.xlu1 %5038, %v4891_v0  }
 0x3d1   : > { %v7010_v21 = vpop.permute.xlu0 %2669 }
 0x3d2   : > { %3370 = vrot.lane.b32.xlu0 %v6921_v26, %s5160_s26  ;;  %3315 = vrot.lane.b32.xlu1 %v6919_v42, %s5157_s2 }
 0x3d3   : > { %5039 = vset.pattern.permute.xlu1 %v8543_v13 }
 0x3d5   : > { %v7012_v35 = vpop.permute.xlu0 %2771 }
 0x3d6   : > { %3401 = vperm.xlu0 %5037, %v4893_v34   ;;  %3317 = vrot.lane.b32.xlu1 %v6921_v26, %s5157_s2 }
 0x3da   : > { %3488 = vperm.xlu0 %5037, %v4895_v60   ;;  %3347 = vperm.xlu1 %5039, %v6943_v49  }
 0x3de   : > { %3561 = vrot.lane.b32.xlu0 %v6921_v26, %s8373_s3  ;;  %3368 = vrot.lane.b32.xlu1 %v6919_v42, %s5160_s26  ;;  %s5165_s26 = smov 123   ;;  %s5171_s3 = smov 23  }
 0x3df   : > { %5040 = vset.pattern.permute.xlu1 %v8548_v45 }
 0x3e2   : > { %3757 = vperm.xlu0 %5037, %v4900_v41   ;;  %3385 = vperm.xlu1 %5040, %v4893_v34  }
 0x3e6   : > { %3611 = vrot.lane.b32.xlu0 %v6921_v26, %s8577_s24  ;;  %3418 = vrot.lane.b32.xlu1 %v6919_v42, %s5162_s16 }
 0x3e7   : > { %5041 = vset.pattern.permute.xlu1 %v8543_v13  ;;  %5045 = vset.pattern.permute.xlu0 %v5163_v38 }
 0x3ea   : > { %3662 = vrot.lane.b32.xlu0 %v6921_v26, %s5164_s19  ;;  %3420 = vrot.lane.b32.xlu1 %v6921_v26, %s5162_s16 }
 0x3ee   : > { %3451 = vperm.xlu1 %5041, %v6962_v12   ;;  %3718 = vperm.xlu0 %5045, %v6709_v32  }
 0x3f2   : > { %5042 = vset.pattern.permute.xlu1 %v8548_v45  ;;  %5046 = vset.pattern.permute.xlu0 %v8543_v13 }
 0x3f3   : > { %3472 = vperm.xlu1 %5042, %v4895_v60   ;;  %3592 = vperm.xlu0 %5046, %v4897_v18  }
 0x3f7   : > { %3505 = vrot.lane.b32.xlu1 %v6919_v42, %s5165_s26  ;;  %3641 = vperm.xlu0 %5046, %v4898_v33  }
 0x3f8   : > { %5043 = vset.pattern.permute.xlu1 %v8543_v13 }
 0x3fb   : > { %3507 = vrot.lane.b32.xlu1 %v6921_v26, %s5165_s26  ;;  %3693 = vperm.xlu0 %5046, %v4899_v46   ;;  %s5077_s26 = sshll.u32 %s5175_s12, 4  ;;  %s5078_s26 = int_to_ptr.vmem [resolvable:$false] %s5077_s26 }
 0x3ff   : > { %3538 = vperm.xlu1 %5043, %v6983_v4  }
 0x403   : > { %3559 = vrot.lane.b32.xlu1 %v6919_v42, %s8578_s4  ;;  %s5170_s4 = smov 121  }
 0x404   : > { %5044 = vset.pattern.permute.xlu1 %v8548_v45 }
 0x407   : > { %3751 = vperm.xlu1 %5044, %v4900_v41   ;;  %v3498_v41 = vrot.slane %v6921_v26, %v5470_v53 }
 0x40b   : > { %3768 = vperm.xlu1 %5044, %v4901_v48  }
 0x40f   : > { %3576 = vperm.xlu1 %5044, %v4897_v18  }
 0x413   : > { %3609 = vrot.lane.b32.xlu1 %v6919_v42, %s8577_s24  ;;  %s5172_s24 = smov 9  }
 0x417   : > { %3625 = vperm.xlu1 %5044, %v4898_v33  }
 0x41b   : > { %3660 = vrot.lane.b32.xlu1 %v6919_v42, %s5164_s19 }
 0x41f   : > { %3677 = vperm.xlu1 %5044, %v4899_v46  }
 0x423   : > { %3712 = vperm.xlu1 %5044, %v4890_v28  }
 0x427   : > { %5047 = vset.pattern.permute.xlu1 %v5166_v63 }
 0x428   : > { %3728 = vperm.xlu1 %5047, %v6709_v32  }
 0x42c   : > { %5048 = vset.pattern.permute.xlu1 %v8548_v45 }
 0x43c   : > { %v3268_v31 = vpop.permute.xlu1 %3267  ;;  %v3270_v39 = vpop.permute.xlu0 %3269 }
 0x43d   : > { %v3272_v32 = vsel %vm3271_vm15, %v3268_v31, %v3270_v39  ;;  %v3273_v27 = vsel %vm3271_vm15, %v3270_v39, %v3268_v31  ;;  %vm8397_vm15 = vcmp.lt.s32.totalorder %v5514_v16, 11 }
 0x43e   : > { %v3278_v58 = vsel %vm3265_vm12, %v3273_v27, 0.0  ;;  %v3279_v5 = vsel %vm8383_vm7, %v3272_v32, 0.0  ;;  %vm3366_vm12 = vmand %vm3261_vm6, %vm8398_vm0 }
 0x43f   : > { %v3290_v29 = vrot.slane %v3278_v58, %v5467_v52  ;;  %v3294_v23 = vrot.slane %v3279_v5, %v5467_v52  ;;  %v3306_v7 = vrot.slane %v3278_v58, %v5470_v53  ;;  %v3310_v56 = vrot.slane %v3279_v5, %v5470_v53 }
 0x44d   : > { %v3285_v59 = vpop.permute.xlu1 %3284  ;;  %v3301_v47 = vpop.permute.xlu0 %3300 }
 0x44e   : > { %v3295_v19 = vmul.f32 %v3290_v29, %v3285_v59  ;;  %v3296_v20 = vmul.f32 %v3294_v23, %v3285_v59  ;;  %v3311_v2 = vmul.f32 %v3306_v7, %v3301_v47  ;;  %v3312_v40 = vmul.f32 %v3310_v56, %v3301_v47 }
 0x450   : > { %v7028_v8 = vadd.f32 %v3311_v2, %v3295_v19  ;;  %v7030_v10 = vadd.f32 %v3312_v40, %v3296_v20 }
 0x451   : > { %v7032_v55 = vpop.permute.xlu1 %3315  ;;  %v3371_v0 = vpop.permute.xlu0 %3370 }
 0x452   : > { %8580 = vst [vmem:[#allocation88_spill] sm:$0xff] %v7028_v8  ;;  %8581 = vst [vmem:[#allocation89_spill] sm:$0xff] %v7030_v10 }
 0x453   : > { %8582 = vst [vmem:[#allocation90_spill] sm:$0xff] %v7032_v55 }
 0x455   : > { %v7034_v34 = vpop.permute.xlu1 %3317  ;;  %v3402_v60 = vpop.permute.xlu0 %3401 }
 0x456   : > { %8583 = vst [vmem:[#allocation91_spill] sm:$0xff] %v7034_v34 }
 0x459   : > { %v7038_v38 = vpop.permute.xlu1 %3347  ;;  %v7040_v18 = vpop.permute.xlu0 %3488 }
 0x45a   : > { %8584 = vst [vmem:[#allocation92_spill] sm:$0xff] %v7038_v38  ;;  %8585 = vst [vmem:[#allocation93_spill] sm:$0xff] %v7040_v18  ;;  %v3500_v33 = vmul.f32 %v3498_v41, %v7040_v18  ;;  %v3482_v41 = vrot.slane %v6921_v26, %v5467_v52  ;;  %v8599_v18 = vld [vmem:[#allocation25_spill] sm:$0xff] }
 0x45d   : > { %v3369_v46 = vpop.permute.xlu1 %3368  ;;  %v3562_v20 = vpop.permute.xlu0 %3561 }
 0x45e   : > { %v3373_v48 = vsel %vm3372_vm1, %v3369_v46, %v3371_v0  ;;  %v3374_v28 = vsel %vm3372_vm1, %v3371_v0, %v3369_v46  ;;  %vm3556_vm1 = vcmp.lt.s32.totalorder %v5504_v9, 176 }
 0x45f   : > { %v3379_v63 = vsel %vm3366_vm12, %v3374_v28, 0.0  ;;  %v3380_v31 = vsel %vm8397_vm15, %v3373_v48, 0.0  ;;  %vm3563_vm12 = vcmp.lt.s32.totalorder %v5497_v6, 53  ;;  %vm3558_vm14 = vmand %vm3556_vm1, %vm8383_vm7 }
 0x460   : > { %v3407_v39 = vrot.slane %v3379_v63, %v5470_v53  ;;  %v3411_v32 = vrot.slane %v3380_v31, %v5470_v53  ;;  %v3391_v27 = vrot.slane %v3379_v63, %v5467_v52  ;;  %v3395_v58 = vrot.slane %v3380_v31, %v5467_v52  ;;  %vm3659_vm7 = vmand %vm3556_vm1, %vm8397_vm15 }
 0x461   : > { %v3386_v5 = vpop.permute.xlu1 %3385  ;;  %v3758_v0 = vpop.permute.xlu0 %3757 }
 0x462   : > { %v3396_v29 = vmul.f32 %v3391_v27, %v3386_v5  ;;  %v3397_v23 = vmul.f32 %v3395_v58, %v3386_v5  ;;  %v3412_v7 = vmul.f32 %v3407_v39, %v3402_v60  ;;  %v3413_v56 = vmul.f32 %v3411_v32, %v3402_v60 }
 0x464   : > { %v7056_v59 = vadd.f32 %v3412_v7, %v3396_v29  ;;  %v7058_v47 = vadd.f32 %v3413_v56, %v3397_v23 }
 0x465   : > { %v7060_v19 = vpop.permute.xlu1 %3418  ;;  %v3612_v60 = vpop.permute.xlu0 %3611 }
 0x466   : > { %8586 = vst [vmem:[#allocation94_spill] sm:$0xff] %v7056_v59  ;;  %8587 = vst [vmem:[#allocation95_spill] sm:$0xff] %v7058_v47  ;;  %v8600_v59 = vld [vmem:[#allocation26_spill] sm:$0xff] }
 0x467   : > { %8588 = vst [vmem:[#allocation96_spill] sm:$0xff] %v7060_v19  ;;  %v8634_v19 = vld [vmem:[#allocation35_spill] sm:$0xff] }
 0x469   : > { %v7062_v2 = vpop.permute.xlu1 %3420  ;;  %v7075_v31 = vpop.permute.xlu0 %3662 }
 0x46a   : > { %8589 = vst [vmem:[#allocation97_spill] sm:$0xff] %v7062_v2 }
 0x46d   : > { %v7064_v40 = vpop.permute.xlu1 %3451  ;;  %v7082_v27 = vpop.permute.xlu0 %3718 }
 0x46e   : > { %8590 = vst [vmem:[#allocation98_spill] sm:$0xff] %v7064_v40  ;;  %8596 = vst [vmem:[#allocation104_spill] sm:$0xff] %v7082_v27  ;;  %v8598_v27 = vld [vmem:[#allocation29_spill] sm:$0xff] }
 0x472   : > { %v7068_v46 = vpop.permute.xlu1 %3472  ;;  %v3593_v23 = vpop.permute.xlu0 %3592 }
 0x473   : > { %8591 = vst [vmem:[#allocation99_spill] sm:$0xff] %v7068_v46  ;;  %v3484_v48 = vmul.f32 %v3482_v41, %v7068_v46  ;;  %v8597_v41 = vld [vmem:[#allocation28_spill] sm:$0xff] }
 0x475   : > { %v7071_v28 = vadd.f32 %v3500_v33, %v3484_v48  ;;  %v3760_v48 = vmul.f32 %v3758_v0, %v8597_v41 }
 0x476   : > { %v7073_v63 = vpop.permute.xlu1 %3505 }
 0x477   : > { %8592 = vst [vmem:[#allocation100_spill] sm:$0xff] %v7071_v28  ;;  %8593 = vst [vmem:[#allocation101_spill] sm:$0xff] %v7073_v63  ;;  %v3761_v28 = vmul.f32 %v3758_v0, %v8598_v27 }
 0x47a   : > { %v7077_v39 = vpop.permute.xlu1 %3507 }
 0x47b   : > { %8594 = vst [vmem:[#allocation102_spill] sm:$0xff] %v7077_v39 }
 0x47e   : > { %v7079_v32 = vpop.permute.xlu1 %3538 }
 0x47f   : > { %8595 = vst [vmem:[#allocation103_spill] sm:$0xff] %v7079_v32 }
 0x482   : > { %v3560_v26 = vpop.permute.xlu1 %3559 }
 0x483   : > { %v3564_v33 = vsel %vm3563_vm12, %v3560_v26, %v3562_v20  ;;  %v3565_v58 = vsel %vm3563_vm12, %v3562_v20, %v3560_v26  ;;  %vm3664_vm12 = vcmp.lt.s32.totalorder %v5497_v6, 43 }
 0x484   : > { %v3570_v5 = vsel %vm8399_vm11, %v3564_v33, 0.0  ;;  %v3571_v29 = vsel %vm3558_vm14, %v3565_v58, 0.0  ;;  %vm2395_vm14 = vcmp.lt.s32.totalorder %v5497_v6, 48  ;;  %vm2499_vm11 = vcmp.lt.s32.totalorder %v5497_v6, 3 }
 0x485   : > { %v3598_v7 = vrot.slane %v3570_v5, %v5470_v53  ;;  %v3602_v56 = vrot.slane %v3571_v29, %v5470_v53  ;;  %v3582_v41 = vrot.slane %v3570_v5, %v5467_v52  ;;  %v3586_v0 = vrot.slane %v3571_v29, %v5467_v52  ;;  %v4904_v29 = vld [vmem:[%s8245_s7 + $0x38] sm:$0x3] }
 0x486   : > { %v3752_v32 = vpop.permute.xlu1 %3751 }
 0x487   : > { %v3754_v47 = vmul.f32 %v3752_v32, %v8599_v18  ;;  %v3755_v46 = vmul.f32 %v3752_v32, %v8600_v59  ;;  %v3603_v10 = vmul.f32 %v3598_v7, %v3593_v23  ;;  %v3604_v20 = vmul.f32 %v3602_v56, %v3593_v23  ;;  %v3642_v32 = vpop.permute.xlu0 %3641 }
 0x489   : > { %v3762_v26 = vadd.f32 %v3760_v48, %v3754_v47  ;;  %v3763_v8 = vadd.f32 %v3761_v28, %v3755_v46 }
 0x48a   : > { %v3769_v33 = vpop.permute.xlu1 %3768 }
 0x48b   : > { %v3771_v58 = vadd.f32 %v3769_v33, %v3762_v26  ;;  %v3772_v40 = vadd.f32 %v3769_v33, %v3763_v8  ;;  %v4903_v8 = vld [vmem:[%s8245_s7 + $0x36] sm:$0x3]  ;;  %v4905_v33 = vld [vmem:[%s8245_s7 + $0x3a] sm:$0x3] }
 0x48d   : > { %v7097_v42 = vmax.f32 %v3771_v58, 0.0  ;;  %v7099_v38 = vmax.f32 %v3772_v40, 0.0 }
 0x48e   : > { %v3577_v27 = vpop.permute.xlu1 %3576 }
 0x48f   : > { %8601 = vst [vmem:[#allocation28_spill] sm:$0xff] %v7097_v42  ;;  %8602 = vst [vmem:[#allocation29_spill] sm:$0xff] %v7099_v38  ;;  %v3587_v63 = vmul.f32 %v3582_v41, %v3577_v27  ;;  %v3588_v18 = vmul.f32 %v3586_v0, %v3577_v27  ;;  %3779 = vrot.lane.b32.xlu0 %v7099_v38, %s8440_s18  ;;  %3777 = vrot.lane.b32.xlu1 %v7097_v42, %s8440_s18  ;;  %s5168_s18 = smov 105  }
 0x491   : > { %v7110_v59 = vadd.f32 %v3603_v10, %v3587_v63  ;;  %v7112_v47 = vadd.f32 %v3604_v20, %v3588_v18 }
 0x492   : > { %v3610_v40 = vpop.permute.xlu1 %3609 }
 0x493   : > { %8603 = vst [vmem:[#allocation25_spill] sm:$0xff] %v7110_v59  ;;  %8604 = vst [vmem:[#allocation26_spill] sm:$0xff] %v7112_v47  ;;  %v3613_v46 = vsel %vm2395_vm14, %v3610_v40, %v3612_v60  ;;  %v3614_v28 = vsel %vm2395_vm14, %v3612_v60, %v3610_v40  ;;  %3805 = vperm.xlu0 %5046, %v4903_v8   ;;  %3789 = vperm.xlu1 %5048, %v4903_v8   ;;  %v8627_v47 = vld [vmem:[#allocation27_spill] sm:$0xff] }
 0x494   : > { %v3620_v5 = vsel %vm3556_vm1, %v3614_v28, 0.0  ;;  %v3631_v10 = vrot.slane %v3613_v46, %v5467_v52  ;;  %v3647_v63 = vrot.slane %v3613_v46, %v5470_v53  ;;  %v3694_v46 = vpop.permute.xlu0 %3693  ;;  %vm8616_vm1 = vcmp.lt.s32.totalorder %v5497_v6, 15 }
 0x495   : > { %v3651_v23 = vrot.slane %v3620_v5, %v5470_v53  ;;  %v3635_v7 = vrot.slane %v3620_v5, %v5467_v52 }
 0x496   : > { %v3652_v56 = vmul.f32 %v3647_v63, %v3642_v32  ;;  %v3626_v60 = vpop.permute.xlu1 %3625 }
 0x497   : > { %v3653_v48 = vmul.f32 %v3651_v23, %v3642_v32  ;;  %v3636_v20 = vmul.f32 %v3631_v10, %v3626_v60  ;;  %v3637_v26 = vmul.f32 %v3635_v7, %v3626_v60  ;;  %3848 = vperm.xlu0 %5046, %v4904_v29   ;;  %3820 = vrot.lane.b32.xlu1 %v7097_v42, %s8441_s28 }
 0x499   : > { %v7134_v58 = vadd.f32 %v3652_v56, %v3636_v20  ;;  %v7136_v41 = vadd.f32 %v3653_v48, %v3637_v26  ;;  %v4909_v20 = vld [vmem:[%s8245_s7 + $0x42] sm:$0x3]  ;;  %v4906_v26 = vld [vmem:[%s8245_s7 + $0x3c] sm:$0x3] }
 0x49a   : > { %v3661_v0 = vpop.permute.xlu1 %3660 }
 0x49b   : > { %8605 = vst [vmem:[#allocation105_spill] sm:$0xff] %v7134_v58  ;;  %8606 = vst [vmem:[#allocation106_spill] sm:$0xff] %v7136_v41  ;;  %v3665_v27 = vsel %vm3664_vm12, %v3661_v0, %v7075_v31  ;;  %v3666_v18 = vsel %vm3664_vm12, %v7075_v31, %v3661_v0  ;;  %3893 = vperm.xlu0 %5046, %v4905_v33   ;;  %3832 = vperm.xlu1 %5048, %v4904_v29   ;;  %v4907_v29 = vld [vmem:[%s8245_s7 + $0x3e] sm:$0x3]  ;;  %v4908_v0 = vld [vmem:[%s8245_s7 + $0x40] sm:$0x3] }
 0x49c   : > { %v3671_v8 = vsel %vm8398_vm0, %v3665_v27, 0.0  ;;  %v3672_v40 = vsel %vm3659_vm7, %v3666_v18, 0.0  ;;  %v7214_v27 = vld [vmem:[%s8247_s9 + $0x28] sm:$0x3]  ;;  %v8609_v18 = vld [vmem:[#allocation56_spill] sm:$0xff]  ;;  %vm8613_vm7 = vcmp.ge.s32.totalorder %v5497_v6, 16  ;;  %vm8617_vm12 = vmmov %vm8616_vm1 }
 0x49d   : > { %v3683_v28 = vrot.slane %v3671_v8, %v5467_v52  ;;  %v3687_v32 = vrot.slane %v3672_v40, %v5467_v52  ;;  %v3699_v5 = vrot.slane %v3671_v8, %v5470_v53  ;;  %v3703_v10 = vrot.slane %v3672_v40, %v5470_v53  ;;  %v8610_v8 = vld [vmem:[#allocation57_spill] sm:$0xff] }
 0x49e   : > { %v3678_v63 = vpop.permute.xlu1 %3677  ;;  %v1520_v40 = vsel %vm8396_vm5, %v8610_v8, %v8609_v18  ;;  %vm2449_vm0 = vcmp.lt.s32.totalorder %v5497_v6, 45 }
 0x49f   : > { %v3688_v23 = vmul.f32 %v3683_v28, %v3678_v63  ;;  %v3689_v7 = vmul.f32 %v3687_v32, %v3678_v63  ;;  %v3704_v56 = vmul.f32 %v3699_v5, %v3694_v46  ;;  %v3705_v31 = vmul.f32 %v3703_v10, %v3694_v46  ;;  %3867 = vrot.lane.b32.xlu0 %v7099_v38, %s8442_s21  ;;  %v8611_v46 = vld [vmem:[#allocation54_spill] sm:$0xff]  ;;  %v8612_v28 = vld [vmem:[#allocation55_spill] sm:$0xff] }
 0x4a0   : > { %3877 = vperm.xlu1 %5048, %v4905_v33   ;;  %v4911_v33 = vld [vmem:[%s8245_s7 + $0x46] sm:$0x3]  ;;  %v1478_v32 = vsel %vm525_vm2, %v8612_v28, %v8611_v46  ;;  %v1477_v5 = vsel %vm525_vm2, %v8611_v46, %v8612_v28  ;;  %v1521_v10 = vsel %vm8613_vm7, %v1520_v40, 0.0  ;;  %v8614_v63 = vld [vmem:[#allocation59_spill] sm:$0xff]  ;;  %vm8620_vm7 = vcmp.lt.s32.totalorder %v5497_v6, 1 }
 0x4a1   : > { %v7155_v60 = vadd.f32 %v3704_v56, %v3688_v23  ;;  %v7157_v48 = vadd.f32 %v3705_v31, %v3689_v7  ;;  %v8615_v23 = vld [vmem:[#allocation58_spill] sm:$0xff]  ;;  %v1479_v56 = vsel %vm5527_vm3, %v1478_v32, 0.0  ;;  %v1480_v31 = vsel %vm507_vm4, %v1477_v5, 0.0 }
 0x4a2   : > { %v1565_v7 = vsel %vm8616_vm1, %v8615_v23, %v8614_v63  ;;  %v1490_v40 = vrot.slane %v1479_v56, %v5467_v52  ;;  %v1549_v46 = vrot.slane %v1521_v10, %v5470_v53  ;;  %v1494_v28 = vrot.slane %v1480_v31, %v5467_v52  ;;  %vm8621_vm1 = vmmov %vm8620_vm7 }
 0x4a3   : > { %8607 = vst [vmem:[#allocation107_spill] sm:$0xff] %v7155_v60  ;;  %8608 = vst [vmem:[#allocation108_spill] sm:$0xff] %v7157_v48  ;;  %3975 = vperm.xlu0 %5046, %v4907_v29   ;;  %v1506_v32 = vrot.slane %v1479_v56, %v5470_v53  ;;  %v8623_v56 = vld [vmem:[#allocation23_spill] sm:$0xff] }
 0x4a4   : > { %3822 = vrot.lane.b32.xlu1 %v7099_v38, %s8441_s28 }
 0x4a5   : > { %5049 = vset.pattern.permute.xlu1 %v8543_v13 }
 0x4a7   : > { %4065 = vperm.xlu0 %5046, %v4909_v20  }
 0x4a8   : > { %3938 = vperm.xlu1 %5049, %v4906_v26  }
 0x4ab   : > { %4039 = vrot.lane.b32.xlu0 %v7099_v38, %s8423_s17 }
 0x4ac   : > { %3865 = vrot.lane.b32.xlu1 %v7097_v42, %s8442_s21 }
 0x4ad   : > { %5050 = vset.pattern.permute.xlu1 %v8548_v45 }
 0x4af   : > { %4155 = vperm.xlu0 %5046, %v4911_v33  }
 0x4b0   : > { %3959 = vperm.xlu1 %5050, %v4907_v29   ;;  %v1564_v29 = vsel %vm8617_vm12, %v8614_v63, %v8615_v23  ;;  %vm8622_vm12 = vcmp.ge.s32.totalorder %v5507_v11, 1 }
 0x4b3   : > { %5055 = vset.pattern.permute.xlu0 %v8548_v45 }
 0x4b4   : > { %3910 = vrot.lane.b32.xlu1 %v7097_v42, %s8443_s20  ;;  %3331 = vperm.xlu0 %5055, %v6943_v49   ;;  %v4910_v49 = vld [vmem:[%s8245_s7 + $0x44] sm:$0x3] }
 0x4b5   : > { %5051 = vset.pattern.permute.xlu1 %v8543_v13 }
 0x4b8   : > { %3912 = vrot.lane.b32.xlu1 %v7099_v38, %s8443_s20  ;;  %3435 = vperm.xlu0 %5055, %v6962_v12   ;;  %v4902_v12 = vld [vmem:[%s8246_s8 + $0x6] sm:$0x3] }
 0x4bc   : > { %4020 = vperm.xlu1 %5051, %v4908_v0   ;;  %3522 = vperm.xlu0 %5055, %v6983_v4   ;;  %v7207_v4 = vld [vmem:[%s8247_s9 + $0x26] sm:$0x3] }
 0x4c0   : > { %5052 = vset.pattern.permute.xlu1 %v8548_v45  ;;  %3922 = vperm.xlu0 %5055, %v4906_v26   ;;  %v1533_v26 = vrot.slane %v1521_v10, %v5467_v52 }
 0x4c1   : > { %4049 = vperm.xlu1 %5052, %v4909_v20   ;;  %v1519_v20 = vsel %vm8396_vm5, %v8609_v18, %v8610_v8  ;;  %v1567_v18 = vsel %vm8395_vm9, %v1564_v29, 0.0  ;;  %vm2348_vm5 = vcmp.lt.s32.totalorder %v5497_v6, 51 }
 0x4c2   : > { %v1537_v5 = vrot.slane %v1519_v20, %v5467_v52  ;;  %v1553_v63 = vrot.slane %v1519_v20, %v5470_v53  ;;  %v1538_v29 = vmul.f32 %v1533_v26, %v8623_v56  ;;  %v1582_v48 = vrot.slane %v1567_v18, %v5467_v52 }
 0x4c3   : > { %v1598_v60 = vrot.slane %v1567_v18, %v5470_v53  ;;  %v8628_v18 = vld [vmem:[#allocation32_spill] sm:$0xff] }
 0x4c4   : > { %4004 = vperm.xlu0 %5055, %v4908_v0   ;;  %v8618_v0 = vld [vmem:[#allocation61_spill] sm:$0xff]  ;;  %v1539_v58 = vmul.f32 %v1537_v5, %v8623_v56  ;;  %v1584_v5 = vmul.f32 %v1582_v48, %v8627_v47 }
 0x4c5   : > { %3992 = vrot.lane.b32.xlu1 %v7097_v42, %s8444_s27  ;;  %v8638_v48 = vld [vmem:[#allocation65_spill] sm:$0xff] }
 0x4c6   : > { %5053 = vset.pattern.permute.xlu1 %v8543_v13 }
 0x4c8   : > { %4094 = vperm.xlu0 %5055, %v4910_v49  }
 0x4c9   : > { %3994 = vrot.lane.b32.xlu1 %v7099_v38, %s8444_s27  ;;  %s8196_s27 = scalar_lea.hbm %s8252_s15, %s4929_s1 }
 0x4cc   : > { %4127 = vrot.lane.b32.xlu0 %v7097_v42, %s8424_s0 }
 0x4cd   : > { %4110 = vperm.xlu1 %5053, %v4910_v49   ;;  %v8619_v49 = vld [vmem:[#allocation60_spill] sm:$0xff] }
 0x4ce   : > { %v1609_v8 = vsel %vm8621_vm1, %v8618_v0, %v8619_v49 }
 0x4d0   : > { %4174 = vperm.xlu0 %5055, %v4902_v12   ;;  %v1610_v12 = vsel %vm8620_vm7, %v8619_v49, %v8618_v0  ;;  %v4913_v0 = vld [vmem:[%s8247_s9 + $0x24] sm:$0x3]  ;;  %vm8631_vm7 = vcmp.lt.s32.totalorder %v5497_v6, 127 }
 0x4d1   : > { %4037 = vrot.lane.b32.xlu1 %v7097_v42, %s8423_s17  ;;  %v1611_v10 = vsel %vm8622_vm12, %v1610_v12, 0.0  ;;  %v8624_v49 = vld [vmem:[#allocation30_spill] sm:$0xff]  ;;  %v1612_v12 = vsel %vm507_vm4, %v1609_v8, 0.0  ;;  %vm8635_vm1 = vmmov %vm8631_vm7  ;;  %vm8636_vm12 = vcmp.lt.s32.totalorder %v5507_v11, 15 }
 0x4d2   : > { %5054 = vset.pattern.permute.xlu1 %v8548_v45  ;;  %v1554_v20 = vmul.f32 %v1549_v46, %v8624_v49  ;;  %v1623_v26 = vrot.slane %v1611_v10, %v5467_v52  ;;  %v1555_v46 = vmul.f32 %v1553_v63, %v8624_v49  ;;  %v1627_v8 = vrot.slane %v1612_v12, %v5467_v52 }
 0x4d3   : > { %v1600_v63 = vmul.f32 %v1598_v60, %v8628_v18 }
 0x4d4   : > { %4253 = vperm.xlu0 %5055, %v7207_v4   ;;  %v1556_v2 = vadd.f32 %v1554_v20, %v1538_v29  ;;  %v1557_v55 = vadd.f32 %v1555_v46, %v1539_v58 }
 0x4d5   : > { %4139 = vperm.xlu1 %5054, %v4911_v33   ;;  %v1566_v33 = vsel %vm5563_vm8, %v1565_v7, 0.0  ;;  %v1510_v7 = vrot.slane %v1480_v31, %v5470_v53  ;;  %v1496_v31 = vmul.f32 %v1494_v28, %v8625_v57  ;;  %v8630_v28 = vld [vmem:[#allocation63_spill] sm:$0xff] }
 0x4d6   : > { %v1578_v23 = vrot.slane %v1566_v33, %v5467_v52  ;;  %v1594_v45 = vrot.slane %v1566_v33, %v5470_v53  ;;  %v1639_v33 = vrot.slane %v1611_v10, %v5470_v53 }
 0x4d8   : > { %4307 = vperm.xlu0 %5055, %v7214_v27   ;;  %v1583_v59 = vmul.f32 %v1578_v23, %v8627_v47  ;;  %v1599_v39 = vmul.f32 %v1594_v45, %v8628_v18  ;;  %v8632_v23 = vld [vmem:[#allocation33_spill] sm:$0xff]  ;;  %v8633_v45 = vld [vmem:[#allocation31_spill] sm:$0xff]  ;;  %v1644_v62 = vmul.f32 %v1639_v33, %v8634_v19  ;;  %v8637_v47 = vld [vmem:[#allocation64_spill] sm:$0xff] }
 0x4d9   : > { %4082 = vrot.lane.b32.xlu1 %v7097_v42, %s8445_s14  ;;  %v8626_v42 = vld [vmem:[#allocation24_spill] sm:$0xff]  ;;  %v1660_v56 = vrot.slane %v8632_v23, %v5467_v52  ;;  %v1628_v49 = vmul.f32 %v1623_v26, %v8633_v45  ;;  %v1629_v20 = vmul.f32 %v1627_v8, %v8633_v45  ;;  %v8645_v45 = vld [vmem:[#allocation38_spill] sm:$0xff] }
 0x4da   : > { %v1511_v41 = vmul.f32 %v1506_v32, %v8626_v42  ;;  %v1512_v32 = vmul.f32 %v1510_v7, %v8626_v42  ;;  %v1676_v7 = vrot.slane %v8632_v23, %v5470_v53  ;;  %v1601_v29 = vadd.f32 %v1599_v39, %v1583_v59  ;;  %v8641_v39 = vld [vmem:[#allocation34_spill] sm:$0xff] }
 0x4db   : > { %v1646_v46 = vadd.f32 %v1644_v62, %v1628_v49  ;;  %v1664_v59 = vrot.slane %v8641_v39, %v5467_v52 }
 0x4dd   : > { %4084 = vrot.lane.b32.xlu1 %v7099_v38, %s8445_s14 }
 0x4e1   : > { %4129 = vrot.lane.b32.xlu1 %v7099_v38, %s8424_s0  ;;  %v1495_v38 = vmul.f32 %v1490_v40, %v8625_v57  ;;  %v1643_v40 = vrot.slane %v1612_v12, %v5470_v53  ;;  %v8629_v57 = vld [vmem:[#allocation62_spill] sm:$0xff]  ;;  %s5167_s0 = smov 119  }
 0x4e2   : > { %v1691_v10 = vsel %vm8631_vm7, %v8630_v28, %v8629_v57  ;;  %v1692_v12 = vsel %vm8635_vm1, %v8629_v57, %v8630_v28  ;;  %vm8639_vm7 = vcmp.lt.s32.totalorder %v5497_v6, 113  ;;  %vm8640_vm1 = vcmp.ge.s32.totalorder %v5507_v11, 1  ;;  %v8644_v28 = vld [vmem:[#allocation36_spill] sm:$0xff] }
 0x4e3   : > { %v1513_v34 = vadd.f32 %v1511_v41, %v1495_v38  ;;  %v1693_v42 = vsel %vm8636_vm12, %v1691_v10, 0.0  ;;  %v1736_v60 = vsel %vm8639_vm7, %v8638_v48, %v8637_v47  ;;  %v1645_v26 = vmul.f32 %v1643_v40, %v8634_v19  ;;  %vm8643_vm12 = vmmov %vm8639_vm7 }
 0x4e4   : > { %v1514_v38 = vadd.f32 %v1512_v32, %v1496_v31  ;;  %v1602_v41 = vadd.f32 %v1600_v63, %v1584_v5  ;;  %v1694_v33 = vsel %vm8395_vm9, %v1692_v12, 0.0  ;;  %v1705_v18 = vrot.slane %v1693_v42, %v5467_v52  ;;  %v8646_v12 = vld [vmem:[#allocation39_spill] sm:$0xff] }
 0x4e5   : > { %4206 = vperm.xlu1 %5054, %v4913_v0   ;;  %v1558_v58 = vadd.f32 %v1556_v2, %v1513_v34  ;;  %v1738_v57 = vsel %vm8640_vm1, %v1736_v60, 0.0  ;;  %v1680_v19 = vrot.slane %v8641_v39, %v5470_v53  ;;  %v1647_v8 = vadd.f32 %v1645_v26, %v1629_v20  ;;  %v8647_v20 = vld [vmem:[#allocation41_spill] sm:$0xff] }
 0x4e6   : > { %v1559_v2 = vadd.f32 %v1557_v55, %v1514_v38  ;;  %v1709_v62 = vrot.slane %v1694_v33, %v5467_v52  ;;  %v1737_v40 = vsel %vm8643_vm12, %v8637_v47, %v8638_v48  ;;  %v1665_v10 = vmul.f32 %v1660_v56, %v8644_v28  ;;  %v8648_v38 = vld [vmem:[#allocation40_spill] sm:$0xff] }
 0x4e7   : > { %v1603_v31 = vadd.f32 %v1601_v29, %v1558_v58  ;;  %v1725_v32 = vrot.slane %v1694_v33, %v5470_v53  ;;  %v1750_v5 = vrot.slane %v1738_v57, %v5467_v52  ;;  %v1766_v63 = vrot.slane %v1738_v57, %v5470_v53  ;;  %v8650_v33 = vld [vmem:[#allocation66_spill] sm:$0xff] }
 0x4e8   : > { %v1604_v55 = vadd.f32 %v1602_v41, %v1559_v2  ;;  %v1710_v49 = vmul.f32 %v1705_v18, %v8645_v45  ;;  %v1666_v60 = vmul.f32 %v1664_v59, %v8644_v28  ;;  %v1739_v47 = vsel %vm5638_vm10, %v1737_v40, 0.0  ;;  %v8649_v41 = vld [vmem:[#allocation67_spill] sm:$0xff] }
 0x4e9   : > { %5056 = vset.pattern.permute.xlu1 %v8543_v13  ;;  %v1721_v13 = vrot.slane %v1693_v42, %v5470_v53  ;;  %v1648_v23 = vadd.f32 %v1646_v46, %v1603_v31  ;;  %v1727_v29 = vmul.f32 %v1725_v32, %v8646_v12  ;;  %v1755_v26 = vmul.f32 %v1750_v5, %v8647_v20  ;;  %v8654_v32 = vld [vmem:[#allocation68_spill] sm:$0xff]  ;;  %v8655_v5 = vld [vmem:[#allocation69_spill] sm:$0xff] }
 0x4ea   : > { %4222 = vperm.xlu1 %5056, %v4913_v0   ;;  %v8642_v0 = vld [vmem:[#allocation37_spill] sm:$0xff]  ;;  %v1649_v48 = vadd.f32 %v1647_v8, %v1604_v55  ;;  %v1771_v58 = vmul.f32 %v1766_v63, %v8648_v38  ;;  %vm8651_vm7 = vcmp.lt.s32.totalorder %v5497_v6, 112  ;;  %v1754_v57 = vrot.slane %v1739_v47, %v5467_v52 }
 0x4eb   : > { %v1681_v34 = vmul.f32 %v1676_v7, %v8642_v0  ;;  %v1726_v42 = vmul.f32 %v1721_v13, %v8646_v12  ;;  %v1711_v7 = vmul.f32 %v1709_v62, %v8645_v45  ;;  %v1782_v46 = vsel %vm8651_vm7, %v8650_v33, %v8649_v41  ;;  %vm8652_vm1 = vmmov %vm8651_vm7 }
 0x4ec   : > { %v1770_v39 = vrot.slane %v1739_v47, %v5470_v53  ;;  %vm8653_vm12 = vcmp.lt.s32.totalorder %v5504_v9, 240  ;;  %v7376_v40 = vmul.f32 %v1754_v57, %v8647_v20  ;;  %vm8656_vm7 = vcmp.lt.s32.totalorder %v5497_v6, 111  ;;  %v8662_v57 = vld [vmem:[#allocation73_spill] sm:$0xff] }
 0x4ed   : > { %v1683_v56 = vadd.f32 %v1681_v34, %v1665_v10  ;;  %v1728_v13 = vadd.f32 %v1726_v42, %v1710_v49  ;;  %v7373_v8 = vadd.f32 %v1727_v29, %v1711_v7  ;;  %v1826_v63 = vsel %vm8656_vm7, %v8655_v5, %v8654_v32  ;;  %v8658_v49 = vld [vmem:[#allocation43_spill] sm:$0xff]  ;;  %v8659_v42 = vld [vmem:[#allocation42_spill] sm:$0xff] }
 0x4ee   : > { %4269 = vperm.xlu1 %5056, %v7207_v4   ;;  %v1682_v4 = vmul.f32 %v1680_v19, %v8642_v0  ;;  %v7367_v19 = vsel %vm8653_vm12, %v1782_v46, 0.0  ;;  %v1773_v0 = vadd.f32 %v1771_v58, %v1755_v26  ;;  %v7379_v28 = vmul.f32 %v1770_v39, %v8648_v38  ;;  %v7437_v58 = vpop.permute.xlu1 %3712 }
 0x4ef   : > { %v1685_v18 = vadd.f32 %v1683_v56, %v1648_v23  ;;  %v1799_v10 = vrot.slane %v7367_v19, %v5467_v52  ;;  %vm2338_vm12 = vcmp.ge.s32.totalorder %v5497_v6, 48  ;;  %vm2340_vm9 = vcmp.ge.s32.totalorder %v5507_v11, 3  ;;  %8661 = vst [vmem:[#allocation56_spill] sm:$0xff] %v7437_v58 }
 0x4f0   : > { %v1684_v59 = vadd.f32 %v1682_v4, %v1666_v60  ;;  %v2397_v47 = vsel %vm2395_vm14, %v6757_v3, %v6755_v30  ;;  %vm2342_vm15 = vmand %vm2338_vm12, %vm2340_vm9  ;;  %v2349_v7 = vsel %vm2348_vm5, %v6751_v1, %v6773_v25  ;;  %v2350_v29 = vsel %vm2348_vm5, %v6773_v25, %v6751_v1  ;;  %v8668_v1 = vld [vmem:[#allocation49_spill] sm:$0xff] }
 0x4f1   : > { %v1730_v62 = vadd.f32 %v1728_v13, %v1685_v18  ;;  %v7430_v20 = vmul.f32 %v1799_v10, %v8658_v49  ;;  %v2402_v26 = vsel %vm2338_vm12, %v2397_v47, 0.0  ;;  %v2559_v38 = vrot.slane %v6669_v37, %v5467_v52  ;;  %v8665_v47 = vld [vmem:[#allocation80_spill] sm:$0xff] }
 0x4f2   : > { %4323 = vperm.xlu1 %5056, %v7214_v27   ;;  %v1781_v27 = vsel %vm8652_vm1, %v8649_v41, %v8650_v33  ;;  %v7371_v31 = vadd.f32 %v1684_v59, %v1649_v48  ;;  %vm8657_vm1 = vmmov %vm8656_vm7  ;;  %vm8660_vm7 = vcmp.lt.s32.totalorder %v5507_v11, 15  ;;  %v2555_v48 = vrot.slane %v6676_v24, %v5467_v52  ;;  %v8669_v33 = vld [vmem:[#allocation48_spill] sm:$0xff] }
 0x4f3   : > { %v1795_v34 = vrot.slane %v1781_v27, %v5467_v52  ;;  %v1811_v2 = vrot.slane %v1781_v27, %v5470_v53  ;;  %v1827_v55 = vsel %vm8657_vm1, %v8654_v32, %v8655_v5  ;;  %v7396_v45 = vadd.f32 %v1773_v0, %v1730_v62 }
 0x4f4   : > { %v7410_v4 = vsel %vm8660_vm7, %v1826_v63, 0.0  ;;  %v7414_v56 = vsel %vm5704_vm13, %v1827_v55, 0.0  ;;  %vm2341_vm1 = vcmp.ge.s32.totalorder %v5514_v16, 3  ;;  %vm2441_vm7 = vcmp.lt.s32.totalorder %v5507_v11, 13 }
 0x4f5   : > { %v7399_v12 = vmul.f32 %v1795_v34, %v8658_v49  ;;  %v7402_v60 = vmul.f32 %v1811_v2, %v8659_v42  ;;  %v2355_v46 = vsel %vm2342_vm15, %v2350_v29, 0.0  ;;  %v2356_v18 = vsel %vm2341_vm1, %v2349_v7, 0.0  ;;  %vm2443_vm5 = vmand %vm2338_vm12, %vm2441_vm7  ;;  %v8663_v34 = vld [vmem:[#allocation78_spill] sm:$0xff]  ;;  %v8666_v7 = vld [vmem:[#allocation53_spill] sm:$0xff] }
 0x4f6   : > { %v2451_v13 = vsel %vm2449_vm0, %v6781_v17, %v6761_v50  ;;  %v7458_v27 = vmul.f32 %v2555_v48, %v8662_v57  ;;  %v2396_v39 = vsel %vm2395_vm14, %v6755_v30, %v6757_v3  ;;  %v2414_v59 = vrot.slane %v2402_v26, %v5467_v52  ;;  %v7479_v3 = vpop.permute.xlu1 %3728 }
 0x4f7   : > { %v2430_v0 = vrot.slane %v2402_v26, %v5470_v53  ;;  %v2501_v2 = vsel %vm2499_vm11, %v8663_v34, %v6765_v36  ;;  %vm2442_vm15 = vcmp.lt.s32.totalorder %v5514_v16, 13  ;;  %v2450_v62 = vsel %vm2449_vm0, %v6761_v50, %v6781_v17  ;;  %8664 = vst [vmem:[#allocation57_spill] sm:$0xff] %v7479_v3 }
 0x4f8   : > { %vm2586_vm12 = vcmp.lt.s32.totalorder %v5497_v6, 125  ;;  %v7477_v30 = vmul.f32 %v2559_v38, %v8662_v57  ;;  %v2366_v10 = vrot.slane %v2355_v46, %v5467_v52  ;;  %v2370_v32 = vrot.slane %v2356_v18, %v5467_v52 }
 0x4f9   : > { %v2456_v5 = vsel %vm2443_vm5, %v2451_v13, 0.0  ;;  %v2500_v63 = vsel %vm2499_vm11, %v6765_v36, %v8663_v34  ;;  %v2418_v55 = vrot.slane %v2396_v39, %v5467_v52  ;;  %v2434_v50 = vrot.slane %v2396_v39, %v5470_v53 }
 0x4fa   : > { %v2506_v17 = vsel %vm2340_vm9, %v2501_v2, 0.0  ;;  %v2382_v49 = vrot.slane %v2355_v46, %v5470_v53  ;;  %v2419_v48 = vmul.f32 %v2414_v59, %v8665_v47  ;;  %v2435_v29 = vmul.f32 %v2430_v0, %v8666_v7  ;;  %v8667_v0 = vld [vmem:[#allocation51_spill] sm:$0xff] }
 0x4fb   : > { %v2457_v26 = vsel %vm2442_vm15, %v2450_v62, 0.0  ;;  %vm2640_vm0 = vcmp.lt.s32.totalorder %v5497_v6, 83  ;;  %v2386_v36 = vrot.slane %v2356_v18, %v5470_v53  ;;  %v2468_v38 = vrot.slane %v2456_v5, %v5467_v52 }
 0x4fc   : > { %v2507_v13 = vsel %vm2341_vm1, %v2500_v63, 0.0  ;;  %v2387_v57 = vmul.f32 %v2382_v49, %v7000_v44  ;;  %v2484_v46 = vrot.slane %v2456_v5, %v5470_v53  ;;  %v2518_v39 = vrot.slane %v2506_v17, %v5467_v52 }
 0x4fd   : > { %v2534_v59 = vrot.slane %v2506_v17, %v5470_v53  ;;  %v2371_v34 = vmul.f32 %v2366_v10, %v8667_v0  ;;  %v2372_v2 = vmul.f32 %v2370_v32, %v8667_v0  ;;  %v2420_v62 = vmul.f32 %v2418_v55, %v8665_v47  ;;  %v8671_v0 = vld [vmem:[#allocation82_spill] sm:$0xff] }
 0x4fe   : > { %v2436_v18 = vmul.f32 %v2434_v50, %v8666_v7  ;;  %v2472_v25 = vrot.slane %v2457_v26, %v5467_v52  ;;  %v2489_v63 = vmul.f32 %v2484_v46, %v7006_v15  ;;  %v2522_v5 = vrot.slane %v2507_v13, %v5467_v52  ;;  %v8670_v7 = vld [vmem:[#allocation71_spill] sm:$0xff] }
 0x4ff   : > { %v2587_v17 = vsel %vm2586_vm12, %v8669_v33, %v8668_v1  ;;  %vm2633_vm11 = vcmp.lt.s32.totalorder %v5504_v9, 208  ;;  %v2437_v10 = vadd.f32 %v2435_v29, %v2419_v48  ;;  %v2488_v32 = vrot.slane %v2457_v26, %v5470_v53 }
 0x500   : > { %v2538_v55 = vrot.slane %v2507_v13, %v5470_v53  ;;  %v2388_v50 = vmul.f32 %v2386_v36, %v7000_v44  ;;  %v2389_v47 = vadd.f32 %v2387_v57, %v2371_v34  ;;  %v2473_v46 = vmul.f32 %v2468_v38, %v8670_v7 }
 0x501   : > { %v3778_v23 = vpop.permute.xlu1 %3777  ;;  %v3780_v49 = vpop.permute.xlu0 %3779  ;;  %v2523_v41 = vmul.f32 %v2518_v39, %v8671_v0  ;;  %v2539_v14 = vmul.f32 %v2534_v59, %v8672_v54  ;;  %v2588_v48 = vsel %vm2586_vm12, %v8668_v1, %v8669_v33  ;;  %v2593_v44 = vsel %vm2441_vm7, %v2587_v17, 0.0 }
 0x502   : > { %v3781_v58 = vsel %vm525_vm2, %v3778_v23, %v3780_v49  ;;  %v3782_v3 = vsel %vm525_vm2, %v3780_v49, %v3778_v23  ;;  %v2490_v29 = vmul.f32 %v2488_v32, %v7006_v15  ;;  %v2491_v26 = vadd.f32 %v2489_v63, %v2473_v46  ;;  %vm2635_vm2 = vmand %vm2633_vm11, %vm2341_vm1 }
 0x503   : > { %v2438_v36 = vadd.f32 %v2436_v18, %v2420_v62  ;;  %v2524_v38 = vmul.f32 %v2522_v5, %v8671_v0  ;;  %vm2690_vm14 = vcmp.lt.s32.totalorder %v5497_v6, 80  ;;  %v2474_v13 = vmul.f32 %v2472_v25, %v8670_v7  ;;  %v8673_v62 = vld [vmem:[#allocation14_spill] sm:$0xff] }
 0x504   : > { %v2390_v57 = vadd.f32 %v2388_v50, %v2372_v2  ;;  %v2439_v23 = vadd.f32 %v2437_v10, %v2389_v47  ;;  %v3783_v39 = vsel %vm5527_vm3, %v3782_v3, 0.0  ;;  %v3784_v1 = vsel %vm507_vm4, %v3781_v58, 0.0  ;;  %v8674_v18 = vld [vmem:[#allocation50_spill] sm:$0xff] }
 0x505   : > { %v2540_v33 = vmul.f32 %v2538_v55, %v8672_v54  ;;  %v2541_v59 = vadd.f32 %v2539_v14, %v2523_v41  ;;  %v2594_v15 = vsel %vm2442_vm15, %v2588_v48, 0.0  ;;  %v2605_v34 = vrot.slane %v2593_v44, %v5467_v52 }
 0x506   : > { %v2641_v25 = vsel %vm2640_vm0, %v8674_v18, %v8673_v62  ;;  %v2492_v2 = vadd.f32 %v2490_v29, %v2474_v13  ;;  %v2493_v63 = vadd.f32 %v2491_v26, %v2439_v23  ;;  %v2576_v58 = vmul.f32 %v8675_v22, %v7008_v61 }
 0x507   : > { %v3795_v54 = vrot.slane %v3783_v39, %v5467_v52  ;;  %v3799_v14 = vrot.slane %v3784_v1, %v5467_v52  ;;  %v3811_v41 = vrot.slane %v3783_v39, %v5470_v53  ;;  %v3815_v3 = vrot.slane %v3784_v1, %v5470_v53  ;;  %v8677_v39 = vld [vmem:[#allocation83_spill] sm:$0xff] }
 0x508   : > { %v2609_v49 = vrot.slane %v2594_v15, %v5467_v52  ;;  %v2621_v5 = vrot.slane %v2593_v44, %v5470_v53  ;;  %v2625_v17 = vrot.slane %v2594_v15, %v5470_v53  ;;  %v2440_v10 = vadd.f32 %v2438_v36, %v2390_v57  ;;  %v8678_v15 = vld [vmem:[#allocation74_spill] sm:$0xff] }
 0x509   : > { %v2642_v46 = vsel %vm2640_vm0, %v8673_v62, %v8674_v18  ;;  %v2647_v0 = vsel %vm2340_vm9, %v2641_v25, 0.0  ;;  %v8676_v44 = vrot.slane %v6669_v37, %v5470_v53  ;;  %v2543_v26 = vadd.f32 %v2541_v59, %v2493_v63  ;;  %v8679_v59 = vld [vmem:[#allocation85_spill] sm:$0xff]  ;;  %vm2737_vm9 = vmand %vm2633_vm11, %vm2442_vm15 }
 0x50a   : > { %v2494_v48 = vadd.f32 %v2492_v2, %v2440_v10  ;;  %v2578_v36 = vadd.f32 %v2576_v58, %v7458_v27  ;;  %v2542_v23 = vadd.f32 %v2540_v33, %v2524_v38  ;;  %v2610_v1 = vmul.f32 %v2605_v34, %v8677_v39  ;;  %v8680_v27 = vld [vmem:[#allocation52_spill] sm:$0xff] }
 0x50b   : > { %v2577_v29 = vmul.f32 %v8676_v44, %v7008_v61  ;;  %v2626_v62 = vmul.f32 %v2621_v5, %v8678_v15  ;;  %vm2742_vm3 = vcmp.lt.s32.totalorder %v5497_v6, 77  ;;  %v2648_v37 = vsel %vm2635_vm2, %v2642_v46, 0.0 }
 0x50c   : > { %v2659_v61 = vrot.slane %v2647_v0, %v5467_v52  ;;  %v2691_v2 = vsel %vm2690_vm14, %v8680_v27, %v8679_v59  ;;  %v2675_v38 = vrot.slane %v2647_v0, %v5470_v53  ;;  %v2611_v33 = vmul.f32 %v2609_v49, %v8677_v39  ;;  %v8682_v39 = vld [vmem:[#allocation84_spill] sm:$0xff] }
 0x50d   : > { %v2692_v34 = vsel %vm2690_vm14, %v8679_v59, %v8680_v27  ;;  %v2544_v63 = vadd.f32 %v2542_v23, %v2494_v48  ;;  %v2579_v22 = vadd.f32 %v2577_v29, %v7477_v30  ;;  %v2627_v58 = vmul.f32 %v2625_v17, %v8678_v15 }
 0x50e   : > { %v2663_v49 = vrot.slane %v2648_v37, %v5467_v52  ;;  %v2709_v5 = vrot.slane %v2691_v2, %v5467_v52  ;;  %v2679_v10 = vrot.slane %v2648_v37, %v5470_v53  ;;  %v1860_v44 = vrot.slane %v7414_v56, %v5470_v53 }
 0x50f   : > { %v2581_v0 = vadd.f32 %v2579_v22, %v2544_v63  ;;  %v2629_v29 = vadd.f32 %v2627_v58, %v2611_v33  ;;  %vm3422_vm1 = vcmp.lt.s32.totalorder %v5497_v6, 5  ;;  %vm8701_vm5 = vcmp.ge.s32.totalorder %v5514_v16, 5 }
 0x510   : > { %v2681_v48 = vmul.f32 %v2679_v10, %v7010_v21  ;;  %vm8706_vm15 = vcmp.lt.s32.totalorder %v5507_v11, 11  ;;  %vm8707_vm12 = vcmp.lt.s32.totalorder %v5514_v16, 11  ;;  %vm8717_vm0 = vcmp.lt.s32.totalorder %v5497_v6, 16 }
 0x511   : > { %v2631_v22 = vadd.f32 %v2629_v29, %v2581_v0  ;;  %v1731_v29 = vadd.f32 %v7373_v8, %v7371_v31  ;;  %v8690_v8 = vld [vmem:[#allocation90_spill] sm:$0xff]  ;;  %vm8723_vm2 = vcmp.lt.s32.totalorder %v5497_v6, 15 }
 0x512   : > { %v3790_v32 = vpop.permute.xlu1 %3789  ;;  %v3806_v55 = vpop.permute.xlu0 %3805 }
 0x513   : > { %v3800_v50 = vmul.f32 %v3795_v54, %v3790_v32  ;;  %v3801_v24 = vmul.f32 %v3799_v14, %v3790_v32  ;;  %v3816_v47 = vmul.f32 %v3811_v41, %v3806_v55  ;;  %v3817_v7 = vmul.f32 %v3815_v3, %v3806_v55 }
 0x514   : > { %v2743_v54 = vsel %vm2742_vm3, %v6832_v51, %v7002_v43  ;;  %v2580_v14 = vadd.f32 %v2578_v36, %v2543_v26  ;;  %v2680_v41 = vmul.f32 %v2675_v38, %v7010_v21  ;;  %v1856_v3 = vrot.slane %v7410_v4, %v5470_v53 }
 0x515   : > { %v7575_v13 = vadd.f32 %v3816_v47, %v3800_v50  ;;  %v7577_v57 = vadd.f32 %v3817_v7, %v3801_v24  ;;  %v2628_v32 = vadd.f32 %v2626_v62, %v2610_v1  ;;  %v2698_v55 = vsel %vm2633_vm11, %v2692_v34, 0.0  ;;  %v8681_v24 = vld [vmem:[#allocation75_spill] sm:$0xff]  ;;  %v8683_v62 = vld [vmem:[#allocation76_spill] sm:$0xff] }
 0x516   : > { %v7582_v18 = vpop.permute.xlu1 %3820  ;;  %v7584_v25 = vpop.permute.xlu0 %3848  ;;  %v2725_v50 = vrot.slane %v2691_v2, %v5470_v53  ;;  %v2664_v47 = vmul.f32 %v2659_v61, %v8681_v24  ;;  %v2744_v7 = vsel %vm2742_vm3, %v7002_v43, %v6832_v51  ;;  %v2749_v46 = vsel %vm2441_vm7, %v2743_v54, 0.0  ;;  %v8684_v2 = vld [vmem:[#allocation46_spill] sm:$0xff]  ;;  %v8686_v34 = vld [vmem:[#allocation44_spill] sm:$0xff]  ;;  %vm8724_vm3 = vmmov %vm8723_vm2 }
 0x517   : > { %v2630_v26 = vadd.f32 %v2628_v32, %v2580_v14  ;;  %v2713_v23 = vrot.slane %v2698_v55, %v5467_v52  ;;  %v2714_v1 = vmul.f32 %v2709_v5, %v8682_v39  ;;  %v2729_v15 = vrot.slane %v2698_v55, %v5470_v53 }
 0x518   : > { %v2682_v36 = vadd.f32 %v2680_v41, %v2664_v47  ;;  %v2665_v51 = vmul.f32 %v2663_v49, %v8681_v24  ;;  %v2730_v37 = vmul.f32 %v2725_v50, %v8683_v62  ;;  %v2750_v61 = vsel %vm2737_vm9, %v2744_v7, 0.0  ;;  %v8689_v50 = vld [vmem:[#allocation77_spill] sm:$0xff] }
 0x519   : > { %v2761_v21 = vrot.slane %v2749_v46, %v5467_v52  ;;  %v2777_v59 = vrot.slane %v2749_v46, %v5470_v53  ;;  %v8685_v38 = vrot.slane %v7410_v4, %v5467_v52  ;;  %v1861_v63 = vmul.f32 %v1856_v3, %v8686_v34 }
 0x51a   : > { %v7609_v30 = vpop.permute.xlu1 %3832  ;;  %v7611_v17 = vpop.permute.xlu0 %3893  ;;  %v2683_v58 = vadd.f32 %v2681_v48, %v2665_v51  ;;  %v8687_v54 = vrot.slane %v7367_v19, %v5470_v53  ;;  %v1818_v41 = vadd.f32 %v7402_v60, %v7399_v12  ;;  %v2684_v49 = vadd.f32 %v2682_v36, %v2630_v26 }
 0x51b   : > { %v1845_v33 = vmul.f32 %v8685_v38, %v8684_v2  ;;  %v2782_v5 = vmul.f32 %v2777_v59, %v7012_v35  ;;  %v2715_v10 = vmul.f32 %v2713_v23, %v8682_v39  ;;  %v2731_v4 = vmul.f32 %v2729_v15, %v8683_v62 }
 0x51c   : > { %v1817_v14 = vmul.f32 %v8687_v54, %v8659_v42  ;;  %v2765_v32 = vrot.slane %v2750_v61, %v5467_v52  ;;  %v2781_v3 = vrot.slane %v2750_v61, %v5470_v53  ;;  %v1774_v19 = vadd.f32 %v7379_v28, %v7376_v40  ;;  %v8691_v61 = vld [vmem:[#allocation91_spill] sm:$0xff] }
 0x51d   : > { %v8688_v12 = vrot.slane %v7414_v56, %v5467_v52  ;;  %v2732_v60 = vadd.f32 %v2730_v37, %v2714_v1  ;;  %v2766_v24 = vmul.f32 %v2761_v21, %v8689_v50  ;;  %v1862_v7 = vmul.f32 %v1860_v44, %v8686_v34  ;;  %v8692_v21 = vld [vmem:[#allocation87_spill] sm:$0xff] }
 0x51e   : > { %v7634_v43 = vpop.permute.xlu0 %3867  ;;  %v1863_v46 = vadd.f32 %v1861_v63, %v1845_v33  ;;  %v2685_v0 = vadd.f32 %v2683_v58, %v2631_v22  ;;  %v2783_v48 = vmul.f32 %v2781_v3, %v7012_v35  ;;  %v1819_v26 = vadd.f32 %v1817_v14, %v7430_v20  ;;  %v8693_v33 = vld [vmem:[#allocation47_spill] sm:$0xff] }
 0x51f   : > { %v7639_v27 = vpop.permute.xlu1 %3877  ;;  %v1846_v42 = vmul.f32 %v8688_v12, %v8684_v2  ;;  %v2734_v40 = vadd.f32 %v2732_v60, %v2684_v49  ;;  %v2784_v28 = vadd.f32 %v2782_v5, %v2766_v24  ;;  %v1820_v56 = vadd.f32 %v1818_v41, %v7396_v45  ;;  %v8694_v22 = vld [vmem:[#allocation79_spill] sm:$0xff]  ;;  %v8695_v41 = vld [vmem:[#allocation96_spill] sm:$0xff]  ;;  %v8696_v49 = vld [vmem:[#allocation97_spill] sm:$0xff] }
 0x520   : > { %v2733_v36 = vadd.f32 %v2731_v4, %v2715_v10  ;;  %v2767_v23 = vmul.f32 %v2765_v32, %v8689_v50  ;;  %v1776_v1 = vadd.f32 %v1774_v19, %v1731_v29  ;;  %v3320_v20 = vsel %vm2690_vm14, %v8691_v61, %v8690_v8  ;;  %v8698_v4 = vld [vmem:[#allocation70_spill] sm:$0xff] }
 0x521   : > { %v1864_v15 = vadd.f32 %v1862_v7, %v1846_v42  ;;  %v1865_v51 = vadd.f32 %v1863_v46, %v1820_v56  ;;  %v2786_v37 = vadd.f32 %v2784_v28, %v2734_v40  ;;  %v1892_v59 = vrot.slane %v8692_v21, %v5467_v52  ;;  %v8699_v42 = vld [vmem:[#allocation45_spill] sm:$0xff]  ;;  %v8702_v28 = vld [vmem:[#allocation102_spill] sm:$0xff] }
 0x522   : > { %v7657_v55 = vpop.permute.xlu0 %3975  ;;  %v2735_v35 = vadd.f32 %v2733_v36, %v2685_v0  ;;  %v2785_v62 = vadd.f32 %v2783_v48, %v2767_v23  ;;  %v1821_v31 = vadd.f32 %v1819_v26, %v1776_v1  ;;  %v3319_v54 = vsel %vm2690_vm14, %v8690_v8, %v8691_v61  ;;  %v8703_v26 = vld [vmem:[#allocation101_spill] sm:$0xff]  ;;  %v8705_v8 = vld [vmem:[#allocation92_spill] sm:$0xff]  ;;  %vm8722_vm14 = vmmov %vm8717_vm0 }
 0x523   : > { %v7666_v47 = vpop.permute.xlu1 %3822  ;;  %v7691_v34 = vadd.f32 %v8693_v33, %v1865_v51  ;;  %v7694_v58 = vadd.f32 %v8694_v22, %v2786_v37  ;;  %v3325_v14 = vsel %vm3261_vm6, %v3320_v20, 0.0  ;;  %v3424_v5 = vsel %vm3422_vm1, %v8696_v49, %v8695_v41  ;;  %v8704_v1 = vld [vmem:[#allocation81_spill] sm:$0xff] }
 0x524   : > { %v1866_v38 = vadd.f32 %v1864_v15, %v1821_v31  ;;  %v2787_v63 = vadd.f32 %v2785_v62, %v2735_v35  ;;  %v2812_v32 = vrot.slane %v8698_v4, %v5467_v52  ;;  %v3423_v19 = vsel %vm3422_vm1, %v8695_v41, %v8696_v49  ;;  %v8709_v4 = vld [vmem:[#allocation98_spill] sm:$0xff] }
 0x525   : > { %v7709_v3 = vmul.f32 %v1892_v59, %v7691_v34  ;;  %vm3509_vm7 = vcmp.lt.s32.totalorder %v5497_v6, 123  ;;  %v7718_v60 = vrot.slane %v8699_v42, %v5467_v52  ;;  %v3357_v50 = vrot.slane %v3319_v54, %v5470_v53 }
 0x526   : > { %v7675_v39 = vpop.permute.xlu0 %4065  ;;  %v3353_v24 = vrot.slane %v3325_v14, %v5470_v53  ;;  %vm8700_vm6 = vcmp.ge.s32.totalorder %v5507_v11, 5  ;;  %v7725_v46 = vadd.f32 %v8693_v33, %v1866_v38  ;;  %v2794_v0 = vadd.f32 %v8694_v22, %v2787_v63 }
 0x527   : > { %v7677_v44 = vpop.permute.xlu1 %3938  ;;  %v3429_v7 = vsel %vm8700_vm6, %v3424_v5, 0.0  ;;  %v7729_v48 = vmul.f32 %v2812_v32, %v7694_v58  ;;  %v3341_v29 = vrot.slane %v3319_v54, %v5467_v52  ;;  %v3430_v40 = vsel %vm8701_vm5, %v3423_v19, 0.0 }
 0x528   : > { %v3510_v56 = vsel %vm3509_vm7, %v8703_v26, %v8702_v28  ;;  %v3511_v36 = vsel %vm3509_vm7, %v8702_v28, %v8703_v26  ;;  %v3337_v23 = vrot.slane %v3325_v14, %v5467_v52  ;;  %v2802_v15 = vrot.slane %v8704_v1, %v5467_v52  ;;  %v8708_v14 = vld [vmem:[#allocation86_spill] sm:$0xff]  ;;  %v8710_v28 = vld [vmem:[#allocation88_spill] sm:$0xff]  ;;  %v8712_v1 = vld [vmem:[#allocation99_spill] sm:$0xff] }
 0x529   : > { %v7742_v51 = vmul.f32 %v1892_v59, %v7725_v46  ;;  %v1897_v35 = vrot.slane %v7709_v3, 1  ;;  %v3457_v62 = vrot.slane %v3429_v7, %v5470_v53  ;;  %v3358_v61 = vmul.f32 %v3353_v24, %v8705_v8 }
 0x52a   : > { %v7684_v45 = vpop.permute.xlu0 %4039  ;;  %v3359_v20 = vmul.f32 %v3357_v50, %v8705_v8  ;;  %v2814_v33 = vmul.f32 %v2812_v32, %v2794_v0  ;;  %v3461_v63 = vrot.slane %v3430_v40, %v5470_v53  ;;  %v3516_v59 = vsel %vm8706_vm15, %v3510_v56, 0.0  ;;  %v8711_v56 = vld [vmem:[#allocation89_spill] sm:$0xff] }
 0x52b   : > { %v7688_v2 = vpop.permute.xlu1 %3865  ;;  %v3517_v22 = vsel %vm8707_vm12, %v3511_v36, 0.0  ;;  %v2817_v54 = vrot.slane %v7729_v48, 1  ;;  %v3494_v41 = vrot.slane %v8708_v14, %v5470_v53  ;;  %v3462_v3 = vmul.f32 %v3457_v62, %v8709_v4 }
 0x52c   : > { %v3478_v32 = vrot.slane %v8708_v14, %v5467_v52  ;;  %v3441_v42 = vrot.slane %v3429_v7, %v5467_v52  ;;  %v3445_v50 = vrot.slane %v3430_v40, %v5467_v52  ;;  %v3548_v48 = vrot.slane %v3517_v22, %v5470_v53  ;;  %v8714_v7 = vld [vmem:[#allocation95_spill] sm:$0xff] }
 0x52d   : > { %v3528_v40 = vrot.slane %v3516_v59, %v5467_v52  ;;  %v2818_v14 = vrot.slane %v2814_v33, 1  ;;  %v2803_v33 = vmul.f32 %v2802_v15, %v7694_v58  ;;  %vm8719_vm11 = vcmp.ge.s32.totalorder %v5497_v6, 16 }
 0x52e   : > { %v7704_v10 = vpop.permute.xlu0 %4155  ;;  %v3483_v62 = vmul.f32 %v3478_v32, %v8712_v1  ;;  %v1884_v1 = vmul.f32 %v7718_v60, %v7725_v46  ;;  %vm8734_vm9 = vcmp.lt.s32.totalorder %v5514_v16, 15  ;;  %vm8738_vm7 = vcmp.ge.s32.totalorder %v5507_v11, 1 }
 0x52f   : > { %8697 = vst [vmem:[#allocation54_spill] sm:$0xff] %v7704_v10  ;;  %v7714_v12 = vpop.permute.xlu1 %3959  ;;  %v8715_v10 = vld [vmem:[#allocation93_spill] sm:$0xff]  ;;  %v2821_v58 = vadd.f32 %v2817_v54, %v2803_v33  ;;  %v8732_v33 = vld [vmem:[#allocation108_spill] sm:$0xff]  ;;  %vm8739_vm6 = vcmp.lt.s32.totalorder %v5497_v6, 127  ;;  %vm8741_vm5 = vcmp.lt.s32.totalorder %v5507_v11, 15  ;;  %vm8742_vm15 = vcmp.lt.s32.totalorder %v5497_v6, 113 }
 0x530   : > { %v3499_v9 = vmul.f32 %v3494_v41, %v8715_v10  ;;  %vm8743_vm12 = vmmov %vm8742_vm15 }
 0x533   : > { %v7746_v37 = vpop.permute.xlu1 %3910  ;;  %v3332_v31 = vpop.permute.xlu0 %3331 }
 0x534   : > { %v3342_v21 = vmul.f32 %v3337_v23, %v3332_v31  ;;  %v3343_v38 = vmul.f32 %v3341_v29, %v3332_v31  ;;  %v3544_v29 = vrot.slane %v3516_v59, %v5470_v53  ;;  %v3463_v23 = vmul.f32 %v3461_v63, %v8709_v4  ;;  %v8716_v4 = vld [vmem:[#allocation103_spill] sm:$0xff] }
 0x536   : > { %v3360_v49 = vadd.f32 %v3358_v61, %v3342_v21  ;;  %v3361_v5 = vadd.f32 %v3359_v20, %v3343_v38  ;;  %v8713_v61 = vld [vmem:[#allocation94_spill] sm:$0xff]  ;;  %v3532_v38 = vrot.slane %v3517_v22, %v5467_v52  ;;  %v3549_v32 = vmul.f32 %v3544_v29, %v8716_v4 }
 0x537   : > { %v7761_v19 = vpop.permute.xlu1 %3912  ;;  %v3436_v24 = vpop.permute.xlu0 %3435  ;;  %v2804_v22 = vmul.f32 %v2802_v15, %v2794_v0 }
 0x538   : > { %v3362_v26 = vadd.f32 %v3360_v49, %v8710_v28  ;;  %v3363_v36 = vadd.f32 %v3361_v5, %v8711_v56  ;;  %v3446_v31 = vmul.f32 %v3441_v42, %v3436_v24  ;;  %v3447_v8 = vmul.f32 %v3445_v50, %v3436_v24 }
 0x539   : > { %v3550_v42 = vmul.f32 %v3548_v48, %v8716_v4  ;;  %v3501_v56 = vadd.f32 %v3499_v9, %v3483_v62  ;;  %v1883_v9 = vmul.f32 %v7718_v60, %v7691_v34  ;;  %v2822_v0 = vadd.f32 %v2818_v14, %v2804_v22 }
 0x53a   : > { %v3416_v20 = vadd.f32 %v8713_v61, %v3362_v26  ;;  %v3417_v21 = vadd.f32 %v8714_v7, %v3363_v36  ;;  %v3464_v49 = vadd.f32 %v3462_v3, %v3446_v31  ;;  %v3465_v28 = vadd.f32 %v3463_v23, %v3447_v8  ;;  %v8718_v23 = vld [vmem:[#allocation100_spill] sm:$0xff] }
 0x53b   : > { %v7776_v5 = vpop.permute.xlu1 %4020  ;;  %v3523_v63 = vpop.permute.xlu0 %3522  ;;  %v1898_v26 = vrot.slane %v7742_v51, 1  ;;  %v3825_v3 = vsel %vm8717_vm0, %v7666_v47, %v7582_v18  ;;  %v1901_v31 = vadd.f32 %v1897_v35, %v1883_v9  ;;  %v3824_v34 = vsel %vm8722_vm14, %v7582_v18, %v7666_v47  ;;  %v8727_v18 = vld [vmem:[#allocation104_spill] sm:$0xff]  ;;  %vm8744_vm0 = vmmov %vm8734_vm9 }
 0x53c   : > { %v3533_v50 = vmul.f32 %v3528_v40, %v3523_v63  ;;  %v3534_v24 = vmul.f32 %v3532_v38, %v3523_v63  ;;  %v3466_v59 = vadd.f32 %v3464_v49, %v3416_v20  ;;  %v3467_v36 = vadd.f32 %v3465_v28, %v3417_v21  ;;  %v8720_v20 = vld [vmem:[#allocation25_spill] sm:$0xff]  ;;  %v8721_v21 = vld [vmem:[#allocation26_spill] sm:$0xff] }
 0x53d   : > { %v1902_v8 = vadd.f32 %v1898_v26, %v1884_v1  ;;  %v3826_v61 = vsel %vm8719_vm11, %v3825_v3, 0.0  ;;  %v3870_v60 = vsel %vm8723_vm2, %v7634_v43, %v7688_v2  ;;  %v2823_v54 = vadd.f32 %v2821_v58, %v1901_v31  ;;  %v8725_v49 = vld [vmem:[#allocation105_spill] sm:$0xff]  ;;  %v8726_v63 = vld [vmem:[#allocation106_spill] sm:$0xff]  ;;  %v8735_v58 = vld [vmem:[#allocation56_spill] sm:$0xff] }
 0x53e   : > { %v3551_v10 = vadd.f32 %v3549_v32, %v3533_v50  ;;  %v3552_v41 = vadd.f32 %v3550_v42, %v3534_v24  ;;  %v3503_v29 = vadd.f32 %v3501_v56, %v3466_v59  ;;  %v3504_v48 = vadd.f32 %v8718_v23, %v3467_v36  ;;  %v8728_v42 = vld [vmem:[#allocation28_spill] sm:$0xff]  ;;  %v8729_v24 = vld [vmem:[#allocation29_spill] sm:$0xff]  ;;  %vm8745_vm11 = vmmov %vm8738_vm7 }
 0x53f   : > { %v2824_v35 = vadd.f32 %v2822_v0, %v1902_v8  ;;  %v3838_v38 = vrot.slane %v3826_v61, %v5467_v52  ;;  %v3869_v14 = vsel %vm8724_vm3, %v7688_v2, %v7634_v43  ;;  %v3724_v47 = vrot.slane %v8727_v18, %v5467_v52  ;;  %v8731_v2 = vld [vmem:[#allocation107_spill] sm:$0xff] }
 0x540   : > { %v7791_v51 = vpop.permute.xlu1 %4049  ;;  %v3553_v15 = vadd.f32 %v3551_v10, %v3503_v29  ;;  %v3554_v62 = vadd.f32 %v3552_v41, %v3504_v48  ;;  %v3854_v32 = vrot.slane %v3826_v61, %v5470_v53  ;;  %v3981_v50 = vrot.slane %v8728_v42, %v5470_v53  ;;  %v8733_v10 = vld [vmem:[#allocation57_spill] sm:$0xff] }
 0x541   : > { %v3985_v26 = vrot.slane %v8729_v24, %v5470_v53  ;;  %v3871_v59 = vsel %vm5563_vm8, %v3870_v60, 0.0  ;;  %v3969_v43 = vrot.slane %v8729_v24, %v5467_v52  ;;  %v3734_v41 = vrot.slane %v8733_v10, %v5467_v52 }
 0x542   : > { %v3607_v7 = vadd.f32 %v8720_v20, %v3553_v15  ;;  %v3608_v40 = vadd.f32 %v8721_v21, %v3554_v62  ;;  %v3842_v3 = vrot.slane %v3824_v34, %v5467_v52  ;;  %v3872_v29 = vsel %vm8734_vm9, %v3869_v14, 0.0 }
 0x543   : > { %v3965_v23 = vrot.slane %v8728_v42, %v5467_v52  ;;  %v3843_v1 = vmul.f32 %v3838_v38, %v7609_v30  ;;  %v3858_v9 = vrot.slane %v3824_v34, %v5470_v53  ;;  %v3859_v62 = vmul.f32 %v3854_v32, %v7584_v25  ;;  %v3923_v32 = vpop.permute.xlu0 %3922 }
 0x544   : > { %v3993_v46 = vpop.permute.xlu1 %3992  ;;  %v3656_v28 = vadd.f32 %v8725_v49, %v3607_v7  ;;  %v3657_v4 = vadd.f32 %v8726_v63, %v3608_v40  ;;  %v3883_v31 = vrot.slane %v3871_v59, %v5467_v52  ;;  %vm8736_vm8 = vcmp.lt.s32.totalorder %v5497_v6, 1 }
 0x545   : > { %v3914_v8 = vsel %vm8736_vm8, %v7746_v37, %v7761_v19  ;;  %vm8737_vm1 = vmmov %vm8736_vm8  ;;  %v7847_v20 = vmul.f32 %v3981_v50, %v7657_v55  ;;  %v3887_v7 = vrot.slane %v3872_v29, %v5467_v52  ;;  %v3899_v21 = vrot.slane %v3871_v59, %v5470_v53 }
 0x546   : > { %v3708_v36 = vadd.f32 %v8731_v2, %v3656_v28  ;;  %v3709_v22 = vadd.f32 %v8732_v33, %v3657_v4  ;;  %v3915_v61 = vsel %vm8737_vm1, %v7761_v19, %v7746_v37  ;;  %v3903_v40 = vrot.slane %v3872_v29, %v5470_v53  ;;  %vm8753_vm8 = vmmov %vm8741_vm5 }
 0x547   : > { %v3844_v28 = vmul.f32 %v3842_v3, %v7609_v30  ;;  %v3860_v63 = vmul.f32 %v3858_v9, %v7584_v25  ;;  %v3916_v37 = vsel %vm8738_vm7, %v3915_v61, 0.0  ;;  %v3917_v19 = vsel %vm507_vm4, %v3914_v8, 0.0  ;;  %vm8740_vm4 = vmmov %vm8739_vm6  ;;  %v4005_v61 = vpop.permute.xlu0 %4004 }
 0x548   : > { %v3995_v48 = vpop.permute.xlu1 %3994  ;;  %v3715_v0 = vadd.f32 %v8735_v58, %v3708_v36  ;;  %v3716_v15 = vadd.f32 %v8735_v58, %v3709_v22  ;;  %v3861_v4 = vadd.f32 %v3859_v62, %v3843_v1  ;;  %v3888_v18 = vmul.f32 %v3883_v31, %v7639_v27 }
 0x549   : > { %v3904_v56 = vmul.f32 %v3899_v21, %v7611_v17  ;;  %v3905_v30 = vmul.f32 %v3903_v40, %v7611_v17  ;;  %v3996_v25 = vsel %vm8739_vm6, %v3993_v46, %v3995_v48  ;;  %v3944_v59 = vrot.slane %v3916_v37, %v5470_v53 }
 0x54a   : > { %v3725_v60 = vmul.f32 %v3724_v47, %v3715_v0  ;;  %v3726_v38 = vmul.f32 %v3724_v47, %v3716_v15  ;;  %v3735_v14 = vmul.f32 %v3734_v41, %v3715_v0  ;;  %v3736_v49 = vmul.f32 %v3734_v41, %v3716_v15 }
 0x54b   : > { %v3889_v47 = vmul.f32 %v3887_v7, %v7639_v27  ;;  %v3948_v2 = vrot.slane %v3917_v19, %v5470_v53  ;;  %v3862_v10 = vadd.f32 %v3860_v63, %v3844_v28  ;;  %v3928_v41 = vrot.slane %v3916_v37, %v5467_v52  ;;  %v4095_v24 = vpop.permute.xlu0 %4094 }
 0x54c   : > { %v7852_v34 = vpop.permute.xlu1 %4110  ;;  %v3739_v42 = vrot.slane %v3735_v14, 1  ;;  %v3740_v50 = vrot.slane %v3736_v49, 1  ;;  %v3932_v3 = vrot.slane %v3917_v19, %v5467_v52  ;;  %v3997_v27 = vsel %vm8740_vm4, %v3995_v48, %v3993_v46 }
 0x54d   : > { %v3998_v17 = vsel %vm8741_vm5, %v3996_v25, 0.0  ;;  %v3906_v58 = vadd.f32 %v3904_v56, %v3888_v18  ;;  %v3933_v0 = vmul.f32 %v3928_v41, %v3923_v32  ;;  %v3907_v31 = vadd.f32 %v3905_v30, %v3889_v47  ;;  %v8749_v41 = vld [vmem:[#allocation13_spill] sm:$0xff] }
 0x54e   : > { %v3743_v33 = vadd.f32 %v3739_v42, %v3725_v60  ;;  %v3744_v22 = vadd.f32 %v3740_v50, %v3726_v38  ;;  %v3934_v15 = vmul.f32 %v3932_v3, %v3923_v32  ;;  %v3863_v46 = vadd.f32 %v3861_v4, %v7575_v13 }
 0x54f   : > { %v3949_v48 = vmul.f32 %v3944_v59, %v7677_v44  ;;  %v3950_v8 = vmul.f32 %v3948_v2, %v7677_v44  ;;  %v4026_v21 = vrot.slane %v3998_v17, %v5470_v53  ;;  %v3864_v40 = vadd.f32 %v3862_v10, %v7577_v57 }
 0x550   : > { %v4038_v36 = vpop.permute.xlu1 %4037  ;;  %v7877_v1 = vadd.f32 %v3744_v22, %v2824_v35  ;;  %v7879_v9 = vadd.f32 %v3743_v33, %v2823_v54  ;;  %v3999_v35 = vsel %vm8744_vm0, %v3997_v27, 0.0  ;;  %v4010_v54 = vrot.slane %v3998_v17, %v5467_v52 }
 0x551   : > { %v4041_v29 = vsel %vm8742_vm15, %v4038_v36, %v7684_v45  ;;  %v4042_v62 = vsel %vm8743_vm12, %v7684_v45, %v4038_v36  ;;  %v3987_v13 = vmul.f32 %v3985_v26, %v7657_v55  ;;  %v3970_v44 = vmul.f32 %v3965_v23, %v7714_v12 }
 0x552   : > { %v4043_v45 = vsel %vm8745_vm11, %v4041_v29, 0.0  ;;  %v4044_v38 = vsel %vm5638_vm10, %v4042_v62, 0.0  ;;  %v3971_v14 = vmul.f32 %v3969_v43, %v7714_v12  ;;  %v3908_v49 = vadd.f32 %v3906_v58, %v3863_v46 }
 0x553   : > { %v3951_v28 = vadd.f32 %v3949_v48, %v3933_v0  ;;  %v3952_v63 = vadd.f32 %v3950_v8, %v3934_v15  ;;  %v4014_v57 = vrot.slane %v3999_v35, %v5467_v52  ;;  %v4030_v37 = vrot.slane %v3999_v35, %v5470_v53  ;;  %v4128_v15 = vpop.permute.xlu0 %4127 }
 0x554   : > { %v7887_v7 = vpop.permute.xlu1 %4139  ;;  %v4055_v19 = vrot.slane %v4043_v45, %v5467_v52  ;;  %v4071_v55 = vrot.slane %v4043_v45, %v5470_v53  ;;  %v3909_v23 = vadd.f32 %v3907_v31, %v3864_v40  ;;  %v4015_v4 = vmul.f32 %v4010_v54, %v4005_v61 }
 0x555   : > { %v4031_v18 = vmul.f32 %v4026_v21, %v7776_v5  ;;  %v4059_v32 = vrot.slane %v4044_v38, %v5467_v52  ;;  %v4075_v12 = vrot.slane %v4044_v38, %v5470_v53  ;;  %v3988_v43 = vadd.f32 %v7847_v20, %v3970_v44 }
 0x556   : > { %v3989_v42 = vadd.f32 %v3987_v13, %v3971_v14  ;;  %v3953_v50 = vadd.f32 %v3951_v28, %v3908_v49  ;;  %v3954_v47 = vadd.f32 %v3952_v63, %v3909_v23  ;;  %v4016_v56 = vmul.f32 %v4014_v57, %v4005_v61 }
 0x557   : > { %v4032_v30 = vmul.f32 %v4030_v37, %v7776_v5  ;;  %v4060_v25 = vmul.f32 %v4055_v19, %v7791_v51  ;;  %v4076_v59 = vmul.f32 %v4071_v55, %v7675_v39  ;;  %v4033_v36 = vadd.f32 %v4031_v18, %v4015_v4  ;;  %v8755_v19 = vld [vmem:[#allocation54_spill] sm:$0xff] }
 0x558   : > { %v4083_v26 = vpop.permute.xlu1 %4082  ;;  %v4061_v33 = vmul.f32 %v4059_v32, %v7791_v51  ;;  %vm8747_vm10 = vcmp.lt.s32.totalorder %v5497_v6, 112  ;;  %v4077_v10 = vmul.f32 %v4075_v12, %v7675_v39  ;;  %vm8750_vm2 = vcmp.lt.s32.totalorder %v8749_v41, 240 }
 0x559   : > { %vm8748_vm14 = vmmov %vm8747_vm10  ;;  %v3990_v17 = vadd.f32 %v3988_v43, %v3953_v50  ;;  %v3991_v29 = vadd.f32 %v3989_v42, %v3954_v47  ;;  %v4034_v0 = vadd.f32 %v4032_v30, %v4016_v56  ;;  %v4078_v62 = vadd.f32 %v4076_v59, %v4060_v25  ;;  %v4175_v43 = vpop.permute.xlu0 %4174  ;;  %v4917_v25 = vld [vmem:[%s8247_s9 + $0x2c] sm:$0x3]  ;;  %v4918_v59 = vld [vmem:[%s8247_s9 + $0x2e] sm:$0x3] }
 0x55a   : > { %vm8751_vm3 = vcmp.lt.s32.totalorder %v5497_v6, 111  ;;  %v4079_v21 = vadd.f32 %v4077_v10, %v4061_v33  ;;  %v4921_v33 = vld [vmem:[%s8247_s9 + $0x34] sm:$0x3]  ;;  %v4912_v10 = vld [vmem:[%s8248_s10 + $0x4] sm:$0x3]  ;;  %vm4185_vm1 = vcmp.ge.s32.totalorder %v5507_v11, 7  ;;  %vm8757_vm6 = vmmov %vm8747_vm10 }
 0x55b   : > { %vm8752_vm9 = vmmov %vm8751_vm3  ;;  %v4035_v54 = vadd.f32 %v4033_v36, %v3990_v17  ;;  %v4036_v14 = vadd.f32 %v4034_v0, %v3991_v29  ;;  %v4920_v36 = vld [vmem:[%s8247_s9 + $0x32] sm:$0x3]  ;;  %v4703_v17 = vld [vmem:[#allocation3] sm:$0x1]  ;;  %vm4193_vm7 = vcmp.lt.s32.totalorder %v5497_v6, 119  ;;  %vm4286_vm5 = vcmp.lt.s32.totalorder %v5507_v11, 9 }
 0x55c   : > { %v4085_v2 = vpop.permute.xlu1 %4084  ;;  %v4669_v29 = vld [vmem:[#allocation2] sm:$0x1]  ;;  %vm4294_vm15 = vcmp.lt.s32.totalorder %v5497_v6, 105  ;;  %vm4186_vm12 = vcmp.ge.s32.totalorder %v5514_v16, 7  ;;  %vm4344_vm11 = vcmp.lt.s32.totalorder %v5497_v6, 7 }
 0x55d   : > { %v4086_v22 = vsel %vm8747_vm10, %v4083_v26, %v4085_v2  ;;  %v4087_v20 = vsel %vm8748_vm14, %v4085_v2, %v4083_v26  ;;  %v4080_v63 = vadd.f32 %v4078_v62, %v4035_v54  ;;  %v4081_v26 = vadd.f32 %v4079_v21, %v4036_v14  ;;  %v4919_v2 = vld [vmem:[%s8247_s9 + $0x30] sm:$0x3]  ;;  %vm8758_vm10 = vmmov %vm8757_vm6 }
 0x55e   : > { %v4089_v3 = vsel %vm8750_vm2, %v4087_v20, 0.0  ;;  %v4100_v5 = vrot.slane %v4086_v22, %v5467_v52  ;;  %v4116_v27 = vrot.slane %v4086_v22, %v5470_v53  ;;  %v4681_v22 = vld [vmem:[%s8251_s13] sm:$0x3]  ;;  %v8756_v20 = vmov 0  }
 0x55f   : > { %v4104_v58 = vrot.slane %v4089_v3, %v5467_v52  ;;  %v4120_v51 = vrot.slane %v4089_v3, %v5470_v53  ;;  %v5173_v3 = vmov 7   ;;  %vm4287_vm14 = vcmp.lt.s32.totalorder %v5514_v16, 9 }
 0x560   : > { %v4105_v31 = vmul.f32 %v4100_v5, %v4095_v24  ;;  %v4121_v46 = vmul.f32 %v4116_v27, %v7852_v34  ;;  %v4130_v39 = vpop.permute.xlu1 %4129  ;;  %v5072_v5 = vld [vmem:[%s8249_s11] sm:$0x1]  ;;  %v5174_v27 = vmov 6   ;;  %vm4431_vm2 = vcmp.lt.s32.totalorder %v5497_v6, 121 }
 0x561   : > { %v4106_v48 = vmul.f32 %v4104_v58, %v4095_v24  ;;  %v4122_v8 = vmul.f32 %v4120_v51, %v7852_v34  ;;  %v4131_v61 = vsel %vm8751_vm3, %v4128_v15, %v4130_v39  ;;  %v4132_v35 = vsel %vm8752_vm9, %v4130_v39, %v4128_v15  ;;  %v8008_v15 = vpop.permute.xlu0 %4253 }
 0x562   : > { %v4133_v45 = vsel %vm8753_vm8, %v4131_v61, 0.0  ;;  %v4134_v13 = vsel %vm5704_vm13, %v4132_v35, 0.0  ;;  %v4123_v44 = vadd.f32 %v4121_v46, %v4105_v31  ;;  %vm4183_vm13 = vcmp.ge.s32.totalorder %v5497_v6, 112 }
 0x563   : > { %v4145_v60 = vrot.slane %v4133_v45, %v5467_v52  ;;  %v4149_v38 = vrot.slane %v4134_v13, %v5467_v52  ;;  %v4161_v34 = vrot.slane %v4133_v45, %v5470_v53  ;;  %v4124_v49 = vadd.f32 %v4122_v8, %v4106_v48  ;;  %vm4187_vm4 = vmand %vm4183_vm13, %vm4185_vm1 }
 0x564   : > { %v4165_v28 = vrot.slane %v4134_v13, %v5470_v53  ;;  %v4125_v4 = vadd.f32 %v4123_v44, %v4080_v63  ;;  %v8002_v58 = vpop.permute.xlu1 %4206  ;;  %vm4288_vm0 = vmand %vm4183_vm13, %vm4286_vm5  ;;  %vm4478_vm3 = vcmp.lt.s32.totalorder %v8749_v41, 144  ;;  %vm4485_vm9 = vcmp.lt.s32.totalorder %v5497_v6, 23 }
 0x565   : > { %v4150_v57 = vmul.f32 %v4145_v60, %v7887_v7  ;;  %v4151_v37 = vmul.f32 %v4149_v38, %v7887_v7  ;;  %v4166_v55 = vmul.f32 %v4161_v34, %v8755_v19  ;;  %v4126_v32 = vadd.f32 %v4124_v49, %v4081_v26  ;;  %v4916_v7 = vld [vmem:[%s8247_s9 + $0x2a] sm:$0x3]  ;;  %v8012_v31 = vpop.permute.xlu0 %4307  ;;  %vm4480_vm8 = vmand %vm4478_vm3, %vm4186_vm12 }
 0x566   : > { %v4167_v23 = vmul.f32 %v4165_v28, %v8755_v19 }
 0x567   : > { %v4168_v18 = vadd.f32 %v4166_v55, %v4150_v57 }
 0x568   : > { %v4169_v24 = vadd.f32 %v4167_v23, %v4151_v37 }
 0x569   : > { %v4170_v12 = vadd.f32 %v4168_v18, %v4125_v4  ;;  %v8004_v51 = vpop.permute.xlu1 %4222 }
 0x56a   : > { %v4171_v42 = vadd.f32 %v4169_v24, %v4126_v32 }
 0x56b   : > { %v4177_v50 = vadd.f32 %v4175_v43, %v4170_v12 }
 0x56c   : > { %v4178_v47 = vadd.f32 %v4175_v43, %v4171_v42 }
 0x56d   : > { %v7948_v56 = vmax.f32 %v4177_v50, 0.0  ;;  %v8006_v0 = vpop.permute.xlu1 %4269 }
 0x56e   : > { %v7950_v30 = vmax.f32 %v4178_v47, 0.0 }
 0x56f   : > { %4189 = vrot.lane.b32.xlu0 %v7948_v56, %s5167_s0  ;;  %v4416_v4 = vrot.slane %v7948_v56, %v5470_v53  ;;  %v4400_v18 = vrot.slane %v7948_v56, %v5467_v52 }
 0x570   : > { %4191 = vrot.lane.b32.xlu1 %v7950_v30, %s5167_s0  ;;  %s5079_s0 = scalar_lea.vmem %s5078_s26, 128 }
 0x571   : > { %v8010_v62 = vpop.permute.xlu1 %4323 }
 0x573   : > { %4237 = vrot.lane.b32.xlu0 %v7948_v56, %s8445_s14 }
 0x574   : > { %4239 = vrot.lane.b32.xlu1 %v7950_v30, %s8445_s14 }
 0x577   : > { %4357 = vperm.xlu0 %5055, %v4916_v7  }
 0x578   : > { %4373 = vperm.xlu1 %5056, %v4916_v7  }
 0x57b   : > { %4290 = vrot.lane.b32.xlu0 %v7948_v56, %s5168_s18 }
 0x57c   : > { %4292 = vrot.lane.b32.xlu1 %v7950_v30, %s5168_s18 }
 0x57f   : > { %4394 = vperm.xlu0 %5055, %v4917_v25  }
 0x580   : > { %4410 = vperm.xlu1 %5056, %v4917_v25  }
 0x583   : > { %4340 = vrot.lane.b32.xlu0 %v7948_v56, %s5169_s29 }
 0x584   : > { %4342 = vrot.lane.b32.xlu1 %v7950_v30, %s5169_s29  ;;  %s489_s29 = sand.u32 1, %s5127_s23  }
 0x585   : > { %s4831_s14 = sshll.u32 %s489_s29, 2 }
 0x586   : > { %s491_s20 = scalar_lea.vmem [#allocation4], %s4831_s14 }
 0x587   : > { %4444 = vperm.xlu0 %5055, %v4918_v59   ;;  %s4768_s2 = sshll.u32 %s491_s20, 4  ;;  %s8198_s2 = int_to_ptr.vmem [resolvable:$true] %s4768_s2 }
 0x588   : > { %4460 = vperm.xlu1 %5056, %v4918_v59   ;;  %s5073_s17 = scalar_lea.vmem %s8198_s2, 64  ;;  %p5080_p0 = scmp.lt.s32.totalorder %s8198_s2, %s5078_s26 }
 0x589   : > { %p5074_p11 = scmp.ne.s32.totalorder %s8198_s2, %s5073_s17  ;;  %p5081_p1 = scmp.lt.s32.totalorder %s5079_s0, %s5073_s17 }
 0x58b   : > { %4498 = vperm.xlu0 %5055, %v4919_v2   ;;  %p5075_p12 = pnand %p5074_p11, %p5300_p5  ;;  %p5082_p2 = por %p5081_p1, %p5080_p0 }
 0x58c   : > { %4514 = vperm.xlu1 %5056, %v4919_v2  }
 0x58d   : > { %p5076_p13 = pneg %p5075_p12 }
 0x58f   : > { %4427 = vrot.lane.b32.xlu0 %v7948_v56, %s5170_s4  ;;  %p5083_p3 = pnand %p5082_p2, %p5076_p13 }
 0x590   : > { %4429 = vrot.lane.b32.xlu1 %v7950_v30, %s5170_s4 }
 0x593   : > { %4547 = vperm.xlu0 %5055, %v4920_v36  }
 0x594   : > { %4563 = vperm.xlu1 %5056, %v4920_v36   ;;  %v4420_v36 = vrot.slane %v7950_v30, %v5470_v53 }
 0x597   : > { %4481 = vrot.lane.b32.xlu0 %v7948_v56, %s5171_s3 }
 0x598   : > { %4483 = vrot.lane.b32.xlu1 %v7950_v30, %s5171_s3  ;;  %s4754_s3 = scalar_lea.sflag [#allocation5], %s489_s29 }
 0x59b   : > { %4599 = vperm.xlu0 %5055, %v4921_v33  }
 0x59c   : > { %4615 = vperm.xlu1 %5056, %v4921_v33  }
 0x59f   : > { %4531 = vrot.lane.b32.xlu0 %v7948_v56, %s8441_s28 }
 0x5a0   : > { %4533 = vrot.lane.b32.xlu1 %v7950_v30, %s8441_s28 }
 0x5a1   : > { %5057 = vset.pattern.permute.xlu1 %v8756_v20 }
 0x5a3   : > { %4684 = vperm.xlu0 %5055, %v4681_v22  }
 0x5a4   : > { %4582 = vrot.lane.b32.xlu1 %v7948_v56, %s5172_s24 }
 0x5a7   : > { %4584 = vrot.lane.b32.xlu0 %v7950_v30, %s5172_s24 }
 0x5a8   : > { %5058 = vset.pattern.permute.xlu0 %v5173_v3  ;;  %4634 = vperm.xlu1 %5057, %v4912_v10  }
 0x5ab   : > { %4650 = vperm.xlu0 %5058, %v5072_v5  }
 0x5ac   : > { %5059 = vset.pattern.permute.xlu1 %v5174_v27 }
 0x5ad   : > { %4640 = vperm.xlu1 %5059, %v5072_v5  }
 0x5af   : > { %5061 = vset.pattern.permute.xlu0 %v8756_v20 }
 0x5b0   : > { %4706 = vperm.xlu0 %5061, %v4703_v17  }
 0x5b1   : > { %5060 = vset.pattern.permute.xlu1 %v8756_v20 }
 0x5b2   : > { %4672 = vperm.xlu1 %5060, %v4669_v29  }
 0x5e1   : > { %v4190_v46 = vpop.permute.xlu0 %4189 }
 0x5e2   : > { %v4192_v39 = vpop.permute.xlu1 %4191 }
 0x5e3   : > { %v4195_v60 = vsel %vm4193_vm7, %v4192_v39, %v4190_v46  ;;  %v4194_v14 = vsel %vm4193_vm7, %v4190_v46, %v4192_v39  ;;  %vm4586_vm7 = vcmp.lt.s32.totalorder %v5497_v6, 9 }
 0x5e4   : > { %v4200_v49 = vsel %vm4187_vm4, %v4195_v60, 0.0  ;;  %v4201_v26 = vsel %vm4186_vm12, %v4194_v14, 0.0 }
 0x5e5   : > { %v4238_v48 = vpop.permute.xlu0 %4237  ;;  %v4212_v32 = vrot.slane %v4200_v49, %v5467_v52  ;;  %v4228_v42 = vrot.slane %v4200_v49, %v5470_v53  ;;  %v4216_v59 = vrot.slane %v4201_v26, %v5467_v52  ;;  %v4232_v56 = vrot.slane %v4201_v26, %v5470_v53 }
 0x5e6   : > { %v4240_v8 = vpop.permute.xlu1 %4239  ;;  %v4404_v26 = vrot.slane %v7950_v30, %v5467_v52 }
 0x5e7   : > { %v4242_v13 = vsel %vm8757_vm6, %v4240_v8, %v4238_v48  ;;  %v4241_v57 = vsel %vm8758_vm10, %v4238_v48, %v4240_v8  ;;  %v4217_v29 = vmul.f32 %v4212_v32, %v8002_v58  ;;  %v4233_v46 = vmul.f32 %v4228_v42, %v8004_v51 }
 0x5e8   : > { %v4247_v34 = vsel %vm4183_vm13, %v4242_v13, 0.0  ;;  %v4263_v50 = vrot.slane %v4241_v57, %v5467_v52  ;;  %v4279_v47 = vrot.slane %v4241_v57, %v5470_v53  ;;  %vm8759_vm13 = vcmp.lt.s32.totalorder %v5497_v6, 16 }
 0x5e9   : > { %v4259_v37 = vrot.slane %v4247_v34, %v5467_v52  ;;  %v4275_v23 = vrot.slane %v4247_v34, %v5470_v53  ;;  %v4234_v34 = vmul.f32 %v4232_v56, %v8004_v51  ;;  %vm8763_vm6 = vcmask 1041408  }
 0x5ea   : > { %v4265_v39 = vmul.f32 %v4263_v50, %v8008_v15  ;;  %v4281_v48 = vmul.f32 %v4279_v47, %v8006_v0  ;;  %vm8764_vm4 = vmmov %vm8763_vm6 }
 0x5eb   : > { %v4264_v2 = vmul.f32 %v4259_v37, %v8008_v15  ;;  %v4280_v22 = vmul.f32 %v4275_v23, %v8006_v0  ;;  %v4235_v37 = vadd.f32 %v4233_v46, %v4217_v29 }
 0x5ed   : > { %v4282_v14 = vadd.f32 %v4280_v22, %v4264_v2 }
 0x5ef   : > { %v4284_v42 = vadd.f32 %v4282_v14, %v4235_v37 }
 0x5f6   : > { %v8014_v61 = vpop.permute.xlu0 %4357 }
 0x5f7   : > { %v8016_v35 = vpop.permute.xlu1 %4373 }
 0x5fa   : > { %v4291_v54 = vpop.permute.xlu0 %4290 }
 0x5fb   : > { %v4293_v21 = vpop.permute.xlu1 %4292 }
 0x5fc   : > { %v4296_v28 = vsel %vm4294_vm15, %v4293_v21, %v4291_v54  ;;  %v4295_v19 = vsel %vm4294_vm15, %v4291_v54, %v4293_v21  ;;  %vm4581_vm15 = vmand %vm4478_vm3, %vm4287_vm14 }
 0x5fd   : > { %v4301_v24 = vsel %vm4288_vm0, %v4296_v28, 0.0  ;;  %v4302_v7 = vsel %vm4287_vm14, %v4295_v19, 0.0  ;;  %v4283_v19 = vadd.f32 %v4281_v48, %v4265_v39 }
 0x5fe   : > { %v8018_v45 = vpop.permute.xlu0 %4394  ;;  %v4313_v20 = vrot.slane %v4301_v24, %v5467_v52  ;;  %v4317_v5 = vrot.slane %v4302_v7, %v5467_v52  ;;  %v4329_v27 = vrot.slane %v4301_v24, %v5470_v53  ;;  %v4333_v17 = vrot.slane %v4302_v7, %v5470_v53 }
 0x5ff   : > { %v8020_v40 = vpop.permute.xlu1 %4410  ;;  %v4406_v56 = vmul.f32 %v4404_v26, %v8018_v45 }
 0x600   : > { %v4318_v49 = vmul.f32 %v4313_v20, %v8012_v31  ;;  %v4319_v15 = vmul.f32 %v4317_v5, %v8012_v31  ;;  %v4334_v0 = vmul.f32 %v4329_v27, %v8010_v62  ;;  %v4335_v28 = vmul.f32 %v4333_v17, %v8010_v62 }
 0x601   : > { %v4422_v46 = vmul.f32 %v4420_v36, %v8020_v40 }
 0x602   : > { %v4341_v44 = vpop.permute.xlu0 %4340  ;;  %v4336_v50 = vadd.f32 %v4334_v0, %v4318_v49  ;;  %v4337_v47 = vadd.f32 %v4335_v28, %v4319_v15 }
 0x603   : > { %v4343_v38 = vpop.permute.xlu1 %4342  ;;  %v4424_v36 = vadd.f32 %v4422_v46, %v4406_v56 }
 0x604   : > { %v4345_v12 = vsel %vm4344_vm11, %v4341_v44, %v4343_v38  ;;  %v4346_v43 = vsel %vm4344_vm11, %v4343_v38, %v4341_v44  ;;  %v4218_v38 = vmul.f32 %v4216_v59, %v8002_v58  ;;  %v4421_v59 = vmul.f32 %v4416_v4, %v8020_v40 }
 0x605   : > { %v4351_v10 = vsel %vm4185_vm1, %v4346_v43, 0.0  ;;  %v4352_v3 = vsel %vm4186_vm12, %v4345_v12, 0.0  ;;  %v4338_v17 = vadd.f32 %v4336_v50, %v4284_v42 }
 0x606   : > { %v8035_v63 = vpop.permute.xlu0 %4444  ;;  %v4363_v54 = vrot.slane %v4351_v10, %v5467_v52  ;;  %v4367_v21 = vrot.slane %v4352_v3, %v5467_v52  ;;  %v4379_v13 = vrot.slane %v4351_v10, %v5470_v53  ;;  %v4383_v44 = vrot.slane %v4352_v3, %v5470_v53 }
 0x607   : > { %v8041_v55 = vpop.permute.xlu1 %4460  ;;  %v4236_v12 = vadd.f32 %v4234_v34, %v4218_v38 }
 0x608   : > { %v4368_v23 = vmul.f32 %v4363_v54, %v8014_v61  ;;  %v4369_v31 = vmul.f32 %v4367_v21, %v8014_v61  ;;  %v4384_v32 = vmul.f32 %v4379_v13, %v8016_v35  ;;  %v4385_v62 = vmul.f32 %v4383_v44, %v8016_v35 }
 0x609   : > { %v4285_v7 = vadd.f32 %v4283_v19, %v4236_v12  ;;  %v4405_v35 = vmul.f32 %v4400_v18, %v8018_v45 }
 0x60a   : > { %v8056_v25 = vpop.permute.xlu0 %4498  ;;  %v4386_v22 = vadd.f32 %v4384_v32, %v4368_v23  ;;  %v4387_v20 = vadd.f32 %v4385_v62, %v4369_v31 }
 0x60b   : > { %v8063_v33 = vpop.permute.xlu1 %4514  ;;  %v4339_v29 = vadd.f32 %v4337_v47, %v4285_v7  ;;  %v4423_v40 = vadd.f32 %v4421_v59, %v4405_v35  ;;  %v8761_v7 = vld [vmem:[#allocation20_spill] sm:$0xff]  ;;  %v8762_v35 = vld [vmem:[#allocation21_spill] sm:$0xff] }
 0x60c   : > { %v4388_v54 = vadd.f32 %v4386_v22, %v4338_v17 }
 0x60d   : > { %v4389_v21 = vadd.f32 %v4387_v20, %v4339_v29 }
 0x60e   : > { %v4428_v8 = vpop.permute.xlu0 %4427  ;;  %v4425_v37 = vadd.f32 %v4423_v40, %v4388_v54 }
 0x60f   : > { %v4430_v60 = vpop.permute.xlu1 %4429  ;;  %v4426_v19 = vadd.f32 %v4424_v36, %v4389_v21 }
 0x610   : > { %v4432_v57 = vsel %vm4431_vm2, %v4428_v8, %v4430_v60  ;;  %v4433_v58 = vsel %vm4431_vm2, %v4430_v60, %v4428_v8 }
 0x611   : > { %v4438_v43 = vsel %vm4286_vm5, %v4432_v57, 0.0  ;;  %v4439_v61 = vsel %vm4287_vm14, %v4433_v58, 0.0 }
 0x612   : > { %v8095_v51 = vpop.permute.xlu0 %4547  ;;  %v4450_v10 = vrot.slane %v4438_v43, %v5467_v52  ;;  %v4466_v3 = vrot.slane %v4438_v43, %v5470_v53  ;;  %v4454_v27 = vrot.slane %v4439_v61, %v5467_v52  ;;  %v4470_v4 = vrot.slane %v4439_v61, %v5470_v53 }
 0x613   : > { %v8101_v24 = vpop.permute.xlu1 %4563 }
 0x614   : > { %v4455_v13 = vmul.f32 %v4450_v10, %v8035_v63  ;;  %v4471_v44 = vmul.f32 %v4466_v3, %v8041_v55  ;;  %v4456_v38 = vmul.f32 %v4454_v27, %v8035_v63  ;;  %v4472_v34 = vmul.f32 %v4470_v4, %v8041_v55 }
 0x616   : > { %v4482_v2 = vpop.permute.xlu0 %4481  ;;  %v4473_v28 = vadd.f32 %v4471_v44, %v4455_v13  ;;  %v4474_v26 = vadd.f32 %v4472_v34, %v4456_v38 }
 0x617   : > { %v4484_v5 = vpop.permute.xlu1 %4483 }
 0x618   : > { %v4486_v45 = vsel %vm4485_vm9, %v4482_v2, %v4484_v5  ;;  %v4487_v18 = vsel %vm4485_vm9, %v4484_v5, %v4482_v2  ;;  %v4475_v3 = vadd.f32 %v4473_v28, %v4425_v37  ;;  %v4476_v5 = vadd.f32 %v4474_v26, %v4426_v19 }
 0x619   : > { %v4492_v39 = vsel %vm4185_vm1, %v4486_v45, 0.0  ;;  %v4493_v48 = vsel %vm4480_vm8, %v4487_v18, 0.0  ;;  %vm8760_vm1 = vmmov %vm8759_vm13 }
 0x61a   : > { %v8130_v8 = vpop.permute.xlu0 %4599  ;;  %v4504_v30 = vrot.slane %v4492_v39, %v5467_v52  ;;  %v4508_v14 = vrot.slane %v4493_v48, %v5467_v52  ;;  %v4520_v49 = vrot.slane %v4492_v39, %v5470_v53  ;;  %v4524_v15 = vrot.slane %v4493_v48, %v5470_v53 }
 0x61b   : > { %v8134_v60 = vpop.permute.xlu1 %4615 }
 0x61c   : > { %v4509_v63 = vmul.f32 %v4504_v30, %v8056_v25  ;;  %v4510_v23 = vmul.f32 %v4508_v14, %v8056_v25  ;;  %v4525_v12 = vmul.f32 %v4520_v49, %v8063_v33  ;;  %v4526_v43 = vmul.f32 %v4524_v15, %v8063_v33 }
 0x61e   : > { %v4532_v0 = vpop.permute.xlu0 %4531  ;;  %v4527_v27 = vadd.f32 %v4525_v12, %v4509_v63  ;;  %v4528_v4 = vadd.f32 %v4526_v43, %v4510_v23 }
 0x61f   : > { %v4534_v57 = vpop.permute.xlu1 %4533 }
 0x620   : > { %v4535_v55 = vsel %vm8759_vm13, %v4532_v0, %v4534_v57  ;;  %v4536_v58 = vsel %vm8760_vm1, %v4534_v57, %v4532_v0  ;;  %v4529_v30 = vadd.f32 %v4527_v27, %v4475_v3  ;;  %v4530_v40 = vadd.f32 %v4528_v4, %v4476_v5 }
 0x621   : > { %v4542_v31 = vsel %vm4478_vm3, %v4536_v58, 0.0  ;;  %v4553_v32 = vrot.slane %v4535_v55, %v5467_v52  ;;  %v4569_v62 = vrot.slane %v4535_v55, %v5470_v53 }
 0x622   : > { %v4557_v42 = vrot.slane %v4542_v31, %v5467_v52  ;;  %v4573_v50 = vrot.slane %v4542_v31, %v5470_v53  ;;  %v4685_v47 = vpop.permute.xlu0 %4684 }
 0x623   : > { %v4558_v61 = vmul.f32 %v4553_v32, %v8095_v51  ;;  %v4574_v25 = vmul.f32 %v4569_v62, %v8101_v24  ;;  %v4687_v59 = vmul.f32 %v4685_v47, %v8761_v7  ;;  %v4688_v56 = vmul.f32 %v4685_v47, %v8762_v35  ;;  %v4583_v20 = vpop.permute.xlu1 %4582 }
 0x624   : > { %v4559_v2 = vmul.f32 %v4557_v42, %v8095_v51  ;;  %v4575_v22 = vmul.f32 %v4573_v50, %v8101_v24 }
 0x625   : > { %v4689_v33 = vsel %vm8763_vm6, %v4687_v59, 0.0  ;;  %v4696_v10 = vsel %vm8764_vm4, %v4688_v56, 0.0  ;;  %v4576_v24 = vadd.f32 %v4574_v25, %v4558_v61 }
 0x626   : > { %v4690_v45 = vrot.slane %v4689_v33, 4  ;;  %v4697_v51 = vrot.slane %v4696_v10, 4  ;;  %v4585_v18 = vpop.permute.xlu0 %4584  ;;  %v4577_v6 = vadd.f32 %v4575_v22, %v4559_v2 }
 0x627   : > { %v4587_v17 = vsel %vm4586_vm7, %v4583_v20, %v4585_v18  ;;  %v4588_v29 = vsel %vm4586_vm7, %v4585_v18, %v4583_v20  ;;  %v4635_v54 = vpop.permute.xlu1 %4634  ;;  %v4578_v15 = vadd.f32 %v4576_v24, %v4529_v30 }
 0x628   : > { %v4691_v46 = vadd.f32 %v4690_v45, %v4689_v33  ;;  %v4698_v39 = vadd.f32 %v4697_v51, %v4696_v10  ;;  %v4593_v48 = vsel %vm4286_vm5, %v4587_v17, 0.0  ;;  %v4594_v16 = vsel %vm4581_vm15, %v4588_v29, 0.0 }
 0x629   : > { %v4605_v41 = vrot.slane %v4593_v48, %v5467_v52  ;;  %v4609_v21 = vrot.slane %v4594_v16, %v5467_v52  ;;  %v4621_v13 = vrot.slane %v4593_v48, %v5470_v53  ;;  %v4625_v44 = vrot.slane %v4594_v16, %v5470_v53 }
 0x62a   : > { %v4692_v38 = vrot.slane %v4691_v46, 2  ;;  %v4699_v34 = vrot.slane %v4698_v39, 2  ;;  %v4579_v0 = vadd.f32 %v4577_v6, %v4530_v40  ;;  %v4651_v37 = vpop.permute.xlu0 %4650 }
 0x62b   : > { %v4610_v36 = vmul.f32 %v4605_v41, %v8130_v8  ;;  %v4611_v14 = vmul.f32 %v4609_v21, %v8130_v8  ;;  %v4626_v11 = vmul.f32 %v4621_v13, %v8134_v60  ;;  %v4627_v49 = vmul.f32 %v4625_v44, %v8134_v60  ;;  %v8766_v21 = vld [vmem:[#allocation19_spill] sm:$0xff] }
 0x62c   : > { %v4693_v19 = vadd.f32 %v4692_v38, %v4691_v46  ;;  %v4700_v26 = vadd.f32 %v4699_v34, %v4698_v39  ;;  %v4641_v53 = vpop.permute.xlu1 %4640  ;;  %v4656_v63 = vrot.slane %v4651_v37, %v5467_v52  ;;  %v8767_v44 = vld [vmem:[#allocation11_spill] sm:$0xff]  ;;  %v8768_v34 = vld [vmem:[#allocation12_spill] sm:$0xff] }
 0x62d   : > { %v4628_v28 = vadd.f32 %v4626_v11, %v4610_v36  ;;  %v4629_v57 = vadd.f32 %v4627_v49, %v4611_v14  ;;  %v4646_v8 = vrot.slane %v4641_v53, %v5467_v52 }
 0x62e   : > { %v4694_v32 = vrot.slane %v4693_v19, 1  ;;  %v4701_v62 = vrot.slane %v4700_v26, 1 }
 0x62f   : > { %v4630_v55 = vadd.f32 %v4628_v28, %v4578_v15  ;;  %v4631_v58 = vadd.f32 %v4629_v57, %v4579_v0  ;;  %v4707_v43 = vpop.permute.xlu0 %4706 }
 0x630   : > { %v4695_v7 = vadd.f32 %v4694_v32, %v4693_v19  ;;  %v4702_v59 = vadd.f32 %v4701_v62, %v4700_v26  ;;  %v4712_v35 = vrot.slane %v4707_v43, %v5467_v52 }
 0x631   : > { %v4637_v23 = vadd.f32 %v4635_v54, %v4630_v55  ;;  %v4638_v31 = vadd.f32 %v4635_v54, %v4631_v58  ;;  %v4673_v42 = vpop.permute.xlu1 %4672  ;;  %v8765_v54 = vld [vmem:[#allocation18_spill] sm:$0xff] }
 0x632   : > { %v4678_v22 = vrot.slane %v4673_v42, %v5467_v52  ;;  %v4713_v10 = vadd.f32 %v4712_v35, %v4695_v7  ;;  %v4714_v3 = vadd.f32 %v4712_v35, %v4702_v59 }
 0x633   : > { %v4657_v12 = vmul.f32 %v4656_v63, %v4637_v23  ;;  %v4658_v60 = vmul.f32 %v4656_v63, %v4638_v31  ;;  %v4647_v61 = vmul.f32 %v4646_v8, %v4637_v23  ;;  %v4648_v25 = vmul.f32 %v4646_v8, %v4638_v31 }
 0x635   : > { %v4661_v50 = vrot.slane %v4657_v12, 1  ;;  %v4662_v47 = vrot.slane %v4658_v60, 1 }
 0x637   : > { %v4665_v56 = vadd.f32 %v4661_v50, %v4647_v61  ;;  %v4666_v2 = vadd.f32 %v4662_v47, %v4648_v25 }
 0x639   : > { %v4667_v20 = vadd.f32 %v4665_v56, %v7879_v9  ;;  %v4668_v33 = vadd.f32 %v4666_v2, %v7877_v1 }
 0x63b   : > { %v4679_v5 = vadd.f32 %v4678_v22, %v4667_v20  ;;  %v4680_v27 = vadd.f32 %v4678_v22, %v4668_v33 }
 0x63d   : > { %v4715_v4 = vadd.f32 %v4713_v10, %v4679_v5  ;;  %v4716_v45 = vadd.f32 %v4714_v3, %v4680_v27 }
 0x63f   : > { %v4717_v51 = vsub.f32 0.0, %v4715_v4  ;;  %v4718_v18 = vsub.f32 0.0, %v4716_v45 }
 0x641   : > { %v4719_v24 = vmul.f32 1.442695, %v4717_v51  ;;  %v4721_v17 = vmul.f32 1.442695, %v4718_v18 }
 0x643   : > { %5062 = vpow2.f32 %v4719_v24 }
 0x644   : > { %5064 = vpow2.f32 %v4721_v17 }
 0x64d   : > { %v5063_v29 = vpop.eup %5062 }
 0x64e   : > { %v5065_v6 = vpop.eup %5064  ;;  %v4723_v46 = vadd.f32 1.0, %v5063_v29 }
 0x64f   : > { %v4724_v9 = vadd.f32 1.0, %v5065_v6 }
 0x650   : > { %5066 = vrcp.f32 %v4723_v46 }
 0x651   : > { %5068 = vrcp.f32 %v4724_v9 }
 0x65a   : > { %v5067_v1 = vpop.eup %5066 }
 0x65b   : > { %v5069_v39 = vpop.eup %5068  ;;  %v4732_v48 = vrot.slane %v5067_v1, %v5467_v52 }
 0x65c   : > { %v4736_v16 = vrot.slane %v5069_v39, %v5467_v52 }
 0x65d   : > { %v4737_v41 = vmul.f32 %v4732_v48, %v8765_v54 }
 0x65e   : > { %v4738_v13 = vmul.f32 %v4736_v16, %v8766_v21 }
 0x65f   : > { %v4739_v38 = vadd.f32 %v4737_v41, %v8767_v44 }
 0x660   : > { %v4740_v30 = vadd.f32 %v4738_v13, %v8768_v34 }
 0x662   : > { %v4743_v40 = vcombine.low %v4739_v38, %v4740_v30 }
 0x664   : > { %4922 = vst.sshfl [vmem:[%s491_s20] sm:$0x33 pattern:$0x76325410] %v4743_v40 }
 0x665   : > { %5086 = shalt.err (!%p5083_p3)
}
 0x666   : > { %s5087_s5 = scalar_lea.hbm %s8196_s27, 64  ;;  %s5091_s21 = scalar_lea.hbm %s8252_s15, 128 }
 0x667   : > { %p5088_p4 = scmp.ne.s32.totalorder %s8196_s27, %s5087_s5  ;;  %p5092_p9 = scmp.lt.u32.totalorder %s8196_s27, %s8252_s15 }
 0x668   : > { %p5093_p10 = scmp.lt.u32.totalorder %s5091_s21, %s5087_s5  ;;  %p5095_p12 = scmp.lt.u32.totalorder %s5087_s5, %s8196_s27 }
 0x669   : > { %p5089_p7 = pnand %p5088_p4, %p5300_p5 }
 0x66a   : > { %p5094_p11 = por %p5093_p10, %p5092_p9 }
 0x66b   : > { %p5090_p8 = pneg %p5089_p7 }
 0x66c   : > { %p5096_p13 = por %p5095_p12, %p5094_p11 }
 0x66e   : > { %p5097_p0 = pnand %p5096_p13, %p5090_p8 }
 0x670   : > { %5100 = shalt.err (!%p5097_p0)
}
 0x671   : > { %4930 = dma.vmem_to_hbm [thread:$0]  (%p5300_p5), %s8198_s2, 64, %s8196_s27, %s4754_s3  }
 0x672 PF: > { %p4936_p1 = scmp.ge.s32.totalorder %s5135_s25, 2  ;;  %s4780_s14 = sand.u32 1, %s5123_s22  }
 0x673   : > { %s4781_s1 = scalar_lea.sflag [#allocation5], %s4780_s14 }
 0x674   : > { %p4933_p2 = pnand %p4936_p1, %p5304_p6 }
 0x676   : > { %5118 = dma.done.wait (!%p4933_p2), %s4781_s1, 64  }
 0x677   : > { %5120 = vsyncadd (!%p4933_p2), %s4781_s1, 4294967232  ;;  %s8770_s25 = sld [smem:[#allocation8_spill]]  ;;  %s8771_s20 = sld [smem:[#allocation7_spill]] }
 0x678   : > { %s8772_s24 = sld [smem:[#allocation9_spill]]  ;;  %s8773_s22 = smov %s5127_s23 }
 0x67d   : > { %p29_p3 = scmp.ge.s32.totalorder %s8770_s25, 4   ;;  %s8774_s23 = smov %s8771_s20 }
 0x67f   :  { %31 = sbr.rel (!%p29_p3) target bundleno = 10 (0xa), region = 203 }
 0x686   :  { %4786 = vsyncpa [#allocation5], 1 }
 0x687   :  { %4788 = vsyncpa [#allocation5 + $0x1], 1 }

</bundles_post_ra>
